<compile_context>
chip_gen: v7x
topology: tpu7x:2x2x1
jax: 0.10.0
libtpu: 0.0.40
codegen_flags: <defaults>
</compile_context>

<pallas_src>
import jax
import jax.numpy as jnp
from jax import lax
from jax.experimental import pallas as pl
from jax.experimental.pallas import tpu as pltpu

_VMEM_LIMIT = 32 * 1024 * 1024  # >= default scoped VMEM on v5e/v6e/v7x


def _pick_batch_block(n, per_image_bytes, budget=10 << 20):
    # Amortize the ~0.35us per-grid-step overhead, but keep >= 2 grid steps on
    # the "parallel" axis (megacore) and cap the per-step VMEM footprint.
    for bn in (8, 4, 2):
        if n % bn == 0 and n // bn >= 2 and bn * per_image_bytes <= budget:
            return bn
    return 1


def _pick_k_block(feat):
    # K tile for the fc1 reduction; prefer >= 2 steps so the weight DMA
    # pipelines behind the matmul.
    for bk in (512, 256, 128):
        if feat % bk == 0 and feat // bk >= 2:
            return bk
    return feat


# ----------------------------------------------------------------------------
# Kernel 1: fused 3x3 same-padding conv (in-kernel halo padding + im2col,
#           single MXU matmul) + bias + ReLU + 2x2 maxpool (stride 2).
#           One batch-block per grid step.
# ----------------------------------------------------------------------------
def conv_relu_pool_kernel(x_ref, w_ref, b_ref, o_ref, xp_ref):
    # x_ref : (bn, H, W, Cin)      unpadded NHWC input block
    # w_ref : (9*Cin, Cout)        kernel taps flattened in (dy, dx, ci) order
    # b_ref : (1, Cout)
    # o_ref : (bn, H//2, W//2, Cout)
    # xp_ref: (bn, H+2, W+2, Cin)  VMEM scratch holding the zero-padded block
    bn, h, w, cin = x_ref.shape
    hp, wp = h + 2, w + 2
    cout = w_ref.shape[1]

    # In-kernel "same" padding: zero the 1-pixel halo (every step, so it is
    # correct under megacore grid splitting), then copy the interior.
    zrow = jnp.zeros((bn, 1, wp, cin), dtype=xp_ref.dtype)
    xp_ref[:, 0:1, :, :] = zrow
    xp_ref[:, hp - 1:hp, :, :] = zrow
    zcol = jnp.zeros((bn, hp, 1, cin), dtype=xp_ref.dtype)
    xp_ref[:, :, 0:1, :] = zcol
    xp_ref[:, :, wp - 1:wp, :] = zcol
    xp_ref[:, 1:h + 1, 1:w + 1, :] = x_ref[...]

    # im2col: 9 shifted taps concatenated along the channel (lane) axis, then
    # ONE (bn*H*W, 9*Cin) x (9*Cin, Cout) MXU matmul for the whole tile.
    taps = [xp_ref[:, dy:dy + h, dx:dx + w, :]
            for dy in range(3) for dx in range(3)]
    patches = jnp.concatenate(taps, axis=-1).reshape(bn * h * w, 9 * cin)
    acc = jnp.dot(patches, w_ref[...], preferred_element_type=jnp.float32)
    acc = jnp.maximum(acc + b_ref[...], 0.0)          # bias + ReLU (f32 VPU)

    # 2x2 max pool, stride 2.  H is even, so row pairs never straddle images.
    y = acc.reshape(bn * h, w // 2, 2, cout)
    y = jnp.max(y, axis=2)                            # pool along W
    y = y.reshape(bn * h // 2, 2, w // 2, cout)
    y = jnp.max(y, axis=1)                            # pool along H
    o_ref[...] = y.reshape(bn, h // 2, w // 2, cout).astype(o_ref.dtype)


def conv_relu_pool(x_nhwc, w_flat, b, *, out_dtype=jnp.float32, batch_block=None):
    n, h, w_sp, cin = x_nhwc.shape
    assert h % 2 == 0 and w_sp % 2 == 0, "spatial dims must be even (MaxPool2d)"
    cout = w_flat.shape[1]
    # rough per-image VMEM footprint: im2col + f32 acc + in/out/scratch buffers
    per_image = 4 * h * w_sp * (9 * cin + cout + 4 * cin)
    bn = batch_block or _pick_batch_block(n, per_image)
    ho, wo = h // 2, w_sp // 2

    return pl.pallas_call(
        conv_relu_pool_kernel,
        grid=(n // bn,),
        in_specs=[
            pl.BlockSpec((bn, h, w_sp, cin), lambda i: (i, 0, 0, 0)),
            pl.BlockSpec((9 * cin, cout), lambda i: (0, 0)),
            pl.BlockSpec((1, cout), lambda i: (0, 0)),
        ],
        out_specs=pl.BlockSpec((bn, ho, wo, cout), lambda i: (i, 0, 0, 0)),
        out_shape=jax.ShapeDtypeStruct((n, ho, wo, cout), out_dtype),
        scratch_shapes=[pltpu.VMEM((bn, h + 2, w_sp + 2, cin), x_nhwc.dtype)],
        compiler_params=pltpu.CompilerParams(
            dimension_semantics=("parallel",),
            vmem_limit_bytes=_VMEM_LIMIT),
    )(x_nhwc, w_flat, b.reshape(1, cout))


# ----------------------------------------------------------------------------
# Kernel 2: classifier head, K-tiled: Linear -> ReLU -> (Dropout=id) -> Linear
# fc1 is accumulated over K blocks in an f32 VMEM scratch; fc weights are bf16.
# ----------------------------------------------------------------------------
def mlp_kernel(x_ref, w1_ref, b1_ref, w2_ref, b2_ref, o_ref, acc_ref):
    k = pl.program_id(0)

    @pl.when(k == 0)
    def _():
        acc_ref[...] = jnp.zeros_like(acc_ref)

    # Partial fc1 product for this K block (bf16 x bf16 -> f32 accumulate).
    acc_ref[...] += jnp.dot(x_ref[...], w1_ref[...],
                            preferred_element_type=jnp.float32)

    @pl.when(k == pl.num_programs(0) - 1)
    def _():
        h = jnp.maximum(acc_ref[...] + b1_ref[...], 0.0)     # bias + ReLU (f32)
        # nn.Dropout(0.5) is identity at inference time.
        o_ref[...] = (jnp.dot(h.astype(w2_ref.dtype), w2_ref[...],
                              preferred_element_type=jnp.float32)
                      + b2_ref[...]).astype(o_ref.dtype)


def classifier(x_flat, w1, b1, w2, b2):
    n, feat = x_flat.shape
    hidden = w1.shape[1]
    num_classes = w2.shape[1]
    bk = _pick_k_block(feat)

    return pl.pallas_call(
        mlp_kernel,
        grid=(feat // bk,),
        in_specs=[
            pl.BlockSpec((n, bk), lambda k: (0, k)),
            pl.BlockSpec((bk, hidden), lambda k: (k, 0)),
            pl.BlockSpec((1, hidden), lambda k: (0, 0)),
            pl.BlockSpec((hidden, num_classes), lambda k: (0, 0)),
            pl.BlockSpec((1, num_classes), lambda k: (0, 0)),
        ],
        out_specs=pl.BlockSpec((n, num_classes), lambda k: (0, 0)),
        out_shape=jax.ShapeDtypeStruct((n, num_classes), jnp.float32),
        scratch_shapes=[pltpu.VMEM((n, hidden), jnp.float32)],
        compiler_params=pltpu.CompilerParams(
            dimension_semantics=("arbitrary",),
            vmem_limit_bytes=_VMEM_LIMIT),
    )(x_flat, w1, b1.reshape(1, hidden), w2, b2.reshape(1, num_classes))


# ----------------------------------------------------------------------------
# Full forward pass.
# ----------------------------------------------------------------------------
@jax.jit
def skin_disease_cnn_forward(x_nchw, kparams):
    x = jnp.transpose(x_nchw, (0, 2, 3, 1))                      # NCHW -> NHWC
    x = conv_relu_pool(x, kparams["conv1_w"], kparams["conv1_b"])  # (N,S/2,S/2,16) f32
    x = conv_relu_pool(x, kparams["conv2_w"], kparams["conv2_b"],
                       out_dtype=jnp.bfloat16)                     # (N,S/4,S/4,32) bf16
    # Flatten in NHWC order; fc1 rows were permuted to NHWC order at weight
    # prep time, so no feature-map transpose (extra HBM pass) is needed here.
    x = x.reshape(x.shape[0], -1)
    return classifier(x, kparams["fc1_w"], kparams["fc1_b"],
                      kparams["fc2_w"], kparams["fc2_b"])


# ----------------------------------------------------------------------------
# Parameters: init in PyTorch layout, then convert once to kernel layout.
# ----------------------------------------------------------------------------
def init_params(key, image_size, num_classes):
    ks = jax.random.split(key, 8)
    feat = 32 * (image_size // 4) ** 2
    s = 0.1
    return {
        # PyTorch layouts: conv (O, I, kH, kW); fc as (in, out).
        "conv1_w": s * jax.random.normal(ks[0], (16, 3, 3, 3), jnp.float32),
        "conv1_b": s * jax.random.normal(ks[1], (16,), jnp.float32),
        "conv2_w": s * jax.random.normal(ks[2], (32, 16, 3, 3), jnp.float32),
        "conv2_b": s * jax.random.normal(ks[3], (32,), jnp.float32),
        "fc1_w": s * jax.random.normal(ks[4], (feat, 512), jnp.float32),
        "fc1_b": s * jax.random.normal(ks[5], (512,), jnp.float32),
        "fc2_w": s * jax.random.normal(ks[6], (512, num_classes), jnp.float32),
        "fc2_b": s * jax.random.normal(ks[7], (num_classes,), jnp.float32),
    }


def prepare_params(params, image_size):
    """Convert PyTorch-layout params to the layouts the kernels expect."""
    h4 = w4 = image_size // 4

    def conv_flat(w):  # (O, I, 3, 3) -> (9*I, O), rows ordered (dy, dx, ci)
        o, i, kh, kw = w.shape
        return jnp.transpose(w, (2, 3, 1, 0)).reshape(kh * kw * i, o)

    # Permute fc1 rows from PyTorch (c, h, w) flatten order to NHWC (h, w, c)
    # flatten order so the kernel never transposes the feature map.
    fc1 = params["fc1_w"]
    fc1_nhwc = (fc1.reshape(32, h4, w4, fc1.shape[1])
                   .transpose(1, 2, 0, 3)
                   .reshape(32 * h4 * w4, fc1.shape[1]))

    return {
        "conv1_w": conv_flat(params["conv1_w"]),
        "conv1_b": params["conv1_b"],
        "conv2_w": conv_flat(params["conv2_w"]),
        "conv2_b": params["conv2_b"],
        "fc1_w": fc1_nhwc.astype(jnp.bfloat16),   # weight-read-bound -> bf16
        "fc1_b": params["fc1_b"],
        "fc2_w": params["fc2_w"].astype(jnp.bfloat16),
        "fc2_b": params["fc2_b"],
    }


# ----------------------------------------------------------------------------
# Pure-JAX reference (PyTorch semantics, same bf16 fc weights).
# ----------------------------------------------------------------------------
def reference_forward(x_nchw, params):
    def conv_block(x, w, b):
        y = lax.conv_general_dilated(
            x, w, window_strides=(1, 1), padding=((1, 1), (1, 1)),
            dimension_numbers=("NCHW", "OIHW", "NCHW"),
            precision=lax.Precision.HIGHEST)
        y = jnp.maximum(y + b[None, :, None, None], 0.0)
        return lax.reduce_window(y, -jnp.inf, lax.max,
                                 (1, 1, 2, 2), (1, 1, 2, 2), "VALID")

    x = conv_block(x_nchw, params["conv1_w"], params["conv1_b"])
    x = conv_block(x, params["conv2_w"], params["conv2_b"])
    x = x.reshape(x.shape[0], -1)                       # PyTorch x.view(N, -1)
    w1 = params["fc1_w"].astype(jnp.bfloat16)
    w2 = params["fc2_w"].astype(jnp.bfloat16)
    h = jnp.maximum(jnp.dot(x.astype(jnp.bfloat16), w1,
                            preferred_element_type=jnp.float32)
                    + params["fc1_b"], 0.0)
    return (jnp.dot(h.astype(jnp.bfloat16), w2,
                    preferred_element_type=jnp.float32) + params["fc2_b"])


if __name__ == "__main__":
    image_size = 16
    num_classes = 5
    batch = 2

    key = jax.random.PRNGKey(0)
    k_in, k_par = jax.random.split(key)
    x = jax.random.normal(k_in, (batch, 3, image_size, image_size), jnp.float32)
    params = init_params(k_par, image_size, num_classes)
    kparams = prepare_params(params, image_size)

    out = jax.block_until_ready(skin_disease_cnn_forward(x, kparams))

    ref = reference_forward(x, params)
    assert out.shape == (batch, num_classes)
    max_err = jnp.max(jnp.abs(out - ref))
    assert jnp.allclose(out, ref, rtol=2e-3, atol=2e-3), (
        f"mismatch: max abs err {max_err}")

    print("KERNEL_OK")
</pallas_src>

<mosaic_0001>
module attributes {stable_mosaic.version = 11 : i64} {
  func.func @conv_relu_pool_kernel(%arg0: i32, %arg1: memref<1x16x16x3xf32, #tpu.memory_space<vmem>>, %arg2: memref<27x16xf32, #tpu.memory_space<vmem>>, %arg3: memref<1x16xf32, #tpu.memory_space<vmem>>, %arg4: memref<1x8x8x16xf32, #tpu.memory_space<vmem>>, %arg5: memref<1x18x18x3xf32, #tpu.memory_space<vmem>>) attributes {dimension_semantics = [#tpu.dimension_semantics<parallel>], iteration_bounds = array<i64: 2>, scalar_prefetch = 0 : i64, scratch_operands = 1 : i64, tpu.core_type = #tpu.core_type<tc>, window_params = [{transform_indices = @transform_0, window_bounds = array<i64: 1, 16, 16, 3>}, {pipeline_mode = #tpu.pipeline_mode<synchronous>, transform_indices = @transform_1, window_bounds = array<i64: 27, 16>}, {pipeline_mode = #tpu.pipeline_mode<synchronous>, transform_indices = @transform_2, window_bounds = array<i64: 1, 16>}, {transform_indices = @transform_3, window_bounds = array<i64: 1, 8, 8, 16>}]} {
    %cst = arith.constant 0.000000e+00 : f32
    %0 = vector.broadcast %cst : f32 to vector<1x1x18x3xf32>
    %c0 = arith.constant 0 : index
    %c0_0 = arith.constant 0 : index
    %c0_1 = arith.constant 0 : index
    %c0_2 = arith.constant 0 : index
    %1 = vector.load %arg5[%c0, %c0_0, %c0_1, %c0_2] : memref<1x18x18x3xf32, #tpu.memory_space<vmem>>, vector<1x1x18x3xf32>
    tpu.vector_store %arg5[%c0, %c0_0, %c0_1, %c0_2], %0 {strides = array<i32>} : memref<1x18x18x3xf32, #tpu.memory_space<vmem>>, vector<1x1x18x3xf32>,
    %c0_3 = arith.constant 0 : index
    %c17 = arith.constant 17 : index
    %c0_4 = arith.constant 0 : index
    %c0_5 = arith.constant 0 : index
    %2 = vector.load %arg5[%c0_3, %c17, %c0_4, %c0_5] : memref<1x18x18x3xf32, #tpu.memory_space<vmem>>, vector<1x1x18x3xf32>
    tpu.vector_store %arg5[%c0_3, %c17, %c0_4, %c0_5], %0 {strides = array<i32>} : memref<1x18x18x3xf32, #tpu.memory_space<vmem>>, vector<1x1x18x3xf32>,
    %cst_6 = arith.constant 0.000000e+00 : f32
    %3 = vector.broadcast %cst_6 : f32 to vector<1x18x1x3xf32>
    %c0_7 = arith.constant 0 : index
    %c0_8 = arith.constant 0 : index
    %c0_9 = arith.constant 0 : index
    %c0_10 = arith.constant 0 : index
    %4 = vector.load %arg5[%c0_7, %c0_8, %c0_9, %c0_10] : memref<1x18x18x3xf32, #tpu.memory_space<vmem>>, vector<1x18x1x3xf32>
    tpu.vector_store %arg5[%c0_7, %c0_8, %c0_9, %c0_10], %3 {strides = array<i32>} : memref<1x18x18x3xf32, #tpu.memory_space<vmem>>, vector<1x18x1x3xf32>,
    %c0_11 = arith.constant 0 : index
    %c0_12 = arith.constant 0 : index
    %c17_13 = arith.constant 17 : index
    %c0_14 = arith.constant 0 : index
    %5 = vector.load %arg5[%c0_11, %c0_12, %c17_13, %c0_14] : memref<1x18x18x3xf32, #tpu.memory_space<vmem>>, vector<1x18x1x3xf32>
    tpu.vector_store %arg5[%c0_11, %c0_12, %c17_13, %c0_14], %3 {strides = array<i32>} : memref<1x18x18x3xf32, #tpu.memory_space<vmem>>, vector<1x18x1x3xf32>,
    %c0_15 = arith.constant 0 : index
    %c0_16 = arith.constant 0 : index
    %c0_17 = arith.constant 0 : index
    %c0_18 = arith.constant 0 : index
    %6 = vector.load %arg1[%c0_15, %c0_16, %c0_17, %c0_18] : memref<1x16x16x3xf32, #tpu.memory_space<vmem>>, vector<1x16x16x3xf32>
    %c0_19 = arith.constant 0 : index
    %c1 = arith.constant 1 : index
    %c1_20 = arith.constant 1 : index
    %c0_21 = arith.constant 0 : index
    %7 = vector.load %arg5[%c0_19, %c1, %c1_20, %c0_21] : memref<1x18x18x3xf32, #tpu.memory_space<vmem>>, vector<1x16x16x3xf32>
    tpu.vector_store %arg5[%c0_19, %c1, %c1_20, %c0_21], %6 {strides = array<i32>} : memref<1x18x18x3xf32, #tpu.memory_space<vmem>>, vector<1x16x16x3xf32>,
    %c0_22 = arith.constant 0 : index
    %c0_23 = arith.constant 0 : index
    %c0_24 = arith.constant 0 : index
    %c0_25 = arith.constant 0 : index
    %8 = vector.load %arg5[%c0_22, %c0_23, %c0_24, %c0_25] : memref<1x18x18x3xf32, #tpu.memory_space<vmem>>, vector<1x16x16x3xf32>
    %c0_26 = arith.constant 0 : index
    %c0_27 = arith.constant 0 : index
    %c1_28 = arith.constant 1 : index
    %c0_29 = arith.constant 0 : index
    %9 = vector.load %arg5[%c0_26, %c0_27, %c1_28, %c0_29] : memref<1x18x18x3xf32, #tpu.memory_space<vmem>>, vector<1x16x16x3xf32>
    %c0_30 = arith.constant 0 : index
    %c0_31 = arith.constant 0 : index
    %c2 = arith.constant 2 : index
    %c0_32 = arith.constant 0 : index
    %10 = vector.load %arg5[%c0_30, %c0_31, %c2, %c0_32] : memref<1x18x18x3xf32, #tpu.memory_space<vmem>>, vector<1x16x16x3xf32>
    %c0_33 = arith.constant 0 : index
    %c1_34 = arith.constant 1 : index
    %c0_35 = arith.constant 0 : index
    %c0_36 = arith.constant 0 : index
    %11 = vector.load %arg5[%c0_33, %c1_34, %c0_35, %c0_36] : memref<1x18x18x3xf32, #tpu.memory_space<vmem>>, vector<1x16x16x3xf32>
    %c0_37 = arith.constant 0 : index
    %c1_38 = arith.constant 1 : index
    %c1_39 = arith.constant 1 : index
    %c0_40 = arith.constant 0 : index
    %12 = vector.load %arg5[%c0_37, %c1_38, %c1_39, %c0_40] : memref<1x18x18x3xf32, #tpu.memory_space<vmem>>, vector<1x16x16x3xf32>
    %c0_41 = arith.constant 0 : index
    %c1_42 = arith.constant 1 : index
    %c2_43 = arith.constant 2 : index
    %c0_44 = arith.constant 0 : index
    %13 = vector.load %arg5[%c0_41, %c1_42, %c2_43, %c0_44] : memref<1x18x18x3xf32, #tpu.memory_space<vmem>>, vector<1x16x16x3xf32>
    %c0_45 = arith.constant 0 : index
    %c2_46 = arith.constant 2 : index
    %c0_47 = arith.constant 0 : index
    %c0_48 = arith.constant 0 : index
    %14 = vector.load %arg5[%c0_45, %c2_46, %c0_47, %c0_48] : memref<1x18x18x3xf32, #tpu.memory_space<vmem>>, vector<1x16x16x3xf32>
    %c0_49 = arith.constant 0 : index
    %c2_50 = arith.constant 2 : index
    %c1_51 = arith.constant 1 : index
    %c0_52 = arith.constant 0 : index
    %15 = vector.load %arg5[%c0_49, %c2_50, %c1_51, %c0_52] : memref<1x18x18x3xf32, #tpu.memory_space<vmem>>, vector<1x16x16x3xf32>
    %c0_53 = arith.constant 0 : index
    %c2_54 = arith.constant 2 : index
    %c2_55 = arith.constant 2 : index
    %c0_56 = arith.constant 0 : index
    %16 = vector.load %arg5[%c0_53, %c2_54, %c2_55, %c0_56] : memref<1x18x18x3xf32, #tpu.memory_space<vmem>>, vector<1x16x16x3xf32>
    %17 = tpu.concatenate %8, %9, %10, %11, %12, %13, %14, %15, %16 in 3 : vector<1x16x16x3xf32>, vector<1x16x16x3xf32>, vector<1x16x16x3xf32>, vector<1x16x16x3xf32>, vector<1x16x16x3xf32>, vector<1x16x16x3xf32>, vector<1x16x16x3xf32>, vector<1x16x16x3xf32>, vector<1x16x16x3xf32> -> vector<1x16x16x27xf32>
    %18 = vector.shape_cast %17 : vector<1x16x16x27xf32> to vector<256x27xf32>
    %c0_57 = arith.constant 0 : index
    %c0_58 = arith.constant 0 : index
    %19 = vector.load %arg2[%c0_57, %c0_58] : memref<27x16xf32, #tpu.memory_space<vmem>>, vector<27x16xf32>
    %cst_59 = arith.constant dense<0.000000e+00> : vector<256x16xf32>
    %20 = tpu.matmul %18, %19, %cst_59 {dimension_numbers = #tpu.dot_dimension_numbers<[1], [0], [0], [1], [0, 0, 1, 1], [], []>} : vector<256x27xf32>, vector<27x16xf32>, vector<256x16xf32> -> vector<256x16xf32>
    %c0_60 = arith.constant 0 : index
    %c0_61 = arith.constant 0 : index
    %21 = vector.load %arg3[%c0_60, %c0_61] : memref<1x16xf32, #tpu.memory_space<vmem>>, vector<1x16xf32>
    %22 = vector.broadcast %21 : vector<1x16xf32> to vector<256x16xf32>
    %23 = arith.addf %20, %22 : vector<256x16xf32>
    %cst_62 = arith.constant 0.000000e+00 : f32
    %24 = vector.broadcast %cst_62 : f32 to vector<256x16xf32>
    %25 = arith.maximumf %23, %24 : vector<256x16xf32>
    %26 = vector.shape_cast %25 : vector<256x16xf32> to vector<16x8x2x16xf32>
    %cst_63 = arith.constant dense<0xFF800000> : vector<16x8x16xf32>
    %27 = vector.multi_reduction <maximumf>, %26, %cst_63 [2] : vector<16x8x2x16xf32> to vector<16x8x16xf32>
    %28 = vector.shape_cast %27 : vector<16x8x16xf32> to vector<8x2x8x16xf32>
    %cst_64 = arith.constant dense<0xFF800000> : vector<8x8x16xf32>
    %29 = vector.multi_reduction <maximumf>, %28, %cst_64 [1] : vector<8x2x8x16xf32> to vector<8x8x16xf32>
    %30 = vector.shape_cast %29 : vector<8x8x16xf32> to vector<1x8x8x16xf32>
    %c0_65 = arith.constant 0 : index
    %c0_66 = arith.constant 0 : index
    %c0_67 = arith.constant 0 : index
    %c0_68 = arith.constant 0 : index
    %31 = vector.load %arg4[%c0_65, %c0_66, %c0_67, %c0_68] : memref<1x8x8x16xf32, #tpu.memory_space<vmem>>, vector<1x8x8x16xf32>
    tpu.vector_store %arg4[%c0_65, %c0_66, %c0_67, %c0_68], %30 {strides = array<i32>} : memref<1x8x8x16xf32, #tpu.memory_space<vmem>>, vector<1x8x8x16xf32>,
    return
  }
  func.func @transform_0(%arg0: i32) -> (i32, i32, i32, i32) {
    %c0_i32 = arith.constant 0 : i32
    %c0_i32_0 = arith.constant 0 : i32
    %c0_i32_1 = arith.constant 0 : i32
    %c0_i32_2 = arith.constant 0 : i32
    return %arg0, %c0_i32, %c0_i32_0, %c0_i32_1 : i32, i32, i32, i32
  }
  func.func @transform_1(%arg0: i32) -> (i32, i32) {
    %c0_i32 = arith.constant 0 : i32
    %c0_i32_0 = arith.constant 0 : i32
    %c0_i32_1 = arith.constant 0 : i32
    return %c0_i32, %c0_i32_0 : i32, i32
  }
  func.func @transform_2(%arg0: i32) -> (i32, i32) {
    %c0_i32 = arith.constant 0 : i32
    %c0_i32_0 = arith.constant 0 : i32
    %c0_i32_1 = arith.constant 0 : i32
    return %c0_i32, %c0_i32_0 : i32, i32
  }
  func.func @transform_3(%arg0: i32) -> (i32, i32, i32, i32) {
    %c0_i32 = arith.constant 0 : i32
    %c0_i32_0 = arith.constant 0 : i32
    %c0_i32_1 = arith.constant 0 : i32
    %c0_i32_2 = arith.constant 0 : i32
    return %arg0, %c0_i32, %c0_i32_0, %c0_i32_1 : i32, i32, i32, i32
  }
}

module attributes {stable_mosaic.version = 11 : i64} {
  func.func @conv_relu_pool_kernel(%arg0: i32, %arg1: memref<1x8x8x16xf32, #tpu.memory_space<vmem>>, %arg2: memref<144x32xf32, #tpu.memory_space<vmem>>, %arg3: memref<1x32xf32, #tpu.memory_space<vmem>>, %arg4: memref<1x4x4x32xbf16, #tpu.memory_space<vmem>>, %arg5: memref<1x10x10x16xf32, #tpu.memory_space<vmem>>) attributes {dimension_semantics = [#tpu.dimension_semantics<parallel>], iteration_bounds = array<i64: 2>, scalar_prefetch = 0 : i64, scratch_operands = 1 : i64, tpu.core_type = #tpu.core_type<tc>, window_params = [{transform_indices = @transform_0, window_bounds = array<i64: 1, 8, 8, 16>}, {pipeline_mode = #tpu.pipeline_mode<synchronous>, transform_indices = @transform_1, window_bounds = array<i64: 144, 32>}, {pipeline_mode = #tpu.pipeline_mode<synchronous>, transform_indices = @transform_2, window_bounds = array<i64: 1, 32>}, {transform_indices = @transform_3, window_bounds = array<i64: 1, 4, 4, 32>}]} {
    %cst = arith.constant 0.000000e+00 : f32
    %0 = vector.broadcast %cst : f32 to vector<1x1x10x16xf32>
    %c0 = arith.constant 0 : index
    %c0_0 = arith.constant 0 : index
    %c0_1 = arith.constant 0 : index
    %c0_2 = arith.constant 0 : index
    %1 = vector.load %arg5[%c0, %c0_0, %c0_1, %c0_2] : memref<1x10x10x16xf32, #tpu.memory_space<vmem>>, vector<1x1x10x16xf32>
    tpu.vector_store %arg5[%c0, %c0_0, %c0_1, %c0_2], %0 {strides = array<i32>} : memref<1x10x10x16xf32, #tpu.memory_space<vmem>>, vector<1x1x10x16xf32>,
    %c0_3 = arith.constant 0 : index
    %c9 = arith.constant 9 : index
    %c0_4 = arith.constant 0 : index
    %c0_5 = arith.constant 0 : index
    %2 = vector.load %arg5[%c0_3, %c9, %c0_4, %c0_5] : memref<1x10x10x16xf32, #tpu.memory_space<vmem>>, vector<1x1x10x16xf32>
    tpu.vector_store %arg5[%c0_3, %c9, %c0_4, %c0_5], %0 {strides = array<i32>} : memref<1x10x10x16xf32, #tpu.memory_space<vmem>>, vector<1x1x10x16xf32>,
    %cst_6 = arith.constant 0.000000e+00 : f32
    %3 = vector.broadcast %cst_6 : f32 to vector<1x10x1x16xf32>
    %c0_7 = arith.constant 0 : index
    %c0_8 = arith.constant 0 : index
    %c0_9 = arith.constant 0 : index
    %c0_10 = arith.constant 0 : index
    %4 = vector.load %arg5[%c0_7, %c0_8, %c0_9, %c0_10] : memref<1x10x10x16xf32, #tpu.memory_space<vmem>>, vector<1x10x1x16xf32>
    tpu.vector_store %arg5[%c0_7, %c0_8, %c0_9, %c0_10], %3 {strides = array<i32>} : memref<1x10x10x16xf32, #tpu.memory_space<vmem>>, vector<1x10x1x16xf32>,
    %c0_11 = arith.constant 0 : index
    %c0_12 = arith.constant 0 : index
    %c9_13 = arith.constant 9 : index
    %c0_14 = arith.constant 0 : index
    %5 = vector.load %arg5[%c0_11, %c0_12, %c9_13, %c0_14] : memref<1x10x10x16xf32, #tpu.memory_space<vmem>>, vector<1x10x1x16xf32>
    tpu.vector_store %arg5[%c0_11, %c0_12, %c9_13, %c0_14], %3 {strides = array<i32>} : memref<1x10x10x16xf32, #tpu.memory_space<vmem>>, vector<1x10x1x16xf32>,
    %c0_15 = arith.constant 0 : index
    %c0_16 = arith.constant 0 : index
    %c0_17 = arith.constant 0 : index
    %c0_18 = arith.constant 0 : index
    %6 = vector.load %arg1[%c0_15, %c0_16, %c0_17, %c0_18] : memref<1x8x8x16xf32, #tpu.memory_space<vmem>>, vector<1x8x8x16xf32>
    %c0_19 = arith.constant 0 : index
    %c1 = arith.constant 1 : index
    %c1_20 = arith.constant 1 : index
    %c0_21 = arith.constant 0 : index
    %7 = vector.load %arg5[%c0_19, %c1, %c1_20, %c0_21] : memref<1x10x10x16xf32, #tpu.memory_space<vmem>>, vector<1x8x8x16xf32>
    tpu.vector_store %arg5[%c0_19, %c1, %c1_20, %c0_21], %6 {strides = array<i32>} : memref<1x10x10x16xf32, #tpu.memory_space<vmem>>, vector<1x8x8x16xf32>,
    %c0_22 = arith.constant 0 : index
    %c0_23 = arith.constant 0 : index
    %c0_24 = arith.constant 0 : index
    %c0_25 = arith.constant 0 : index
    %8 = vector.load %arg5[%c0_22, %c0_23, %c0_24, %c0_25] : memref<1x10x10x16xf32, #tpu.memory_space<vmem>>, vector<1x8x8x16xf32>
    %c0_26 = arith.constant 0 : index
    %c0_27 = arith.constant 0 : index
    %c1_28 = arith.constant 1 : index
    %c0_29 = arith.constant 0 : index
    %9 = vector.load %arg5[%c0_26, %c0_27, %c1_28, %c0_29] : memref<1x10x10x16xf32, #tpu.memory_space<vmem>>, vector<1x8x8x16xf32>
    %c0_30 = arith.constant 0 : index
    %c0_31 = arith.constant 0 : index
    %c2 = arith.constant 2 : index
    %c0_32 = arith.constant 0 : index
    %10 = vector.load %arg5[%c0_30, %c0_31, %c2, %c0_32] : memref<1x10x10x16xf32, #tpu.memory_space<vmem>>, vector<1x8x8x16xf32>
    %c0_33 = arith.constant 0 : index
    %c1_34 = arith.constant 1 : index
    %c0_35 = arith.constant 0 : index
    %c0_36 = arith.constant 0 : index
    %11 = vector.load %arg5[%c0_33, %c1_34, %c0_35, %c0_36] : memref<1x10x10x16xf32, #tpu.memory_space<vmem>>, vector<1x8x8x16xf32>
    %c0_37 = arith.constant 0 : index
    %c1_38 = arith.constant 1 : index
    %c1_39 = arith.constant 1 : index
    %c0_40 = arith.constant 0 : index
    %12 = vector.load %arg5[%c0_37, %c1_38, %c1_39, %c0_40] : memref<1x10x10x16xf32, #tpu.memory_space<vmem>>, vector<1x8x8x16xf32>
    %c0_41 = arith.constant 0 : index
    %c1_42 = arith.constant 1 : index
    %c2_43 = arith.constant 2 : index
    %c0_44 = arith.constant 0 : index
    %13 = vector.load %arg5[%c0_41, %c1_42, %c2_43, %c0_44] : memref<1x10x10x16xf32, #tpu.memory_space<vmem>>, vector<1x8x8x16xf32>
    %c0_45 = arith.constant 0 : index
    %c2_46 = arith.constant 2 : index
    %c0_47 = arith.constant 0 : index
    %c0_48 = arith.constant 0 : index
    %14 = vector.load %arg5[%c0_45, %c2_46, %c0_47, %c0_48] : memref<1x10x10x16xf32, #tpu.memory_space<vmem>>, vector<1x8x8x16xf32>
    %c0_49 = arith.constant 0 : index
    %c2_50 = arith.constant 2 : index
    %c1_51 = arith.constant 1 : index
    %c0_52 = arith.constant 0 : index
    %15 = vector.load %arg5[%c0_49, %c2_50, %c1_51, %c0_52] : memref<1x10x10x16xf32, #tpu.memory_space<vmem>>, vector<1x8x8x16xf32>
    %c0_53 = arith.constant 0 : index
    %c2_54 = arith.constant 2 : index
    %c2_55 = arith.constant 2 : index
    %c0_56 = arith.constant 0 : index
    %16 = vector.load %arg5[%c0_53, %c2_54, %c2_55, %c0_56] : memref<1x10x10x16xf32, #tpu.memory_space<vmem>>, vector<1x8x8x16xf32>
    %17 = tpu.concatenate %8, %9, %10, %11, %12, %13, %14, %15, %16 in 3 : vector<1x8x8x16xf32>, vector<1x8x8x16xf32>, vector<1x8x8x16xf32>, vector<1x8x8x16xf32>, vector<1x8x8x16xf32>, vector<1x8x8x16xf32>, vector<1x8x8x16xf32>, vector<1x8x8x16xf32>, vector<1x8x8x16xf32> -> vector<1x8x8x144xf32>
    %18 = vector.shape_cast %17 : vector<1x8x8x144xf32> to vector<64x144xf32>
    %c0_57 = arith.constant 0 : index
    %c0_58 = arith.constant 0 : index
    %19 = vector.load %arg2[%c0_57, %c0_58] : memref<144x32xf32, #tpu.memory_space<vmem>>, vector<144x32xf32>
    %cst_59 = arith.constant dense<0.000000e+00> : vector<64x32xf32>
    %20 = tpu.matmul %18, %19, %cst_59 {dimension_numbers = #tpu.dot_dimension_numbers<[1], [0], [0], [1], [0, 0, 1, 1], [], []>} : vector<64x144xf32>, vector<144x32xf32>, vector<64x32xf32> -> vector<64x32xf32>
    %c0_60 = arith.constant 0 : index
    %c0_61 = arith.constant 0 : index
    %21 = vector.load %arg3[%c0_60, %c0_61] : memref<1x32xf32, #tpu.memory_space<vmem>>, vector<1x32xf32>
    %22 = vector.broadcast %21 : vector<1x32xf32> to vector<64x32xf32>
    %23 = arith.addf %20, %22 : vector<64x32xf32>
    %cst_62 = arith.constant 0.000000e+00 : f32
    %24 = vector.broadcast %cst_62 : f32 to vector<64x32xf32>
    %25 = arith.maximumf %23, %24 : vector<64x32xf32>
    %26 = vector.shape_cast %25 : vector<64x32xf32> to vector<8x4x2x32xf32>
    %cst_63 = arith.constant dense<0xFF800000> : vector<8x4x32xf32>
    %27 = vector.multi_reduction <maximumf>, %26, %cst_63 [2] : vector<8x4x2x32xf32> to vector<8x4x32xf32>
    %28 = vector.shape_cast %27 : vector<8x4x32xf32> to vector<4x2x4x32xf32>
    %cst_64 = arith.constant dense<0xFF800000> : vector<4x4x32xf32>
    %29 = vector.multi_reduction <maximumf>, %28, %cst_64 [1] : vector<4x2x4x32xf32> to vector<4x4x32xf32>
    %30 = vector.shape_cast %29 : vector<4x4x32xf32> to vector<1x4x4x32xf32>
    %31 = arith.truncf %30 : vector<1x4x4x32xf32> to vector<1x4x4x32xbf16>
    %c0_65 = arith.constant 0 : index
    %c0_66 = arith.constant 0 : index
    %c0_67 = arith.constant 0 : index
    %c0_68 = arith.constant 0 : index
    %32 = vector.load %arg4[%c0_65, %c0_66, %c0_67, %c0_68] : memref<1x4x4x32xbf16, #tpu.memory_space<vmem>>, vector<1x4x4x32xbf16>
    tpu.vector_store %arg4[%c0_65, %c0_66, %c0_67, %c0_68], %31 {strides = array<i32>} : memref<1x4x4x32xbf16, #tpu.memory_space<vmem>>, vector<1x4x4x32xbf16>,
    return
  }
  func.func @transform_0(%arg0: i32) -> (i32, i32, i32, i32) {
    %c0_i32 = arith.constant 0 : i32
    %c0_i32_0 = arith.constant 0 : i32
    %c0_i32_1 = arith.constant 0 : i32
    %c0_i32_2 = arith.constant 0 : i32
    return %arg0, %c0_i32, %c0_i32_0, %c0_i32_1 : i32, i32, i32, i32
  }
  func.func @transform_1(%arg0: i32) -> (i32, i32) {
    %c0_i32 = arith.constant 0 : i32
    %c0_i32_0 = arith.constant 0 : i32
    %c0_i32_1 = arith.constant 0 : i32
    return %c0_i32, %c0_i32_0 : i32, i32
  }
  func.func @transform_2(%arg0: i32) -> (i32, i32) {
    %c0_i32 = arith.constant 0 : i32
    %c0_i32_0 = arith.constant 0 : i32
    %c0_i32_1 = arith.constant 0 : i32
    return %c0_i32, %c0_i32_0 : i32, i32
  }
  func.func @transform_3(%arg0: i32) -> (i32, i32, i32, i32) {
    %c0_i32 = arith.constant 0 : i32
    %c0_i32_0 = arith.constant 0 : i32
    %c0_i32_1 = arith.constant 0 : i32
    %c0_i32_2 = arith.constant 0 : i32
    return %arg0, %c0_i32, %c0_i32_0, %c0_i32_1 : i32, i32, i32, i32
  }
}

module attributes {stable_mosaic.version = 11 : i64} {
  func.func @mlp_kernel(%arg0: i32, %arg1: memref<2x256xbf16, #tpu.memory_space<vmem>>, %arg2: memref<256x512xbf16, #tpu.memory_space<vmem>>, %arg3: memref<1x512xf32, #tpu.memory_space<vmem>>, %arg4: memref<512x5xbf16, #tpu.memory_space<vmem>>, %arg5: memref<1x5xf32, #tpu.memory_space<vmem>>, %arg6: memref<2x5xf32, #tpu.memory_space<vmem>>, %arg7: memref<2x512xf32, #tpu.memory_space<vmem>>) attributes {dimension_semantics = [#tpu.dimension_semantics<arbitrary>], iteration_bounds = array<i64: 2>, scalar_prefetch = 0 : i64, scratch_operands = 1 : i64, tpu.core_type = #tpu.core_type<tc>, window_params = [{transform_indices = @transform_0, window_bounds = array<i64: 2, 256>}, {transform_indices = @transform_1, window_bounds = array<i64: 256, 512>}, {pipeline_mode = #tpu.pipeline_mode<synchronous>, transform_indices = @transform_2, window_bounds = array<i64: 1, 512>}, {pipeline_mode = #tpu.pipeline_mode<synchronous>, transform_indices = @transform_3, window_bounds = array<i64: 512, 5>}, {pipeline_mode = #tpu.pipeline_mode<synchronous>, transform_indices = @transform_4, window_bounds = array<i64: 1, 5>}, {pipeline_mode = #tpu.pipeline_mode<synchronous>, transform_indices = @transform_5, window_bounds = array<i64: 2, 5>}]} {
    %c0_i32 = arith.constant 0 : i32
    %0 = arith.cmpi eq, %arg0, %c0_i32 : i32
    %1 = arith.extui %0 : i1 to i32
    %c0_i32_0 = arith.constant 0 : i32
    %2 = arith.cmpi ne, %1, %c0_i32_0 : i32
    scf.if %2 {
      %cst_9 = arith.constant 0.000000e+00 : f32
      %12 = vector.broadcast %cst_9 : f32 to vector<2x512xf32>
      %c0_10 = arith.constant 0 : index
      %c0_11 = arith.constant 0 : index
      %13 = vector.load %arg7[%c0_10, %c0_11] : memref<2x512xf32, #tpu.memory_space<vmem>>, vector<2x512xf32>
      tpu.vector_store %arg7[%c0_10, %c0_11], %12 {strides = array<i32>} : memref<2x512xf32, #tpu.memory_space<vmem>>, vector<2x512xf32>,
    } else {
    }
    %c0 = arith.constant 0 : index
    %c0_1 = arith.constant 0 : index
    %3 = vector.load %arg7[%c0, %c0_1] : memref<2x512xf32, #tpu.memory_space<vmem>>, vector<2x512xf32>
    %c0_2 = arith.constant 0 : index
    %c0_3 = arith.constant 0 : index
    %4 = vector.load %arg1[%c0_2, %c0_3] : memref<2x256xbf16, #tpu.memory_space<vmem>>, vector<2x256xbf16>
    %c0_4 = arith.constant 0 : index
    %c0_5 = arith.constant 0 : index
    %5 = vector.load %arg2[%c0_4, %c0_5] : memref<256x512xbf16, #tpu.memory_space<vmem>>, vector<256x512xbf16>
    %cst = arith.constant dense<0.000000e+00> : vector<2x512xf32>
    %6 = tpu.matmul %4, %5, %cst {dimension_numbers = #tpu.dot_dimension_numbers<[1], [0], [0], [1], [0, 0, 1, 1], [], []>} : vector<2x256xbf16>, vector<256x512xbf16>, vector<2x512xf32> -> vector<2x512xf32>
    %7 = arith.addf %3, %6 : vector<2x512xf32>
    %c0_6 = arith.constant 0 : index
    %c0_7 = arith.constant 0 : index
    %8 = vector.load %arg7[%c0_6, %c0_7] : memref<2x512xf32, #tpu.memory_space<vmem>>, vector<2x512xf32>
    tpu.vector_store %arg7[%c0_6, %c0_7], %7 {strides = array<i32>} : memref<2x512xf32, #tpu.memory_space<vmem>>, vector<2x512xf32>,
    %c1_i32 = arith.constant 1 : i32
    %9 = arith.cmpi eq, %arg0, %c1_i32 : i32
    %10 = arith.extui %9 : i1 to i32
    %c0_i32_8 = arith.constant 0 : i32
    %11 = arith.cmpi ne, %10, %c0_i32_8 : i32
    scf.if %11 {
      %c0_9 = arith.constant 0 : index
      %c0_10 = arith.constant 0 : index
      %12 = vector.load %arg7[%c0_9, %c0_10] : memref<2x512xf32, #tpu.memory_space<vmem>>, vector<2x512xf32>
      %c0_11 = arith.constant 0 : index
      %c0_12 = arith.constant 0 : index
      %13 = vector.load %arg3[%c0_11, %c0_12] : memref<1x512xf32, #tpu.memory_space<vmem>>, vector<1x512xf32>
      %14 = vector.broadcast %13 : vector<1x512xf32> to vector<2x512xf32>
      %15 = arith.addf %12, %14 : vector<2x512xf32>
      %cst_13 = arith.constant 0.000000e+00 : f32
      %16 = vector.broadcast %cst_13 : f32 to vector<2x512xf32>
      %17 = arith.maximumf %15, %16 : vector<2x512xf32>
      %18 = arith.truncf %17 : vector<2x512xf32> to vector<2x512xbf16>
      %c0_14 = arith.constant 0 : index
      %c0_15 = arith.constant 0 : index
      %19 = vector.load %arg4[%c0_14, %c0_15] : memref<512x5xbf16, #tpu.memory_space<vmem>>, vector<512x5xbf16>
      %cst_16 = arith.constant dense<0.000000e+00> : vector<2x5xf32>
      %20 = tpu.matmul %18, %19, %cst_16 {dimension_numbers = #tpu.dot_dimension_numbers<[1], [0], [0], [1], [0, 0, 1, 1], [], []>} : vector<2x512xbf16>, vector<512x5xbf16>, vector<2x5xf32> -> vector<2x5xf32>
      %c0_17 = arith.constant 0 : index
      %c0_18 = arith.constant 0 : index
      %21 = vector.load %arg5[%c0_17, %c0_18] : memref<1x5xf32, #tpu.memory_space<vmem>>, vector<1x5xf32>
      %22 = vector.broadcast %21 : vector<1x5xf32> to vector<2x5xf32>
      %23 = arith.addf %20, %22 : vector<2x5xf32>
      %c0_19 = arith.constant 0 : index
      %c0_20 = arith.constant 0 : index
      %24 = vector.load %arg6[%c0_19, %c0_20] : memref<2x5xf32, #tpu.memory_space<vmem>>, vector<2x5xf32>
      tpu.vector_store %arg6[%c0_19, %c0_20], %23 {strides = array<i32>} : memref<2x5xf32, #tpu.memory_space<vmem>>, vector<2x5xf32>,
    } else {
    }
    return
  }
  func.func @transform_0(%arg0: i32) -> (i32, i32) {
    %c0_i32 = arith.constant 0 : i32
    %c0_i32_0 = arith.constant 0 : i32
    return %c0_i32, %arg0 : i32, i32
  }
  func.func @transform_1(%arg0: i32) -> (i32, i32) {
    %c0_i32 = arith.constant 0 : i32
    %c0_i32_0 = arith.constant 0 : i32
    return %arg0, %c0_i32 : i32, i32
  }
  func.func @transform_2(%arg0: i32) -> (i32, i32) {
    %c0_i32 = arith.constant 0 : i32
    %c0_i32_0 = arith.constant 0 : i32
    %c0_i32_1 = arith.constant 0 : i32
    return %c0_i32, %c0_i32_0 : i32, i32
  }
  func.func @transform_3(%arg0: i32) -> (i32, i32) {
    %c0_i32 = arith.constant 0 : i32
    %c0_i32_0 = arith.constant 0 : i32
    %c0_i32_1 = arith.constant 0 : i32
    return %c0_i32, %c0_i32_0 : i32, i32
  }
  func.func @transform_4(%arg0: i32) -> (i32, i32) {
    %c0_i32 = arith.constant 0 : i32
    %c0_i32_0 = arith.constant 0 : i32
    %c0_i32_1 = arith.constant 0 : i32
    return %c0_i32, %c0_i32_0 : i32, i32
  }
  func.func @transform_5(%arg0: i32) -> (i32, i32) {
    %c0_i32 = arith.constant 0 : i32
    %c0_i32_0 = arith.constant 0 : i32
    %c0_i32_1 = arith.constant 0 : i32
    return %c0_i32, %c0_i32_0 : i32, i32
  }
}

</mosaic_0001>

<bundles_post_ra>
// kernel: skin_disease_cnn_forward.4
= control target key start
LH: loop header
LB: loop body
LE: loop exit
PB: predicated region body
PF: predicated region fallthrough
CT: control target
= control target key end

     0   :  { %s1843_s12 = smov 0   ;;  %s2338_s0 = inlined_call_operand.vmem [shape: f32[2,8,8,16], index: 0, kind: input, shape index: {}]   ;;  %s2339_s1 = inlined_call_operand.vmem [shape: f32[144,32], index: 1, kind: input, shape index: {}]   ;;  %s2340_s2 = inlined_call_operand.vmem [shape: f32[1,32], index: 2, kind: input, shape index: {}]   ;;  %s2341_s3 = inlined_call_operand.vmem [shape: bf16[2,4,4,32], index: 3, kind: output, shape index: {}]  }
   0x1 LB: > { %s1580_s13 = sadd.s32 4294967295, %s1811_s12   ;;  %p1584_p0 = scmp.ge.s32.totalorder %s1811_s12, 1  ;;  %s1811_s12 = sphi %s1843_s12, %s13_s12  }
   0x2   : > { %p137_p1 = scmp.lt.s32.totalorder %s1811_s12, 3 }
   0x4   : > { %p138_p2 = pnand %p1584_p0, %p137_p1 }
   0x5   : > { %p1853_p3 = scmp.lt.s32.totalorder (!%p138_p2), %s1580_s13, 1  ;;  %vm171_vm0 = vcmask (!%p138_p2), 130048   ;;  %vm173_vm1 = vcmask (!%p138_p2), 123904   ;;  %vm178_vm2 = vcmask (!%p138_p2), 122880   ;;  %v1813_v0 = vmov (!%p138_p2), 0.0   ;;  %v575_v1 = vld [vmem:[%s2339_s1] sm:$0xff] (!%p138_p2) }
   0x6   : > { %141 = sbr.rel (%p138_p2) target bundleno = 497 (0x1f1), region = 32  ;;  %172 = vst.msk [vmem:[#allocation2] sm:$0xff] (!%p138_p2), %vm171_vm0, %v1813_v0  ;;  %176 = vst.msk [vmem:[#allocation2 + $0x90] sm:$0xff] (!%p138_p2), %vm171_vm0, %v1813_v0  ;;  %v576_v2 = vld [vmem:[%s2339_s1 + $0x8] sm:$0xff] (!%p138_p2)  ;;  %v577_v3 = vld [vmem:[%s2339_s1 + $0x10] sm:$0xff] (!%p138_p2)  ;;  %v1814_v4 = vmov (!%p138_p2), 0.0|0.0  }
   0x7   : > { %174 = vst.msk [vmem:[#allocation2 + $0x8] sm:$0x3] (!%p138_p2), %vm173_vm1, %v1813_v0  ;;  %177 = vst.msk [vmem:[#allocation2 + $0x98] sm:$0x3] (!%p138_p2), %vm173_vm1, %v1813_v0  ;;  %1602 = vmatprep.subr.bf16.mxu0 (!%p138_p2), %v1814_v4  ;;  %1629 = vmatprep.subr.bf16.mxu1 (!%p138_p2), %v1814_v4  ;;  %v1603_v5 = vpack.c.bf16 (!%p138_p2), %v576_v2, %v575_v1  ;;  %v578_v6 = vld [vmem:[%s2339_s1 + $0x18] sm:$0xff] (!%p138_p2)  ;;  %v579_v8 = vld [vmem:[%s2339_s1 + $0x20] sm:$0xff] (!%p138_p2) }
   0x8   : > { %180 = vst.msk [vmem:[#allocation2 + $0x10] sm:$0x1] (!%p138_p2), %vm178_vm2, %v1813_v0  ;;  %181 = vst.msk [vmem:[#allocation2 + $0x20] sm:$0x1] (!%p138_p2), %vm178_vm2, %v1813_v0  ;;  %v1606_v7 = vpack.c.bf16 (!%p138_p2), %v578_v6, %v577_v3  ;;  %v580_v9 = vld [vmem:[%s2339_s1 + $0x28] sm:$0xff] (!%p138_p2)  ;;  %v581_v19 = vld [vmem:[%s2339_s1 + $0x30] sm:$0xff] (!%p138_p2) }
   0x9   : > { %182 = vst.msk [vmem:[#allocation2 + $0x30] sm:$0x1] (!%p138_p2), %vm178_vm2, %v1813_v0  ;;  %183 = vst.msk [vmem:[#allocation2 + $0x40] sm:$0x1] (!%p138_p2), %vm178_vm2, %v1813_v0  ;;  %1604 = vmatpush1.bf16.msra.mxu0 (!%p138_p2), %v1603_v5  ;;  %1638 = vmatpush1.bf16.msra.mxu1 (!%p138_p2), %v1603_v5  ;;  %v1609_v18 = vpack.c.bf16 (!%p138_p2), %v580_v9, %v579_v8  ;;  %v582_v20 = vld [vmem:[%s2339_s1 + $0x38] sm:$0xff] (!%p138_p2)  ;;  %v583_v24 = vld [vmem:[%s2339_s1 + $0x40] sm:$0xff] (!%p138_p2) }
   0xa   : > { %184 = vst.msk [vmem:[#allocation2 + $0x50] sm:$0x1] (!%p138_p2), %vm178_vm2, %v1813_v0  ;;  %185 = vst.msk [vmem:[#allocation2 + $0x60] sm:$0x1] (!%p138_p2), %vm178_vm2, %v1813_v0  ;;  %1605 = vmatprep.subr.bf16.mxu0 (!%p138_p2), %v1814_v4  ;;  %1630 = vmatprep.subr.bf16.mxu1 (!%p138_p2), %v1814_v4  ;;  %v1612_v22 = vpack.c.bf16 (!%p138_p2), %v582_v20, %v581_v19  ;;  %v584_v25 = vld [vmem:[%s2339_s1 + $0x48] sm:$0xff] (!%p138_p2)  ;;  %s1815_s14 = smov (!%p138_p2), 16  }
   0xb   : > { %186 = vst.msk [vmem:[#allocation2 + $0x70] sm:$0x1] (!%p138_p2), %vm178_vm2, %v1813_v0  ;;  %187 = vst.msk [vmem:[#allocation2 + $0x80] sm:$0x1] (!%p138_p2), %vm178_vm2, %v1813_v0  ;;  %v1615_v34 = vpack.c.bf16 (!%p138_p2), %v584_v25, %v583_v24  ;;  %s1816_s15 = smov (!%p138_p2), 48   ;;  %v585_v38 = vld [vmem:[%s2339_s1 + $0x50] sm:$0xff] (!%p138_p2) }
   0xc   : > { %190 = vst.msk [vmem:[#allocation2 + $0x19] sm:$0x1] (!%p138_p2), %vm178_vm2, %v1813_v0  ;;  %191 = vst.msk [vmem:[#allocation2 + $0x29] sm:$0x1] (!%p138_p2), %vm178_vm2, %v1813_v0  ;;  %v586_v39 = vld [vmem:[%s2339_s1 + $0x58] sm:$0xff] (!%p138_p2)  ;;  %s1817_s20 = smov (!%p138_p2), 32  }
   0xd   : > { %192 = vst.msk [vmem:[#allocation2 + $0x39] sm:$0x1] %vm178_vm2, %v1813_v0  ;;  %193 = vst.msk [vmem:[#allocation2 + $0x49] sm:$0x1] %vm178_vm2, %v1813_v0  ;;  %s2344_s13 = smov (!%p1853_p3, %s1580_s13), 1  ;;  %1607 = vmatpush1.bf16.msra.mxu0 %v1606_v7  ;;  %1639 = vmatpush1.bf16.msra.mxu1 %v1606_v7  ;;  %v1618_v43 = vpack.c.bf16 %v586_v39, %v585_v38  ;;  %s1818_s21 = smov 64  }
   0xe   : > { %194 = vst.msk [vmem:[#allocation2 + $0x59] sm:$0x1] %vm178_vm2, %v1813_v0  ;;  %195 = vst.msk [vmem:[#allocation2 + $0x69] sm:$0x1] %vm178_vm2, %v1813_v0  ;;  %s1600_s23 = sshll.u32 %s2344_s13, 6  ;;  %1608 = vmatprep.subr.bf16.mxu0 %v1814_v4  ;;  %1631 = vmatprep.subr.bf16.mxu1 %v1814_v4  ;;  %v224_v21 = vld [vmem:[#allocation2 + $0x1] sm:$0xff] }
   0xf   : > { %196 = vst.msk [vmem:[#allocation2 + $0x79] sm:$0x1] %vm178_vm2, %v1813_v0  ;;  %197 = vst.msk [vmem:[#allocation2 + $0x89] sm:$0x1] %vm178_vm2, %v1813_v0  ;;  %s165_s26 = scalar_lea.vmem %s2338_s0, %s1600_s23  ;;  %v587_v45 = vld [vmem:[%s2339_s1 + $0x60] sm:$0xff]  ;;  %v588_v46 = vld [vmem:[%s2339_s1 + $0x68] sm:$0xff] }
  0x10   : > { %179 = vst.msk [vmem:[#allocation2] sm:$0x1] %vm178_vm2, %v1813_v0  ;;  %189 = vst.msk [vmem:[#allocation2 + $0x9] sm:$0x1] %vm178_vm2, %v1813_v0  ;;  %v202_v10 = vld [vmem:[%s165_s26 + $0x18] sm:$0xff]  ;;  %v199_v11 = vld [vmem:[%s165_s26] sm:$0xff]  ;;  %v1621_v49 = vpack.c.bf16 %v588_v46, %v587_v45 }
  0x11   : > { %198 = vst.msk [vmem:[#allocation2 + $0x99] sm:$0x1] %vm178_vm2, %v1813_v0  ;;  %188 = vst.msk [vmem:[#allocation2 + $0x90] sm:$0x1] %vm178_vm2, %v1813_v0  ;;  %v203_v12 = vld [vmem:[%s165_s26 + $0x20] sm:$0xff]  ;;  %v200_v13 = vld [vmem:[%s165_s26 + $0x8] sm:$0xff]  ;;  %1610 = vmatpush1.bf16.msra.mxu0 %v1609_v18  ;;  %1640 = vmatpush1.bf16.msra.mxu1 %v1609_v18 }
  0x12   : > { %211 = vst.msk [vmem:[#allocation2 + $0x41] sm:$0xff] %vm171_vm0, %v202_v10  ;;  %208 = vst.msk [vmem:[#allocation2 + $0x11] sm:$0xff] %vm171_vm0, %v199_v11  ;;  %v204_v14 = vld [vmem:[%s165_s26 + $0x28] sm:$0xff]  ;;  %v201_v15 = vld [vmem:[%s165_s26 + $0x10] sm:$0xff]  ;;  %1611 = vmatprep.subr.bf16.mxu0 %v1814_v4  ;;  %1632 = vmatprep.subr.bf16.mxu1 %v1814_v4  ;;  %s1820_s4 = smov 96   ;;  %s1821_s9 = smov 112  }
  0x13   : > { %212 = vst.msk [vmem:[#allocation2 + $0x51] sm:$0xff] %vm171_vm0, %v203_v12  ;;  %209 = vst.msk [vmem:[#allocation2 + $0x21] sm:$0xff] %vm171_vm0, %v200_v13  ;;  %v205_v16 = vld [vmem:[%s165_s26 + $0x30] sm:$0xff]  ;;  %v206_v17 = vld [vmem:[%s165_s26 + $0x38] sm:$0xff]  ;;  %s1819_s26 = smov 80   ;;  %vm521_vm3 = vcmask 261120  }
  0x14   : > { %213 = vst.msk [vmem:[#allocation2 + $0x61] sm:$0xff] %vm171_vm0, %v204_v14  ;;  %210 = vst.msk [vmem:[#allocation2 + $0x31] sm:$0xff] %vm171_vm0, %v201_v15  ;;  %v589_v51 = vld [vmem:[%s2339_s1 + $0x70] sm:$0xff]  ;;  %v590_v52 = vld [vmem:[%s2339_s1 + $0x78] sm:$0xff]  ;;  %vm530_vm4 = vcmask 392192   ;;  %vm539_vm5 = vcmask 523264  }
  0x15   : > { %214 = vst.msk [vmem:[#allocation2 + $0x71] sm:$0xff] %vm171_vm0, %v205_v16  ;;  %215 = vst.msk [vmem:[#allocation2 + $0x81] sm:$0xff] %vm171_vm0, %v206_v17  ;;  %1613 = vmatpush1.bf16.msra.mxu0 %v1612_v22  ;;  %1641 = vmatpush1.bf16.msra.mxu1 %v1612_v22  ;;  %v1624_v55 = vpack.c.bf16 %v590_v52, %v589_v51  ;;  %v591_v57 = vld [vmem:[%s2339_s1 + $0x80] sm:$0xff]  ;;  %v592_v58 = vld [vmem:[%s2339_s1 + $0x88] sm:$0xff]  ;;  %vm548_vm6 = vcmask 654336   ;;  %vm557_vm7 = vcmask 785408  }
  0x16   : > { %1614 = vmatprep.subr.bf16.mxu0 %v1814_v4  ;;  %1633 = vmatprep.subr.bf16.mxu1 %v1814_v4  ;;  %v1627_v59 = vpack.c.bf16 %v592_v58, %v591_v57  ;;  %v280_v14 = vld [vmem:[#allocation2 + $0x91] sm:$0xff]  ;;  %vm566_vm8 = vcmask 916480   ;;  %vm913_vm9 = vcmask 254976   ;;  %vm1459_vm10 = vcmask 1041409  }
  0x17   : > { %v232_v23 = vld [vmem:[#allocation2 + $0x2] sm:$0xff]  ;;  %vm1462_vm11 = vcmask 1042434   ;;  %vm1465_vm12 = vcmask 1043459  }
  0x18   : > { %v272_v13 = vld [vmem:[#allocation2 + $0x90] sm:$0xff] }
  0x19   : > { %v1935_v26 = vld [vmem:[#allocation2 + $0x41] sm:$0xff]  ;;  %v1937_v27 = vld [vmem:[#allocation2 + $0x10] sm:$0xff]  ;;  %1616 = vmatpush1.bf16.msra.mxu0 %v1615_v34  ;;  %1642 = vmatpush1.bf16.msra.mxu1 %v1615_v34 }
  0x1a   : > { %v1939_v28 = vld [vmem:[#allocation2 + $0x50] sm:$0xff]  ;;  %v1665_v29 = vpack.i.bf16 %v1935_v26, %v224_v21  ;;  %v1944_v31 = vld [vmem:[#allocation2 + $0x42] sm:$0xff]  ;;  %1617 = vmatprep.subr.bf16.mxu0 %v1814_v4  ;;  %1634 = vmatprep.subr.bf16.mxu1 %v1814_v4 }
  0x1b   : > { %v1675_v30 = vpack.i.bf16 %v1939_v28, %v1937_v27  ;;  %v248_v32 = vld [vmem:[#allocation2 + $0x11] sm:$0xff]  ;;  %v1670_v35 = vpack.i.bf16 %v1944_v31, %v232_v23  ;;  %v234_v41 = vld [vmem:[#allocation2 + $0x22] sm:$0xff]  ;;  %v1795_v15 = vpack.i.bf16 %v272_v13, %v1939_v28 }
  0x1c   : > { %v1946_v33 = vld [vmem:[#allocation2 + $0x51] sm:$0xff]  ;;  %1666 = vrot.lane.b32.xlu0 %v1665_v29, %s1815_s14  ;;  %v238_v42 = vld [vmem:[#allocation2 + $0x62] sm:$0xff]  ;;  %1590 = vmatprep.mubr.msk.f32.mxu0 %vm171_vm0, %v234_v41 }
  0x1d   : > { %1676 = vrot.lane.b32.xlu1 %v1675_v30, %s1816_s15  ;;  %v1680_v36 = vpack.i.bf16 %v1946_v33, %v248_v32  ;;  %v256_v37 = vld [vmem:[#allocation2 + $0x12] sm:$0xff]  ;;  %1594 = vmatprep.mubr.msk.f32.mxu1 %vm171_vm0, %v238_v42  ;;  %v1973_v47 = vld [vmem:[#allocation2 + $0x20] sm:$0xff]  ;;  %v1730_v60 = vpack.i.bf16 %v238_v42, %v234_v41  ;;  %v1800_v16 = vpack.i.bf16 %v280_v14, %v1946_v33 }
  0x1e   : > { %v1958_v40 = vld [vmem:[#allocation2 + $0x52] sm:$0xff]  ;;  %v1975_v48 = vld [vmem:[#allocation2 + $0x60] sm:$0xff]  ;;  %1619 = vmatpush1.bf16.msra.mxu0 %v1618_v43  ;;  %1643 = vmatpush1.bf16.msra.mxu1 %v1618_v43 }
  0x1f   : > { %v1690_v44 = vpack.i.bf16 %v1958_v40, %v256_v37  ;;  %v1700_v50 = vpack.i.bf16 %v1975_v48, %v1973_v47  ;;  %v273_v53 = vld [vmem:[#allocation2 + $0x21] sm:$0xff]  ;;  %1620 = vmatprep.subr.bf16.mxu0 %v1814_v4  ;;  %1635 = vmatprep.subr.bf16.mxu1 %v1814_v4  ;;  %v2007_v61 = vld [vmem:[#allocation2 + $0x30] sm:$0xff] }
  0x20   : > { %1671 = vrot.lane.b32.xlu0 %v1670_v35, %s1817_s20  ;;  %v277_v54 = vld [vmem:[#allocation2 + $0x61] sm:$0xff]  ;;  %v2009_v62 = vld [vmem:[#allocation2 + $0x70] sm:$0xff] }
  0x21   : > { %1681 = vrot.lane.b32.xlu1 %v1680_v36, %s1818_s21  ;;  %v1710_v56 = vpack.i.bf16 %v277_v54, %v273_v53  ;;  %v1740_v63 = vpack.i.bf16 %v2009_v62, %v2007_v61  ;;  %v250_v0 = vld [vmem:[#allocation2 + $0x31] sm:$0xff]  ;;  %v267_v6 = vld [vmem:[#allocation2 + $0x40] sm:$0xff] }
  0x22   : > { %1622 = vmatpush1.bf16.msra.mxu0 %v1621_v49  ;;  %1644 = vmatpush1.bf16.msra.mxu1 %v1621_v49  ;;  %v254_v1 = vld [vmem:[#allocation2 + $0x71] sm:$0xff]  ;;  %v271_v7 = vld [vmem:[#allocation2 + $0x80] sm:$0xff] }
  0x23   : > { %1623 = vmatprep.subr.bf16.mxu0 %v1814_v4  ;;  %1636 = vmatprep.subr.bf16.mxu1 %v1814_v4  ;;  %v1750_v2 = vpack.i.bf16 %v254_v1, %v250_v0  ;;  %v2017_v3 = vld [vmem:[#allocation2 + $0x32] sm:$0xff]  ;;  %v1770_v8 = vpack.i.bf16 %v271_v7, %v267_v6  ;;  %v279_v9 = vld [vmem:[#allocation2 + $0x81] sm:$0xff] }
  0x24   : > { %1686 = vrot.lane.b32.xlu0 %v1680_v36, %s1815_s14  ;;  %v1780_v10 = vpack.i.bf16 %v279_v9, %v1935_v26  ;;  %v2030_v11 = vld [vmem:[#allocation2 + $0x82] sm:$0xff] }
  0x25   : > { %1691 = vrot.lane.b32.xlu1 %v1690_v44, %s1819_s26  ;;  %v1790_v12 = vpack.i.bf16 %v2030_v11, %v1944_v31  ;;  %v216_v21 = vld [vmem:[#allocation2] sm:$0xff] }
  0x26   : > { %1625 = vmatpush1.bf16.msra.mxu0 %v1624_v55  ;;  %1645 = vmatpush1.bf16.msra.mxu1 %v1624_v55 }
  0x27   : > { %1626 = vmatprep.subr.bf16.mxu0 %v1814_v4  ;;  %1637 = vmatprep.subr.bf16.mxu1 %v1814_v4  ;;  %v2019_v4 = vld [vmem:[#allocation2 + $0x72] sm:$0xff] }
  0x28   : > { %1696 = vrot.lane.b32.xlu0 %v1690_v44, %s1817_s20  ;;  %v1760_v5 = vpack.i.bf16 %v2019_v4, %v2017_v3 }
  0x29   : > { %1701 = vrot.lane.b32.xlu1 %v1700_v50, %s1820_s4 }
  0x2a   : > { %1628 = vmatpush1.bf16.msra.mxu0 %v1627_v59  ;;  %1646 = vmatpush1.bf16.msra.mxu1 %v1627_v59 }
  0x2c   : > { %1706 = vrot.lane.b32.xlu0 %v1700_v50, %s1816_s15 }
  0x2d   : > { %1711 = vrot.lane.b32.xlu1 %v1710_v56, %s1821_s9 }
  0x30   : > { %1716 = vrot.lane.b32.xlu0 %v1710_v56, %s1818_s21 }
  0x31   : > { %1721 = vrot.lane.b32.xlu1 %v1710_v56, %s1815_s14 }
  0x34   : > { %1726 = vrot.lane.b32.xlu0 %v1730_v60, %s1819_s26 }
  0x35   : > { %1731 = vrot.lane.b32.xlu1 %v1730_v60, %s1817_s20 }
  0x38   : > { %1736 = vrot.lane.b32.xlu0 %v1740_v63, %s1820_s4 }
  0x39   : > { %1741 = vrot.lane.b32.xlu1 %v1740_v63, %s1816_s15 }
  0x3c   : > { %1746 = vrot.lane.b32.xlu0 %v1750_v2, %s1821_s9 }
  0x3d   : > { %1751 = vrot.lane.b32.xlu1 %v1750_v2, %s1818_s21 }
  0x40   : > { %1756 = vrot.lane.b32.xlu0 %v1750_v2, %s1815_s14  ;;  %s1601_s14 = sshll.u32 %s2344_s13, 3 }
  0x41   : > { %1761 = vrot.lane.b32.xlu1 %v1760_v5, %s1819_s26  ;;  %s2227_s13 = scalar_lea.vmem %s2341_s3, %s1601_s14 }
  0x44   : > { %1766 = vrot.lane.b32.xlu0 %v1760_v5, %s1817_s20 }
  0x45   : > { %1771 = vrot.lane.b32.xlu1 %v1770_v8, %s1820_s4 }
  0x48   : > { %1776 = vrot.lane.b32.xlu0 %v1770_v8, %s1816_s15 }
  0x49   : > { %1781 = vrot.lane.b32.xlu1 %v1780_v10, %s1821_s9 }
  0x4c   : > { %1786 = vrot.lane.b32.xlu0 %v1780_v10, %s1818_s21 }
  0x4d   : > { %1791 = vrot.lane.b32.xlu1 %v1790_v12, %s1819_s26 }
  0x50   : > { %1796 = vrot.lane.b32.xlu0 %v1795_v15, %s1820_s4 }
  0x51   : > { %1801 = vrot.lane.b32.xlu1 %v1800_v16, %s1821_s9 }
  0x8e   : > { %v1667_v17 = vpop.permute.xlu0 %1666 }
  0x8f   : > { %v1677_v18 = vpop.permute.xlu1 %1676  ;;  %v1669_v19 = vunpack.i.h.bf16 %v1667_v17  ;;  %v1668_v20 = vunpack.i.l.bf16 %v1667_v17 }
  0x90   : > { %v1679_v35 = vunpack.i.h.bf16 %v1677_v18  ;;  %v1678_v36 = vunpack.i.l.bf16 %v1677_v18 }
  0x91   : > { %v513_v26 = vsel %vm171_vm0, %v216_v21, %v1668_v20  ;;  %v517_v29 = vsel %vm171_vm0, %v267_v6, %v1669_v19 }
  0x92   : > { %v1672_v22 = vpop.permute.xlu0 %1671 }
  0x93   : > { %v1682_v23 = vpop.permute.xlu1 %1681  ;;  %v1674_v24 = vunpack.i.h.bf16 %v1672_v22  ;;  %v1673_v25 = vunpack.i.l.bf16 %v1672_v22 }
  0x94   : > { %v1684_v37 = vunpack.i.h.bf16 %v1682_v23  ;;  %v1683_v38 = vunpack.i.l.bf16 %v1682_v23 }
  0x95   : > { %v522_v30 = vsel %vm521_vm3, %v513_v26, %v1673_v25  ;;  %v526_v32 = vsel %vm521_vm3, %v517_v29, %v1674_v24 }
  0x96   : > { %v1687_v34 = vpop.permute.xlu0 %1686  ;;  %v531_v39 = vsel %vm530_vm4, %v522_v30, %v1678_v36  ;;  %v535_v41 = vsel %vm530_vm4, %v526_v32, %v1679_v35 }
  0x97   : > { %v1692_v33 = vpop.permute.xlu1 %1691  ;;  %v540_v46 = vsel %vm539_vm5, %v531_v39, %v1683_v38  ;;  %v544_v49 = vsel %vm539_vm5, %v535_v41, %v1684_v37  ;;  %v1689_v6 = vunpack.i.h.bf16 %v1687_v34  ;;  %v1688_v7 = vunpack.i.l.bf16 %v1687_v34 }
  0x98   : > { %v1694_v44 = vunpack.i.h.bf16 %v1692_v33  ;;  %v1693_v45 = vunpack.i.l.bf16 %v1692_v33 }
  0x99   : > { %v518_v17 = vsel %vm171_vm0, %v1939_v28, %v1689_v6 }
  0x9a   : > { %v1697_v43 = vpop.permute.xlu0 %1696  ;;  %v549_v56 = vsel %vm548_vm6, %v540_v46, %v1693_v45  ;;  %v553_v57 = vsel %vm548_vm6, %v544_v49, %v1694_v44 }
  0x9b   : > { %v1702_v42 = vpop.permute.xlu1 %1701  ;;  %v1699_v8 = vunpack.i.h.bf16 %v1697_v43  ;;  %v1698_v9 = vunpack.i.l.bf16 %v1697_v43 }
  0x9c   : > { %v1704_v50 = vunpack.i.h.bf16 %v1702_v42  ;;  %v1703_v51 = vunpack.i.l.bf16 %v1702_v42 }
  0x9d   : > { %v527_v20 = vsel %vm521_vm3, %v518_v17, %v1699_v8 }
  0x9e   : > { %v1707_v53 = vpop.permute.xlu0 %1706  ;;  %v558_v58 = vsel %vm557_vm7, %v549_v56, %v1703_v51  ;;  %v562_v59 = vsel %vm557_vm7, %v553_v57, %v1704_v50 }
  0x9f   : > { %v1712_v52 = vpop.permute.xlu1 %1711  ;;  %v1709_v10 = vunpack.i.h.bf16 %v1707_v53  ;;  %v1708_v12 = vunpack.i.l.bf16 %v1707_v53 }
  0xa0   : > { %v1714_v54 = vunpack.i.h.bf16 %v1712_v52  ;;  %v1713_v55 = vunpack.i.l.bf16 %v1712_v52 }
  0xa1   : > { %v536_v24 = vsel %vm530_vm4, %v527_v20, %v1709_v10 }
  0xa2   : > { %v567_v60 = vsel %vm566_vm8, %v558_v58, %v1713_v55  ;;  %v571_v63 = vsel %vm566_vm8, %v562_v59, %v1714_v54  ;;  %v1717_v1 = vpop.permute.xlu0 %1716 }
  0xa3   : > { %v1722_v0 = vpop.permute.xlu1 %1721  ;;  %689 = vmatmul.mubr.f32.vlgmr.msra.gmra.mrb[0].mxu0 %v567_v60  ;;  %709 = vmatmul.mubr.f32.vlgmr.msra.gmra.mrb[0].mxu1 %v571_v63  ;;  %v1719_v13 = vunpack.i.h.bf16 %v1717_v1  ;;  %v1718_v14 = vunpack.i.l.bf16 %v1717_v1 }
  0xa4   : > { %1591 = vmatprep.mubr.msk.f32.mxu0 %vm171_vm0, %v2017_v3  ;;  %1595 = vmatprep.mubr.msk.f32.mxu1 %vm171_vm0, %v2019_v4  ;;  %v514_v3 = vsel %vm171_vm0, %v1937_v27, %v1688_v7  ;;  %v1724_v38 = vunpack.i.h.bf16 %v1722_v0  ;;  %v1723_v39 = vunpack.i.l.bf16 %v1722_v0 }
  0xa5   : > { %v523_v19 = vsel %vm521_vm3, %v514_v3, %v1698_v9  ;;  %v545_v26 = vsel %vm539_vm5, %v536_v24, %v1719_v13 }
  0xa6   : > { %v1727_v5 = vpop.permute.xlu0 %1726  ;;  %v532_v23 = vsel %vm530_vm4, %v523_v19, %v1708_v12  ;;  %v519_v51 = vsel %vm171_vm0, %v1975_v48, %v1724_v38  ;;  %v515_v52 = vsel %vm171_vm0, %v1973_v47, %v1723_v39 }
  0xa7   : > { %v1732_v2 = vpop.permute.xlu1 %1731  ;;  %v1729_v18 = vunpack.i.h.bf16 %v1727_v5  ;;  %v1728_v4 = vunpack.i.l.bf16 %v1727_v5  ;;  %v541_v25 = vsel %vm539_vm5, %v532_v23, %v1718_v14 }
  0xa8   : > { %v1734_v43 = vunpack.i.h.bf16 %v1732_v2  ;;  %v1733_v44 = vunpack.i.l.bf16 %v1732_v2 }
  0xa9   : > { %v550_v32 = vsel %vm548_vm6, %v541_v25, %v1728_v4  ;;  %v554_v33 = vsel %vm548_vm6, %v545_v26, %v1729_v18 }
  0xaa   : > { %v1737_v16 = vpop.permute.xlu0 %1736  ;;  %v524_v57 = vsel %vm521_vm3, %v515_v52, %v1733_v44  ;;  %v749_v44 = vlaneseq }
  0xab   : > { %v1742_v15 = vpop.permute.xlu1 %1741  ;;  %v1739_v21 = vunpack.i.h.bf16 %v1737_v16  ;;  %v1738_v22 = vunpack.i.l.bf16 %v1737_v16  ;;  %v288_v16 = vld [vmem:[#allocation2 + $0x92] sm:$0xff] }
  0xac   : > { %v1744_v45 = vunpack.i.h.bf16 %v1742_v15  ;;  %v1743_v46 = vunpack.i.l.bf16 %v1742_v15 }
  0xad   : > { %v559_v34 = vsel %vm557_vm7, %v550_v32, %v1738_v22  ;;  %v563_v35 = vsel %vm557_vm7, %v554_v33, %v1739_v21 }
  0xae   : > { %v1747_v29 = vpop.permute.xlu0 %1746 }
  0xaf   : > { %v1752_v28 = vpop.permute.xlu1 %1751  ;;  %v1749_v30 = vunpack.i.h.bf16 %v1747_v29  ;;  %v1748_v27 = vunpack.i.l.bf16 %v1747_v29 }
  0xb0   : > { %v1754_v49 = vunpack.i.h.bf16 %v1752_v28  ;;  %v1753_v50 = vunpack.i.l.bf16 %v1752_v28 }
  0xb1   : > { %v568_v36 = vsel %vm566_vm8, %v559_v34, %v1748_v27  ;;  %v572_v37 = vsel %vm566_vm8, %v563_v35, %v1749_v30 }
  0xb2   : > { %v1757_v42 = vpop.permute.xlu0 %1756  ;;  %694 = vmatmul.mubr.f32.gmra.mrb[2].mxu0 %v568_v36  ;;  %714 = vmatmul.mubr.f32.gmra.mrb[2].mxu1 %v572_v37 }
  0xb3   : > { %v1762_v41 = vpop.permute.xlu1 %1761  ;;  %1592 = vmatprep.mubr.msk.f32.mxu0 %vm171_vm0, %v1944_v31  ;;  %1596 = vmatprep.mubr.msk.f32.mxu1 %vm171_vm0, %v2030_v11  ;;  %v528_v31 = vsel %vm521_vm3, %v519_v51, %v1734_v43  ;;  %v533_v11 = vsel %vm530_vm4, %v524_v57, %v1743_v46  ;;  %v1759_v0 = vunpack.i.h.bf16 %v1757_v42  ;;  %v1758_v47 = vunpack.i.l.bf16 %v1757_v42 }
  0xb4   : > { %v1764_v53 = vunpack.i.h.bf16 %v1762_v41  ;;  %v1763_v54 = vunpack.i.l.bf16 %v1762_v41  ;;  %v537_v58 = vsel %vm530_vm4, %v528_v31, %v1744_v45  ;;  %v542_v63 = vsel %vm539_vm5, %v533_v11, %v1753_v50 }
  0xb5   : > { %v546_v48 = vsel %vm539_vm5, %v537_v58, %v1754_v49  ;;  %v520_v18 = vsel %vm171_vm0, %v2009_v62, %v1759_v0  ;;  %v516_v4 = vsel %vm171_vm0, %v2007_v61, %v1758_v47  ;;  %v1822_v42 = vmov 1983009808   ;;  %v2118_v49 = vld [vmem:[%s2340_s2] ss:$0 sm:$0xff] }
  0xb6   : > { %v1767_v56 = vpop.permute.xlu0 %1766  ;;  %v551_v5 = vsel %vm548_vm6, %v542_v63, %v1763_v54  ;;  %v555_v6 = vsel %vm548_vm6, %v546_v48, %v1764_v53  ;;  %v747_v43 = vunpack.c.l.s4 %v1822_v42  ;;  %v750_v46 = vshrl.u32 %v749_v44, 7 }
  0xb7   : > { %v1772_v55 = vpop.permute.xlu1 %1771  ;;  %v1769_v7 = vunpack.i.h.bf16 %v1767_v56  ;;  %v1768_v8 = vunpack.i.l.bf16 %v1767_v56 }
  0xb8   : > { %v1774_v59 = vunpack.i.h.bf16 %v1772_v55  ;;  %v1773_v60 = vunpack.i.l.bf16 %v1772_v55  ;;  %v748_v45 = vunpack.c.0.s8 %v747_v43 }
  0xb9   : > { %v525_v21 = vsel %vm521_vm3, %v516_v4, %v1768_v8  ;;  %v529_v22 = vsel %vm521_vm3, %v520_v18, %v1769_v7 }
  0xba   : > { %v1777_v2 = vpop.permute.xlu0 %1776  ;;  %v560_v14 = vsel %vm557_vm7, %v551_v5, %v1773_v60  ;;  %v564_v15 = vsel %vm557_vm7, %v555_v6, %v1774_v59  ;;  %v2121_v53 = vsub.s32 %v748_v45, %v750_v46 }
  0xbb   : > { %v1782_v1 = vpop.permute.xlu1 %1781  ;;  %v1779_v12 = vunpack.i.h.bf16 %v1777_v2  ;;  %v1778_v13 = vunpack.i.l.bf16 %v1777_v2 }
  0xbc   : > { %v1784_v9 = vunpack.i.h.bf16 %v1782_v1  ;;  %v1783_v10 = vunpack.i.l.bf16 %v1782_v1 }
  0xbd   : > { %v534_v62 = vsel %vm530_vm4, %v525_v21, %v1778_v13  ;;  %v538_v25 = vsel %vm530_vm4, %v529_v22, %v1779_v12 }
  0xbe   : > { %v569_v17 = vsel %vm566_vm8, %v560_v14, %v1783_v10  ;;  %v573_v3 = vsel %vm566_vm8, %v564_v15, %v1784_v9  ;;  %v1787_v19 = vpop.permute.xlu0 %1786 }
  0xbf   : > { %699 = vmatmul.mubr.f32.gmra.mrb[4].mxu0 %v569_v17  ;;  %719 = vmatmul.mubr.f32.gmra.mrb[4].mxu1 %v573_v3  ;;  %v1792_v20 = vpop.permute.xlu1 %1791  ;;  %v1789_v23 = vunpack.i.h.bf16 %v1787_v19  ;;  %v1788_v24 = vunpack.i.l.bf16 %v1787_v19 }
  0xc0   : > { %1593 = vmatprep.mubr.msk.f32.mxu0 %vm171_vm0, %v1958_v40  ;;  %1597 = vmatprep.mubr.msk.f32.mxu1 %vm171_vm0, %v288_v16  ;;  %v1794_v61 = vunpack.i.h.bf16 %v1792_v20  ;;  %v1793_v26 = vunpack.i.l.bf16 %v1792_v20 }
  0xc1   : > { %v543_v28 = vsel %vm539_vm5, %v534_v62, %v1788_v24  ;;  %v547_v29 = vsel %vm539_vm5, %v538_v25, %v1789_v23 }
  0xc2   : > { %v1797_v30 = vpop.permute.xlu0 %1796  ;;  %v552_v40 = vsel %vm548_vm6, %v543_v28, %v1793_v26  ;;  %v556_v36 = vsel %vm548_vm6, %v547_v29, %v1794_v61 }
  0xc3   : > { %v1802_v27 = vpop.permute.xlu1 %1801  ;;  %v1799_v32 = vunpack.i.h.bf16 %v1797_v30  ;;  %v1798_v33 = vunpack.i.l.bf16 %v1797_v30 }
  0xc4   : > { %v1804_v34 = vunpack.i.h.bf16 %v1802_v27  ;;  %v1803_v35 = vunpack.i.l.bf16 %v1802_v27 }
  0xc5   : > { %v561_v37 = vsel %vm557_vm7, %v552_v40, %v1798_v33  ;;  %v565_v38 = vsel %vm557_vm7, %v556_v36, %v1799_v32 }
  0xc6   : > { %v570_v39 = vsel %vm566_vm8, %v561_v37, %v1803_v35  ;;  %v574_v41 = vsel %vm566_vm8, %v565_v38, %v1804_v34 }
  0xc7   : > { %704 = vmatmul.mubr.f32.gmra.mrb[6].mxu0 %v570_v39  ;;  %724 = vmatmul.mubr.f32.gmra.mrb[6].mxu1 %v574_v41 }
 0x176   : > { %v690_v50 = vpop.f32.mrb[0].mxu0  ;;  %v710_v51 = vpop.f32.mrb[0].mxu1 }
 0x177   : > { %v691_v52 = vadd.f32 %v2118_v49, %v690_v50  ;;  %v711_v54 = vadd.f32 %v2118_v49, %v710_v51  ;;  %v692_v55 = vpop.f32.mrb[1].mxu0  ;;  %v712_v56 = vpop.f32.mrb[1].mxu1 }
 0x179   : > { %v729_v57 = vmax.f32 %v691_v52, 0.0  ;;  %v733_v31 = vmax.f32 %v711_v54, 0.0 }
 0x17b   : > { %v745_v11 = vcombine.high %v729_v57, %v729_v57  ;;  %v752_v58 = vrot.slane %v729_v57, %v2121_v53  ;;  %v813_v59 = vcombine.high %v733_v31, %v733_v31  ;;  %v820_v60 = vrot.slane %v733_v31, %v2121_v53 }
 0x17d   : > { %v759_v63 = vrot.slane %v745_v11, %v2121_v53  ;;  %v760_v48 = vcombine.high %v752_v58, %v752_v58  ;;  %v914_v0 = vsel %vm913_vm9, %v752_v58, -inf  ;;  %v827_v47 = vrot.slane %v813_v59, %v2121_v53 }
 0x17e   : > { %v915_v1 = vrot.slane %v914_v0, 4  ;;  %v828_v2 = vcombine.high %v820_v60, %v820_v60  ;;  %v1026_v5 = vsel %vm913_vm9, %v820_v60, -inf }
 0x17f   : > { %v761_v6 = vcombine.high %v759_v63, %v759_v63  ;;  %v921_v7 = vsel %vm913_vm9, %v760_v48, -inf  ;;  %v928_v8 = vsel %vm913_vm9, %v759_v63, -inf  ;;  %v829_v9 = vcombine.high %v827_v47, %v827_v47 }
 0x180   : > { %v916_v10 = vmax.f32 %v914_v0, %v915_v1  ;;  %v922_v12 = vrot.slane %v921_v7, 4  ;;  %v929_v13 = vrot.slane %v928_v8, 4  ;;  %v1027_v14 = vrot.slane %v1026_v5, 4 }
 0x181   : > { %v935_v15 = vsel %vm913_vm9, %v761_v6, -inf  ;;  %v1033_v16 = vsel %vm913_vm9, %v828_v2, -inf  ;;  %v1040_v17 = vsel %vm913_vm9, %v827_v47, -inf  ;;  %v1047_v3 = vsel %vm913_vm9, %v829_v9, -inf }
 0x182   : > { %v917_v18 = vrot.slane %v916_v10, 2  ;;  %v923_v4 = vmax.f32 %v921_v7, %v922_v12  ;;  %v930_v19 = vmax.f32 %v928_v8, %v929_v13  ;;  %v936_v20 = vrot.slane %v935_v15, 4 }
 0x183   : > { %v1028_v21 = vmax.f32 %v1026_v5, %v1027_v14  ;;  %v1034_v22 = vrot.slane %v1033_v16, 4  ;;  %v1041_v23 = vrot.slane %v1040_v17, 4  ;;  %v1048_v24 = vrot.slane %v1047_v3, 4 }
 0x184   : > { %v918_v62 = vmax.f32 %v916_v10, %v917_v18  ;;  %v924_v25 = vrot.slane %v923_v4, 2  ;;  %v931_v61 = vrot.slane %v930_v19, 2  ;;  %v937_v26 = vmax.f32 %v935_v15, %v936_v20 }
 0x185   : > { %v1029_v28 = vrot.slane %v1028_v21, 2  ;;  %v1035_v29 = vmax.f32 %v1033_v16, %v1034_v22  ;;  %v1042_v30 = vmax.f32 %v1040_v17, %v1041_v23  ;;  %v1049_v27 = vmax.f32 %v1047_v3, %v1048_v24  ;;  %v695_v40 = vpop.f32.mrb[2].mxu0  ;;  %v715_v36 = vpop.f32.mrb[2].mxu1 }
 0x186   : > { %v919_v32 = vrot.slane %v918_v62, 1  ;;  %v925_v33 = vmax.f32 %v923_v4, %v924_v25  ;;  %v932_v34 = vmax.f32 %v930_v19, %v931_v61  ;;  %v938_v35 = vrot.slane %v937_v26, 2  ;;  %v697_v42 = vpop.f32.mrb[3].mxu0  ;;  %v717_v43 = vpop.f32.mrb[3].mxu1 }
 0x187   : > { %v1030_v37 = vmax.f32 %v1028_v21, %v1029_v28  ;;  %v1036_v38 = vrot.slane %v1035_v29, 2  ;;  %v1043_v39 = vrot.slane %v1042_v30, 2  ;;  %v1050_v41 = vrot.slane %v1049_v27, 2 }
 0x188   : > { %v926_v44 = vrot.slane %v925_v33, 1  ;;  %v933_v45 = vrot.slane %v932_v34, 1  ;;  %v939_v46 = vmax.f32 %v937_v26, %v938_v35  ;;  %v920_v55 = vmax.f32 %v918_v62, %v919_v32 }
 0x189   : > { %v1031_v50 = vrot.slane %v1030_v37, 1  ;;  %v1037_v51 = vmax.f32 %v1035_v29, %v1036_v38  ;;  %v1044_v52 = vmax.f32 %v1042_v30, %v1043_v39  ;;  %v1051_v54 = vmax.f32 %v1049_v27, %v1050_v41 }
 0x18a   : > { %v927_v56 = vmax.f32 %v925_v33, %v926_v44  ;;  %v940_v57 = vrot.slane %v939_v46, 1  ;;  %v934_v31 = vmax.f32 %v932_v34, %v933_v45  ;;  %v696_v63 = vadd.f32 %v2118_v49, %v695_v40 }
 0x18b   : > { %v1038_v11 = vrot.slane %v1037_v51, 1  ;;  %v1045_v58 = vrot.slane %v1044_v52, 1  ;;  %v1052_v59 = vrot.slane %v1051_v54, 1  ;;  %v1032_v60 = vmax.f32 %v1030_v37, %v1031_v50 }
 0x18c   : > { %v941_v48 = vmax.f32 %v939_v46, %v940_v57  ;;  %v730_v2 = vmax.f32 %v696_v63, 0.0  ;;  %v716_v5 = vadd.f32 %v2118_v49, %v715_v36  ;;  %v2139_v6 = vsel %vm521_vm3, %v920_v55, -inf }
 0x18d   : > { %v1039_v0 = vmax.f32 %v1037_v51, %v1038_v11  ;;  %v1046_v47 = vmax.f32 %v1044_v52, %v1045_v58  ;;  %v1053_v1 = vmax.f32 %v1051_v54, %v1052_v59  ;;  %v2142_v7 = vsel %vm521_vm3, %v927_v56, -inf }
 0x18e   : > { %v2145_v8 = vsel %vm521_vm3, %v934_v31, -inf  ;;  %v2148_v9 = vsel %vm521_vm3, %v1032_v60, -inf  ;;  %v762_v10 = vcombine.high %v730_v2, %v730_v2  ;;  %v769_v12 = vrot.slane %v730_v2, %v2121_v53 }
 0x18f   : > { %v734_v13 = vmax.f32 %v716_v5, 0.0  ;;  %v2152_v14 = vsel %vm521_vm3, %v941_v48, -inf  ;;  %v2155_v15 = vsel %vm521_vm3, %v1039_v0, -inf  ;;  %v2158_v16 = vsel %vm521_vm3, %v1046_v47, -inf }
 0x190   : > { %v2161_v17 = vsel %vm521_vm3, %v1053_v1, -inf  ;;  %v776_v3 = vrot.slane %v762_v10, %v2121_v53  ;;  %v777_v18 = vcombine.high %v769_v12, %v769_v12  ;;  %v942_v4 = vsel %vm913_vm9, %v769_v12, -inf }
 0x191   : > { %v830_v19 = vcombine.high %v734_v13, %v734_v13  ;;  %v943_v22 = vrot.slane %v942_v4, 4  ;;  %v837_v23 = vrot.slane %v734_v13, %v2121_v53 }
 0x192   : > { %v700_v20 = vpop.f32.mrb[4].mxu0  ;;  %v720_v21 = vpop.f32.mrb[4].mxu1  ;;  %v778_v26 = vcombine.high %v776_v3, %v776_v3  ;;  %v949_v28 = vsel %vm913_vm9, %v777_v18, -inf  ;;  %v956_v29 = vsel %vm913_vm9, %v776_v3, -inf }
 0x193   : > { %v2167_v24 = vadd.f32 %v2118_v49, %v700_v20  ;;  %v2170_v62 = vadd.f32 %v2118_v49, %v720_v21  ;;  %v702_v25 = vpop.f32.mrb[5].mxu0  ;;  %v722_v61 = vpop.f32.mrb[5].mxu1  ;;  %v844_v30 = vrot.slane %v830_v19, %v2121_v53  ;;  %v944_v27 = vmax.f32 %v942_v4, %v943_v22 }
 0x194   : > { %v950_v32 = vrot.slane %v949_v28, 4  ;;  %v957_v33 = vrot.slane %v956_v29, 4  ;;  %v845_v34 = vcombine.high %v837_v23, %v837_v23  ;;  %v963_v35 = vsel %vm913_vm9, %v778_v26, -inf }
 0x195   : > { %v846_v40 = vcombine.high %v844_v30, %v844_v30  ;;  %v1054_v36 = vsel %vm913_vm9, %v837_v23, -inf  ;;  %v1068_v37 = vsel %vm913_vm9, %v844_v30, -inf  ;;  %v945_v38 = vrot.slane %v944_v27, 2 }
 0x196   : > { %v951_v39 = vmax.f32 %v949_v28, %v950_v32  ;;  %v958_v41 = vmax.f32 %v956_v29, %v957_v33  ;;  %v964_v42 = vrot.slane %v963_v35, 4  ;;  %v1055_v43 = vrot.slane %v1054_v36, 4 }
 0x197   : > { %v1061_v44 = vsel %vm913_vm9, %v845_v34, -inf  ;;  %v1069_v45 = vrot.slane %v1068_v37, 4  ;;  %v1075_v46 = vsel %vm913_vm9, %v846_v40, -inf  ;;  %v946_v50 = vmax.f32 %v944_v27, %v945_v38 }
 0x198   : > { %v952_v51 = vrot.slane %v951_v39, 2  ;;  %v959_v52 = vrot.slane %v958_v41, 2  ;;  %v965_v54 = vmax.f32 %v963_v35, %v964_v42  ;;  %v1056_v55 = vmax.f32 %v1054_v36, %v1055_v43 }
 0x199   : > { %v1062_v56 = vrot.slane %v1061_v44, 4  ;;  %v1070_v57 = vmax.f32 %v1068_v37, %v1069_v45  ;;  %v1076_v31 = vrot.slane %v1075_v46, 4  ;;  %v947_v11 = vrot.slane %v946_v50, 1 }
 0x19a   : > { %v953_v58 = vmax.f32 %v951_v39, %v952_v51  ;;  %v960_v59 = vmax.f32 %v958_v41, %v959_v52  ;;  %v966_v60 = vrot.slane %v965_v54, 2  ;;  %v2180_v63 = vpop.f32.mrb[6].mxu0  ;;  %v2182_v48 = vpop.f32.mrb[6].mxu1  ;;  %v1057_v0 = vrot.slane %v1056_v55, 2 }
 0x19b   : > { %v1063_v47 = vmax.f32 %v1061_v44, %v1062_v56  ;;  %v1071_v1 = vrot.slane %v1070_v57, 2  ;;  %v1077_v2 = vmax.f32 %v1075_v46, %v1076_v31  ;;  %v707_v5 = vpop.f32.mrb[7].mxu0  ;;  %v727_v10 = vpop.f32.mrb[7].mxu1  ;;  %v948_v12 = vmax.f32 %v946_v50, %v947_v11 }
 0x19c   : > { %v954_v13 = vrot.slane %v953_v58, 1  ;;  %v961_v3 = vrot.slane %v960_v59, 1  ;;  %v967_v18 = vmax.f32 %v965_v54, %v966_v60  ;;  %v1058_v4 = vmax.f32 %v1056_v55, %v1057_v0 }
 0x19d   : > { %v1064_v19 = vrot.slane %v1063_v47, 2  ;;  %v1072_v20 = vmax.f32 %v1070_v57, %v1071_v1  ;;  %v1078_v21 = vrot.slane %v1077_v2, 2  ;;  %v1139_v61 = vsel %vm521_vm3, %v948_v12, -inf }
 0x19e   : > { %v955_v22 = vmax.f32 %v953_v58, %v954_v13  ;;  %v962_v23 = vmax.f32 %v960_v59, %v961_v3  ;;  %v968_v25 = vrot.slane %v967_v18, 1  ;;  %v1140_v26 = vmax.f32 %v2139_v6, %v1139_v61 }
 0x19f   : > { %v1059_v28 = vrot.slane %v1058_v4, 1  ;;  %v1065_v29 = vmax.f32 %v1063_v47, %v1064_v19  ;;  %v1073_v30 = vrot.slane %v1072_v20, 1  ;;  %v1079_v34 = vmax.f32 %v1077_v2, %v1078_v21 }
 0x1a0   : > { %v969_v27 = vmax.f32 %v967_v18, %v968_v25  ;;  %v1142_v32 = vsel %vm521_vm3, %v955_v22, -inf  ;;  %v1145_v33 = vsel %vm521_vm3, %v962_v23, -inf  ;;  %v1186_v36 = vpack.c.bf16 %v1140_v26, %v1140_v26 }
 0x1a1   : > { %v1143_v35 = vmax.f32 %v2142_v7, %v1142_v32  ;;  %v1146_v40 = vmax.f32 %v2145_v8, %v1145_v33  ;;  %v1060_v37 = vmax.f32 %v1058_v4, %v1059_v28  ;;  %v1066_v39 = vrot.slane %v1065_v29, 1 }
 0x1a2   : > { %v1148_v38 = vsel %vm521_vm3, %v969_v27, -inf  ;;  %v1074_v6 = vmax.f32 %v1072_v20, %v1073_v30  ;;  %v1080_v41 = vrot.slane %v1079_v34, 1  ;;  %v1224_v45 = vrot.slane %v1186_v36, %v2121_v53 }
 0x1a3   : > { %v1149_v42 = vmax.f32 %v2152_v14, %v1148_v38  ;;  %v1187_v43 = vpack.c.bf16 %v1143_v35, %v1143_v35  ;;  %v1188_v44 = vpack.c.bf16 %v1146_v40, %v1146_v40  ;;  %v1067_v46 = vmax.f32 %v1065_v29, %v1066_v39 }
 0x1a4   : > { %v1081_v7 = vmax.f32 %v1079_v34, %v1080_v41  ;;  %v1163_v8 = vsel %vm521_vm3, %v1060_v37, -inf  ;;  %v1169_v50 = vsel %vm521_vm3, %v1074_v6, -inf  ;;  %v1336_v55 = vrot.slane %v1224_v45, %v2121_v53 }
 0x1a5   : > { %v1189_v51 = vpack.c.bf16 %v1149_v42, %v1149_v42  ;;  %v1231_v52 = vrot.slane %v1187_v43, %v2121_v53  ;;  %v1238_v54 = vrot.slane %v1188_v44, %v2121_v53  ;;  %v1164_v14 = vmax.f32 %v2148_v9, %v1163_v8 }
 0x1a6   : > { %v1166_v56 = vsel %vm521_vm3, %v1067_v46, -inf  ;;  %v1170_v57 = vmax.f32 %v2158_v16, %v1169_v50  ;;  %v1172_v31 = vsel %vm521_vm3, %v1081_v7, -inf  ;;  %v1442_v60 = vunpack.c.l.b16 %v1336_v55 }
 0x1a7   : > { %v1245_v11 = vrot.slane %v1189_v51, %v2121_v53  ;;  %v1343_v58 = vrot.slane %v1231_v52, %v2121_v53  ;;  %v1350_v59 = vrot.slane %v1238_v54, %v2121_v53  ;;  %v1167_v0 = vmax.f32 %v2155_v15, %v1166_v56 }
 0x1a8   : > { %v1173_v47 = vmax.f32 %v2161_v17, %v1172_v31  ;;  %v1194_v1 = vpack.c.bf16 %v1164_v14, %v1164_v14  ;;  %v1196_v2 = vpack.c.bf16 %v1170_v57, %v1170_v57  ;;  %v731_v16 = vmax.f32 %v2167_v24, 0.0 }
 0x1a9   : > { %v1357_v9 = vrot.slane %v1245_v11, %v2121_v53  ;;  %v1443_v5 = vunpack.c.l.b16 %v1343_v58  ;;  %v1444_v10 = vunpack.c.l.b16 %v1350_v59  ;;  %v1195_v12 = vpack.c.bf16 %v1167_v0, %v1167_v0 }
 0x1aa   : > { %v1197_v13 = vpack.c.bf16 %v1173_v47, %v1173_v47  ;;  %v1280_v3 = vrot.slane %v1194_v1, %v2121_v53  ;;  %v1294_v18 = vrot.slane %v1196_v2, %v2121_v53  ;;  %v779_v20 = vcombine.high %v731_v16, %v731_v16 }
 0x1ab   : > { %v1445_v4 = vunpack.c.l.b16 %v1357_v9  ;;  %v1458_v19 = vrot.slane %v1443_v5, 7  ;;  %v1461_v15 = vrot.slane %v1444_v10, 6  ;;  %v1287_v17 = vrot.slane %v1195_v12, %v2121_v53 }
 0x1ac   : > { %v1301_v21 = vrot.slane %v1197_v13, %v2121_v53  ;;  %v1392_v22 = vrot.slane %v1280_v3, %v2121_v53  ;;  %v1406_v23 = vrot.slane %v1294_v18, %v2121_v53  ;;  %v786_v61 = vrot.slane %v731_v16, %v2121_v53 }
 0x1ad   : > { %v1460_v24 = vsel %vm1459_vm10, %v1458_v19, %v1442_v60  ;;  %v1464_v25 = vrot.slane %v1445_v4, 5  ;;  %v793_v26 = vrot.slane %v779_v20, %v2121_v53  ;;  %v1399_v29 = vrot.slane %v1287_v17, %v2121_v53 }
 0x1ae   : > { %v1463_v28 = vsel %vm1462_vm11, %v1461_v15, %v1460_v24  ;;  %v1413_v30 = vrot.slane %v1301_v21, %v2121_v53  ;;  %v1450_v27 = vunpack.c.l.b16 %v1392_v22  ;;  %v1452_v33 = vunpack.c.l.b16 %v1406_v23 }
 0x1af   : > { %v1466_v32 = vsel %vm1465_vm12, %v1464_v25, %v1463_v28  ;;  %v794_v34 = vcombine.high %v786_v61, %v786_v61  ;;  %v795_v35 = vcombine.high %v793_v26, %v793_v26  ;;  %v1451_v36 = vunpack.c.l.b16 %v1399_v29 }
 0x1b0   : > { %v1485_v40 = vpack.c.b16 %v1466_v32, %v1466_v32  ;;  %v1453_v37 = vunpack.c.l.b16 %v1413_v30  ;;  %v970_v38 = vsel %vm913_vm9, %v786_v61, -inf  ;;  %v1475_v39 = vrot.slane %v1452_v33, 6 }
 0x1b1   : > { %v971_v6 = vrot.slane %v970_v38, 4  ;;  %v977_v41 = vsel %vm913_vm9, %v794_v34, -inf  ;;  %v984_v42 = vsel %vm913_vm9, %v793_v26, -inf  ;;  %v1473_v44 = vrot.slane %v1451_v36, 7 }
 0x1b2   : > { %v1495_v43 = vrot.slane %v1485_v40, %v2121_v53  ;;  %v1477_v45 = vrot.slane %v1453_v37, 5  ;;  %v978_v46 = vrot.slane %v977_v41, 4  ;;  %v985_v8 = vrot.slane %v984_v42, 4 }
 0x1b3   : > { %v972_v7 = vmax.f32 %v970_v38, %v971_v6  ;;  %v991_v50 = vsel %vm913_vm9, %v795_v35, -inf  ;;  %v735_v51 = vmax.f32 %v2170_v62, 0.0  ;;  %v1474_v52 = vsel %vm1459_vm10, %v1473_v44, %v1450_v27 }
 0x1b4   : > { %1521 = vst.msk [vmem:[%s2227_s13] sm:$0x3] %vm913_vm9, %v1495_v43  ;;  %v979_v54 = vmax.f32 %v977_v41, %v978_v46  ;;  %v992_v55 = vrot.slane %v991_v50, 4  ;;  %v706_v14 = vadd.f32 %v2118_v49, %v2180_v63  ;;  %v1476_v56 = vsel %vm1462_vm11, %v1475_v39, %v1474_v52 }
 0x1b5   : > { %v973_v57 = vrot.slane %v972_v7, 2  ;;  %v986_v31 = vmax.f32 %v984_v42, %v985_v8  ;;  %v847_v11 = vcombine.high %v735_v51, %v735_v51  ;;  %v1478_v58 = vsel %vm1465_vm12, %v1477_v45, %v1476_v56 }
 0x1b6   : > { %v980_v59 = vrot.slane %v979_v54, 2  ;;  %v993_v60 = vmax.f32 %v991_v50, %v992_v55  ;;  %v854_v62 = vrot.slane %v735_v51, %v2121_v53  ;;  %v1487_v0 = vpack.c.b16 %v1478_v58, %v1478_v58 }
 0x1b7   : > { %v974_v47 = vmax.f32 %v972_v7, %v973_v57  ;;  %v987_v1 = vrot.slane %v986_v31, 2  ;;  %v861_v2 = vrot.slane %v847_v11, %v2121_v53  ;;  %v732_v35 = vmax.f32 %v706_v14, 0.0 }
 0x1b8   : > { %v981_v9 = vmax.f32 %v979_v54, %v980_v59  ;;  %v994_v5 = vrot.slane %v993_v60, 2  ;;  %v862_v63 = vcombine.high %v854_v62, %v854_v62  ;;  %v1082_v10 = vsel %vm913_vm9, %v854_v62, -inf }
 0x1b9   : > { %v1509_v16 = vrot.slane %v1487_v0, %v2121_v53  ;;  %v975_v12 = vrot.slane %v974_v47, 1  ;;  %v988_v13 = vmax.f32 %v986_v31, %v987_v1  ;;  %v863_v3 = vcombine.high %v861_v2, %v861_v2 }
 0x1ba   : > { %v982_v18 = vrot.slane %v981_v9, 1  ;;  %v995_v4 = vmax.f32 %v993_v60, %v994_v5  ;;  %v1083_v19 = vrot.slane %v1082_v10, 4  ;;  %v1089_v15 = vsel %vm913_vm9, %v862_v63, -inf }
 0x1bb   : > { %1523 = vst.msk [vmem:[%s2227_s13 + $0x4] sm:$0x3] %vm913_vm9, %v1509_v16  ;;  %v976_v20 = vmax.f32 %v974_v47, %v975_v12  ;;  %v989_v17 = vrot.slane %v988_v13, 1  ;;  %v1090_v21 = vrot.slane %v1089_v15, 4  ;;  %v1096_v22 = vsel %vm913_vm9, %v861_v2, -inf }
 0x1bc   : > { %v996_v23 = vrot.slane %v995_v4, 1  ;;  %v1084_v24 = vmax.f32 %v1082_v10, %v1083_v19  ;;  %v1097_v25 = vrot.slane %v1096_v22, 4  ;;  %v1103_v26 = vsel %vm913_vm9, %v863_v3, -inf }
 0x1bd   : > { %v1091_v61 = vmax.f32 %v1089_v15, %v1090_v21  ;;  %v983_v28 = vmax.f32 %v981_v9, %v982_v18  ;;  %v990_v29 = vmax.f32 %v988_v13, %v989_v17  ;;  %v2251_v32 = vsel %vm521_vm3, %v976_v20, -inf }
 0x1be   : > { %v1085_v30 = vrot.slane %v1084_v24, 2  ;;  %v1098_v27 = vmax.f32 %v1096_v22, %v1097_v25  ;;  %v1104_v34 = vrot.slane %v1103_v26, 4  ;;  %v997_v40 = vmax.f32 %v995_v4, %v996_v23 }
 0x1bf   : > { %v1092_v33 = vrot.slane %v1091_v61, 2  ;;  %v726_v38 = vadd.f32 %v2118_v49, %v2182_v48  ;;  %v796_v41 = vcombine.high %v732_v35, %v732_v35  ;;  %v803_v42 = vrot.slane %v732_v35, %v2121_v53 }
 0x1c0   : > { %v1086_v36 = vmax.f32 %v1084_v24, %v1085_v30  ;;  %v1099_v37 = vrot.slane %v1098_v27, 2  ;;  %v1105_v6 = vmax.f32 %v1103_v26, %v1104_v34  ;;  %v2257_v43 = vsel %vm521_vm3, %v983_v28, -inf }
 0x1c1   : > { %v1093_v39 = vmax.f32 %v1091_v61, %v1092_v33  ;;  %v736_v46 = vmax.f32 %v726_v38, 0.0  ;;  %v810_v50 = vrot.slane %v796_v41, %v2121_v53  ;;  %v811_v51 = vcombine.high %v803_v42, %v803_v42 }
 0x1c2   : > { %v1087_v44 = vrot.slane %v1086_v36, 1  ;;  %v1100_v45 = vmax.f32 %v1098_v27, %v1099_v37  ;;  %v1106_v8 = vrot.slane %v1105_v6, 2  ;;  %v2261_v52 = vsel %vm521_vm3, %v990_v29, -inf }
 0x1c3   : > { %v1094_v7 = vrot.slane %v1093_v39, 1  ;;  %v998_v54 = vsel %vm913_vm9, %v803_v42, -inf  ;;  %v812_v56 = vcombine.high %v810_v50, %v810_v50  ;;  %v2267_v31 = vsel %vm521_vm3, %v997_v40, -inf }
 0x1c4   : > { %v1088_v49 = vmax.f32 %v1086_v36, %v1087_v44  ;;  %v1101_v48 = vrot.slane %v1100_v45, 1  ;;  %v2264_v14 = vmax.f32 %v1105_v6, %v1106_v8  ;;  %v999_v57 = vrot.slane %v998_v54, 4 }
 0x1c5   : > { %v1095_v55 = vmax.f32 %v1093_v39, %v1094_v7  ;;  %v1005_v11 = vsel %vm913_vm9, %v811_v51, -inf  ;;  %v1012_v58 = vsel %vm913_vm9, %v810_v50, -inf  ;;  %v864_v59 = vcombine.high %v736_v46, %v736_v46 }
 0x1c6   : > { %v1102_v60 = vmax.f32 %v1100_v45, %v1101_v48  ;;  %v2272_v62 = vsel %vm521_vm3, %v1088_v49, -inf  ;;  %v1000_v0 = vmax.f32 %v998_v54, %v999_v57  ;;  %v1006_v47 = vrot.slane %v1005_v11, 4 }
 0x1c7   : > { %v1108_v1 = vrot.slane %v2264_v14, 1  ;;  %v1013_v2 = vrot.slane %v1012_v58, 4  ;;  %v1019_v9 = vsel %vm913_vm9, %v812_v56, -inf  ;;  %v871_v5 = vrot.slane %v736_v46, %v2121_v53 }
 0x1c8   : > { %v2278_v63 = vsel %vm521_vm3, %v1095_v55, -inf  ;;  %v1001_v10 = vrot.slane %v1000_v0, 2  ;;  %v1007_v16 = vmax.f32 %v1005_v11, %v1006_v47  ;;  %v1020_v12 = vrot.slane %v1019_v9, 4 }
 0x1c9   : > { %v1014_v13 = vmax.f32 %v1012_v58, %v1013_v2  ;;  %v878_v3 = vrot.slane %v864_v59, %v2121_v53  ;;  %v879_v18 = vcombine.high %v871_v5, %v871_v5  ;;  %v1110_v4 = vsel %vm913_vm9, %v871_v5, -inf }
 0x1ca   : > { %v2283_v19 = vsel %vm521_vm3, %v1102_v60, -inf  ;;  %v1002_v15 = vmax.f32 %v1000_v0, %v1001_v10  ;;  %v1008_v20 = vrot.slane %v1007_v16, 2  ;;  %v1021_v17 = vmax.f32 %v1019_v9, %v1020_v12 }
 0x1cb   : > { %v1015_v21 = vrot.slane %v1014_v13, 2  ;;  %v880_v22 = vcombine.high %v878_v3, %v878_v3  ;;  %v1111_v23 = vrot.slane %v1110_v4, 4  ;;  %v1117_v24 = vsel %vm913_vm9, %v879_v18, -inf }
 0x1cc   : > { %v1003_v25 = vrot.slane %v1002_v15, 1  ;;  %v1009_v61 = vmax.f32 %v1007_v16, %v1008_v20  ;;  %v1022_v26 = vrot.slane %v1021_v17, 2  ;;  %v1118_v28 = vrot.slane %v1117_v24, 4 }
 0x1cd   : > { %v1016_v29 = vmax.f32 %v1014_v13, %v1015_v21  ;;  %v1112_v30 = vmax.f32 %v1110_v4, %v1111_v23  ;;  %v1124_v27 = vsel %vm913_vm9, %v878_v3, -inf  ;;  %v1131_v33 = vsel %vm913_vm9, %v880_v22, -inf }
 0x1ce   : > { %v1004_v34 = vmax.f32 %v1002_v15, %v1003_v25  ;;  %v1010_v35 = vrot.slane %v1009_v61, 1  ;;  %v1023_v40 = vmax.f32 %v1021_v17, %v1022_v26  ;;  %v1119_v36 = vmax.f32 %v1117_v24, %v1118_v28 }
 0x1cf   : > { %v1017_v37 = vrot.slane %v1016_v29, 1  ;;  %v1113_v38 = vrot.slane %v1112_v30, 2  ;;  %v1125_v39 = vrot.slane %v1124_v27, 4  ;;  %v1132_v6 = vrot.slane %v1131_v33, 4 }
 0x1d0   : > { %v1011_v41 = vmax.f32 %v1009_v61, %v1010_v35  ;;  %v1024_v42 = vrot.slane %v1023_v40, 1  ;;  %v1151_v44 = vsel %vm521_vm3, %v1004_v34, -inf  ;;  %v1120_v45 = vrot.slane %v1119_v36, 2 }
 0x1d1   : > { %v1018_v46 = vmax.f32 %v1016_v29, %v1017_v37  ;;  %v1152_v7 = vmax.f32 %v2251_v32, %v1151_v44  ;;  %v1114_v8 = vmax.f32 %v1112_v30, %v1113_v38  ;;  %v1126_v50 = vmax.f32 %v1124_v27, %v1125_v39 }
 0x1d2   : > { %v1025_v51 = vmax.f32 %v1023_v40, %v1024_v42  ;;  %v1154_v49 = vsel %vm521_vm3, %v1011_v41, -inf  ;;  %v1121_v48 = vmax.f32 %v1119_v36, %v1120_v45  ;;  %v1133_v54 = vmax.f32 %v1131_v33, %v1132_v6 }
 0x1d3   : > { %v1155_v55 = vmax.f32 %v2257_v43, %v1154_v49  ;;  %v1157_v56 = vsel %vm521_vm3, %v1018_v46, -inf  ;;  %v1190_v57 = vpack.c.bf16 %v1152_v7, %v1152_v7  ;;  %v1115_v11 = vrot.slane %v1114_v8, 1 }
 0x1d4   : > { %v1158_v58 = vmax.f32 %v2261_v52, %v1157_v56  ;;  %v1160_v59 = vsel %vm521_vm3, %v1025_v51, -inf  ;;  %v1122_v60 = vrot.slane %v1121_v48, 1  ;;  %v1127_v0 = vrot.slane %v1126_v50, 2 }
 0x1d5   : > { %v1161_v32 = vmax.f32 %v2267_v31, %v1160_v59  ;;  %v1191_v47 = vpack.c.bf16 %v1155_v55, %v1155_v55  ;;  %v1252_v2 = vrot.slane %v1190_v57, %v2121_v53  ;;  %v1116_v9 = vmax.f32 %v1114_v8, %v1115_v11 }
 0x1d6   : > { %v1192_v5 = vpack.c.bf16 %v1158_v58, %v1158_v58  ;;  %v1123_v10 = vmax.f32 %v1121_v48, %v1122_v60  ;;  %v1128_v16 = vmax.f32 %v1126_v50, %v1127_v0  ;;  %v1134_v43 = vrot.slane %v1133_v54, 2 }
 0x1d7   : > { %v1193_v12 = vpack.c.bf16 %v1161_v32, %v1161_v32  ;;  %v1259_v13 = vrot.slane %v1191_v47, %v2121_v53  ;;  %v1364_v3 = vrot.slane %v1252_v2, %v2121_v53  ;;  %v1175_v52 = vsel %vm521_vm3, %v1116_v9, -inf }
 0x1d8   : > { %v1266_v18 = vrot.slane %v1192_v5, %v2121_v53  ;;  %v1129_v4 = vrot.slane %v1128_v16, 1  ;;  %v1135_v15 = vmax.f32 %v1133_v54, %v1134_v43  ;;  %v1176_v31 = vmax.f32 %v2272_v62, %v1175_v52 }
 0x1d9   : > { %v1109_v20 = vmax.f32 %v2264_v14, %v1108_v1  ;;  %v1273_v17 = vrot.slane %v1193_v12, %v2121_v53  ;;  %v1371_v21 = vrot.slane %v1259_v13, %v2121_v53  ;;  %v1178_v22 = vsel %vm521_vm3, %v1123_v10, -inf }
 0x1da   : > { %v1378_v23 = vrot.slane %v1266_v18, %v2121_v53  ;;  %v1130_v24 = vmax.f32 %v1128_v16, %v1129_v4  ;;  %v1136_v25 = vrot.slane %v1135_v15, 1  ;;  %v1179_v61 = vmax.f32 %v2278_v63, %v1178_v22 }
 0x1db   : > { %v1385_v26 = vrot.slane %v1273_v17, %v2121_v53  ;;  %v1446_v28 = vunpack.c.l.b16 %v1364_v3  ;;  %v1447_v62 = vunpack.c.l.b16 %v1371_v21  ;;  %v1198_v29 = vpack.c.bf16 %v1176_v31, %v1176_v31 }
 0x1dc   : > { %v1448_v30 = vunpack.c.l.b16 %v1378_v23  ;;  %v1137_v27 = vmax.f32 %v1135_v15, %v1136_v25  ;;  %v1181_v14 = vsel %vm521_vm3, %v1130_v24, -inf  ;;  %v1199_v1 = vpack.c.bf16 %v1179_v61, %v1179_v61 }
 0x1dd   : > { %v1449_v33 = vunpack.c.l.b16 %v1385_v26  ;;  %v1467_v34 = vrot.slane %v1447_v62, 7  ;;  %v1182_v35 = vmax.f32 %v2283_v19, %v1181_v14  ;;  %v1308_v40 = vrot.slane %v1198_v29, %v2121_v53 }
 0x1de   : > { %v1183_v36 = vsel %vm521_vm3, %v1109_v20, -inf  ;;  %v1469_v37 = vrot.slane %v1448_v30, 6  ;;  %v1184_v63 = vsel %vm521_vm3, %v1137_v27, -inf  ;;  %v1315_v38 = vrot.slane %v1199_v1, %v2121_v53 }
 0x1df   : > { %v1468_v39 = vsel %vm1459_vm10, %v1467_v34, %v1446_v28  ;;  %v1471_v6 = vrot.slane %v1449_v33, 5  ;;  %v1185_v41 = vmax.f32 %v1183_v36, %v1184_v63  ;;  %v1200_v42 = vpack.c.bf16 %v1182_v35, %v1182_v35 }
 0x1e0   : > { %v1470_v44 = vsel %vm1462_vm11, %v1469_v37, %v1468_v39  ;;  %v1420_v45 = vrot.slane %v1308_v40, %v2121_v53  ;;  %v1427_v19 = vrot.slane %v1315_v38, %v2121_v53 }
 0x1e1   : > { %v1472_v46 = vsel %vm1465_vm12, %v1471_v6, %v1470_v44  ;;  %v1201_v7 = vpack.c.bf16 %v1185_v41, %v1185_v41  ;;  %v1322_v8 = vrot.slane %v1200_v42, %v2121_v53 }
 0x1e2   : > { %v1486_v50 = vpack.c.b16 %v1472_v46, %v1472_v46  ;;  %v1455_v51 = vunpack.c.l.b16 %v1427_v19  ;;  %v1454_v55 = vunpack.c.l.b16 %v1420_v45 }
 0x1e3   : > { %v1329_v49 = vrot.slane %v1201_v7, %v2121_v53  ;;  %v1434_v48 = vrot.slane %v1322_v8, %v2121_v53 }
 0x1e4   : > { %v1502_v54 = vrot.slane %v1486_v50, %v2121_v53  ;;  %v1479_v56 = vrot.slane %v1455_v51, 7 }
 0x1e5   : > { %v1441_v57 = vrot.slane %v1329_v49, %v2121_v53  ;;  %v1456_v11 = vunpack.c.l.b16 %v1434_v48 }
 0x1e6   : > { %1522 = vst.msk [vmem:[%s2227_s13 + $0x2] sm:$0x3] %vm913_vm9, %v1502_v54  ;;  %v1480_v58 = vsel %vm1459_vm10, %v1479_v56, %v1454_v55 }
 0x1e7   : > { %v1457_v59 = vunpack.c.l.b16 %v1441_v57  ;;  %v1481_v60 = vrot.slane %v1456_v11, 6 }
 0x1e9   : > { %v1482_v0 = vsel %vm1462_vm11, %v1481_v60, %v1480_v58  ;;  %v1483_v32 = vrot.slane %v1457_v59, 5 }
 0x1eb   : > { %v1484_v47 = vsel %vm1465_vm12, %v1483_v32, %v1482_v0 }
 0x1ec   : > { %v1488_v2 = vpack.c.b16 %v1484_v47, %v1484_v47 }
 0x1ee   : > { %v1516_v9 = vrot.slane %v1488_v2, %v2121_v53 }
 0x1f0   : > { %1524 = vst.msk [vmem:[%s2227_s13 + $0x6] sm:$0x3] %vm913_vm9, %v1516_v9 }
 0x1f1 PF: > { %s13_s12 = sadd.s32 1, %s1811_s12  }
 0x1f2   : > { %p10_p4 = scmp.ge.s32.totalorder %s13_s12, 4  }
 0x1f4   :  { %12 = sbr.rel (!%p10_p4) target bundleno = 1 (0x1), region = 65 }

// kernel: skin_disease_cnn_forward.5
= control target key start
LH: loop header
LB: loop body
LE: loop exit
PB: predicated region body
PF: predicated region fallthrough
CT: control target
= control target key end

     0   :  { %10 = vsyncpa [#allocation4], 0  ;;  %s1602_s18 = smov 0   ;;  %s1840_s0 = inlined_call_operand.vmem [shape: bf16[2,512], index: 0, kind: input, shape index: {}]   ;;  %s1841_s1 = inlined_call_operand.vmem [shape: bf16[512,512], index: 1, kind: input, shape index: {}]   ;;  %s1842_s2 = inlined_call_operand.vmem [shape: f32[1,512], index: 2, kind: input, shape index: {}]   ;;  %s1843_s3 = inlined_call_operand.vmem [shape: bf16[512,5], index: 3, kind: input, shape index: {}]   ;;  %s1844_s4 = inlined_call_operand.vmem [shape: f32[1,5], index: 4, kind: input, shape index: {}]   ;;  %s1845_s5 = inlined_call_operand.hbm [shape: f32[2,5], index: 5, kind: output, shape index: {}]  }
   0x1 LB: > { %s1608_s19 = sadd.s32 4294967295, %s1566_s18   ;;  %p1230_p0 = scmp.ge.s32.totalorder %s1566_s18, 1  ;;  %s1566_s18 = sphi %s1602_s18, %s16_s18  }
   0x2   : > { %p195_p1 = scmp.lt.s32.totalorder %s1566_s18, 3 }
   0x4   : > { %p196_p2 = pnand %p1230_p0, %p195_p1 }
   0x5   : > { %s1231_s20 = sshll.u32 (!%p196_p2), %s1608_s19, 1  ;;  %s1232_s21 = sshll.u32 (!%p196_p2), %s1608_s19, 5 }
   0x6   : > { %199 = sbr.rel (%p196_p2) target bundleno = 572 (0x23c), region = 40  ;;  %p224_p3 = scmp.lt.s32.totalorder (!%p196_p2), %s1231_s20, 3 }
   0x7   : > { %p229_p4 = scmp.lt.s32.totalorder (!%p196_p2), %s1232_s21, 63  ;;  %p1235_p5 = scmp.ne.s32.totalorder (!%p196_p2), %s1608_s19, 0 }
   0xd   : > { %s1847_s20 = smov (!%p224_p3, %s1231_s20), 3  ;;  %s1849_s21 = smov (!%p229_p4, %s1232_s21), 63 }
   0xe   : > { %s226_s24 = scalar_lea.vmem %s1840_s0, %s1847_s20  ;;  %s1339_s25 = sshll.u32 %s1849_s21, 4  ;;  %v1568_v0 = vmov (!%p1235_p5), 0.0  }
   0xf   : > { %s1623_s28 = scalar_lea.vmem %s1841_s1, %s1339_s25  ;;  %239 = sbr.rel (%p1235_p5) target bundleno = 22 (0x16), region = 44  ;;  %240 = vst [vmem:[#allocation2] sm:$0xff] (!%p1235_p5), %v1568_v0 }
  0x16 PF: > { %v1402_v1 = vld [vmem:[%s1623_s28 + $0x4] ss:$16 sps:$4 sm:$0xff]   ;;  %v1404_v2 = vld [vmem:[%s1623_s28 + $0xc] ss:$16 sps:$4 sm:$0xff]   ;;  %v1406_v3 = vld [vmem:[%s1623_s28] ss:$16 sps:$4 sm:$0xff]   ;;  %v319_v41 = vlaneseq }
  0x17   : > { %652 = vmatprep.subr.bf16.mxu0 %v1402_v1  ;;  %v1407_v4 = vld [vmem:[%s1623_s28 + $0x8] ss:$16 sps:$4 sm:$0xff]   ;;  %693 = vmatprep.subr.bf16.mxu1 %v1404_v2  ;;  %v1408_v5 = vld [vmem:[%s1623_s28 + $0x24] ss:$16 sps:$4 sm:$0xff]   ;;  %v1410_v6 = vld [vmem:[%s1623_s28 + $0x2c] ss:$16 sps:$4 sm:$0xff]  }
  0x18   : > { %653 = vmatpush1.bf16.msra.mxu0 %v1406_v3  ;;  %694 = vmatpush1.bf16.msra.mxu1 %v1407_v4  ;;  %v1412_v7 = vld [vmem:[%s1623_s28 + $0x20] ss:$16 sps:$4 sm:$0xff]   ;;  %v1413_v8 = vld [vmem:[%s1623_s28 + $0x28] ss:$16 sps:$4 sm:$0xff]   ;;  %v1414_v9 = vld [vmem:[%s1623_s28 + $0x44] ss:$16 sps:$4 sm:$0xff]  }
  0x19   : > { %654 = vmatprep.subr.bf16.mxu0 %v1408_v5  ;;  %695 = vmatprep.subr.bf16.mxu1 %v1410_v6  ;;  %v1416_v10 = vld [vmem:[%s1623_s28 + $0x4c] ss:$16 sps:$4 sm:$0xff]   ;;  %v1418_v11 = vld [vmem:[%s1623_s28 + $0x40] ss:$16 sps:$4 sm:$0xff]   ;;  %v1419_v12 = vld [vmem:[%s1623_s28 + $0x48] ss:$16 sps:$4 sm:$0xff]  }
  0x1a   : > { %v1420_v13 = vld [vmem:[%s1623_s28 + $0x64] ss:$16 sps:$4 sm:$0xff]   ;;  %v1422_v14 = vld [vmem:[%s1623_s28 + $0x6c] ss:$16 sps:$4 sm:$0xff]   ;;  %v1424_v15 = vld [vmem:[%s1623_s28 + $0x60] ss:$16 sps:$4 sm:$0xff]  }
  0x1b   : > { %v1425_v16 = vld [vmem:[%s1623_s28 + $0x68] ss:$16 sps:$4 sm:$0xff]   ;;  %v1426_v17 = vld [vmem:[%s1623_s28 + $0x84] ss:$16 sps:$4 sm:$0xff]   ;;  %v1428_v18 = vld [vmem:[%s1623_s28 + $0x8c] ss:$16 sps:$4 sm:$0xff]  }
  0x1c   : > { %655 = vmatpush1.bf16.msra.mxu0 %v1412_v7  ;;  %696 = vmatpush1.bf16.msra.mxu1 %v1413_v8  ;;  %v1430_v19 = vld [vmem:[%s1623_s28 + $0x80] ss:$16 sps:$4 sm:$0xff]   ;;  %v1431_v20 = vld [vmem:[%s1623_s28 + $0x88] ss:$16 sps:$4 sm:$0xff]   ;;  %v1432_v21 = vld [vmem:[%s1623_s28 + $0xa4] ss:$16 sps:$4 sm:$0xff]  }
  0x1d   : > { %656 = vmatprep.subr.bf16.mxu0 %v1414_v9  ;;  %697 = vmatprep.subr.bf16.mxu1 %v1416_v10  ;;  %v1434_v22 = vld [vmem:[%s1623_s28 + $0xac] ss:$16 sps:$4 sm:$0xff]   ;;  %v1436_v23 = vld [vmem:[%s1623_s28 + $0xa0] ss:$16 sps:$4 sm:$0xff]   ;;  %v1437_v24 = vld [vmem:[%s1623_s28 + $0xa8] ss:$16 sps:$4 sm:$0xff]  }
  0x1e   : > { %v1438_v25 = vld [vmem:[%s1623_s28 + $0xc4] ss:$16 sps:$4 sm:$0xff]   ;;  %v1440_v26 = vld [vmem:[%s1623_s28 + $0xcc] ss:$16 sps:$4 sm:$0xff]   ;;  %v1442_v27 = vld [vmem:[%s1623_s28 + $0xc0] ss:$16 sps:$4 sm:$0xff]  }
  0x1f   : > { %v1443_v28 = vld [vmem:[%s1623_s28 + $0xc8] ss:$16 sps:$4 sm:$0xff]   ;;  %v1444_v29 = vld [vmem:[%s1623_s28 + $0xe4] ss:$16 sps:$4 sm:$0xff]   ;;  %v1446_v30 = vld [vmem:[%s1623_s28 + $0xec] ss:$16 sps:$4 sm:$0xff]  }
  0x20   : > { %657 = vmatpush1.bf16.msra.mxu0 %v1418_v11  ;;  %698 = vmatpush1.bf16.msra.mxu1 %v1419_v12  ;;  %v1448_v31 = vld [vmem:[%s1623_s28 + $0xe0] ss:$16 sps:$4 sm:$0xff]   ;;  %v1449_v32 = vld [vmem:[%s1623_s28 + $0xe8] ss:$16 sps:$4 sm:$0xff]   ;;  %v1450_v33 = vld [vmem:[%s1623_s28 + $0x104] ss:$16 sps:$4 sm:$0xff]  }
  0x21   : > { %658 = vmatprep.subr.bf16.mxu0 %v1420_v13  ;;  %699 = vmatprep.subr.bf16.mxu1 %v1422_v14  ;;  %v1452_v34 = vld [vmem:[%s1623_s28 + $0x10c] ss:$16 sps:$4 sm:$0xff]   ;;  %v1454_v35 = vld [vmem:[%s1623_s28 + $0x100] ss:$16 sps:$4 sm:$0xff]   ;;  %v1455_v36 = vld [vmem:[%s1623_s28 + $0x108] ss:$16 sps:$4 sm:$0xff]  }
  0x22   : > { %v1456_v37 = vld [vmem:[%s1623_s28 + $0x124] ss:$16 sps:$4 sm:$0xff]   ;;  %v1458_v38 = vld [vmem:[%s1623_s28 + $0x12c] ss:$16 sps:$4 sm:$0xff]   ;;  %v1569_v39 = vmov 1966171168  }
  0x23   : > { %v317_v40 = vunpack.c.l.s4 %v1569_v39  ;;  %v1460_v42 = vld [vmem:[%s1623_s28 + $0x120] ss:$16 sps:$4 sm:$0xff]   ;;  %v1461_v43 = vld [vmem:[%s1623_s28 + $0x128] ss:$16 sps:$4 sm:$0xff]   ;;  %v1462_v44 = vld [vmem:[%s1623_s28 + $0x144] ss:$16 sps:$4 sm:$0xff]  }
  0x24   : > { %659 = vmatpush1.bf16.msra.mxu0 %v1424_v15  ;;  %700 = vmatpush1.bf16.msra.mxu1 %v1425_v16  ;;  %v1464_v45 = vld [vmem:[%s1623_s28 + $0x14c] ss:$16 sps:$4 sm:$0xff]   ;;  %v1668_v47 = vshrl.u32 %v319_v41, 7  ;;  %v1466_v48 = vld [vmem:[%s1623_s28 + $0x140] ss:$16 sps:$4 sm:$0xff]   ;;  %p1301_p6 = scmp.ne.s32.totalorder %s1608_s19, 1 }
  0x25   : > { %660 = vmatprep.subr.bf16.mxu0 %v1426_v17  ;;  %701 = vmatprep.subr.bf16.mxu1 %v1428_v18  ;;  %v318_v46 = vunpack.c.0.s8 %v317_v40  ;;  %v1467_v49 = vld [vmem:[%s1623_s28 + $0x148] ss:$16 sps:$4 sm:$0xff]   ;;  %v1468_v50 = vld [vmem:[%s1623_s28 + $0x164] ss:$16 sps:$4 sm:$0xff]   ;;  %v1470_v51 = vld [vmem:[%s1623_s28 + $0x16c] ss:$16 sps:$4 sm:$0xff]  }
  0x26   : > { %v1236_v53 = vld.sshfl [vmem:[%s226_s24] sm:$0x11 pattern:$0x75316420]  ;;  %v1473_v55 = vld [vmem:[%s1623_s28 + $0x168] ss:$16 sps:$4 sm:$0xff]  }
  0x27   : > { %v321_v52 = vsub.s32 %v318_v46, %v1668_v47  ;;  %v1472_v54 = vld [vmem:[%s1623_s28 + $0x160] ss:$16 sps:$4 sm:$0xff]   ;;  %v315_v56 = vcombine.high %v1236_v53, %v1236_v53  ;;  %v1474_v57 = vld [vmem:[%s1623_s28 + $0x184] ss:$16 sps:$4 sm:$0xff]   ;;  %v1476_v58 = vld [vmem:[%s1623_s28 + $0x18c] ss:$16 sps:$4 sm:$0xff]  }
  0x28   : > { %661 = vmatpush1.bf16.msra.mxu0 %v1430_v19  ;;  %702 = vmatpush1.bf16.msra.mxu1 %v1431_v20  ;;  %v1478_v60 = vld [vmem:[%s1623_s28 + $0x180] ss:$16 sps:$4 sm:$0xff]   ;;  %v1479_v61 = vld [vmem:[%s1623_s28 + $0x188] ss:$16 sps:$4 sm:$0xff]   ;;  %v1480_v62 = vld [vmem:[%s1623_s28 + $0x1a4] ss:$16 sps:$4 sm:$0xff]  }
  0x29   : > { %662 = vmatprep.subr.bf16.mxu0 %v1432_v21  ;;  %703 = vmatprep.subr.bf16.mxu1 %v1434_v22  ;;  %v329_v59 = vrot.slane %v315_v56, %v321_v52  ;;  %v1482_v63 = vld [vmem:[%s1623_s28 + $0x1ac] ss:$16 sps:$4 sm:$0xff]   ;;  %v1484_v0 = vld [vmem:[%s1623_s28 + $0x1a0] ss:$16 sps:$4 sm:$0xff]   ;;  %v1485_v1 = vld [vmem:[%s1623_s28 + $0x1a8] ss:$16 sps:$4 sm:$0xff]   ;;  %v322_v10 = vrot.slane %v1236_v53, %v321_v52 }
  0x2a   : > { %v1486_v2 = vld [vmem:[%s1623_s28 + $0x1c4] ss:$16 sps:$4 sm:$0xff]   ;;  %v1488_v3 = vld [vmem:[%s1623_s28 + $0x1cc] ss:$16 sps:$4 sm:$0xff]   ;;  %v1490_v4 = vld [vmem:[%s1623_s28 + $0x1c0] ss:$16 sps:$4 sm:$0xff]  }
  0x2b   : > { %684 = vmatprep.mubr.bf16.mxu0 %v329_v59  ;;  %725 = vmatprep.mubr.bf16.mxu1 %v329_v59  ;;  %v1491_v5 = vld [vmem:[%s1623_s28 + $0x1c8] ss:$16 sps:$4 sm:$0xff]   ;;  %v1492_v6 = vld [vmem:[%s1623_s28 + $0x1e4] ss:$16 sps:$4 sm:$0xff]   ;;  %v1494_v7 = vld [vmem:[%s1623_s28 + $0x1ec] ss:$16 sps:$4 sm:$0xff]  }
  0x2c   : > { %663 = vmatpush1.bf16.msra.mxu0 %v1436_v23  ;;  %704 = vmatpush1.bf16.msra.mxu1 %v1437_v24  ;;  %v1496_v8 = vld [vmem:[%s1623_s28 + $0x1e0] ss:$16 sps:$4 sm:$0xff]   ;;  %v1497_v9 = vld [vmem:[%s1623_s28 + $0x1e8] ss:$16 sps:$4 sm:$0xff]   ;;  %v1570_v11 = vmov 1983009808  }
  0x2d   : > { %664 = vmatprep.subr.bf16.mxu0 %v1438_v25  ;;  %705 = vmatprep.subr.bf16.mxu1 %v1440_v26  ;;  %v741_v12 = vunpack.c.l.s4 %v1570_v11  ;;  %v1507_v39 = vld [vmem:[%s1843_s3 + $0xd0] sm:$0xff] (!%p1301_p6)   ;;  %v1514_v46 = vld [vmem:[%s1843_s3 + $0x60] sm:$0xff] (!%p1301_p6)   ;;  %v1519_v52 = vld [vmem:[%s1843_s3 + $0xe8] sm:$0xff] (!%p1301_p6)   ;;  %vm1170_vm0 = vcmask (!%p1301_p6), 33792  }
  0x2e   : > { %v1508_v40 = vld [vmem:[%s1843_s3 + $0x10] sm:$0xff] (!%p1301_p6)   ;;  %v1520_v53 = vld [vmem:[%s1843_s3 + $0x28] sm:$0xff] (!%p1301_p6)  }
  0x2f   : > { %v742_v13 = vunpack.c.0.s8 %v741_v12  ;;  %v1509_v41 = vld [vmem:[%s1843_s3 + $0x90] sm:$0xff] (!%p1301_p6)  }
  0x30   : > { %665 = vmatpush1.bf16.msra.mxu0 %v1442_v27  ;;  %706 = vmatpush1.bf16.msra.mxu1 %v1443_v28  ;;  %v241_v27 = vld [vmem:[#allocation2] sm:$0xff]  ;;  %v1523_v56 = vld [vmem:[%s1843_s3 + $0xf0] sm:$0xff] (!%p1301_p6)  }
  0x31   : > { %666 = vmatprep.subr.bf16.mxu0 %v1444_v29  ;;  %707 = vmatprep.subr.bf16.mxu1 %v1446_v30  ;;  %v1699_v16 = vsub.s32 %v742_v13, %v1668_v47  ;;  %v1498_v30 = vld [vmem:[%s1843_s3 + $0x40] sm:$0xff] (!%p1301_p6)   ;;  %v1525_v59 = vld [vmem:[%s1843_s3 + $0xb0] sm:$0xff] (!%p1301_p6)  }
  0x34   : > { %667 = vmatpush1.bf16.msra.mxu0 %v1448_v31  ;;  %708 = vmatpush1.bf16.msra.mxu1 %v1449_v32  ;;  %v1499_v31 = vld [vmem:[%s1843_s3 + $0xc0] sm:$0xff] (!%p1301_p6)  }
  0x35   : > { %668 = vmatprep.subr.bf16.mxu0 %v1450_v33  ;;  %709 = vmatprep.subr.bf16.mxu1 %v1452_v34  ;;  %v1500_v32 = vld [vmem:[%s1843_s3] sm:$0xff] (!%p1301_p6)   ;;  %v1502_v34 = vld [vmem:[%s1843_s3 + $0x48] sm:$0xff] (!%p1301_p6)  }
  0x36   : > { %v1501_v33 = vld [vmem:[%s1843_s3 + $0x80] sm:$0xff] (!%p1301_p6)  }
  0x38   : > { %669 = vmatpush1.bf16.msra.mxu0 %v1454_v35  ;;  %710 = vmatpush1.bf16.msra.mxu1 %v1455_v36  ;;  %v1503_v35 = vld [vmem:[%s1843_s3 + $0xc8] sm:$0xff] (!%p1301_p6)  }
  0x39   : > { %670 = vmatprep.subr.bf16.mxu0 %v1456_v37  ;;  %711 = vmatprep.subr.bf16.mxu1 %v1458_v38  ;;  %v1504_v36 = vld [vmem:[%s1843_s3 + $0x8] sm:$0xff] (!%p1301_p6)   ;;  %v1506_v38 = vld [vmem:[%s1843_s3 + $0x50] sm:$0xff] (!%p1301_p6)  }
  0x3a   : > { %v1505_v37 = vld [vmem:[%s1843_s3 + $0x88] sm:$0xff] (!%p1301_p6)  }
  0x3c   : > { %671 = vmatpush1.bf16.msra.mxu0 %v1460_v42  ;;  %712 = vmatpush1.bf16.msra.mxu1 %v1461_v43  ;;  %v1510_v42 = vld [vmem:[%s1843_s3 + $0x58] sm:$0xff] (!%p1301_p6)  }
  0x3d   : > { %672 = vmatprep.subr.bf16.mxu0 %v1462_v44  ;;  %713 = vmatprep.subr.bf16.mxu1 %v1464_v45  ;;  %v1511_v43 = vld [vmem:[%s1843_s3 + $0xd8] sm:$0xff] (!%p1301_p6)  }
  0x3e   : > { %v1512_v44 = vld [vmem:[%s1843_s3 + $0x18] sm:$0xff] (!%p1301_p6)  }
  0x3f   : > { %v1513_v45 = vld [vmem:[%s1843_s3 + $0x98] sm:$0xff] (!%p1301_p6)  }
  0x40   : > { %673 = vmatpush1.bf16.msra.mxu0 %v1466_v48  ;;  %714 = vmatpush1.bf16.msra.mxu1 %v1467_v49  ;;  %v1515_v48 = vld [vmem:[%s1843_s3 + $0xe0] sm:$0xff] (!%p1301_p6)  }
  0x41   : > { %674 = vmatprep.subr.bf16.mxu0 %v1468_v50  ;;  %715 = vmatprep.subr.bf16.mxu1 %v1470_v51  ;;  %v1516_v49 = vld [vmem:[%s1843_s3 + $0x20] sm:$0xff] (!%p1301_p6)   ;;  %v1518_v51 = vld [vmem:[%s1843_s3 + $0x68] sm:$0xff] (!%p1301_p6)  }
  0x42   : > { %v1517_v50 = vld [vmem:[%s1843_s3 + $0xa0] sm:$0xff] (!%p1301_p6)  }
  0x44   : > { %675 = vmatpush1.bf16.msra.mxu0 %v1472_v54  ;;  %716 = vmatpush1.bf16.msra.mxu1 %v1473_v55  ;;  %v1521_v54 = vld [vmem:[%s1843_s3 + $0xa8] sm:$0xff] (!%p1301_p6)   ;;  %v1522_v55 = vld [vmem:[%s1843_s3 + $0x70] sm:$0xff] (!%p1301_p6)  }
  0x45   : > { %676 = vmatprep.subr.bf16.mxu0 %v1474_v57  ;;  %717 = vmatprep.subr.bf16.mxu1 %v1476_v58  ;;  %v1524_v57 = vld [vmem:[%s1843_s3 + $0x30] sm:$0xff] (!%p1301_p6)   ;;  %v767_v58 = vsub.s32 (!%p1301_p6), 0, %v1668_v47 }
  0x48   : > { %677 = vmatpush1.bf16.msra.mxu0 %v1478_v60  ;;  %718 = vmatpush1.bf16.msra.mxu1 %v1479_v61  ;;  %v771_v60 = vsub.s32 (!%p1301_p6), 1, %v1668_v47  ;;  %v1526_v61 = vld [vmem:[%s1843_s3 + $0x78] sm:$0xff] (!%p1301_p6)  }
  0x49   : > { %678 = vmatprep.subr.bf16.mxu0 %v1480_v62  ;;  %719 = vmatprep.subr.bf16.mxu1 %v1482_v63  ;;  %v775_v62 = vsub.s32 (!%p1301_p6), 2, %v1668_v47  ;;  %v1527_v63 = vld [vmem:[%s1843_s3 + $0xf8] sm:$0xff] (!%p1301_p6)  }
  0x4c   : > { %679 = vmatpush1.bf16.msra.mxu0 %v1484_v0  ;;  %720 = vmatpush1.bf16.msra.mxu1 %v1485_v1  ;;  %v779_v0 = vsub.s32 (!%p1301_p6), 3, %v1668_v47  ;;  %v1528_v1 = vld [vmem:[%s1843_s3 + $0x38] sm:$0xff] (!%p1301_p6)  }
  0x4d   : > { %680 = vmatprep.subr.bf16.mxu0 %v1486_v2  ;;  %721 = vmatprep.subr.bf16.mxu1 %v1488_v3  ;;  %v1529_v2 = vld [vmem:[%s1843_s3 + $0xb8] sm:$0xff] (!%p1301_p6)   ;;  %v763_v3 = vld [vmem:[%s1842_s2] sm:$0xf] (!%p1301_p6) }
  0x4e   : > { %v780_v47 = vrot.slane (!%p1301_p6), %v763_v3, %v779_v0 }
  0x50   : > { %681 = vmatpush1.bf16.msra.mxu0 %v1490_v4  ;;  %722 = vmatpush1.bf16.msra.mxu1 %v1491_v5  ;;  %v768_v4 = vrot.slane (!%p1301_p6), %v763_v3, %v767_v58  ;;  %v772_v5 = vrot.slane (!%p1301_p6), %v763_v3, %v771_v60 }
  0x51   : > { %682 = vmatprep.subr.bf16.mxu0 %v1492_v6  ;;  %723 = vmatprep.subr.bf16.mxu1 %v1494_v7  ;;  %v776_v6 = vrot.slane (!%p1301_p6), %v763_v3, %v775_v62 }
  0x52   : > { %v781_v7 = vcombine.low (!%p1301_p6), %v768_v4, %v772_v5 }
  0x54   : > { %683 = vmatpush1.bf16.msra.mxu0 %v1496_v8  ;;  %724 = vmatpush1.bf16.msra.mxu1 %v1497_v9  ;;  %v782_v8 = vcombine.low (!%p1301_p6), %v776_v6, %v780_v47  ;;  %v789_v9 = vrot.slane (!%p1301_p6), %v781_v7, %v1699_v16 }
  0x55   : > { %1340 = vmatprep.subr.bf16.mxu0 (!%p1301_p6), %v1498_v30  ;;  %1362 = vmatprep.subr.bf16.mxu1 (!%p1301_p6), %v1499_v31 }
  0x57   : > { %685 = vmatmul.mubr.bf16.vlgmr.msra.gmra.mrb[0].mxu0 %v322_v10  ;;  %726 = vmatmul.mubr.bf16.vlgmr.msra.gmra.mrb[0].mxu1 %v322_v10  ;;  %v796_v10 = vrot.slane (!%p1301_p6), %v782_v8, %v1699_v16 }
  0x58   : > { %1341 = vmatpush3.bf16.msra.mxu0 (!%p1301_p6), %v1500_v32  ;;  %1363 = vmatpush3.bf16.msra.mxu1 (!%p1301_p6), %v1501_v33 }
  0x59   : > { %1342 = vmatprep.subr.bf16.mxu0 (!%p1301_p6), %v1502_v34  ;;  %1364 = vmatprep.subr.bf16.mxu1 (!%p1301_p6), %v1503_v35  ;;  %v797_v12 = vcombine.low (!%p1301_p6), %v789_v9, %v796_v10 }
  0x5c   : > { %1343 = vmatpush3.bf16.msra.mxu0 (!%p1301_p6), %v1504_v36  ;;  %1365 = vmatpush3.bf16.msra.mxu1 (!%p1301_p6), %v1505_v37 }
  0x5d   : > { %1344 = vmatprep.subr.bf16.mxu0 (!%p1301_p6), %v1506_v38  ;;  %1366 = vmatprep.subr.bf16.mxu1 (!%p1301_p6), %v1507_v39 }
  0x60   : > { %1345 = vmatpush3.bf16.msra.mxu0 (!%p1301_p6), %v1508_v40  ;;  %1367 = vmatpush3.bf16.msra.mxu1 (!%p1301_p6), %v1509_v41 }
  0x61   : > { %1346 = vmatprep.subr.bf16.mxu0 (!%p1301_p6), %v1510_v42  ;;  %1368 = vmatprep.subr.bf16.mxu1 (!%p1301_p6), %v1511_v43 }
  0x64   : > { %1347 = vmatpush3.bf16.msra.mxu0 (!%p1301_p6), %v1512_v44  ;;  %1369 = vmatpush3.bf16.msra.mxu1 (!%p1301_p6), %v1513_v45 }
  0x65   : > { %1348 = vmatprep.subr.bf16.mxu0 (!%p1301_p6), %v1514_v46  ;;  %1370 = vmatprep.subr.bf16.mxu1 (!%p1301_p6), %v1515_v48 }
  0x68   : > { %1349 = vmatpush3.bf16.msra.mxu0 (!%p1301_p6), %v1516_v49  ;;  %1371 = vmatpush3.bf16.msra.mxu1 (!%p1301_p6), %v1517_v50 }
  0x69   : > { %1350 = vmatprep.subr.bf16.mxu0 (!%p1301_p6), %v1518_v51  ;;  %1372 = vmatprep.subr.bf16.mxu1 (!%p1301_p6), %v1519_v52 }
  0x6c   : > { %1351 = vmatpush3.bf16.msra.mxu0 (!%p1301_p6), %v1520_v53  ;;  %1373 = vmatpush3.bf16.msra.mxu1 (!%p1301_p6), %v1521_v54 }
  0x6d   : > { %1352 = vmatprep.subr.bf16.mxu0 (!%p1301_p6), %v1522_v55  ;;  %1374 = vmatprep.subr.bf16.mxu1 (!%p1301_p6), %v1523_v56 }
  0x70   : > { %1353 = vmatpush3.bf16.msra.mxu0 (!%p1301_p6), %v1524_v57  ;;  %1375 = vmatpush3.bf16.msra.mxu1 (!%p1301_p6), %v1525_v59 }
  0x71   : > { %1354 = vmatprep.subr.bf16.mxu0 (!%p1301_p6), %v1526_v61  ;;  %1376 = vmatprep.subr.bf16.mxu1 (!%p1301_p6), %v1527_v63 }
  0x74   : > { %1355 = vmatpush3.bf16.msra.mxu0 (!%p1301_p6), %v1528_v1  ;;  %1377 = vmatpush3.bf16.msra.mxu1 (!%p1301_p6), %v1529_v2 }
 0x12a   : > { %v686_v14 = vpop.f32.mrb[0].mxu0  ;;  %v727_v15 = vpop.f32.mrb[0].mxu1 }
 0x12b   : > { %v688_v17 = vpop.f32.mrb[1].mxu0  ;;  %v729_v18 = vpop.f32.mrb[1].mxu1 }
 0x12c   : > { %v738_v19 = vcombine.low %v686_v14, %v688_v17  ;;  %v739_v20 = vcombine.low %v727_v15, %v729_v18  ;;  %v690_v21 = vpop.f32.mrb[2].mxu0  ;;  %v731_v22 = vpop.f32.mrb[2].mxu1 }
 0x12d   : > { %v691_v23 = vpop.f32.mrb[3].mxu0  ;;  %v732_v24 = vpop.f32.mrb[3].mxu1 }
 0x12e   : > { %v746_v25 = vrot.slane %v738_v19, %v1699_v16  ;;  %v753_v26 = vrot.slane %v739_v20, %v1699_v16  ;;  %761 = sbr.rel (%p1301_p6) target bundleno = 547 (0x223), region = 48 }
 0x130   : > { %v754_v28 = vcombine.low %v746_v25, %v753_v26  ;;  %v1302_v26 = vld [vmem:[%s1844_s4] ss:$0 sm:$0xff] (!%p1301_p6) }
 0x132   : > { %v756_v29 = vadd.f32 %v754_v28, %v241_v27 }
 0x134   : > { %757 = vst [vmem:[#allocation2] sm:$0xff] %v756_v29 }
 0x13b   : > { %v762_v11 = vld [vmem:[#allocation2] sm:$0xff] }
 0x13c   : > { %v799_v13 = vadd.f32 %v797_v12, %v762_v11 }
 0x13e   : > { %v800_v14 = vmax.f32 %v799_v13, 0.0 }
 0x140   : > { %v809_v15 = vrot.slane %v800_v14, %v1699_v16  ;;  %v802_v17 = vcombine.high %v800_v14, %v800_v14 }
 0x142   : > { %v817_v18 = vcombine.high %v809_v15, %v809_v15  ;;  %v816_v19 = vrot.slane %v802_v17, %v1699_v16  ;;  %v823_v20 = vpack.c.bf16 %v809_v15, %v809_v15 }
 0x144   : > { %v824_v21 = vpack.c.bf16 %v817_v18, %v817_v18  ;;  %v818_v22 = vcombine.high %v816_v19, %v816_v19  ;;  %v825_v23 = vpack.c.bf16 %v816_v19, %v816_v19 }
 0x146   : > { %1122 = vmatprep.mubr.bf16.mxu0 %v824_v21  ;;  %v826_v24 = vpack.c.bf16 %v818_v22, %v818_v22 }
 0x147   : > { %1123 = vmatmul.mubr.bf16.vlgmr.msra.gmra.mrb[0].mxu0 %v823_v20 }
 0x148   : > { %1162 = vmatprep.mubr.bf16.mxu1 %v826_v24 }
 0x149   : > { %1163 = vmatmul.mubr.bf16.vlgmr.msra.gmra.mrb[0].mxu1 %v825_v23 }
 0x21a   : > { %v1356_v25 = vpop.f32.mrb[0].mxu0 }
 0x21b   : > { %v1357_v27 = vpop.f32.mrb[1].mxu0 }
 0x21c   : > { %v1378_v28 = vpop.f32.mrb[0].mxu1  ;;  %v1358_v29 = vadd.f32 %v1357_v27, %v1356_v25  ;;  %v1359_v30 = vpop.f32.mrb[2].mxu0 }
 0x21d   : > { %v1379_v31 = vpop.f32.mrb[1].mxu1  ;;  %v1360_v16 = vpop.f32.mrb[3].mxu0 }
 0x21e   : > { %v1125_v32 = vadd.f32 %v1358_v29, %v1302_v26  ;;  %v1380_v33 = vadd.f32 %v1379_v31, %v1378_v28  ;;  %v1381_v34 = vpop.f32.mrb[2].mxu1 }
 0x21f   : > { %v1382_v35 = vpop.f32.mrb[3].mxu1 }
 0x220   : > { %v1165_v36 = vadd.f32 %v1380_v33, %v1125_v32 }
 0x222   : > { %1171 = vst.msk [vmem:[#allocation3] sm:$0x3] %vm1170_vm0, %v1165_v36 }
 0x223 PF: > { %p1388_p7 = scmp.eq.s32.totalorder %s1608_s19, 1  ;;  %s1571_s30 = smov [#allocation3]  }
 0x224   : > { %s1179_s6 = sshll.u32 %s1571_s30, 4  ;;  %s1180_s6 = int_to_ptr.vmem [resolvable:$true] %s1179_s6 }
 0x225   : > { %s1530_s7 = scalar_lea.vmem %s1180_s6, 32  ;;  %p1537_p11 = scmp.lt.s32.totalorder %s1180_s6, %s1180_s6 }
 0x226   : > { %p1531_p8 = scmp.ne.s32.totalorder %s1180_s6, %s1530_s7  ;;  %p1538_p12 = scmp.lt.s32.totalorder %s1530_s7, %s1530_s7 }
 0x228   : > { %p1532_p9 = pnand %p1531_p8, %p1388_p7  ;;  %p1539_p13 = por %p1538_p12, %p1537_p11 }
 0x22a   : > { %p1533_p10 = pneg %p1532_p9 }
 0x22c   : > { %p1540_p0 = pnand %p1539_p13, %p1533_p10 }
 0x22e   : > { %1543 = shalt.err (!%p1540_p0)
}
 0x22f   : > { %s1544_s10 = scalar_lea.hbm %s1845_s5, 32 }
 0x230   : > { %p1545_p1 = scmp.ne.s32.totalorder %s1845_s5, %s1544_s10  ;;  %p1550_p4 = scmp.lt.u32.totalorder %s1544_s10, %s1845_s5 }
 0x232   : > { %p1546_p2 = pnand %p1545_p1, %p1388_p7 }
 0x234   : > { %p1547_p3 = pneg %p1546_p2 }
 0x236   : > { %p1552_p5 = pnand %p1550_p4, %p1547_p3 }
 0x238   : > { %1555 = shalt.err (!%p1552_p5)
}
 0x239   : > { %1385 = dma.vmem_to_hbm [thread:$0]  (%p1388_p7), %s1180_s6, 32, %s1845_s5, [#allocation4]  }
 0x23a   : > { %1561 = dma.done.wait (%p1388_p7), [#allocation4], 32  }
 0x23b   : > { %1563 = vsyncadd (%p1388_p7), [#allocation4], 4294967264 }
 0x23c PF: > { %s16_s18 = sadd.s32 1, %s1566_s18  }
 0x23d   : > { %p13_p6 = scmp.ge.s32.totalorder %s16_s18, 4  }
 0x23f   :  { %15 = sbr.rel (!%p13_p6) target bundleno = 1 (0x1), region = 78 }
 0x246   :  { %1192 = vsyncpa [#allocation4], 1 }
 0x247   :  { %1194 = vsyncpa [#allocation4 + $0x1], 1 }

// kernel: skin_disease_cnn_forward.3
= control target key start
LH: loop header
LB: loop body
LE: loop exit
PB: predicated region body
PF: predicated region fallthrough
CT: control target
= control target key end

     0   :  { %s4443_s12 = smov 0   ;;  %s6772_s0 = inlined_call_operand.vmem [shape: f32[2,16,16,3], index: 0, kind: input, shape index: {}]   ;;  %s6773_s1 = inlined_call_operand.vmem [shape: f32[27,16], index: 1, kind: input, shape index: {}]   ;;  %s6774_s2 = inlined_call_operand.vmem [shape: f32[1,16], index: 2, kind: input, shape index: {}]   ;;  %s6775_s3 = inlined_call_operand.vmem [shape: f32[2,8,8,16], index: 3, kind: output, shape index: {}]  }
   0x1 LB: > { %s4219_s13 = sadd.s32 4294967295, %s4410_s12   ;;  %p4223_p0 = scmp.ge.s32.totalorder %s4410_s12, 1  ;;  %s4410_s12 = sphi %s4443_s12, %s13_s12  }
   0x2   : > { %p137_p1 = scmp.lt.s32.totalorder %s4410_s12, 3 }
   0x4   : > { %p138_p2 = pnand %p4223_p0, %p137_p1 }
   0x6   : > { %141 = sbr.rel (%p138_p2) target bundleno = 957 (0x3bd), region = 32 }
   0xd   : > { %vm171_vm0 = vcmask 23552   ;;  %vm174_vm1 = vcmask 17408   ;;  %p4453_p3 = scmp.lt.s32.totalorder %s4219_s13, 1  ;;  %vm180_vm2 = vcmask 16384   ;;  %v4412_v0 = vmov 0.0   ;;  %s4413_s19 = smov 3  }
   0xe   : > { %172 = vst.msk [vmem:[#allocation2] sm:$0xff] %vm171_vm0, %v4412_v0  ;;  %173 = vst.msk [vmem:[#allocation2 + $0x8] sm:$0xff] %vm171_vm0, %v4412_v0  ;;  %s4414_s20 = smov 6   ;;  %s4415_s21 = smov 9   ;;  %vm1966_vm3 = vcmask 1042432   ;;  %vm4420_vm4 = vmmov 1  }
   0xf   : > { %177 = vst.msk [vmem:[#allocation2 + $0x198] sm:$0xff] %vm171_vm0, %v4412_v0  ;;  %178 = vst.msk [vmem:[#allocation2 + $0x1a0] sm:$0xff] %vm171_vm0, %v4412_v0  ;;  %s6913_s13 = smov (!%p4453_p3, %s4219_s13), 1  ;;  %s4416_s22 = smov 12   ;;  %vm1627_vm6 = vcmask 48128   ;;  %vm1660_vm7 = vcmask 72704  }
  0x10   : > { %175 = vst.msk [vmem:[#allocation2 + $0x10] sm:$0x3] %vm174_vm1, %v4412_v0  ;;  %179 = vst.msk [vmem:[#allocation2 + $0x1a8] sm:$0x3] %vm174_vm1, %v4412_v0  ;;  %s4264_s15 = sshll.u32 %s6913_s13, 8  ;;  %s4417_s23 = smov 15  }
  0x11   : > { %182 = vst.msk [vmem:[#allocation2 + $0x18] sm:$0x1] %vm180_vm2, %v4412_v0  ;;  %183 = vst.msk [vmem:[#allocation2 + $0x30] sm:$0x1] %vm180_vm2, %v4412_v0  ;;  %s4507_s18 = scalar_lea.vmem %s6772_s0, %s4264_s15  ;;  %s4418_s24 = smov 18   ;;  %vm1693_vm8 = vcmask 97280  }
  0x12   : > { %184 = vst.msk [vmem:[#allocation2 + $0x48] sm:$0x1] %vm180_vm2, %v4412_v0  ;;  %185 = vst.msk [vmem:[#allocation2 + $0x60] sm:$0x1] %vm180_vm2, %v4412_v0  ;;  %v217_v1 = vld [vmem:[%s4507_s18] sm:$0xff]  ;;  %v219_v2 = vld [vmem:[%s4507_s18 + $0x10] sm:$0xff] }
  0x13   : > { %186 = vst.msk [vmem:[#allocation2 + $0x78] sm:$0x1] %vm180_vm2, %v4412_v0  ;;  %187 = vst.msk [vmem:[#allocation2 + $0x90] sm:$0x1] %vm180_vm2, %v4412_v0  ;;  %v218_v3 = vld [vmem:[%s4507_s18 + $0x8] sm:$0xff]  ;;  %v221_v4 = vld [vmem:[%s4507_s18 + $0x20] sm:$0xff] }
  0x14   : > { %188 = vst.msk [vmem:[#allocation2 + $0xa8] sm:$0x1] %vm180_vm2, %v4412_v0  ;;  %189 = vst.msk [vmem:[#allocation2 + $0xc0] sm:$0x1] %vm180_vm2, %v4412_v0  ;;  %v220_v5 = vld [vmem:[%s4507_s18 + $0x18] sm:$0xff]  ;;  %v223_v6 = vld [vmem:[%s4507_s18 + $0x30] sm:$0xff] }
  0x15   : > { %190 = vst.msk [vmem:[#allocation2 + $0xd8] sm:$0x1] %vm180_vm2, %v4412_v0  ;;  %191 = vst.msk [vmem:[#allocation2 + $0xf0] sm:$0x1] %vm180_vm2, %v4412_v0  ;;  %v314_v7 = vld [vmem:[#allocation2 + $0x1] sm:$0xff]  ;;  %v224_v11 = vld [vmem:[%s4507_s18 + $0x38] sm:$0xff] }
  0x16   : > { %192 = vst.msk [vmem:[#allocation2 + $0x108] sm:$0x1] %vm180_vm2, %v4412_v0  ;;  %193 = vst.msk [vmem:[#allocation2 + $0x120] sm:$0x1] %vm180_vm2, %v4412_v0  ;;  %v222_v9 = vld [vmem:[%s4507_s18 + $0x28] sm:$0xff]  ;;  %603 = vrot.lane.b32.xlu0 %v314_v7, %s4413_s19  ;;  %v225_v10 = vld [vmem:[%s4507_s18 + $0x40] sm:$0xff] }
  0x17   : > { %194 = vst.msk [vmem:[#allocation2 + $0x138] sm:$0x1] %vm180_vm2, %v4412_v0  ;;  %195 = vst.msk [vmem:[#allocation2 + $0x150] sm:$0x1] %vm180_vm2, %v4412_v0  ;;  %v315_v8 = vld [vmem:[#allocation2 + $0x9] sm:$0xff]  ;;  %v229_v14 = vld [vmem:[%s4507_s18 + $0x60] sm:$0xff] }
  0x18   : > { %196 = vst.msk [vmem:[#allocation2 + $0x168] sm:$0x1] %vm180_vm2, %v4412_v0  ;;  %197 = vst.msk [vmem:[#allocation2 + $0x180] sm:$0x1] %vm180_vm2, %v4412_v0  ;;  %v227_v12 = vld [vmem:[%s4507_s18 + $0x50] sm:$0xff]  ;;  %v226_v13 = vld [vmem:[%s4507_s18 + $0x48] sm:$0xff] }
  0x19   : > { %200 = vst.msk [vmem:[#allocation2 + $0x29] sm:$0x1] %vm180_vm2, %v4412_v0  ;;  %201 = vst.msk [vmem:[#allocation2 + $0x41] sm:$0x1] %vm180_vm2, %v4412_v0  ;;  %v228_v15 = vld [vmem:[%s4507_s18 + $0x58] sm:$0xff]  ;;  %v231_v16 = vld [vmem:[%s4507_s18 + $0x70] sm:$0xff] }
  0x1a   : > { %202 = vst.msk [vmem:[#allocation2 + $0x59] sm:$0x1] %vm180_vm2, %v4412_v0  ;;  %203 = vst.msk [vmem:[#allocation2 + $0x71] sm:$0x1] %vm180_vm2, %v4412_v0  ;;  %v230_v17 = vld [vmem:[%s4507_s18 + $0x68] sm:$0xff]  ;;  %v233_v18 = vld [vmem:[%s4507_s18 + $0x80] sm:$0xff]  ;;  %605 = vrot.lane.b32.xlu0 %v315_v8, %s4413_s19 }
  0x1b   : > { %204 = vst.msk [vmem:[#allocation2 + $0x89] sm:$0x1] %vm180_vm2, %v4412_v0  ;;  %205 = vst.msk [vmem:[#allocation2 + $0xa1] sm:$0x1] %vm180_vm2, %v4412_v0  ;;  %v232_v19 = vld [vmem:[%s4507_s18 + $0x78] sm:$0xff]  ;;  %v235_v20 = vld [vmem:[%s4507_s18 + $0x90] sm:$0xff] }
  0x1c   : > { %206 = vst.msk [vmem:[#allocation2 + $0xb9] sm:$0x1] %vm180_vm2, %v4412_v0  ;;  %207 = vst.msk [vmem:[#allocation2 + $0xd1] sm:$0x1] %vm180_vm2, %v4412_v0  ;;  %v234_v21 = vld [vmem:[%s4507_s18 + $0x88] sm:$0xff]  ;;  %v237_v22 = vld [vmem:[%s4507_s18 + $0xa0] sm:$0xff] }
  0x1d   : > { %208 = vst.msk [vmem:[#allocation2 + $0xe9] sm:$0x1] %vm180_vm2, %v4412_v0  ;;  %209 = vst.msk [vmem:[#allocation2 + $0x101] sm:$0x1] %vm180_vm2, %v4412_v0  ;;  %v236_v23 = vld [vmem:[%s4507_s18 + $0x98] sm:$0xff]  ;;  %v239_v24 = vld [vmem:[%s4507_s18 + $0xb0] sm:$0xff] }
  0x1e   : > { %210 = vst.msk [vmem:[#allocation2 + $0x119] sm:$0x1] %vm180_vm2, %v4412_v0  ;;  %211 = vst.msk [vmem:[#allocation2 + $0x131] sm:$0x1] %vm180_vm2, %v4412_v0  ;;  %v238_v28 = vld [vmem:[%s4507_s18 + $0xa8] sm:$0xff]  ;;  %v241_v29 = vld [vmem:[%s4507_s18 + $0xc0] sm:$0xff] }
  0x1f   : > { %212 = vst.msk [vmem:[#allocation2 + $0x149] sm:$0x1] %vm180_vm2, %v4412_v0  ;;  %213 = vst.msk [vmem:[#allocation2 + $0x161] sm:$0x1] %vm180_vm2, %v4412_v0  ;;  %v240_v33 = vld [vmem:[%s4507_s18 + $0xb8] sm:$0xff]  ;;  %v243_v34 = vld [vmem:[%s4507_s18 + $0xd0] sm:$0xff] }
  0x20   : > { %214 = vst.msk [vmem:[#allocation2 + $0x179] sm:$0x1] %vm180_vm2, %v4412_v0  ;;  %215 = vst.msk [vmem:[#allocation2 + $0x191] sm:$0x1] %vm180_vm2, %v4412_v0  ;;  %v242_v35 = vld [vmem:[%s4507_s18 + $0xc8] sm:$0xff]  ;;  %v245_v36 = vld [vmem:[%s4507_s18 + $0xe0] sm:$0xff] }
  0x21   : > { %199 = vst.msk [vmem:[#allocation2 + $0x11] sm:$0x1] %vm180_vm2, %v4412_v0  ;;  %181 = vst.msk [vmem:[#allocation2] sm:$0x1] %vm180_vm2, %v4412_v0  ;;  %v244_v37 = vld [vmem:[%s4507_s18 + $0xd8] sm:$0xff]  ;;  %v246_v39 = vld [vmem:[%s4507_s18 + $0xe8] sm:$0xff] }
  0x22   : > { %198 = vst.msk [vmem:[#allocation2 + $0x198] sm:$0x1] %vm180_vm2, %v4412_v0  ;;  %216 = vst.msk [vmem:[#allocation2 + $0x1a9] sm:$0x1] %vm180_vm2, %v4412_v0  ;;  %v346_v62 = vld [vmem:[#allocation2 + $0x2] sm:$0xff]  ;;  %s4419_s25 = smov 21  }
  0x23   : > { %250 = vst.msk [vmem:[#allocation2 + $0x19] sm:$0xff] %vm171_vm0, %v217_v1  ;;  %252 = vst.msk [vmem:[#allocation2 + $0x31] sm:$0xff] %vm171_vm0, %v219_v2  ;;  %s4421_s7 = smov 24   ;;  %vm1726_vm9 = vcmask 121856   ;;  %vm1759_vm10 = vcmask 146432   ;;  %vm1792_vm11 = vcmask 171008  }
  0x24   : > { %251 = vst.msk [vmem:[#allocation2 + $0x21] sm:$0xff] %vm171_vm0, %v218_v3  ;;  %254 = vst.msk [vmem:[#allocation2 + $0x49] sm:$0xff] %vm171_vm0, %v221_v4  ;;  %vm1825_vm12 = vcmask 195584   ;;  %vm1869_vm13 = vcmask 220160   ;;  %vm2931_vm14 = vcmask 123904   ;;  %vm3828_vm15 = vcmask 130048  }
  0x25   : > { %253 = vst.msk [vmem:[#allocation2 + $0x39] sm:$0xff] %vm171_vm0, %v220_v5  ;;  %256 = vst.msk [vmem:[#allocation2 + $0x61] sm:$0xff] %vm171_vm0, %v223_v6  ;;  %vm4087_vm1 = vcmask 1042434   ;;  %vm4089_vm2 = vcmask 1043459   ;;  %s4265_s10 = sshll.u32 %s6913_s13, 6 }
  0x26   : > { %255 = vst.msk [vmem:[#allocation2 + $0x51] sm:$0xff] %vm171_vm0, %v222_v9  ;;  %258 = vst.msk [vmem:[#allocation2 + $0x79] sm:$0xff] %vm171_vm0, %v225_v10  ;;  %s6059_s14 = scalar_lea.vmem %s6775_s3, %s4265_s10 }
  0x27   : > { %257 = vst.msk [vmem:[#allocation2 + $0x69] sm:$0xff] %vm171_vm0, %v224_v11  ;;  %260 = vst.msk [vmem:[#allocation2 + $0x91] sm:$0xff] %vm171_vm0, %v227_v12 }
  0x28   : > { %259 = vst.msk [vmem:[#allocation2 + $0x81] sm:$0xff] %vm171_vm0, %v226_v13  ;;  %262 = vst.msk [vmem:[#allocation2 + $0xa9] sm:$0xff] %vm171_vm0, %v229_v14  ;;  %v347_v1 = vld [vmem:[#allocation2 + $0xa] sm:$0xff] }
  0x29   : > { %261 = vst.msk [vmem:[#allocation2 + $0x99] sm:$0xff] %vm171_vm0, %v228_v15  ;;  %264 = vst.msk [vmem:[#allocation2 + $0xc1] sm:$0xff] %vm171_vm0, %v231_v16 }
  0x2a   : > { %263 = vst.msk [vmem:[#allocation2 + $0xb1] sm:$0xff] %vm171_vm0, %v230_v17  ;;  %266 = vst.msk [vmem:[#allocation2 + $0xd9] sm:$0xff] %vm171_vm0, %v233_v18  ;;  %v4552_v25 = vld [vmem:[#allocation2 + $0x19] sm:$0xff]  ;;  %v4554_v26 = vld [vmem:[#allocation2 + $0x31] sm:$0xff] }
  0x2b   : > { %265 = vst.msk [vmem:[#allocation2 + $0xc9] sm:$0xff] %vm171_vm0, %v232_v19  ;;  %268 = vst.msk [vmem:[#allocation2 + $0xf1] sm:$0xff] %vm171_vm0, %v235_v20  ;;  %607 = vrot.lane.b32.xlu1 %v4552_v25, %s4413_s19  ;;  %v4561_v27 = vld [vmem:[#allocation2 + $0x21] sm:$0xff]  ;;  %611 = vrot.lane.b32.xlu0 %v4554_v26, %s4413_s19  ;;  %v4569_v30 = vld [vmem:[#allocation2 + $0x49] sm:$0xff] }
  0x2c   : > { %267 = vst.msk [vmem:[#allocation2 + $0xe1] sm:$0xff] %vm171_vm0, %v234_v21  ;;  %270 = vst.msk [vmem:[#allocation2 + $0x109] sm:$0xff] %vm171_vm0, %v237_v22  ;;  %v4573_v31 = vld [vmem:[#allocation2 + $0x39] sm:$0xff]  ;;  %v322_v32 = vld [vmem:[#allocation2 + $0x61] sm:$0xff] }
  0x2d   : > { %269 = vst.msk [vmem:[#allocation2 + $0xf9] sm:$0xff] %vm171_vm0, %v236_v23  ;;  %272 = vst.msk [vmem:[#allocation2 + $0x121] sm:$0xff] %vm171_vm0, %v239_v24  ;;  %v4587_v38 = vld [vmem:[#allocation2 + $0x51] sm:$0xff]  ;;  %v324_v40 = vld [vmem:[#allocation2 + $0x79] sm:$0xff] }
  0x2e   : > { %271 = vst.msk [vmem:[#allocation2 + $0x111] sm:$0xff] %vm171_vm0, %v238_v28  ;;  %274 = vst.msk [vmem:[#allocation2 + $0x139] sm:$0xff] %vm171_vm0, %v241_v29  ;;  %v323_v41 = vld [vmem:[#allocation2 + $0x69] sm:$0xff]  ;;  %v326_v42 = vld [vmem:[#allocation2 + $0x91] sm:$0xff] }
  0x2f   : > { %609 = vrot.lane.b32.xlu1 %v4561_v27, %s4413_s19  ;;  %615 = vrot.lane.b32.xlu0 %v4569_v30, %s4413_s19  ;;  %273 = vst.msk [vmem:[#allocation2 + $0x129] sm:$0xff] %vm171_vm0, %v240_v33  ;;  %276 = vst.msk [vmem:[#allocation2 + $0x151] sm:$0xff] %vm171_vm0, %v243_v34  ;;  %v325_v43 = vld [vmem:[#allocation2 + $0x81] sm:$0xff]  ;;  %v328_v44 = vld [vmem:[#allocation2 + $0xa9] sm:$0xff] }
  0x30   : > { %275 = vst.msk [vmem:[#allocation2 + $0x141] sm:$0xff] %vm171_vm0, %v242_v35  ;;  %278 = vst.msk [vmem:[#allocation2 + $0x169] sm:$0xff] %vm171_vm0, %v245_v36  ;;  %v327_v45 = vld [vmem:[#allocation2 + $0x99] sm:$0xff]  ;;  %v330_v46 = vld [vmem:[#allocation2 + $0xc1] sm:$0xff] }
  0x31   : > { %277 = vst.msk [vmem:[#allocation2 + $0x159] sm:$0xff] %vm171_vm0, %v244_v37  ;;  %279 = vst.msk [vmem:[#allocation2 + $0x171] sm:$0xff] %vm171_vm0, %v246_v39  ;;  %v329_v47 = vld [vmem:[#allocation2 + $0xb1] sm:$0xff]  ;;  %v4603_v48 = vld [vmem:[#allocation2 + $0xd9] sm:$0xff] }
  0x32   : > { %v331_v49 = vld [vmem:[#allocation2 + $0xc9] sm:$0xff]  ;;  %v4608_v50 = vld [vmem:[#allocation2 + $0xf1] sm:$0xff]  ;;  %v4643_v0 = vld [vmem:[#allocation2 + $0x1a] sm:$0xff] }
  0x33   : > { %613 = vrot.lane.b32.xlu1 %v4573_v31, %s4413_s19  ;;  %619 = vrot.lane.b32.xlu0 %v322_v32, %s4413_s19  ;;  %v4611_v51 = vld [vmem:[#allocation2 + $0xe1] sm:$0xff]  ;;  %v4615_v52 = vld [vmem:[#allocation2 + $0x109] sm:$0xff]  ;;  %v4648_v2 = vld [vmem:[#allocation2 + $0x32] sm:$0xff] }
  0x34   : > { %v4619_v53 = vld [vmem:[#allocation2 + $0xf9] sm:$0xff]  ;;  %v4623_v54 = vld [vmem:[#allocation2 + $0x121] sm:$0xff]  ;;  %v4655_v4 = vld [vmem:[#allocation2 + $0x4a] sm:$0xff] }
  0x35   : > { %v4627_v55 = vld [vmem:[#allocation2 + $0x111] sm:$0xff]  ;;  %v340_v56 = vld [vmem:[#allocation2 + $0x139] sm:$0xff]  ;;  %v4651_v3 = vld [vmem:[#allocation2 + $0x22] sm:$0xff] }
  0x36   : > { %v4633_v57 = vld [vmem:[#allocation2 + $0x129] sm:$0xff]  ;;  %v342_v58 = vld [vmem:[#allocation2 + $0x151] sm:$0xff]  ;;  %v4659_v5 = vld [vmem:[#allocation2 + $0x3a] sm:$0xff] }
  0x37   : > { %617 = vrot.lane.b32.xlu1 %v4587_v38, %s4413_s19  ;;  %623 = vrot.lane.b32.xlu0 %v324_v40, %s4413_s19  ;;  %v341_v59 = vld [vmem:[#allocation2 + $0x141] sm:$0xff]  ;;  %v344_v60 = vld [vmem:[#allocation2 + $0x169] sm:$0xff]  ;;  %v4667_v7 = vld [vmem:[#allocation2 + $0x52] sm:$0xff] }
  0x38   : > { %v343_v61 = vld [vmem:[#allocation2 + $0x159] sm:$0xff]  ;;  %v345_v63 = vld [vmem:[#allocation2 + $0x171] sm:$0xff]  ;;  %v4663_v6 = vld [vmem:[#allocation2 + $0x62] sm:$0xff] }
  0x39   : > { %v356_v8 = vld [vmem:[#allocation2 + $0x7a] sm:$0xff]  ;;  %v4673_v9 = vld [vmem:[#allocation2 + $0x6a] sm:$0xff]  ;;  %v358_v10 = vld [vmem:[#allocation2 + $0x92] sm:$0xff] }
  0x3a   : > { %v357_v11 = vld [vmem:[#allocation2 + $0x82] sm:$0xff]  ;;  %v360_v12 = vld [vmem:[#allocation2 + $0xaa] sm:$0xff]  ;;  %v359_v13 = vld [vmem:[#allocation2 + $0x9a] sm:$0xff] }
  0x3b   : > { %621 = vrot.lane.b32.xlu1 %v323_v41, %s4413_s19  ;;  %627 = vrot.lane.b32.xlu0 %v326_v42, %s4413_s19  ;;  %v362_v14 = vld [vmem:[#allocation2 + $0xc2] sm:$0xff]  ;;  %v361_v15 = vld [vmem:[#allocation2 + $0xb2] sm:$0xff]  ;;  %v4683_v16 = vld [vmem:[#allocation2 + $0xda] sm:$0xff] }
  0x3c   : > { %v363_v17 = vld [vmem:[#allocation2 + $0xca] sm:$0xff]  ;;  %v4688_v18 = vld [vmem:[#allocation2 + $0xf2] sm:$0xff]  ;;  %v4691_v19 = vld [vmem:[#allocation2 + $0xe2] sm:$0xff] }
  0x3d   : > { %v4695_v20 = vld [vmem:[#allocation2 + $0x10a] sm:$0xff]  ;;  %v4699_v21 = vld [vmem:[#allocation2 + $0xfa] sm:$0xff]  ;;  %v4703_v22 = vld [vmem:[#allocation2 + $0x122] sm:$0xff] }
  0x3e   : > { %v4707_v23 = vld [vmem:[#allocation2 + $0x112] sm:$0xff]  ;;  %v372_v24 = vld [vmem:[#allocation2 + $0x13a] sm:$0xff]  ;;  %v4715_v29 = vld [vmem:[#allocation2 + $0x12a] sm:$0xff] }
  0x3f   : > { %625 = vrot.lane.b32.xlu1 %v325_v43, %s4413_s19  ;;  %631 = vrot.lane.b32.xlu0 %v328_v44, %s4413_s19  ;;  %v374_v32 = vld [vmem:[#allocation2 + $0x152] sm:$0xff]  ;;  %v373_v34 = vld [vmem:[#allocation2 + $0x142] sm:$0xff]  ;;  %v376_v36 = vld [vmem:[#allocation2 + $0x16a] sm:$0xff] }
  0x40   : > { %v375_v39 = vld [vmem:[#allocation2 + $0x15a] sm:$0xff]  ;;  %v377_v43 = vld [vmem:[#allocation2 + $0x172] sm:$0xff]  ;;  %vm4363_vm5 = vmpackc.low %vm1966_vm3, %vm4420_vm4  ;;  %vm4091_vm3 = vcmask 1044484   ;;  %vm4093_vm4 = vcmask 1045509  }
  0x41   : > { %v4734_v42 = vld [vmem:[#allocation2 + $0x18] sm:$0xff] }
  0x43   : > { %629 = vrot.lane.b32.xlu1 %v327_v45, %s4413_s19  ;;  %635 = vrot.lane.b32.xlu0 %v330_v46, %s4413_s19  ;;  %v4743_v46 = vld [vmem:[#allocation2 + $0x30] sm:$0xff] }
  0x47   : > { %633 = vrot.lane.b32.xlu1 %v329_v47, %s4413_s19  ;;  %639 = vrot.lane.b32.xlu0 %v4603_v48, %s4413_s19 }
  0x4b   : > { %637 = vrot.lane.b32.xlu1 %v331_v49, %s4413_s19  ;;  %643 = vrot.lane.b32.xlu0 %v4608_v50, %s4413_s19  ;;  %v4749_v49 = vld [vmem:[#allocation2 + $0x20] sm:$0xff] }
  0x4f   : > { %641 = vrot.lane.b32.xlu1 %v4611_v51, %s4413_s19  ;;  %647 = vrot.lane.b32.xlu0 %v4615_v52, %s4413_s19 }
  0x53   : > { %645 = vrot.lane.b32.xlu1 %v4619_v53, %s4413_s19  ;;  %651 = vrot.lane.b32.xlu0 %v4623_v54, %s4413_s19 }
  0x57   : > { %649 = vrot.lane.b32.xlu1 %v4627_v55, %s4413_s19  ;;  %655 = vrot.lane.b32.xlu0 %v340_v56, %s4413_s19 }
  0x5b   : > { %653 = vrot.lane.b32.xlu1 %v4633_v57, %s4413_s19  ;;  %659 = vrot.lane.b32.xlu0 %v342_v58, %s4413_s19  ;;  %v4755_v58 = vld [vmem:[#allocation2 + $0x48] sm:$0xff] }
  0x5c   : > { %6788 = vst [vmem:[#allocation9_spill] sm:$0xff] %v4755_v58 }
  0x5f   : > { %657 = vrot.lane.b32.xlu1 %v341_v59, %s4413_s19  ;;  %663 = vrot.lane.b32.xlu0 %v344_v60, %s4413_s19  ;;  %v4761_v60 = vld [vmem:[#allocation2 + $0x38] sm:$0xff] }
  0x63   : > { %661 = vrot.lane.b32.xlu1 %v343_v61, %s4413_s19  ;;  %731 = vrot.lane.b32.xlu0 %v346_v62, %s4414_s20  ;;  %v4767_v62 = vld [vmem:[#allocation2 + $0x60] sm:$0xff] }
  0x67   : > { %665 = vrot.lane.b32.xlu1 %v345_v63, %s4413_s19  ;;  %735 = vrot.lane.b32.xlu0 %v4643_v0, %s4414_s20 }
  0x6b   : > { %733 = vrot.lane.b32.xlu1 %v347_v1, %s4414_s20  ;;  %739 = vrot.lane.b32.xlu0 %v4648_v2, %s4414_s20  ;;  %v4773_v1 = vld [vmem:[#allocation2 + $0x50] sm:$0xff] }
  0x6f   : > { %737 = vrot.lane.b32.xlu1 %v4651_v3, %s4414_s20  ;;  %743 = vrot.lane.b32.xlu0 %v4655_v4, %s4414_s20 }
  0x73   : > { %741 = vrot.lane.b32.xlu1 %v4659_v5, %s4414_s20  ;;  %747 = vrot.lane.b32.xlu0 %v4663_v6, %s4414_s20 }
  0x77   : > { %745 = vrot.lane.b32.xlu1 %v4667_v7, %s4414_s20  ;;  %751 = vrot.lane.b32.xlu0 %v356_v8, %s4414_s20 }
  0x7b   : > { %749 = vrot.lane.b32.xlu1 %v4673_v9, %s4414_s20  ;;  %755 = vrot.lane.b32.xlu0 %v358_v10, %s4414_s20  ;;  %v4779_v10 = vld [vmem:[#allocation2 + $0x78] sm:$0xff] }
  0x7f   : > { %753 = vrot.lane.b32.xlu1 %v357_v11, %s4414_s20  ;;  %759 = vrot.lane.b32.xlu0 %v360_v12, %s4414_s20  ;;  %v4785_v12 = vld [vmem:[#allocation2 + $0x68] sm:$0xff] }
  0x83   : > { %757 = vrot.lane.b32.xlu1 %v359_v13, %s4414_s20  ;;  %763 = vrot.lane.b32.xlu0 %v362_v14, %s4414_s20  ;;  %v4791_v14 = vld [vmem:[#allocation2 + $0x90] sm:$0xff] }
  0x87   : > { %761 = vrot.lane.b32.xlu1 %v361_v15, %s4414_s20  ;;  %767 = vrot.lane.b32.xlu0 %v4683_v16, %s4414_s20 }
  0x88   : > { %v4711_v28 = vpop.permute.xlu0 %603 }
  0x8b   : > { %765 = vrot.lane.b32.xlu1 %v363_v17, %s4414_s20  ;;  %771 = vrot.lane.b32.xlu0 %v4688_v18, %s4414_s20  ;;  %v4797_v17 = vld [vmem:[#allocation2 + $0x80] sm:$0xff] }
  0x8c   : > { %v4718_v33 = vpop.permute.xlu0 %605 }
  0x8f   : > { %769 = vrot.lane.b32.xlu1 %v4691_v19, %s4414_s20  ;;  %775 = vrot.lane.b32.xlu0 %v4695_v20, %s4414_s20 }
  0x93   : > { %773 = vrot.lane.b32.xlu1 %v4699_v21, %s4414_s20  ;;  %779 = vrot.lane.b32.xlu0 %v4703_v22, %s4414_s20 }
  0x97   : > { %777 = vrot.lane.b32.xlu1 %v4707_v23, %s4414_s20  ;;  %783 = vrot.lane.b32.xlu0 %v372_v24, %s4414_s20 }
  0x9b   : > { %781 = vrot.lane.b32.xlu1 %v4715_v29, %s4414_s20  ;;  %787 = vrot.lane.b32.xlu0 %v374_v32, %s4414_s20  ;;  %v296_v32 = vld [vmem:[#allocation2 + $0xa8] sm:$0xff] }
  0x9d   : > { %v4723_v35 = vpop.permute.xlu1 %607  ;;  %v4725_v37 = vpop.permute.xlu0 %611 }
  0x9e   : > { %6782 = vst [vmem:[#allocation3_spill] sm:$0xff] %v4725_v37 }
  0x9f   : > { %785 = vrot.lane.b32.xlu1 %v373_v34, %s4414_s20  ;;  %791 = vrot.lane.b32.xlu0 %v376_v36, %s4414_s20  ;;  %v4806_v36 = vld [vmem:[#allocation2 + $0x98] sm:$0xff] }
  0xa1   : > { %v4729_v40 = vpop.permute.xlu1 %609  ;;  %v4731_v41 = vpop.permute.xlu0 %615 }
  0xa2   : > { %6783 = vst [vmem:[#allocation4_spill] sm:$0xff] %v4731_v41  ;;  %v4851_v41 = vld [vmem:[#allocation2 + $0xf8] sm:$0xff] }
  0xa3   : > { %789 = vrot.lane.b32.xlu1 %v375_v39, %s4414_s20  ;;  %859 = vrot.lane.b32.xlu0 %v4734_v42, %s4415_s21  ;;  %6803 = vst [vmem:[#allocation24_spill] sm:$0xff] %v4851_v41 }
  0xa5   : > { %v4738_v44 = vpop.permute.xlu1 %613  ;;  %v4740_v45 = vpop.permute.xlu0 %619 }
  0xa6   : > { %6784 = vst [vmem:[#allocation5_spill] sm:$0xff] %v4738_v44  ;;  %6785 = vst [vmem:[#allocation6_spill] sm:$0xff] %v4740_v45  ;;  %v4839_v45 = vld [vmem:[#allocation2 + $0xe0] sm:$0xff]  ;;  %v4863_v44 = vld [vmem:[#allocation2 + $0x110] sm:$0xff] }
  0xa7   : > { %793 = vrot.lane.b32.xlu1 %v377_v43, %s4414_s20  ;;  %863 = vrot.lane.b32.xlu0 %v4743_v46, %s4415_s21  ;;  %v4812_v43 = vld [vmem:[#allocation2 + $0xc0] sm:$0xff]  ;;  %6806 = vst [vmem:[#allocation27_spill] sm:$0xff] %v4863_v44 }
  0xa9   : > { %v4747_v47 = vpop.permute.xlu1 %617  ;;  %v4751_v56 = vpop.permute.xlu0 %623 }
  0xaa   : > { %6786 = vst [vmem:[#allocation7_spill] sm:$0xff] %v4747_v47  ;;  %6787 = vst [vmem:[#allocation8_spill] sm:$0xff] %v4751_v56 }
  0xab   : > { %861 = vrot.lane.b32.xlu1 %v4749_v49, %s4415_s21  ;;  %867 = vrot.lane.b32.xlu0 %v4755_v58, %s4415_s21 }
  0xad   : > { %v4759_v59 = vpop.permute.xlu1 %621  ;;  %v4763_v61 = vpop.permute.xlu0 %627 }
  0xae   : > { %6789 = vst [vmem:[#allocation10_spill] sm:$0xff] %v4759_v59  ;;  %6790 = vst [vmem:[#allocation11_spill] sm:$0xff] %v4763_v61  ;;  %v4827_v61 = vld [vmem:[#allocation2 + $0xc8] sm:$0xff]  ;;  %v4833_v59 = vld [vmem:[#allocation2 + $0xf0] sm:$0xff] }
  0xaf   : > { %865 = vrot.lane.b32.xlu1 %v4761_v60, %s4415_s21  ;;  %871 = vrot.lane.b32.xlu0 %v4767_v62, %s4415_s21 }
  0xb1   : > { %v4771_v63 = vpop.permute.xlu1 %625  ;;  %v4775_v8 = vpop.permute.xlu0 %631 }
  0xb2   : > { %6791 = vst [vmem:[#allocation12_spill] sm:$0xff] %v4771_v63  ;;  %6792 = vst [vmem:[#allocation13_spill] sm:$0xff] %v4775_v8 }
  0xb3   : > { %869 = vrot.lane.b32.xlu1 %v4773_v1, %s4415_s21  ;;  %875 = vrot.lane.b32.xlu0 %v4779_v10, %s4415_s21 }
  0xb5   : > { %v4783_v11 = vpop.permute.xlu1 %629  ;;  %v4787_v13 = vpop.permute.xlu0 %635 }
  0xb6   : > { %6793 = vst [vmem:[#allocation14_spill] sm:$0xff] %v4783_v11  ;;  %v297_v11 = vld [vmem:[#allocation2 + $0xb0] sm:$0xff] }
  0xb7   : > { %873 = vrot.lane.b32.xlu1 %v4785_v12, %s4415_s21  ;;  %879 = vrot.lane.b32.xlu0 %v4791_v14, %s4415_s21 }
  0xb9   : > { %v4795_v15 = vpop.permute.xlu1 %633  ;;  %v4799_v24 = vpop.permute.xlu0 %639 }
  0xba   : > { %6794 = vst [vmem:[#allocation15_spill] sm:$0xff] %v4795_v15 }
  0xbb   : > { %877 = vrot.lane.b32.xlu1 %v4797_v17, %s4415_s21  ;;  %883 = vrot.lane.b32.xlu0 %v296_v32, %s4415_s21  ;;  %v4821_v32 = vld [vmem:[#allocation2 + $0xd8] sm:$0xff] }
  0xbd   : > { %v4804_v34 = vpop.permute.xlu1 %637  ;;  %v4808_v39 = vpop.permute.xlu0 %643 }
  0xbe   : > { %6795 = vst [vmem:[#allocation16_spill] sm:$0xff] %v4808_v39 }
  0xbf   : > { %881 = vrot.lane.b32.xlu1 %v4806_v36, %s4415_s21  ;;  %887 = vrot.lane.b32.xlu0 %v4812_v43, %s4415_s21 }
  0xc1   : > { %v4816_v15 = vpop.permute.xlu1 %641  ;;  %v4818_v8 = vpop.permute.xlu0 %647 }
  0xc2   : > { %6796 = vst [vmem:[#allocation17_spill] sm:$0xff] %v4818_v8  ;;  %v4845_v8 = vld [vmem:[#allocation2 + $0x108] sm:$0xff] }
  0xc3   : > { %885 = vrot.lane.b32.xlu1 %v297_v11, %s4415_s21  ;;  %891 = vrot.lane.b32.xlu0 %v4821_v32, %s4415_s21  ;;  %6801 = vst [vmem:[#allocation22_spill] sm:$0xff] %v4845_v8 }
  0xc5   : > { %v4825_v63 = vpop.permute.xlu1 %645  ;;  %v4829_v56 = vpop.permute.xlu0 %651 }
  0xc6   : > { %6797 = vst [vmem:[#allocation18_spill] sm:$0xff] %v4825_v63  ;;  %6798 = vst [vmem:[#allocation19_spill] sm:$0xff] %v4829_v56 }
  0xc7   : > { %889 = vrot.lane.b32.xlu1 %v4827_v61, %s4415_s21  ;;  %895 = vrot.lane.b32.xlu0 %v4833_v59, %s4415_s21 }
  0xc9   : > { %v4837_v11 = vpop.permute.xlu1 %649  ;;  %v4841_v47 = vpop.permute.xlu0 %655 }
  0xca   : > { %6799 = vst [vmem:[#allocation20_spill] sm:$0xff] %v4837_v11  ;;  %6800 = vst [vmem:[#allocation21_spill] sm:$0xff] %v4841_v47  ;;  %v4857_v11 = vld [vmem:[#allocation2 + $0x120] sm:$0xff] }
  0xcb   : > { %893 = vrot.lane.b32.xlu1 %v4839_v45, %s4415_s21  ;;  %899 = vrot.lane.b32.xlu0 %v4845_v8, %s4415_s21 }
  0xcd   : > { %v4849_v56 = vpop.permute.xlu1 %653  ;;  %v4853_v63 = vpop.permute.xlu0 %659 }
  0xce   : > { %6802 = vst [vmem:[#allocation23_spill] sm:$0xff] %v4849_v56  ;;  %6804 = vst [vmem:[#allocation25_spill] sm:$0xff] %v4853_v63  ;;  %v4873_v56 = vld [vmem:[#allocation2 + $0x128] sm:$0xff] }
  0xcf   : > { %897 = vrot.lane.b32.xlu1 %v4851_v41, %s4415_s21  ;;  %903 = vrot.lane.b32.xlu0 %v4857_v11, %s4415_s21 }
  0xd1   : > { %v4861_v47 = vpop.permute.xlu1 %657  ;;  %v4865_v39 = vpop.permute.xlu0 %663 }
  0xd2   : > { %6805 = vst [vmem:[#allocation26_spill] sm:$0xff] %v4861_v47  ;;  %6807 = vst [vmem:[#allocation28_spill] sm:$0xff] %v4865_v39 }
  0xd3   : > { %901 = vrot.lane.b32.xlu1 %v4863_v44, %s4415_s21  ;;  %987 = vrot.lane.b32.xlu0 %v4552_v25, %s4416_s22 }
  0xd5   : > { %v4871_v63 = vpop.permute.xlu1 %661  ;;  %v4875_v37 = vpop.permute.xlu0 %731 }
  0xd6   : > { %6808 = vst [vmem:[#allocation29_spill] sm:$0xff] %v4871_v63 }
  0xd7   : > { %905 = vrot.lane.b32.xlu1 %v4873_v56, %s4415_s21  ;;  %989 = vrot.lane.b32.xlu0 %v4561_v27, %s4416_s22 }
  0xd9   : > { %v4881_v39 = vpop.permute.xlu1 %665  ;;  %v4883_v47 = vpop.permute.xlu0 %735 }
  0xda   : > { %6809 = vst [vmem:[#allocation30_spill] sm:$0xff] %v4881_v39 }
  0xdb   : > { %1019 = vrot.lane.b32.xlu1 %v4603_v48, %s4416_s22  ;;  %1115 = vrot.lane.b32.xlu0 %v4643_v0, %s4417_s23 }
  0xdd   : > { %v4889_v25 = vpop.permute.xlu1 %733  ;;  %v4891_v63 = vpop.permute.xlu0 %739 }
  0xdf   : > { %1021 = vrot.lane.b32.xlu1 %v4611_v51, %s4416_s22  ;;  %1117 = vrot.lane.b32.xlu0 %v4651_v3, %s4417_s23 }
  0xe1   : > { %v4897_v27 = vpop.permute.xlu1 %737  ;;  %v4899_v39 = vpop.permute.xlu0 %743 }
  0xe2   : > { %6810 = vst [vmem:[#allocation31_spill] sm:$0xff] %v4899_v39 }
  0xe3   : > { %1147 = vrot.lane.b32.xlu1 %v4683_v16, %s4417_s23  ;;  %1243 = vrot.lane.b32.xlu0 %v4743_v46, %s4418_s24 }
  0xe5   : > { %v4905_v48 = vpop.permute.xlu1 %741  ;;  %v4907_v0 = vpop.permute.xlu0 %747 }
  0xe6   : > { %6811 = vst [vmem:[#allocation32_spill] sm:$0xff] %v4905_v48  ;;  %6812 = vst [vmem:[#allocation33_spill] sm:$0xff] %v4907_v0  ;;  %v1859_v0 = vld [vmem:[%s6773_s1 + $0x8] sm:$0xff]  ;;  %v1861_v48 = vld [vmem:[%s6773_s1 + $0x18] sm:$0x7] }
  0xe7   : > { %1149 = vrot.lane.b32.xlu1 %v4691_v19, %s4417_s23  ;;  %1245 = vrot.lane.b32.xlu0 %v4761_v60, %s4418_s24  ;;  %v1858_v19 = vld [vmem:[%s6773_s1] sm:$0xff] }
  0xe9   : > { %v4913_v51 = vpop.permute.xlu1 %745  ;;  %v4915_v3 = vpop.permute.xlu0 %751 }
  0xea   : > { %6813 = vst [vmem:[#allocation34_spill] sm:$0xff] %v4913_v51  ;;  %6814 = vst [vmem:[#allocation35_spill] sm:$0xff] %v4915_v3  ;;  %v4358_v3 = vpack.c.bf16 %v1859_v0, %v1858_v19 }
  0xeb   : > { %1275 = vrot.lane.b32.xlu1 %v4833_v59, %s4418_s24  ;;  %1371 = vrot.lane.b32.xlu0 %v4554_v26, %s4419_s25 }
  0xec   : > { %4359 = vmatprep.subr.bf16.mxu0 %v4358_v3  ;;  %4368 = vmatprep.subr.bf16.mxu1 %v4358_v3 }
  0xed   : > { %v4921_v16 = vpop.permute.xlu1 %749  ;;  %v4929_v51 = vpop.permute.xlu0 %755  ;;  %4361 = vmatpush3.bf16.msra.mxu0 %v4358_v3  ;;  %4370 = vmatpush3.bf16.msra.mxu1 %v4358_v3 }
  0xee   : > { %6815 = vst [vmem:[#allocation36_spill] sm:$0xff] %v4921_v16  ;;  %6816 = vst [vmem:[#allocation37_spill] sm:$0xff] %v4929_v51  ;;  %v1860_v16 = vld [vmem:[%s6773_s1 + $0x10] sm:$0xff] }
  0xef   : > { %1277 = vrot.lane.b32.xlu1 %v4851_v41, %s4418_s24  ;;  %991 = vrot.lane.b32.xlu0 %v4554_v26, %s4416_s22  ;;  %v4362_v26 = vpack.c.bf16 %v1861_v48, %v1860_v16 }
  0xf1   : > { %v4935_v39 = vpop.permute.xlu1 %753  ;;  %v4943_v51 = vpop.permute.xlu0 %759  ;;  %4364 = vmatprep.subr.msk.bf16.mxu0 %vm4363_vm5, %v4362_v26  ;;  %4369 = vmatprep.subr.msk.bf16.mxu1 %vm4363_vm5, %v4362_v26 }
  0xf2   : > { %6817 = vst [vmem:[#allocation38_spill] sm:$0xff] %v4935_v39  ;;  %6818 = vst [vmem:[#allocation39_spill] sm:$0xff] %v4943_v51  ;;  %4367 = vmatpush3.bf16.msk.msra.mxu0 %vm4363_vm5, %v4362_v26  ;;  %4371 = vmatpush3.bf16.msk.msra.mxu1 %vm4363_vm5, %v4362_v26  ;;  %vm4095_vm5 = vcmask 1046534  }
  0xf3   : > { %1403 = vrot.lane.b32.xlu1 %v4608_v50, %s4419_s25  ;;  %1373 = vrot.lane.b32.xlu0 %v4573_v31, %s4419_s25 }
  0xf5   : > { %v4949_v0 = vpop.permute.xlu1 %757  ;;  %v4951_v19 = vpop.permute.xlu0 %763 }
  0xf6   : > { %6819 = vst [vmem:[#allocation40_spill] sm:$0xff] %v4949_v0 }
  0xf7   : > { %1023 = vrot.lane.b32.xlu1 %v4608_v50, %s4416_s22  ;;  %1499 = vrot.lane.b32.xlu0 %v4648_v2, %s4421_s7 }
  0xf9   : > { %v4957_v48 = vpop.permute.xlu1 %761  ;;  %v4959_v3 = vpop.permute.xlu0 %767 }
  0xfa   : > { %6820 = vst [vmem:[#allocation41_spill] sm:$0xff] %v4957_v48 }
  0xfb   : > { %1405 = vrot.lane.b32.xlu1 %v4619_v53, %s4419_s25  ;;  %993 = vrot.lane.b32.xlu0 %v4573_v31, %s4416_s22 }
  0xfd   : > { %v4965_v16 = vpop.permute.xlu1 %765  ;;  %v4967_v0 = vpop.permute.xlu0 %771 }
  0xff   : > { %1531 = vrot.lane.b32.xlu1 %v4688_v18, %s4421_s7  ;;  %1119 = vrot.lane.b32.xlu0 %v4648_v2, %s4417_s23 }
 0x101   : > { %v4973_v50 = vpop.permute.xlu1 %769  ;;  %v4975_v26 = vpop.permute.xlu0 %775 }
 0x102   : > { %6821 = vst [vmem:[#allocation42_spill] sm:$0xff] %v4975_v26 }
 0x103   : > { %1025 = vrot.lane.b32.xlu1 %v4619_v53, %s4416_s22  ;;  %1501 = vrot.lane.b32.xlu0 %v4659_v5, %s4421_s7 }
 0x105   : > { %v4981_v31 = vpop.permute.xlu1 %773  ;;  %v4983_v48 = vpop.permute.xlu0 %779 }
 0x106   : > { %6822 = vst [vmem:[#allocation43_spill] sm:$0xff] %v4981_v31  ;;  %6823 = vst [vmem:[#allocation44_spill] sm:$0xff] %v4983_v48 }
 0x107   : > { %1151 = vrot.lane.b32.xlu1 %v4688_v18, %s4417_s23  ;;  %1121 = vrot.lane.b32.xlu0 %v4659_v5, %s4417_s23 }
 0x109   : > { %v4989_v2 = vpop.permute.xlu1 %777  ;;  %v4991_v51 = vpop.permute.xlu0 %783 }
 0x10a   : > { %6824 = vst [vmem:[#allocation45_spill] sm:$0xff] %v4989_v2  ;;  %6825 = vst [vmem:[#allocation46_spill] sm:$0xff] %v4991_v51 }
 0x10b   : > { %1533 = vrot.lane.b32.xlu1 %v4699_v21, %s4421_s7  ;;  %1247 = vrot.lane.b32.xlu0 %v4755_v58, %s4418_s24 }
 0x10d   : > { %v4997_v53 = vpop.permute.xlu1 %781  ;;  %v4999_v39 = vpop.permute.xlu0 %787 }
 0x10e   : > { %6826 = vst [vmem:[#allocation47_spill] sm:$0xff] %v4997_v53  ;;  %6827 = vst [vmem:[#allocation48_spill] sm:$0xff] %v4999_v39 }
 0x10f   : > { %1153 = vrot.lane.b32.xlu1 %v4699_v21, %s4417_s23  ;;  %1249 = vrot.lane.b32.xlu0 %v4773_v1, %s4418_s24 }
 0x111   : > { %v5005_v5 = vpop.permute.xlu1 %785  ;;  %v5007_v18 = vpop.permute.xlu0 %791 }
 0x112   : > { %6828 = vst [vmem:[#allocation49_spill] sm:$0xff] %v5005_v5  ;;  %6829 = vst [vmem:[#allocation50_spill] sm:$0xff] %v5007_v18 }
 0x113   : > { %1279 = vrot.lane.b32.xlu1 %v4845_v8, %s4418_s24  ;;  %1375 = vrot.lane.b32.xlu0 %v4569_v30, %s4419_s25 }
 0x115   : > { %v5013_v51 = vpop.permute.xlu1 %789  ;;  %v5015_v53 = vpop.permute.xlu0 %859 }
 0x116   : > { %6830 = vst [vmem:[#allocation51_spill] sm:$0xff] %v5013_v51 }
 0x117   : > { %1281 = vrot.lane.b32.xlu1 %v4863_v44, %s4418_s24  ;;  %995 = vrot.lane.b32.xlu0 %v4569_v30, %s4416_s22 }
 0x119   : > { %v5021_v21 = vpop.permute.xlu1 %793  ;;  %v5023_v1 = vpop.permute.xlu0 %863 }
 0x11a   : > { %6831 = vst [vmem:[#allocation52_spill] sm:$0xff] %v5021_v21 }
 0x11b   : > { %1407 = vrot.lane.b32.xlu1 %v4615_v52, %s4419_s25  ;;  %1377 = vrot.lane.b32.xlu0 %v4587_v38, %s4419_s25 }
 0x11d   : > { %v5029_v18 = vpop.permute.xlu1 %861  ;;  %v5031_v51 = vpop.permute.xlu0 %867 }
 0x11f   : > { %1027 = vrot.lane.b32.xlu1 %v4615_v52, %s4416_s22  ;;  %1503 = vrot.lane.b32.xlu0 %v4655_v4, %s4421_s7 }
 0x121   : > { %v5037_v30 = vpop.permute.xlu1 %865  ;;  %v5039_v21 = vpop.permute.xlu0 %871 }
 0x122   : > { %6832 = vst [vmem:[#allocation53_spill] sm:$0xff] %v5039_v21  ;;  %v282_v21 = vld [vmem:[#allocation2] sm:$0xff] }
 0x123   : > { %1409 = vrot.lane.b32.xlu1 %v4627_v55, %s4419_s25  ;;  %997 = vrot.lane.b32.xlu0 %v4587_v38, %s4416_s22 }
 0x125   : > { %v5045_v5 = vpop.permute.xlu1 %869  ;;  %v5047_v39 = vpop.permute.xlu0 %875 }
 0x126   : > { %6833 = vst [vmem:[#allocation54_spill] sm:$0xff] %v5045_v5  ;;  %6834 = vst [vmem:[#allocation55_spill] sm:$0xff] %v5047_v39 }
 0x127   : > { %1535 = vrot.lane.b32.xlu1 %v4695_v20, %s4421_s7  ;;  %1123 = vrot.lane.b32.xlu0 %v4655_v4, %s4417_s23 }
 0x129   : > { %v5053_v52 = vpop.permute.xlu1 %873  ;;  %v5055_v48 = vpop.permute.xlu0 %879 }
 0x12a   : > { %6835 = vst [vmem:[#allocation56_spill] sm:$0xff] %v5053_v52  ;;  %6836 = vst [vmem:[#allocation57_spill] sm:$0xff] %v5055_v48 }
 0x12b   : > { %1029 = vrot.lane.b32.xlu1 %v4627_v55, %s4416_s22  ;;  %1505 = vrot.lane.b32.xlu0 %v4667_v7, %s4421_s7 }
 0x12d   : > { %v5061_v38 = vpop.permute.xlu1 %877  ;;  %v5063_v2 = vpop.permute.xlu0 %883 }
 0x12e   : > { %6837 = vst [vmem:[#allocation58_spill] sm:$0xff] %v5061_v38  ;;  %6838 = vst [vmem:[#allocation59_spill] sm:$0xff] %v5063_v2 }
 0x12f   : > { %1155 = vrot.lane.b32.xlu1 %v4695_v20, %s4417_s23  ;;  %1125 = vrot.lane.b32.xlu0 %v4667_v7, %s4417_s23  ;;  %v511_v20 = vld [vmem:[#allocation2 + $0x61] sm:$0xff] }
 0x131   : > { %v5069_v4 = vpop.permute.xlu1 %881  ;;  %v5071_v39 = vpop.permute.xlu0 %887 }
 0x132   : > { %6839 = vst [vmem:[#allocation60_spill] sm:$0xff] %v5069_v4  ;;  %6840 = vst [vmem:[#allocation61_spill] sm:$0xff] %v5071_v39 }
 0x133   : > { %1537 = vrot.lane.b32.xlu1 %v4707_v23, %s4421_s7  ;;  %1251 = vrot.lane.b32.xlu0 %v4767_v62, %s4418_s24 }
 0x135   : > { %v5077_v55 = vpop.permute.xlu1 %885  ;;  %v5079_v48 = vpop.permute.xlu0 %891 }
 0x136   : > { %6841 = vst [vmem:[#allocation62_spill] sm:$0xff] %v5077_v55 }
 0x137   : > { %1157 = vrot.lane.b32.xlu1 %v4707_v23, %s4417_s23  ;;  %1253 = vrot.lane.b32.xlu0 %v4785_v12, %s4418_s24  ;;  %v512_v12 = vld [vmem:[#allocation2 + $0x69] sm:$0xff] }
 0x139   : > { %v5085_v7 = vpop.permute.xlu1 %889  ;;  %v5087_v39 = vpop.permute.xlu0 %895 }
 0x13a   : > { %6842 = vst [vmem:[#allocation63_spill] sm:$0xff] %v5085_v7 }
 0x13b   : > { %1283 = vrot.lane.b32.xlu1 %v4857_v11, %s4418_s24  ;;  %1379 = vrot.lane.b32.xlu0 %v511_v20, %s4419_s25  ;;  %v432_v11 = vld [vmem:[#allocation2 + $0x121] sm:$0xff] }
 0x13d   : > { %v5092_v62 = vpop.permute.xlu1 %893  ;;  %v5094_v55 = vpop.permute.xlu0 %899 }
 0x13f   : > { %1285 = vrot.lane.b32.xlu1 %v4873_v56, %s4418_s24  ;;  %999 = vrot.lane.b32.xlu0 %v511_v20, %s4416_s22 }
 0x141   : > { %v5099_v23 = vpop.permute.xlu1 %897  ;;  %v5101_v7 = vpop.permute.xlu0 %903 }
 0x142   : > { %6843 = vst [vmem:[#allocation64_spill] sm:$0xff] %v5101_v7 }
 0x143   : > { %1411 = vrot.lane.b32.xlu1 %v4623_v54, %s4419_s25  ;;  %1381 = vrot.lane.b32.xlu0 %v512_v12, %s4419_s25 }
 0x145   : > { %v5106_v2 = vpop.permute.xlu1 %901  ;;  %v988_v4 = vpop.permute.xlu0 %987 }
 0x146   : > { %6844 = vst [vmem:[#allocation65_spill] sm:$0xff] %v5106_v2  ;;  %v529_v2 = vld [vmem:[#allocation2 + $0x139] sm:$0xff] }
 0x147   : > { %1031 = vrot.lane.b32.xlu1 %v432_v11, %s4416_s22  ;;  %1507 = vrot.lane.b32.xlu0 %v4663_v6, %s4421_s7  ;;  %v433_v11 = vld [vmem:[#allocation2 + $0x129] sm:$0xff] }
 0x149   : > { %v5111_v56 = vpop.permute.xlu1 %905  ;;  %v5113_v20 = vpop.permute.xlu0 %989 }
 0x14a   : > { %6845 = vst [vmem:[#allocation66_spill] sm:$0xff] %v5111_v56 }
 0x14b   : > { %1413 = vrot.lane.b32.xlu1 %v4633_v57, %s4419_s25  ;;  %1001 = vrot.lane.b32.xlu0 %v512_v12, %s4416_s22 }
 0x14d   : > { %v5118_v54 = vpop.permute.xlu1 %1019  ;;  %v1116_v38 = vpop.permute.xlu0 %1115 }
 0x14f   : > { %1539 = vrot.lane.b32.xlu1 %v4703_v22, %s4421_s7  ;;  %1127 = vrot.lane.b32.xlu0 %v4663_v6, %s4417_s23 }
 0x151   : > { %v5124_v44 = vpop.permute.xlu1 %1021  ;;  %v5126_v56 = vpop.permute.xlu0 %1117 }
 0x153   : > { %1033 = vrot.lane.b32.xlu1 %v433_v11, %s4416_s22  ;;  %1509 = vrot.lane.b32.xlu0 %v4673_v9, %s4421_s7  ;;  %v247_v11 = vld [vmem:[%s4507_s18 + $0xf0] sm:$0xff] }
 0x154   : > { %280 = vst.msk [vmem:[#allocation2 + $0x181] sm:$0xff] %vm171_vm0, %v247_v11  ;;  %v5159_v11 = vld [vmem:[#allocation2 + $0x140] sm:$0xff] }
 0x155   : > { %v1148_v57 = vpop.permute.xlu1 %1147  ;;  %v1244_v12 = vpop.permute.xlu0 %1243 }
 0x157   : > { %1159 = vrot.lane.b32.xlu1 %v4703_v22, %s4417_s23  ;;  %1129 = vrot.lane.b32.xlu0 %v4673_v9, %s4417_s23  ;;  %v5147_v22 = vld [vmem:[#allocation2 + $0x138] sm:$0xff] }
 0x158   : > { %6846 = vst [vmem:[#allocation67_spill] sm:$0xff] %v5147_v22  ;;  %v248_v9 = vld [vmem:[%s4507_s18 + $0xf8] sm:$0xff] }
 0x159   : > { %v5135_v52 = vpop.permute.xlu1 %1149  ;;  %v5137_v6 = vpop.permute.xlu0 %1245  ;;  %281 = vst.msk [vmem:[#allocation2 + $0x189] sm:$0xff] %vm171_vm0, %v248_v9 }
 0x15b   : > { %1541 = vrot.lane.b32.xlu1 %v4715_v29, %s4421_s7  ;;  %1255 = vrot.lane.b32.xlu0 %v4779_v10, %s4418_s24 }
 0x15d   : > { %v1276_v7 = vpop.permute.xlu1 %1275  ;;  %v1372_v26 = vpop.permute.xlu0 %1371 }
 0x15f   : > { %1161 = vrot.lane.b32.xlu1 %v4715_v29, %s4417_s23  ;;  %907 = vrot.lane.b32.xlu0 %v5147_v22, %s4415_s21  ;;  %v1595_v29 = vsel %vm171_vm0, %v282_v21, %v4711_v28  ;;  %v513_v21 = vld [vmem:[#allocation2 + $0x79] sm:$0xff] }
 0x160   : > { %v1628_v9 = vsel %vm1627_vm6, %v1595_v29, %v4875_v37 }
 0x161   : > { %v5152_v8 = vpop.permute.xlu1 %1277  ;;  %v5155_v10 = vpop.permute.xlu0 %991  ;;  %v1661_v31 = vsel %vm1660_vm7, %v1628_v9, %v5015_v53  ;;  %v1611_v53 = vsel %vm171_vm0, %v4812_v43, %v4787_v13  ;;  %v514_v43 = vld [vmem:[#allocation2 + $0x81] sm:$0xff] }
 0x162   : > { %v1694_v28 = vsel %vm1693_vm8, %v1661_v31, %v988_v4  ;;  %v1644_v31 = vsel %vm1627_vm6, %v1611_v53, %v4951_v19 }
 0x163   : > { %1287 = vrot.lane.b32.xlu1 %v5147_v22, %s4418_s24  ;;  %1289 = vrot.lane.b32.xlu0 %v5159_v11, %s4418_s24  ;;  %v1727_v41 = vsel %vm1726_vm9, %v1694_v28, %v1116_v38  ;;  %v1677_v4 = vsel %vm1660_vm7, %v1644_v31, %v5079_v48 }
 0x164   : > { %v1760_v37 = vsel %vm1759_vm10, %v1727_v41, %v1244_v12  ;;  %v283_v12 = vld [vmem:[#allocation2 + $0x8] sm:$0xff]  ;;  %v1710_v13 = vsel %vm1693_vm8, %v1677_v4, %v5118_v54 }
 0x165   : > { %v1404_v58 = vpop.permute.xlu1 %1403  ;;  %v1374_v22 = vpop.permute.xlu0 %1373  ;;  %v1596_v48 = vsel %vm171_vm0, %v283_v12, %v4718_v33 }
 0x166   : > { %v1629_v54 = vsel %vm1627_vm6, %v1596_v48, %v4889_v25 }
 0x167   : > { %1257 = vrot.lane.b32.xlu1 %v4797_v17, %s4418_s24  ;;  %1415 = vrot.lane.b32.xlu0 %v529_v2, %s4419_s25  ;;  %v1793_v17 = vsel %vm1792_vm11, %v1760_v37, %v1372_v26  ;;  %v1743_v26 = vsel %vm1726_vm9, %v1710_v13, %v1148_v57  ;;  %v545_v37 = vld [vmem:[#allocation2 + $0x7a] sm:$0xff]  ;;  %v1662_v53 = vsel %vm1660_vm7, %v1629_v54, %v5029_v18 }
 0x168   : > { %v1776_v19 = vsel %vm1759_vm10, %v1743_v26, %v1276_v7  ;;  %v1695_v33 = vsel %vm1693_vm8, %v1662_v53, %v5113_v20  ;;  %v1597_v54 = vsel %vm171_vm0, %v4734_v42, %v4723_v35 }
 0x169   : > { %v5174_v5 = vpop.permute.xlu1 %1023  ;;  %v1500_v29 = vpop.permute.xlu0 %1499  ;;  %v1809_v28 = vsel %vm1792_vm11, %v1776_v19, %v1404_v58  ;;  %v530_v58 = vld [vmem:[#allocation2 + $0x141] sm:$0xff]  ;;  %v1728_v7 = vsel %vm1726_vm9, %v1695_v33, %v5126_v56  ;;  %v5269_v33 = vld [vmem:[#allocation2 + $0x158] sm:$0xff] }
 0x16a   : > { %v1826_v38 = vsel %vm1825_vm12, %v1793_v17, %v1500_v29  ;;  %v1761_v29 = vsel %vm1759_vm10, %v1728_v7, %v5137_v6  ;;  %v531_v7 = vld [vmem:[#allocation2 + $0x151] sm:$0xff] }
 0x16b   : > { %1383 = vrot.lane.b32.xlu1 %v513_v21, %s4419_s25  ;;  %1003 = vrot.lane.b32.xlu0 %v513_v21, %s4416_s22  ;;  %v1794_v18 = vsel %vm1792_vm11, %v1761_v29, %v1374_v22 }
 0x16c   : > { %4310 = vmatprep.mubr.msk.f32.mxu0 %vm1869_vm13, %v1826_v38  ;;  %v561_v38 = vld [vmem:[#allocation2 + $0x13a] sm:$0xff] }
 0x16d   : > { %v1406_v41 = vpop.permute.xlu1 %1405  ;;  %v5192_v9 = vpop.permute.xlu0 %993 }
 0x16f   : > { %909 = vrot.lane.b32.xlu1 %v5159_v11, %s4415_s21  ;;  %1385 = vrot.lane.b32.xlu0 %v514_v43, %s4419_s25 }
 0x171   : > { %v1532_v21 = vpop.permute.xlu1 %1531  ;;  %v1120_v17 = vpop.permute.xlu0 %1119 }
 0x172   : > { %v1842_v57 = vsel %vm1825_vm12, %v1809_v28, %v1532_v21  ;;  %v5256_v21 = vld [vmem:[#allocation2 + $0x150] sm:$0xff] }
 0x173   : > { %1035 = vrot.lane.b32.xlu1 %v529_v2, %s4416_s22  ;;  %4334 = vmatprep.mubr.msk.f32.mxu1 %vm1869_vm13, %v1842_v57  ;;  %v1612_v2 = vsel %vm171_vm0, %v4827_v61, %v4804_v34 }
 0x174   : > { %1511 = vrot.lane.b32.xlu0 %v545_v37, %s4421_s7  ;;  %v1645_v20 = vsel %vm1627_vm6, %v1612_v2, %v4965_v16 }
 0x175   : > { %v5213_v25 = vpop.permute.xlu1 %1025  ;;  %v1502_v31 = vpop.permute.xlu0 %1501  ;;  %v1678_v4 = vsel %vm1660_vm7, %v1645_v20, %v5092_v62 }
 0x176   : > { %v1827_v56 = vsel %vm1825_vm12, %v1794_v18, %v1502_v31  ;;  %v1711_v61 = vsel %vm1693_vm8, %v1678_v4, %v5124_v44  ;;  %v515_v18 = vld [vmem:[#allocation2 + $0x91] sm:$0xff] }
 0x177   : > { %1417 = vrot.lane.b32.xlu1 %v530_v58, %s4419_s25  ;;  %4311 = vmatmul.mubr.msk.f32.vlgmr.msra.gmra.mrb[0].mxu0 %vm1869_vm13, %v1827_v56  ;;  %v1744_v34 = vsel %vm1726_vm9, %v1711_v61, %v5135_v52 }
 0x178   : > { %1005 = vrot.lane.b32.xlu0 %v514_v43, %s4416_s22  ;;  %v1777_v16 = vsel %vm1759_vm10, %v1744_v34, %v5152_v8  ;;  %v546_v43 = vld [vmem:[#allocation2 + $0x82] sm:$0xff] }
 0x179   : > { %v1152_v6 = vpop.permute.xlu1 %1151  ;;  %v5233_v22 = vpop.permute.xlu0 %1121  ;;  %v1810_v62 = vsel %vm1792_vm11, %v1777_v16, %v1406_v41  ;;  %v562_v8 = vld [vmem:[#allocation2 + $0x142] sm:$0xff] }
 0x17b   : > { %1543 = vrot.lane.b32.xlu1 %v561_v38, %s4421_s7 }
 0x17c   : > { %1131 = vrot.lane.b32.xlu0 %v545_v37, %s4417_s23  ;;  %v1630_v37 = vsel %vm1627_vm6, %v1597_v54, %v4883_v47 }
 0x17d   : > { %v1534_v12 = vpop.permute.xlu1 %1533  ;;  %v1248_v26 = vpop.permute.xlu0 %1247 }
 0x17e   : > { %v1843_v13 = vsel %vm1825_vm12, %v1810_v62, %v1534_v12  ;;  %v547_v62 = vld [vmem:[#allocation2 + $0x92] sm:$0xff] }
 0x17f   : > { %1037 = vrot.lane.b32.xlu1 %v530_v58, %s4416_s22  ;;  %4335 = vmatmul.mubr.msk.f32.vlgmr.msra.gmra.mrb[0].mxu1 %vm1869_vm13, %v1843_v13 }
 0x180   : > { %1513 = vrot.lane.b32.xlu0 %v546_v43, %s4421_s7 }
 0x181   : > { %v5244_v44 = vpop.permute.xlu1 %1153  ;;  %v1250_v52 = vpop.permute.xlu0 %1249 }
 0x183   : > { %1163 = vrot.lane.b32.xlu1 %v561_v38, %s4417_s23 }
 0x184   : > { %1133 = vrot.lane.b32.xlu0 %v546_v43, %s4417_s23  ;;  %v532_v43 = vld [vmem:[#allocation2 + $0x159] sm:$0xff] }
 0x185   : > { %v1280_v41 = vpop.permute.xlu1 %1279  ;;  %v1376_v19 = vpop.permute.xlu0 %1375 }
 0x187   : > { %1545 = vrot.lane.b32.xlu1 %v562_v8, %s4421_s7 }
 0x188   : > { %1259 = vrot.lane.b32.xlu0 %v4791_v14, %s4418_s24  ;;  %v1663_v14 = vsel %vm1660_vm7, %v1630_v37, %v5023_v1  ;;  %v1613_v1 = vsel %vm171_vm0, %v4821_v32, %v4799_v24 }
 0x189   : > { %v5251_v48 = vpop.permute.xlu1 %1281  ;;  %v5253_v28 = vpop.permute.xlu0 %995  ;;  %v1696_v58 = vsel %vm1693_vm8, %v1663_v14, %v5155_v10  ;;  %v1646_v10 = vsel %vm1627_vm6, %v1613_v1, %v4959_v3 }
 0x18a   : > { %v1729_v35 = vsel %vm1726_vm9, %v1696_v58, %v1120_v17  ;;  %v1679_v31 = vsel %vm1660_vm7, %v1646_v10, %v5087_v39  ;;  %v1598_v39 = vsel %vm171_vm0, %v4749_v49, %v4729_v40 }
 0x18b   : > { %1165 = vrot.lane.b32.xlu1 %v562_v8, %s4417_s23  ;;  %v1762_v47 = vsel %vm1759_vm10, %v1729_v35, %v1248_v26  ;;  %v1712_v24 = vsel %vm1693_vm8, %v1679_v31, %v5174_v5  ;;  %v1631_v5 = vsel %vm1627_vm6, %v1598_v39, %v4897_v27  ;;  %v485_v35 = vld [vmem:[#allocation2 + $0xa8] sm:$0xff] }
 0x18c   : > { %911 = vrot.lane.b32.xlu0 %v5256_v21, %s4415_s21  ;;  %v1795_v29 = vsel %vm1792_vm11, %v1762_v47, %v1376_v19  ;;  %v1745_v32 = vsel %vm1726_vm9, %v1712_v24, %v1152_v6  ;;  %v516_v6 = vld [vmem:[#allocation2 + $0x99] sm:$0xff]  ;;  %v1664_v61 = vsel %vm1660_vm7, %v1631_v5, %v5037_v30  ;;  %v1614_v30 = vsel %vm171_vm0, %v4839_v45, %v4816_v15 }
 0x18d   : > { %v1408_v57 = vpop.permute.xlu1 %1407  ;;  %v1378_v53 = vpop.permute.xlu0 %1377  ;;  %v1778_v3 = vsel %vm1759_vm10, %v1745_v32, %v1280_v41  ;;  %v1697_v40 = vsel %vm1693_vm8, %v1664_v61, %v5192_v9  ;;  %v1647_v9 = vsel %vm1627_vm6, %v1614_v30, %v4973_v50  ;;  %v563_v41 = vld [vmem:[#allocation2 + $0x152] sm:$0xff] }
 0x18e   : > { %v1811_v56 = vsel %vm1792_vm11, %v1778_v3, %v1408_v57  ;;  %v1730_v49 = vsel %vm1726_vm9, %v1697_v40, %v5233_v22  ;;  %v1680_v26 = vsel %vm1660_vm7, %v1647_v9, %v5099_v23  ;;  %v6848_v24 = vld [vmem:[#allocation16_spill] sm:$0xff]  ;;  %v517_v40 = vld [vmem:[#allocation2 + $0xa9] sm:$0xff] }
 0x18f   : > { %1291 = vrot.lane.b32.xlu1 %v5256_v21, %s4418_s24  ;;  %v1763_v16 = vsel %vm1759_vm10, %v1730_v49, %v1250_v52  ;;  %v1713_v45 = vsel %vm1693_vm8, %v1680_v26, %v5213_v25 }
 0x190   : > { %1293 = vrot.lane.b32.xlu0 %v5269_v33, %s4418_s24  ;;  %v1796_v12 = vsel %vm1792_vm11, %v1763_v16, %v1378_v53  ;;  %v1746_v15 = vsel %vm1726_vm9, %v1713_v45, %v5244_v44  ;;  %v548_v44 = vld [vmem:[#allocation2 + $0x9a] sm:$0xff] }
 0x191   : > { %v5276_v42 = vpop.permute.xlu1 %1027  ;;  %v1504_v2 = vpop.permute.xlu0 %1503  ;;  %v1779_v50 = vsel %vm1759_vm10, %v1746_v15, %v5251_v48  ;;  %v564_v53 = vld [vmem:[#allocation2 + $0x15a] sm:$0xff]  ;;  %v518_v15 = vld [vmem:[#allocation2 + $0xb1] sm:$0xff] }
 0x192   : > { %v1828_v17 = vsel %vm1825_vm12, %v1795_v29, %v1504_v2 }
 0x193   : > { %1261 = vrot.lane.b32.xlu1 %v4806_v36, %s4418_s24  ;;  %4313 = vmatprep.mubr.msk.f32.mxu0 %vm1869_vm13, %v1828_v17 }
 0x194   : > { %1419 = vrot.lane.b32.xlu0 %v531_v7, %s4419_s25 }
 0x195   : > { %v1410_v20 = vpop.permute.xlu1 %1409  ;;  %v5295_v36 = vpop.permute.xlu0 %997 }
 0x196   : > { %v1812_v23 = vsel %vm1792_vm11, %v1779_v50, %v1410_v20  ;;  %v6852_v50 = vld [vmem:[#allocation18_spill] sm:$0xff] }
 0x197   : > { %1387 = vrot.lane.b32.xlu1 %v515_v18, %s4419_s25 }
 0x198   : > { %1007 = vrot.lane.b32.xlu0 %v515_v18, %s4416_s22  ;;  %v5367_v18 = vld [vmem:[#allocation2 + $0x168] sm:$0xff] }
 0x199   : > { %v1536_v38 = vpop.permute.xlu1 %1535  ;;  %v1124_v34 = vpop.permute.xlu0 %1123 }
 0x19a   : > { %v1844_v4 = vsel %vm1825_vm12, %v1811_v56, %v1536_v38  ;;  %v486_v38 = vld [vmem:[#allocation2 + $0xb0] sm:$0xff] }
 0x19b   : > { %913 = vrot.lane.b32.xlu1 %v5269_v33, %s4415_s21  ;;  %4337 = vmatprep.mubr.msk.f32.mxu1 %vm1869_vm13, %v1844_v4 }
 0x19c   : > { %1389 = vrot.lane.b32.xlu0 %v516_v6, %s4419_s25 }
 0x19d   : > { %v5317_v27 = vpop.permute.xlu1 %1029  ;;  %v1506_v13 = vpop.permute.xlu0 %1505 }
 0x19e   : > { %v1829_v22 = vsel %vm1825_vm12, %v1796_v12, %v1506_v13  ;;  %v6851_v13 = vld [vmem:[#allocation54_spill] sm:$0xff] }
 0x19f   : > { %1039 = vrot.lane.b32.xlu1 %v531_v7, %s4416_s22  ;;  %4314 = vmatmul.mubr.msk.f32.gmra.mrb[2].mxu0 %vm1869_vm13, %v1829_v22  ;;  %v6847_v7 = vld [vmem:[#allocation3_spill] sm:$0xff] }
 0x1a0   : > { %1515 = vrot.lane.b32.xlu0 %v547_v62, %s4421_s7  ;;  %v1599_v1 = vsel %vm171_vm0, %v4743_v46, %v6847_v7 }
 0x1a1   : > { %v1156_v52 = vpop.permute.xlu1 %1155  ;;  %v5336_v8 = vpop.permute.xlu0 %1125  ;;  %v1632_v2 = vsel %vm1627_vm6, %v1599_v1, %v4891_v63 }
 0x1a2   : > { %v1665_v10 = vsel %vm1660_vm7, %v1632_v2, %v5031_v51  ;;  %v1615_v51 = vsel %vm171_vm0, %v4833_v59, %v6848_v24 }
 0x1a3   : > { %1421 = vrot.lane.b32.xlu1 %v532_v43, %s4419_s25  ;;  %v1698_v31 = vsel %vm1693_vm8, %v1665_v10, %v5253_v28  ;;  %v5383_v28 = vld [vmem:[#allocation2 + $0x170] sm:$0xff]  ;;  %v1648_v39 = vsel %vm1627_vm6, %v1615_v51, %v4967_v0 }
 0x1a4   : > { %1009 = vrot.lane.b32.xlu0 %v516_v6, %s4416_s22  ;;  %v1731_v20 = vsel %vm1726_vm9, %v1698_v31, %v1124_v34  ;;  %v1681_v5 = vsel %vm1660_vm7, %v1648_v39, %v5094_v55  ;;  %v533_v6 = vld [vmem:[#allocation2 + $0x169] sm:$0xff]  ;;  %v6849_v55 = vld [vmem:[#allocation5_spill] sm:$0xff] }
 0x1a5   : > { %v1538_v19 = vpop.permute.xlu1 %1537  ;;  %v1252_v57 = vpop.permute.xlu0 %1251  ;;  %v1714_v4 = vsel %vm1693_vm8, %v1681_v5, %v5276_v42  ;;  %v1600_v49 = vsel %vm171_vm0, %v4761_v60, %v6849_v55  ;;  %v6850_v42 = vld [vmem:[#allocation32_spill] sm:$0xff]  ;;  %v6859_v55 = vld [vmem:[#allocation53_spill] sm:$0xff] }
 0x1a6   : > { %v1845_v54 = vsel %vm1825_vm12, %v1812_v23, %v1538_v19  ;;  %v1764_v63 = vsel %vm1759_vm10, %v1731_v20, %v1252_v57  ;;  %v1747_v61 = vsel %vm1726_vm9, %v1714_v4, %v1156_v52  ;;  %v1633_v30 = vsel %vm1627_vm6, %v1600_v49, %v6850_v42  ;;  %v6856_v5 = vld [vmem:[#allocation4_spill] sm:$0xff] }
 0x1a7   : > { %1547 = vrot.lane.b32.xlu1 %v563_v41, %s4421_s7  ;;  %4338 = vmatmul.mubr.msk.f32.gmra.mrb[2].mxu1 %vm1869_vm13, %v1845_v54  ;;  %v1666_v9 = vsel %vm1660_vm7, %v1633_v30, %v6851_v13  ;;  %v504_v13 = vld [vmem:[#allocation2 + $0x188] sm:$0xff] }
 0x1a8   : > { %1135 = vrot.lane.b32.xlu0 %v547_v62, %s4417_s23  ;;  %v1699_v60 = vsel %vm1693_vm8, %v1666_v9, %v5295_v36  ;;  %v6854_v36 = vld [vmem:[#allocation43_spill] sm:$0xff]  ;;  %v6860_v9 = vld [vmem:[#allocation17_spill] sm:$0xff] }
 0x1a9   : > { %v5347_v25 = vpop.permute.xlu1 %1157  ;;  %v1254_v37 = vpop.permute.xlu0 %1253  ;;  %v1732_v26 = vsel %vm1726_vm9, %v1699_v60, %v5336_v8  ;;  %v6861_v60 = vld [vmem:[#allocation22_spill] sm:$0xff] }
 0x1aa   : > { %v1765_v45 = vsel %vm1759_vm10, %v1732_v26, %v1254_v37 }
 0x1ab   : > { %1041 = vrot.lane.b32.xlu1 %v532_v43, %s4416_s22  ;;  %v407_v43 = vld [vmem:[#allocation2 + $0x170] sm:$0xff] }
 0x1ac   : > { %1517 = vrot.lane.b32.xlu0 %v548_v44, %s4421_s7 }
 0x1ad   : > { %v1284_v48 = vpop.permute.xlu1 %1283  ;;  %v1380_v14 = vpop.permute.xlu0 %1379 }
 0x1ae   : > { %v1797_v32 = vsel %vm1792_vm11, %v1764_v63, %v1380_v14  ;;  %v1780_v0 = vsel %vm1759_vm10, %v1747_v61, %v1284_v48  ;;  %v550_v63 = vld [vmem:[#allocation2 + $0xb2] sm:$0xff] }
 0x1af   : > { %1167 = vrot.lane.b32.xlu1 %v563_v41, %s4417_s23  ;;  %v6853_v41 = vld [vmem:[#allocation24_spill] sm:$0xff]  ;;  %v6858_v61 = vld [vmem:[#allocation31_spill] sm:$0xff] }
 0x1b0   : > { %1137 = vrot.lane.b32.xlu0 %v548_v44, %s4417_s23  ;;  %v1616_v23 = vsel %vm171_vm0, %v6853_v41, %v6852_v50  ;;  %v6855_v44 = vld [vmem:[#allocation65_spill] sm:$0xff]  ;;  %v488_v50 = vld [vmem:[#allocation2 + $0xc8] sm:$0xff]  ;;  %v6863_v41 = vld [vmem:[#allocation64_spill] sm:$0xff] }
 0x1b1   : > { %v5353_v58 = vpop.permute.xlu1 %1285  ;;  %v5355_v47 = vpop.permute.xlu0 %999  ;;  %v1649_v57 = vsel %vm1627_vm6, %v1616_v23, %v6854_v36  ;;  %v535_v36 = vld [vmem:[#allocation2 + $0x181] sm:$0xff] }
 0x1b2   : > { %v1682_v48 = vsel %vm1660_vm7, %v1649_v57, %v6855_v44 }
 0x1b3   : > { %1549 = vrot.lane.b32.xlu1 %v564_v53, %s4421_s7  ;;  %v1715_v14 = vsel %vm1693_vm8, %v1682_v48, %v5317_v27  ;;  %v519_v48 = vld [vmem:[#allocation2 + $0xc1] sm:$0xff] }
 0x1b4   : > { %1263 = vrot.lane.b32.xlu0 %v485_v35, %s4418_s24  ;;  %v1748_v35 = vsel %vm1726_vm9, %v1715_v14, %v5347_v25  ;;  %v565_v25 = vld [vmem:[#allocation2 + $0x16a] sm:$0xff] }
 0x1b5   : > { %v1412_v29 = vpop.permute.xlu1 %1411  ;;  %v1382_v17 = vpop.permute.xlu0 %1381  ;;  %v1781_v1 = vsel %vm1759_vm10, %v1748_v35, %v5353_v58  ;;  %v4391_v14 = vld [vmem:[#allocation2 + $0x50] sm:$0xff] }
 0x1b6   : > { %v1813_v16 = vsel %vm1792_vm11, %v1780_v0, %v1412_v29  ;;  %v1798_v19 = vsel %vm1792_vm11, %v1765_v45, %v1382_v17  ;;  %v534_v29 = vld [vmem:[#allocation2 + $0x171] sm:$0xff] }
 0x1b7   : > { %1169 = vrot.lane.b32.xlu1 %v564_v53, %s4417_s23  ;;  %v549_v53 = vld [vmem:[#allocation2 + $0xaa] sm:$0xff] }
 0x1b8   : > { %915 = vrot.lane.b32.xlu0 %v5367_v18, %s4415_s21 }
 0x1b9   : > { %v5374_v46 = vpop.permute.xlu1 %1031  ;;  %v1508_v3 = vpop.permute.xlu0 %1507 }
 0x1ba   : > { %v1830_v56 = vsel %vm1825_vm12, %v1797_v32, %v1508_v3  ;;  %v566_v3 = vld [vmem:[#allocation2 + $0x172] sm:$0xff] }
 0x1bb   : > { %1295 = vrot.lane.b32.xlu1 %v5367_v18, %s4418_s24  ;;  %4316 = vmatprep.mubr.msk.f32.mxu0 %vm1869_vm13, %v1830_v56  ;;  %v487_v56 = vld [vmem:[#allocation2 + $0xc0] sm:$0xff] }
 0x1bc   : > { %1297 = vrot.lane.b32.xlu0 %v5383_v28, %s4418_s24 }
 0x1bd   : > { %v1414_v59 = vpop.permute.xlu1 %1413  ;;  %v5396_v34 = vpop.permute.xlu0 %1001 }
 0x1be   : > { %v1814_v2 = vsel %vm1792_vm11, %v1781_v1, %v1414_v59  ;;  %v6857_v59 = vld [vmem:[#allocation9_spill] sm:$0xff] }
 0x1bf   : > { %1265 = vrot.lane.b32.xlu1 %v486_v38, %s4418_s24  ;;  %v1601_v4 = vsel %vm171_vm0, %v6857_v59, %v6856_v5 }
 0x1c0   : > { %1423 = vrot.lane.b32.xlu0 %v533_v6, %s4419_s25  ;;  %v1634_v0 = vsel %vm1627_vm6, %v1601_v4, %v6858_v61 }
 0x1c1   : > { %v1540_v62 = vpop.permute.xlu1 %1539  ;;  %v5410_v22 = vpop.permute.xlu0 %1127  ;;  %v1667_v49 = vsel %vm1660_vm7, %v1634_v0, %v6859_v55  ;;  %v6870_v0 = vld [vmem:[#allocation66_spill] sm:$0xff] }
 0x1c2   : > { %v1846_v12 = vsel %vm1825_vm12, %v1813_v16, %v1540_v62  ;;  %v1700_v62 = vsel %vm1693_vm8, %v1667_v49, %v5355_v47  ;;  %v6862_v47 = vld [vmem:[#allocation42_spill] sm:$0xff] }
 0x1c3   : > { %1391 = vrot.lane.b32.xlu1 %v517_v40, %s4419_s25  ;;  %4340 = vmatprep.mubr.msk.f32.mxu1 %vm1869_vm13, %v1846_v12  ;;  %v1733_v42 = vsel %vm1726_vm9, %v1700_v62, %v5410_v22  ;;  %v551_v49 = vld [vmem:[#allocation2 + $0xc2] sm:$0xff] }
 0x1c4   : > { %1011 = vrot.lane.b32.xlu0 %v517_v40, %s4416_s22  ;;  %v408_v40 = vld [vmem:[#allocation2 + $0x180] sm:$0xff] }
 0x1c5   : > { %v5419_v52 = vpop.permute.xlu1 %1033  ;;  %v1510_v54 = vpop.permute.xlu0 %1509 }
 0x1c6   : > { %v1831_v8 = vsel %vm1825_vm12, %v1798_v19, %v1510_v54 }
 0x1c7   : > { %917 = vrot.lane.b32.xlu1 %v407_v43, %s4415_s21  ;;  %4317 = vmatmul.mubr.msk.f32.gmra.mrb[4].mxu0 %vm1869_vm13, %v1831_v8  ;;  %v1617_v43 = vsel %vm171_vm0, %v6861_v60, %v6860_v9 }
 0x1c8   : > { %1393 = vrot.lane.b32.xlu0 %v518_v15, %s4419_s25 }
 0x1c9   : > { %v5433_v37 = vpop.permute.xlu1 %1159  ;;  %v5440_v7 = vpop.permute.xlu0 %1129 }
 0x1cb   : > { %1043 = vrot.lane.b32.xlu1 %v533_v6, %s4416_s22 }
 0x1cc   : > { %1519 = vrot.lane.b32.xlu0 %v549_v53, %s4421_s7 }
 0x1cd   : > { %v1542_v10 = vpop.permute.xlu1 %1541  ;;  %v1256_v27 = vpop.permute.xlu0 %1255 }
 0x1ce   : > { %v1847_v17 = vsel %vm1825_vm12, %v1814_v2, %v1542_v10  ;;  %v1766_v12 = vsel %vm1759_vm10, %v1733_v42, %v1256_v27  ;;  %v6866_v10 = vld [vmem:[#allocation56_spill] sm:$0xff] }
 0x1cf   : > { %1425 = vrot.lane.b32.xlu1 %v534_v29, %s4419_s25  ;;  %4341 = vmatmul.mubr.msk.f32.gmra.mrb[4].mxu1 %vm1869_vm13, %v1847_v17 }
 0x1d0   : > { %1013 = vrot.lane.b32.xlu0 %v518_v15, %s4416_s22  ;;  %v1650_v15 = vsel %vm1627_vm6, %v1617_v43, %v6862_v47 }
 0x1d1   : > { %v5451_v31 = vpop.permute.xlu1 %1161  ;;  %v5453_v20 = vpop.permute.xlu0 %907  ;;  %v1683_v23 = vsel %vm1660_vm7, %v1650_v15, %v6863_v41 }
 0x1d2   : > { %v1716_v54 = vsel %vm1693_vm8, %v1683_v23, %v5374_v46  ;;  %v489_v23 = vld [vmem:[#allocation2 + $0xd8] sm:$0xff] }
 0x1d3   : > { %1551 = vrot.lane.b32.xlu1 %v565_v25, %s4421_s7  ;;  %v1749_v57 = vsel %vm1726_vm9, %v1716_v54, %v5433_v37  ;;  %v4392_v54 = vld [vmem:[#allocation2 + $0x60] sm:$0xff] }
 0x1d4   : > { %1139 = vrot.lane.b32.xlu0 %v549_v53, %s4417_s23  ;;  %v6864_v53 = vld [vmem:[#allocation7_spill] sm:$0xff] }
 0x1d5   : > { %v1288_v58 = vpop.permute.xlu1 %1287  ;;  %v5457_v24 = vpop.permute.xlu0 %1289  ;;  %v1602_v35 = vsel %vm171_vm0, %v4391_v14, %v6864_v53  ;;  %v490_v53 = vld [vmem:[#allocation2 + $0xe0] sm:$0xff] }
 0x1d6   : > { %v1782_v44 = vsel %vm1759_vm10, %v1749_v57, %v1288_v58 }
 0x1d7   : > { %1045 = vrot.lane.b32.xlu1 %v534_v29, %s4416_s22  ;;  %v6865_v29 = vld [vmem:[#allocation34_spill] sm:$0xff] }
 0x1d8   : > { %1521 = vrot.lane.b32.xlu0 %v550_v63, %s4421_s7  ;;  %v1635_v2 = vsel %vm1627_vm6, %v1602_v35, %v6865_v29  ;;  %v6873_v35 = vld [vmem:[#allocation55_spill] sm:$0xff] }
 0x1d9   : > { %v1258_v51 = vpop.permute.xlu1 %1257  ;;  %v1416_v32 = vpop.permute.xlu0 %1415  ;;  %v1668_v17 = vsel %vm1660_vm7, %v1635_v2, %v6866_v10  ;;  %v505_v2 = vld [vmem:[#allocation2 + $0x198] sm:$0xff] }
 0x1da   : > { %v1815_v1 = vsel %vm1792_vm11, %v1782_v44, %v1416_v32 }
 0x1db   : > { %1171 = vrot.lane.b32.xlu1 %v565_v25, %s4417_s23  ;;  %v1701_v25 = vsel %vm1693_vm8, %v1668_v17, %v5396_v34  ;;  %v6869_v34 = vld [vmem:[#allocation45_spill] sm:$0xff] }
 0x1dc   : > { %1141 = vrot.lane.b32.xlu0 %v550_v63, %s4417_s23  ;;  %v1734_v58 = vsel %vm1726_vm9, %v1701_v25, %v5440_v7  ;;  %v521_v25 = vld [vmem:[#allocation2 + $0xd9] sm:$0xff] }
 0x1dd   : > { %v1384_v39 = vpop.permute.xlu1 %1383  ;;  %v5463_v38 = vpop.permute.xlu0 %1003  ;;  %v1767_v32 = vsel %vm1759_vm10, %v1734_v58, %v1258_v51  ;;  %v4393_v58 = vld [vmem:[#allocation2 + $0x120] sm:$0xff] }
 0x1de   : > { %v1799_v26 = vsel %vm1792_vm11, %v1766_v12, %v1384_v39  ;;  %v6867_v39 = vld [vmem:[#allocation20_spill] sm:$0xff]  ;;  %v536_v12 = vld [vmem:[#allocation2 + $0x189] sm:$0xff] }
 0x1df   : > { %1553 = vrot.lane.b32.xlu1 %v566_v3, %s4421_s7 }
 0x1e0   : > { %1267 = vrot.lane.b32.xlu0 %v487_v56, %s4418_s24  ;;  %v6868_v56 = vld [vmem:[#allocation27_spill] sm:$0xff] }
 0x1e1   : > { %v5470_v6 = vpop.permute.xlu1 %909  ;;  %v1386_v16 = vpop.permute.xlu0 %1385  ;;  %v1618_v5 = vsel %vm171_vm0, %v6868_v56, %v6867_v39 }
 0x1e2   : > { %v1800_v59 = vsel %vm1792_vm11, %v1767_v32, %v1386_v16  ;;  %v1651_v61 = vsel %vm1627_vm6, %v1618_v5, %v6869_v34  ;;  %v6874_v32 = vld [vmem:[#allocation19_spill] sm:$0xff] }
 0x1e3   : > { %1173 = vrot.lane.b32.xlu1 %v566_v3, %s4417_s23  ;;  %v520_v3 = vld [vmem:[#allocation2 + $0xc9] sm:$0xff] }
 0x1e4   : > { %919 = vrot.lane.b32.xlu0 %v408_v40, %s4415_s21 }
 0x1e5   : > { %v5482_v30 = vpop.permute.xlu1 %1035 }
 0x1e6   : > { %v1512_v45 = vpop.permute.xlu0 %1511 }
 0x1e7   : > { %1299 = vrot.lane.b32.xlu1 %v408_v40, %s4418_s24  ;;  %v1832_v22 = vsel %vm1825_vm12, %v1799_v26, %v1512_v45  ;;  %v1684_v40 = vsel %vm1660_vm7, %v1651_v61, %v6870_v0  ;;  %v552_v45 = vld [vmem:[#allocation2 + $0xca] sm:$0xff] }
 0x1e8   : > { %1301 = vrot.lane.b32.xlu0 %v504_v13, %s4418_s24  ;;  %4319 = vmatprep.mubr.msk.f32.mxu0 %vm1869_vm13, %v1832_v22  ;;  %v1717_v55 = vsel %vm1693_vm8, %v1684_v40, %v5419_v52 }
 0x1e9   : > { %v1418_v19 = vpop.permute.xlu1 %1417  ;;  %v1750_v16 = vsel %vm1726_vm9, %v1717_v55, %v5451_v31  ;;  %v567_v31 = vld [vmem:[#allocation2 + $0x182] sm:$0xff] }
 0x1ea   : > { %v5501_v8 = vpop.permute.xlu0 %1005  ;;  %v1783_v42 = vsel %vm1759_vm10, %v1750_v16, %v5457_v24  ;;  %v6876_v16 = vld [vmem:[#allocation10_spill] sm:$0xff] }
 0x1eb   : > { %1269 = vrot.lane.b32.xlu1 %v488_v50, %s4418_s24  ;;  %v568_v50 = vld [vmem:[#allocation2 + $0x18a] sm:$0xff] }
 0x1ec   : > { %1427 = vrot.lane.b32.xlu0 %v535_v36, %s4419_s25 }
 0x1ed   : > { %v1544_v46 = vpop.permute.xlu1 %1543 }
 0x1ee   : > { %v1848_v37 = vsel %vm1825_vm12, %v1815_v1, %v1544_v46  ;;  %v5514_v27 = vpop.permute.xlu0 %1131 }
 0x1ef   : > { %1395 = vrot.lane.b32.xlu1 %v519_v48, %s4419_s25  ;;  %4343 = vmatprep.mubr.msk.f32.mxu1 %vm1869_vm13, %v1848_v37 }
 0x1f0   : > { %1015 = vrot.lane.b32.xlu0 %v519_v48, %s4416_s22  ;;  %v6872_v48 = vld [vmem:[#allocation33_spill] sm:$0xff] }
 0x1f1   : > { %v5523_v63 = vpop.permute.xlu1 %1037 }
 0x1f2   : > { %v1514_v4 = vpop.permute.xlu0 %1513 }
 0x1f3   : > { %921 = vrot.lane.b32.xlu1 %v504_v13, %s4415_s21  ;;  %v1833_v7 = vsel %vm1825_vm12, %v1800_v59, %v1514_v4  ;;  %v1816_v13 = vsel %vm1792_vm11, %v1783_v42, %v1418_v19  ;;  %v506_v59 = vld [vmem:[#allocation2 + $0x1a0] sm:$0xff] }
 0x1f4   : > { %1397 = vrot.lane.b32.xlu0 %v520_v3, %s4419_s25  ;;  %4320 = vmatmul.mubr.msk.f32.gmra.mrb[6].mxu0 %vm1869_vm13, %v1833_v7  ;;  %v522_v7 = vld [vmem:[#allocation2 + $0xe1] sm:$0xff] }
 0x1f5   : > { %v5537_v51 = vpop.permute.xlu1 %1163 }
 0x1f6   : > { %v5544_v62 = vpop.permute.xlu0 %1133 }
 0x1f7   : > { %1047 = vrot.lane.b32.xlu1 %v535_v36, %s4416_s22  ;;  %v6871_v36 = vld [vmem:[#allocation6_spill] sm:$0xff] }
 0x1f8   : > { %1523 = vrot.lane.b32.xlu0 %v551_v49, %s4421_s7  ;;  %v1603_v57 = vsel %vm171_vm0, %v4392_v54, %v6871_v36  ;;  %v554_v54 = vld [vmem:[#allocation2 + $0xe2] sm:$0xff] }
 0x1f9   : > { %v1546_v9 = vpop.permute.xlu1 %1545  ;;  %v1636_v14 = vsel %vm1627_vm6, %v1603_v57, %v6872_v48  ;;  %v4395_v36 = vld [vmem:[#allocation2 + $0x128] sm:$0xff]  ;;  %v6879_v57 = vld [vmem:[#allocation23_spill] sm:$0xff] }
 0x1fa   : > { %v1849_v60 = vsel %vm1825_vm12, %v1816_v13, %v1546_v9  ;;  %v1260_v52 = vpop.permute.xlu0 %1259  ;;  %v1669_v1 = vsel %vm1660_vm7, %v1636_v14, %v6873_v35  ;;  %v6877_v13 = vld [vmem:[#allocation36_spill] sm:$0xff]  ;;  %v1620_v48 = vsel %vm171_vm0, %v4395_v36, %v6879_v57  ;;  %v4397_v36 = vld [vmem:[#allocation2 + $0x90] sm:$0xff] }
 0x1fb   : > { %1429 = vrot.lane.b32.xlu1 %v536_v12, %s4419_s25  ;;  %4344 = vmatmul.mubr.msk.f32.gmra.mrb[6].mxu1 %vm1869_vm13, %v1849_v60  ;;  %v1702_v29 = vsel %vm1693_vm8, %v1669_v1, %v5463_v38  ;;  %v6875_v38 = vld [vmem:[#allocation44_spill] sm:$0xff]  ;;  %v6887_v57 = vld [vmem:[#allocation11_spill] sm:$0xff] }
 0x1fc   : > { %1017 = vrot.lane.b32.xlu0 %v520_v3, %s4416_s22  ;;  %v1735_v37 = vsel %vm1726_vm9, %v1702_v29, %v5514_v27  ;;  %v1619_v3 = vsel %vm171_vm0, %v4393_v58, %v6874_v32  ;;  %v553_v60 = vld [vmem:[#allocation2 + $0xda] sm:$0xff] }
 0x1fd   : > { %v5555_v43 = vpop.permute.xlu1 %1165  ;;  %v1768_v17 = vsel %vm1759_vm10, %v1735_v37, %v1260_v52  ;;  %v1652_v5 = vsel %vm1627_vm6, %v1619_v3, %v6875_v38  ;;  %v6878_v52 = vld [vmem:[#allocation58_spill] sm:$0xff]  ;;  %v569_v1 = vld [vmem:[#allocation2 + $0x19a] sm:$0xff] }
 0x1fe   : > { %v5557_v26 = vpop.permute.xlu0 %911  ;;  %v1685_v4 = vsel %vm1660_vm7, %v1652_v5, %v5453_v20  ;;  %v4394_v20 = vld [vmem:[#allocation2 + $0x68] sm:$0xff] }
 0x1ff   : > { %1555 = vrot.lane.b32.xlu1 %v567_v31, %s4421_s7  ;;  %v1718_v61 = vsel %vm1693_vm8, %v1685_v4, %v5482_v30  ;;  %v1604_v42 = vsel %vm171_vm0, %v4394_v20, %v6876_v16  ;;  %v6881_v4 = vld [vmem:[#allocation8_spill] sm:$0xff] }
 0x200   : > { %1143 = vrot.lane.b32.xlu0 %v551_v49, %s4417_s23  ;;  %v1751_v0 = vsel %vm1726_vm9, %v1718_v61, %v5537_v51  ;;  %v537_v49 = vld [vmem:[#allocation2 + $0x199] sm:$0xff]  ;;  %v1637_v9 = vsel %vm1627_vm6, %v1604_v42, %v6877_v13 }
 0x201   : > { %v1292_v24 = vpop.permute.xlu1 %1291  ;;  %v6884_v13 = vld [vmem:[#allocation21_spill] sm:$0xff] }
 0x202   : > { %v5561_v47 = vpop.permute.xlu0 %1293  ;;  %v1784_v55 = vsel %vm1759_vm10, %v1751_v0, %v1292_v24 }
 0x203   : > { %1049 = vrot.lane.b32.xlu1 %v536_v12, %s4416_s22 }
 0x204   : > { %1525 = vrot.lane.b32.xlu0 %v552_v45, %s4421_s7 }
 0x205   : > { %v1262_v15 = vpop.permute.xlu1 %1261 }
 0x206   : > { %v1420_v22 = vpop.permute.xlu0 %1419 }
 0x207   : > { %1175 = vrot.lane.b32.xlu1 %v567_v31, %s4417_s23  ;;  %v1817_v12 = vsel %vm1792_vm11, %v1784_v55, %v1420_v22  ;;  %v1670_v31 = vsel %vm1660_vm7, %v1637_v9, %v6878_v52  ;;  %v538_v22 = vld [vmem:[#allocation2 + $0x1a1] sm:$0xff]  ;;  %v6885_v9 = vld [vmem:[#allocation67_spill] sm:$0xff] }
 0x208   : > { %1145 = vrot.lane.b32.xlu0 %v552_v45, %s4417_s23  ;;  %v1703_v45 = vsel %vm1693_vm8, %v1670_v31, %v5501_v8  ;;  %v6880_v8 = vld [vmem:[#allocation47_spill] sm:$0xff]  ;;  %v6883_v55 = vld [vmem:[#allocation57_spill] sm:$0xff]  ;;  %v6886_v31 = vld [vmem:[#allocation46_spill] sm:$0xff] }
 0x209   : > { %v1388_v41 = vpop.permute.xlu1 %1387  ;;  %v1653_v35 = vsel %vm1627_vm6, %v1620_v48, %v6880_v8  ;;  %v1607_v48 = vsel %vm171_vm0, %v4397_v36, %v6887_v57  ;;  %v6903_v36 = vld [vmem:[#allocation48_spill] sm:$0xff] }
 0x20a   : > { %v5567_v19 = vpop.permute.xlu0 %1007  ;;  %v1801_v39 = vsel %vm1792_vm11, %v1768_v17, %v1388_v41  ;;  %v1686_v29 = vsel %vm1660_vm7, %v1653_v35, %v5470_v6  ;;  %v6889_v35 = vld [vmem:[#allocation13_spill] sm:$0xff] }
 0x20b   : > { %1557 = vrot.lane.b32.xlu1 %v568_v50, %s4421_s7 }
 0x20c   : > { %1271 = vrot.lane.b32.xlu0 %v489_v23, %s4418_s24 }
 0x20d   : > { %v5573_v44 = vpop.permute.xlu1 %913 }
 0x20e   : > { %v1390_v46 = vpop.permute.xlu0 %1389 }
 0x20f   : > { %1177 = vrot.lane.b32.xlu1 %v568_v50, %s4417_s23  ;;  %v1736_v50 = vsel %vm1726_vm9, %v1703_v45, %v5544_v62 }
 0x210   : > { %1273 = vrot.lane.b32.xlu0 %v490_v53, %s4418_s24  ;;  %v1769_v23 = vsel %vm1759_vm10, %v1736_v50, %v1262_v15 }
 0x211   : > { %v5585_v10 = vpop.permute.xlu1 %1039  ;;  %v1802_v14 = vsel %vm1792_vm11, %v1769_v23, %v1390_v46  ;;  %v1719_v46 = vsel %vm1693_vm8, %v1686_v29, %v5523_v63  ;;  %v4400_v29 = vld [vmem:[#allocation2 + $0x98] sm:$0xff] }
 0x212   : > { %v1516_v56 = vpop.permute.xlu0 %1515 }
 0x213   : > { %1303 = vrot.lane.b32.xlu1 %v505_v2, %s4418_s24  ;;  %v1834_v27 = vsel %vm1825_vm12, %v1801_v39, %v1516_v56  ;;  %v1752_v2 = vsel %vm1726_vm9, %v1719_v46, %v5555_v43 }
 0x214   : > { %1399 = vrot.lane.b32.xlu0 %v521_v25, %s4419_s25  ;;  %4322 = vmatprep.mubr.msk.f32.mxu0 %vm1869_vm13, %v1834_v27  ;;  %v1785_v17 = vsel %vm1759_vm10, %v1752_v2, %v5561_v47  ;;  %v570_v25 = vld [vmem:[#allocation2 + $0x1a2] sm:$0xff] }
 0x215   : > { %v1422_v34 = vpop.permute.xlu1 %1421 }
 0x216   : > { %v5603_v40 = vpop.permute.xlu0 %1009  ;;  %v1818_v6 = vsel %vm1792_vm11, %v1785_v17, %v1422_v34  ;;  %v4422_v17 = vmov 1983009808  }
 0x217   : > { %1305 = vrot.lane.b32.xlu1 %v506_v59, %s4418_s24  ;;  %v4396_v59 = vld [vmem:[#allocation2 + $0x78] sm:$0xff] }
 0x218   : > { %1401 = vrot.lane.b32.xlu0 %v522_v7, %s4419_s25  ;;  %v1605_v34 = vsel %vm171_vm0, %v4396_v59, %v6881_v4  ;;  %v6882_v7 = vld [vmem:[#allocation35_spill] sm:$0xff]  ;;  %v6893_v4 = vld [vmem:[#allocation38_spill] sm:$0xff] }
 0x219   : > { %v1548_v30 = vpop.permute.xlu1 %1547  ;;  %v1638_v0 = vsel %vm1627_vm6, %v1605_v34, %v6882_v7  ;;  %v6894_v7 = vld [vmem:[#allocation26_spill] sm:$0xff] }
 0x21a   : > { %v1850_v51 = vsel %vm1825_vm12, %v1817_v12, %v1548_v30  ;;  %v1136_v24 = vpop.permute.xlu0 %1135 }
 0x21b   : > { %1431 = vrot.lane.b32.xlu1 %v537_v49, %s4419_s25  ;;  %4346 = vmatprep.mubr.msk.f32.mxu1 %vm1869_vm13, %v1850_v51  ;;  %v1671_v49 = vsel %vm1660_vm7, %v1638_v0, %v6883_v55  ;;  %v1621_v51 = vsel %vm171_vm0, %v6885_v9, %v6884_v13  ;;  %v6895_v0 = vld [vmem:[#allocation28_spill] sm:$0xff]  ;;  %v6898_v13 = vld [vmem:[#allocation30_spill] sm:$0xff] }
 0x21c   : > { %1527 = vrot.lane.b32.xlu0 %v553_v60, %s4421_s7  ;;  %v1704_v16 = vsel %vm1693_vm8, %v1671_v49, %v5567_v19  ;;  %v1654_v45 = vsel %vm1627_vm6, %v1621_v51, %v6886_v31  ;;  %v1625_v55 = vsel %vm171_vm0, %v5367_v18, %v6895_v0  ;;  %v6896_v49 = vld [vmem:[#allocation29_spill] sm:$0xff]  ;;  %v1626_v9 = vsel %vm171_vm0, %v5383_v28, %v6898_v13 }
 0x21d   : > { %v5623_v41 = vpop.permute.xlu1 %1041  ;;  %v1737_v42 = vsel %vm1726_vm9, %v1704_v16, %v1136_v24  ;;  %v1687_v19 = vsel %vm1660_vm7, %v1654_v45, %v5557_v26  ;;  %v4399_v26 = vld [vmem:[#allocation2 + $0xa8] sm:$0xff]  ;;  %v1624_v16 = vsel %vm171_vm0, %v5269_v33, %v6896_v49  ;;  %v6899_v51 = vld [vmem:[#allocation37_spill] sm:$0xff]  ;;  %v6901_v33 = vld [vmem:[#allocation40_spill] sm:$0xff] }
 0x21e   : > { %v1518_v53 = vpop.permute.xlu0 %1517  ;;  %v1720_v50 = vsel %vm1693_vm8, %v1687_v19, %v5585_v10  ;;  %v6890_v10 = vld [vmem:[#allocation14_spill] sm:$0xff] }
 0x21f   : > { %1433 = vrot.lane.b32.xlu1 %v538_v22, %s4419_s25  ;;  %v1835_v62 = vsel %vm1825_vm12, %v1802_v14, %v1518_v53  ;;  %v4398_v14 = vld [vmem:[#allocation2 + $0x80] sm:$0xff]  ;;  %v6888_v53 = vld [vmem:[#allocation12_spill] sm:$0xff] }
 0x220   : > { %1529 = vrot.lane.b32.xlu0 %v554_v54, %s4421_s7  ;;  %4323 = vmatmul.mubr.msk.f32.gmra.mrb[8].mxu0 %vm1869_vm13, %v1835_v62  ;;  %v1606_v8 = vsel %vm171_vm0, %v4398_v14, %v6888_v53  ;;  %v1609_v62 = vsel %vm171_vm0, %v4399_v26, %v6889_v35  ;;  %v5745_v53 = vld [vmem:[%s6774_s2] ss:$0 sm:$0xff]  ;;  %v6906_v26 = vld [vmem:[#allocation51_spill] sm:$0xff] }
 0x221   : > { %v1168_v15 = vpop.permute.xlu1 %1167  ;;  %v1657_v35 = vsel %vm1627_vm6, %v1624_v16, %v6906_v26 }
 0x222   : > { %v5641_v37 = vpop.permute.xlu0 %1137  ;;  %v1753_v23 = vsel %vm1726_vm9, %v1720_v50, %v1168_v15  ;;  %v1608_v15 = vsel %vm171_vm0, %v4400_v29, %v6890_v10 }
 0x223   : > { %1559 = vrot.lane.b32.xlu1 %v569_v1, %s4421_s7  ;;  %v1641_v31 = vsel %vm1627_vm6, %v1608_v15, %v6901_v33 }
 0x225   : > { %v1550_v58 = vpop.permute.xlu1 %1549 }
 0x226   : > { %v1851_v32 = vsel %vm1825_vm12, %v1818_v6, %v1550_v58  ;;  %v1264_v3 = vpop.permute.xlu0 %1263  ;;  %v2263_v6 = vlaneseq  ;;  %v4401_v58 = vld [vmem:[#allocation2 + $0xb0] sm:$0xff] }
 0x227   : > { %1561 = vrot.lane.b32.xlu1 %v570_v25, %s4421_s7  ;;  %4347 = vmatmul.mubr.msk.f32.gmra.mrb[8].mxu1 %vm1869_vm13, %v1851_v32  ;;  %v1770_v30 = vsel %vm1759_vm10, %v1737_v42, %v1264_v3  ;;  %v2261_v25 = vunpack.c.l.s4 %v4422_v17  ;;  %v6891_v32 = vld [vmem:[#allocation15_spill] sm:$0xff]  ;;  %v6897_v42 = vld [vmem:[#allocation60_spill] sm:$0xff] }
 0x228   : > { %v1610_v3 = vsel %vm171_vm0, %v4401_v58, %v6891_v32  ;;  %v2264_v50 = vshrl.u32 %v2263_v6, 7  ;;  %v6910_v58 = vld [vmem:[#allocation62_spill] sm:$0xff] }
 0x229   : > { %v5650_v63 = vpop.permute.xlu1 %1169  ;;  %v2262_v19 = vunpack.c.0.s8 %v2261_v25  ;;  %v1674_v32 = vsel %vm1660_vm7, %v1641_v31, %v6910_v58 }
 0x22a   : > { %v5652_v43 = vpop.permute.xlu0 %915 }
 0x22d   : > { %v1296_v39 = vpop.permute.xlu1 %1295 }
 0x22e   : > { %v5654_v56 = vpop.permute.xlu0 %1297  ;;  %v1786_v1 = vsel %vm1759_vm10, %v1753_v23, %v1296_v39  ;;  %v1639_v39 = vsel %vm1627_vm6, %v1606_v8, %v6893_v4  ;;  %v6902_v23 = vld [vmem:[#allocation41_spill] sm:$0xff] }
 0x22f   : > { %v1643_v28 = vsel %vm1627_vm6, %v1610_v3, %v6902_v23 }
 0x231   : > { %v5656_v38 = vpop.permute.xlu1 %1265 }
 0x232   : > { %v1424_v47 = vpop.permute.xlu0 %1423 }
 0x233   : > { %v1819_v46 = vsel %vm1792_vm11, %v1786_v1, %v1424_v47  ;;  %v1622_v47 = vsel %vm171_vm0, %v5159_v11, %v6894_v7  ;;  %v1640_v11 = vsel %vm1627_vm6, %v1607_v48, %v6899_v51  ;;  %v6904_v48 = vld [vmem:[#allocation49_spill] sm:$0xff] }
 0x234   : > { %v1655_v14 = vsel %vm1627_vm6, %v1622_v47, %v6904_v48 }
 0x235   : > { %v1392_v5 = vpop.permute.xlu1 %1391  ;;  %v1688_v17 = vsel %vm1660_vm7, %v1655_v14, %v5573_v44 }
 0x236   : > { %v5658_v27 = vpop.permute.xlu0 %1011  ;;  %v1803_v60 = vsel %vm1792_vm11, %v1770_v30, %v1392_v5  ;;  %v6892_v5 = vld [vmem:[#allocation25_spill] sm:$0xff] }
 0x237   : > { %v1623_v59 = vsel %vm171_vm0, %v5256_v21, %v6892_v5  ;;  %v1672_v21 = vsel %vm1660_vm7, %v1639_v39, %v6897_v42  ;;  %v5772_v5 = vsub.s32 %v2262_v19, %v2264_v50  ;;  %v6911_v39 = vld [vmem:[#allocation63_spill] sm:$0xff]  ;;  %vm4085_vm0 = vcmask 1041409  }
 0x238   : > { %v1656_v57 = vsel %vm1627_vm6, %v1623_v59, %v6903_v36  ;;  %v5779_v44 = vsel %vm1660_vm7, %v1643_v28, %v6911_v39 }
 0x239   : > { %v5662_v61 = vpop.permute.xlu1 %917 }
 0x23a   : > { %v1394_v20 = vpop.permute.xlu0 %1393  ;;  %v1690_v16 = vsel %vm1660_vm7, %v1657_v35, %v5662_v61 }
 0x23d   : > { %v5671_v12 = vpop.permute.xlu1 %1043 }
 0x23e   : > { %v1520_v52 = vpop.permute.xlu0 %1519 }
 0x23f   : > { %v1836_v22 = vsel %vm1825_vm12, %v1803_v60, %v1520_v52  ;;  %v6900_v60 = vld [vmem:[#allocation39_spill] sm:$0xff]  ;;  %v1705_v52 = vsel %vm1693_vm8, %v1672_v21, %v5603_v40 }
 0x240   : > { %4325 = vmatprep.mubr.msk.f32.mxu0 %vm1869_vm13, %v1836_v22  ;;  %v1642_v18 = vsel %vm1627_vm6, %v1609_v62, %v6900_v60  ;;  %v1738_v45 = vsel %vm1726_vm9, %v1705_v52, %v5641_v37  ;;  %v6905_v37 = vld [vmem:[#allocation50_spill] sm:$0xff]  ;;  %v6907_v62 = vld [vmem:[#allocation52_spill] sm:$0xff] }
 0x241   : > { %v5683_v24 = vpop.permute.xlu1 %1425  ;;  %v1771_v40 = vsel %vm1759_vm10, %v1738_v45, %v5656_v38  ;;  %v5749_v8 = vsel %vm1627_vm6, %v1625_v55, %v6905_v37  ;;  %v5755_v1 = vsel %vm1627_vm6, %v1626_v9, %v6907_v62  ;;  %v6908_v38 = vld [vmem:[#allocation59_spill] sm:$0xff]  ;;  %vm4097_vm6 = vcmask 1047559  }
 0x242   : > { %v5689_v54 = vpop.permute.xlu0 %1013  ;;  %v1804_v29 = vsel %vm1792_vm11, %v1771_v40, %v1394_v20  ;;  %v1673_v15 = vsel %vm1660_vm7, %v1640_v11, %v6908_v38  ;;  %v1721_v20 = vsel %vm1693_vm8, %v1688_v17, %v5623_v41  ;;  %v1689_v41 = vsel %vm1660_vm7, %v1656_v57, %v5652_v43 }
 0x243   : > { %v1706_v0 = vsel %vm1693_vm8, %v1673_v15, %v5658_v27 }
 0x245   : > { %v1552_v2 = vpop.permute.xlu1 %1551 }
 0x246   : > { %v1852_v34 = vsel %vm1825_vm12, %v1819_v46, %v1552_v2  ;;  %v1140_v30 = vpop.permute.xlu0 %1139  ;;  %v6909_v46 = vld [vmem:[#allocation61_spill] sm:$0xff] }
 0x247   : > { %4349 = vmatprep.mubr.msk.f32.mxu1 %vm1869_vm13, %v1852_v34  ;;  %v5762_v2 = vsel %vm1660_vm7, %v1642_v18, %v6909_v46  ;;  %v1754_v34 = vsel %vm1726_vm9, %v1721_v20, %v5650_v63  ;;  %v5796_v63 = vsel %vm1693_vm8, %v1689_v41, %v5671_v12  ;;  %v5805_v27 = vsel %vm1726_vm9, %v1706_v0, %v1140_v30 }
 0x248   : > { %v1787_v47 = vsel %vm1759_vm10, %v1754_v34, %v5654_v56  ;;  %v5802_v56 = vsel %vm1693_vm8, %v1674_v32, %v5689_v54 }
 0x249   : > { %v1046_v22 = vpop.permute.xlu1 %1045  ;;  %v1820_v42 = vsel %vm1792_vm11, %v1787_v47, %v5683_v24 }
 0x24a   : > { %v1522_v10 = vpop.permute.xlu0 %1521  ;;  %v4312_v6 = vpop.f32.mrb[0].mxu0  ;;  %v5809_v61 = vsel %vm1693_vm8, %v1690_v16, %v1046_v22 }
 0x24b   : > { %v1837_v25 = vsel %vm1825_vm12, %v1804_v29, %v1522_v10  ;;  %v2042_v3 = vadd.f32 %v4312_v6, %v5745_v53  ;;  %v2036_v59 = vpop.f32.mrb[1].mxu0 }
 0x24c   : > { %4326 = vmatmul.mubr.msk.f32.gmra.mrb[10].mxu0 %vm1869_vm13, %v1837_v25  ;;  %v2037_v7 = vadd.f32 %v5745_v53, %v2036_v59 }
 0x24d   : > { %v5774_v4 = vpop.permute.xlu1 %1171  ;;  %v2196_v55 = vmax.f32 %v2042_v3, 0.0 }
 0x24e   : > { %v5790_v49 = vpop.permute.xlu0 %1141  ;;  %v2195_v43 = vmax.f32 %v2037_v7, 0.0 }
 0x24f   : > { %v2276_v21 = vcombine.high %v2196_v55, %v2196_v55  ;;  %v2283_v13 = vrot.slane %v2196_v55, %v5772_v5 }
 0x250   : > { %v2259_v12 = vcombine.high %v2195_v43, %v2195_v43  ;;  %v2266_v51 = vrot.slane %v2195_v43, %v5772_v5 }
 0x251   : > { %v1554_v9 = vpop.permute.xlu1 %1553  ;;  %v2290_v60 = vrot.slane %v2276_v21, %v5772_v5  ;;  %v2291_v54 = vcombine.high %v2283_v13, %v2283_v13  ;;  %v2960_v18 = vsel %vm2931_vm14, %v2283_v13, -inf }
 0x252   : > { %v1853_v24 = vsel %vm1825_vm12, %v1820_v42, %v1554_v9  ;;  %v4336_v11 = vpop.f32.mrb[0].mxu1  ;;  %v5818_v52 = vpop.permute.xlu0 %1267  ;;  %v2961_v31 = vrot.slane %v2960_v18, 4  ;;  %v2273_v45 = vrot.slane %v2259_v12, %v5772_v5  ;;  %v2274_v22 = vcombine.high %v2266_v51, %v2266_v51 }
 0x253   : > { %v5816_v30 = vadd.f32 %v4336_v11, %v5745_v53  ;;  %v5820_v33 = vpop.f32.mrb[1].mxu1  ;;  %4350 = vmatmul.mubr.msk.f32.gmra.mrb[10].mxu1 %vm1869_vm13, %v1853_v24  ;;  %v2932_v19 = vsel %vm2931_vm14, %v2266_v51, -inf  ;;  %v2292_v50 = vcombine.high %v2290_v60, %v2290_v60  ;;  %v2967_v23 = vsel %vm2931_vm14, %v2291_v54, -inf }
 0x254   : > { %v2974_v28 = vsel %vm2931_vm14, %v2290_v60, -inf  ;;  %v2933_v36 = vrot.slane %v2932_v19, 4  ;;  %v2962_v48 = vmax.f32 %v2960_v18, %v2961_v31  ;;  %v2968_v14 = vrot.slane %v2967_v23, 4 }
 0x255   : > { %v5827_v57 = vpop.permute.xlu1 %1173  ;;  %v2975_v40 = vrot.slane %v2974_v28, 4  ;;  %v2275_v37 = vcombine.high %v2273_v45, %v2273_v45  ;;  %v2981_v26 = vsel %vm2931_vm14, %v2292_v50, -inf  ;;  %v2939_v62 = vsel %vm2931_vm14, %v2274_v22, -inf }
 0x256   : > { %v2934_v35 = vmax.f32 %v2932_v19, %v2933_v36  ;;  %v2946_v29 = vsel %vm2931_vm14, %v2273_v45, -inf  ;;  %v5832_v10 = vpop.permute.xlu0 %919  ;;  %v2963_v38 = vrot.slane %v2962_v48, 2  ;;  %v2969_v15 = vmax.f32 %v2967_v23, %v2968_v14 }
 0x257   : > { %v2976_v46 = vmax.f32 %v2974_v28, %v2975_v40  ;;  %v2982_v17 = vrot.slane %v2981_v26, 4  ;;  %v2940_v6 = vrot.slane %v2939_v62, 4  ;;  %v2947_v58 = vrot.slane %v2946_v29, 4 }
 0x258   : > { %v2935_v25 = vrot.slane %v2934_v35, 2  ;;  %v2953_v32 = vsel %vm2931_vm14, %v2275_v37, -inf  ;;  %v2964_v3 = vmax.f32 %v2962_v48, %v2963_v38  ;;  %v2970_v59 = vrot.slane %v2969_v15, 2 }
 0x259   : > { %v5835_v20 = vpop.permute.xlu1 %1299  ;;  %v2977_v39 = vrot.slane %v2976_v46, 2  ;;  %v2983_v34 = vmax.f32 %v2981_v26, %v2982_v17  ;;  %v2941_v41 = vmax.f32 %v2939_v62, %v2940_v6  ;;  %v2948_v47 = vmax.f32 %v2946_v29, %v2947_v58 }
 0x25a   : > { %v2936_v7 = vmax.f32 %v2934_v35, %v2935_v25  ;;  %v2954_v0 = vrot.slane %v2953_v32, 4  ;;  %v5837_v55 = vpop.permute.xlu0 %1301  ;;  %v2965_v16 = vrot.slane %v2964_v3, 1  ;;  %v2971_v42 = vmax.f32 %v2969_v15, %v2970_v59 }
 0x25b   : > { %v2978_v43 = vmax.f32 %v2976_v46, %v2977_v39  ;;  %v2984_v21 = vrot.slane %v2983_v34, 2  ;;  %v2942_v9 = vrot.slane %v2941_v41, 2  ;;  %v2949_v12 = vrot.slane %v2948_v47, 2 }
 0x25c   : > { %v2937_v13 = vrot.slane %v2936_v7, 1  ;;  %v2955_v51 = vmax.f32 %v2953_v32, %v2954_v0  ;;  %v2966_v11 = vmax.f32 %v2964_v3, %v2965_v16  ;;  %v2972_v60 = vrot.slane %v2971_v42, 1 }
 0x25d   : > { %v5839_v24 = vpop.permute.xlu1 %1269  ;;  %v2979_v54 = vrot.slane %v2978_v43, 1  ;;  %v2985_v18 = vmax.f32 %v2983_v34, %v2984_v21  ;;  %v2943_v45 = vmax.f32 %v2941_v41, %v2942_v9  ;;  %v2950_v22 = vmax.f32 %v2948_v47, %v2949_v12 }
 0x25e   : > { %v2938_v31 = vmax.f32 %v2936_v7, %v2937_v13  ;;  %v2956_v19 = vrot.slane %v2955_v51, 2  ;;  %v5841_v50 = vpop.permute.xlu0 %1427  ;;  %v2973_v23 = vmax.f32 %v2971_v42, %v2972_v60  ;;  %v1755_v48 = vsel %vm1726_vm9, %v5796_v63, %v5774_v4 }
 0x25f   : > { %v2980_v28 = vmax.f32 %v2978_v43, %v2979_v54  ;;  %v2986_v36 = vrot.slane %v2985_v18, 1  ;;  %v2944_v14 = vrot.slane %v2943_v45, 1  ;;  %v2951_v40 = vrot.slane %v2950_v22, 1 }
 0x260   : > { %v2957_v37 = vmax.f32 %v2955_v51, %v2956_v19  ;;  %v5849_v26 = vsel %vm1726_vm9, %v5802_v56, %v5790_v49  ;;  %v5854_v29 = vsel %vm3828_vm15, %v2966_v11, -inf  ;;  %v5857_v38 = vsel %vm3828_vm15, %v2938_v31, -inf }
 0x261   : > { %v5851_v35 = vpop.permute.xlu1 %1395  ;;  %v2987_v62 = vmax.f32 %v2985_v18, %v2986_v36  ;;  %v2212_v15 = vmax.f32 %v5816_v30, 0.0  ;;  %v5861_v4 = vsel %vm3828_vm15, %v2973_v23, -inf  ;;  %v2945_v63 = vmax.f32 %v2943_v45, %v2944_v14 }
 0x262   : > { %v2952_v46 = vmax.f32 %v2950_v22, %v2951_v40  ;;  %v2958_v17 = vrot.slane %v2957_v37, 1  ;;  %v5863_v25 = vpop.permute.xlu0 %1015  ;;  %v5866_v49 = vsel %vm3828_vm15, %v2980_v28, -inf  ;;  %v2117_v58 = vadd.f32 %v5745_v53, %v5820_v33 }
 0x263   : > { %v2548_v56 = vcombine.high %v2212_v15, %v2212_v15  ;;  %v2555_v6 = vrot.slane %v2212_v15, %v5772_v5  ;;  %v5872_v32 = vsel %vm3828_vm15, %v2987_v62, -inf  ;;  %v5875_v3 = vsel %vm3828_vm15, %v2945_v63, -inf }
 0x264   : > { %v2959_v30 = vmax.f32 %v2957_v37, %v2958_v17  ;;  %v5880_v59 = vsel %vm1759_vm10, %v5805_v27, %v5818_v52  ;;  %v2211_v33 = vmax.f32 %v2117_v58, 0.0  ;;  %v5887_v47 = vsel %vm3828_vm15, %v2952_v46, -inf }
 0x265   : > { %v5882_v39 = vpop.permute.xlu1 %921  ;;  %v2562_v34 = vrot.slane %v2548_v56, %v5772_v5  ;;  %v2563_v7 = vcombine.high %v2555_v6, %v2555_v6  ;;  %v3408_v41 = vsel %vm2931_vm14, %v2555_v6, -inf  ;;  %v1756_v27 = vsel %vm1726_vm9, %v5809_v61, %v5827_v57 }
 0x266   : > { %v5890_v0 = vsel %vm3828_vm15, %v2959_v30, -inf  ;;  %v3409_v16 = vrot.slane %v3408_v41, 4  ;;  %v5895_v52 = vpop.permute.xlu0 %1397  ;;  %v2531_v13 = vcombine.high %v2211_v33, %v2211_v33  ;;  %v2538_v11 = vrot.slane %v2211_v33, %v5772_v5 }
 0x267   : > { %v2564_v42 = vcombine.high %v2562_v34, %v2562_v34  ;;  %v3415_v43 = vsel %vm2931_vm14, %v2563_v7, -inf  ;;  %v3422_v21 = vsel %vm2931_vm14, %v2562_v34, -inf  ;;  %v5907_v61 = vsel %vm1660_vm7, %v5749_v8, %v5832_v10 }
 0x268   : > { %v3410_v9 = vmax.f32 %v3408_v41, %v3409_v16  ;;  %v3416_v12 = vrot.slane %v3415_v43, 4  ;;  %v3423_v51 = vrot.slane %v3422_v21, 4  ;;  %v2545_v18 = vrot.slane %v2531_v13, %v5772_v5 }
 0x269   : > { %v5900_v60 = vpop.permute.xlu1 %1047  ;;  %v3429_v54 = vsel %vm2931_vm14, %v2564_v42, -inf  ;;  %v1788_v57 = vsel %vm1759_vm10, %v1755_v48, %v5835_v20  ;;  %v2546_v28 = vcombine.high %v2538_v11, %v2538_v11  ;;  %v3380_v14 = vsel %vm2931_vm14, %v2538_v11, -inf }
 0x26a   : > { %v3411_v31 = vrot.slane %v3410_v9, 2  ;;  %v3417_v45 = vmax.f32 %v3415_v43, %v3416_v12  ;;  %v3424_v22 = vmax.f32 %v3422_v21, %v3423_v51  ;;  %v3430_v19 = vrot.slane %v3429_v54, 4  ;;  %v5911_v23 = vpop.permute.xlu0 %1523 }
 0x26b   : > { %v2547_v36 = vcombine.high %v2545_v18, %v2545_v18  ;;  %v3394_v40 = vsel %vm2931_vm14, %v2545_v18, -inf  ;;  %v3381_v63 = vrot.slane %v3380_v14, 4  ;;  %v3387_v20 = vsel %vm2931_vm14, %v2546_v28, -inf }
 0x26c   : > { %v3412_v37 = vmax.f32 %v3410_v9, %v3411_v31  ;;  %v3418_v62 = vrot.slane %v3417_v45, 2  ;;  %v3425_v15 = vrot.slane %v3424_v22, 2  ;;  %v3431_v8 = vmax.f32 %v3429_v54, %v3430_v19 }
 0x26d   : > { %v1430_v10 = vpop.permute.xlu1 %1429  ;;  %v3395_v48 = vrot.slane %v3394_v40, 4  ;;  %v3401_v46 = vsel %vm2931_vm14, %v2547_v36, -inf  ;;  %v3382_v34 = vmax.f32 %v3380_v14, %v3381_v63  ;;  %v3388_v7 = vrot.slane %v3387_v20, 4 }
 0x26e   : > { %v3413_v17 = vrot.slane %v3412_v37, 1  ;;  %v3419_v56 = vmax.f32 %v3417_v45, %v3418_v62  ;;  %v3426_v6 = vmax.f32 %v3424_v22, %v3425_v15  ;;  %v3432_v58 = vrot.slane %v3431_v8, 2  ;;  %v1018_v30 = vpop.permute.xlu0 %1017 }
 0x26f   : > { %v3396_v41 = vmax.f32 %v3394_v40, %v3395_v48  ;;  %v3402_v33 = vrot.slane %v3401_v46, 4  ;;  %v3383_v9 = vrot.slane %v3382_v34, 2  ;;  %v3389_v12 = vmax.f32 %v3387_v20, %v3388_v7 }
 0x270   : > { %v3414_v16 = vmax.f32 %v3412_v37, %v3413_v17  ;;  %v3420_v42 = vrot.slane %v3419_v56, 1  ;;  %v3427_v43 = vrot.slane %v3426_v6, 1  ;;  %v3433_v21 = vmax.f32 %v3431_v8, %v3432_v58 }
 0x271   : > { %v1556_v13 = vpop.permute.xlu1 %1555  ;;  %v3397_v51 = vrot.slane %v3396_v41, 2  ;;  %v3403_v11 = vmax.f32 %v3401_v46, %v3402_v33  ;;  %v1789_v45 = vsel %vm1759_vm10, %v1756_v27, %v5837_v55  ;;  %v3384_v19 = vmax.f32 %v3382_v34, %v3383_v9 }
 0x272   : > { %v3421_v54 = vmax.f32 %v3419_v56, %v3420_v42  ;;  %v3428_v18 = vmax.f32 %v3426_v6, %v3427_v43  ;;  %v3434_v31 = vrot.slane %v3433_v21, 1  ;;  %v1144_v22 = vpop.permute.xlu0 %1143  ;;  %v3390_v28 = vrot.slane %v3389_v12, 2  ;;  %v4315_v40 = vpop.f32.mrb[2].mxu0 }
 0x273   : > { %v3398_v36 = vmax.f32 %v3396_v41, %v3397_v51  ;;  %v3404_v14 = vrot.slane %v3403_v11, 2  ;;  %v5920_v62 = vsel %vm3828_vm15, %v3414_v16, -inf  ;;  %v1773_v8 = vsel %vm1759_vm10, %v5849_v26, %v5839_v24  ;;  %v2046_v20 = vpop.f32.mrb[3].mxu0 }
 0x274   : > { %v3435_v37 = vmax.f32 %v3433_v21, %v3434_v31  ;;  %v5923_v15 = vsel %vm3828_vm15, %v3421_v54, -inf  ;;  %v3385_v55 = vrot.slane %v3384_v19, 1  ;;  %v3391_v27 = vmax.f32 %v3389_v12, %v3390_v28 }
 0x275   : > { %v1050_v63 = vpop.permute.xlu1 %1049  ;;  %v3399_v48 = vrot.slane %v3398_v36, 1  ;;  %v3405_v46 = vmax.f32 %v3403_v11, %v3404_v14  ;;  %v5929_v17 = vsel %vm3828_vm15, %v3428_v18, -inf  ;;  %v1821_v6 = vsel %vm1792_vm11, %v1788_v57, %v5841_v50 }
 0x276   : > { %v5932_v56 = vsel %vm3828_vm15, %v3435_v37, -inf  ;;  %v1805_v58 = vsel %vm1792_vm11, %v5880_v59, %v5851_v35  ;;  %v1526_v24 = vpop.permute.xlu0 %1525  ;;  %v3386_v26 = vmax.f32 %v3384_v19, %v3385_v55  ;;  %v3392_v34 = vrot.slane %v3391_v27, 1 }
 0x277   : > { %v3400_v7 = vmax.f32 %v3398_v36, %v3399_v48  ;;  %v3406_v41 = vrot.slane %v3405_v46, 1  ;;  %v1708_v33 = vsel %vm1693_vm8, %v5762_v2, %v5863_v25  ;;  %v1692_v16 = vsel %vm1660_vm7, %v5755_v1, %v5882_v39 }
 0x278   : > { %v1806_v50 = vsel %vm1792_vm11, %v1773_v8, %v5895_v52  ;;  %v1838_v57 = vsel %vm1825_vm12, %v1805_v58, %v5911_v23  ;;  %v3393_v59 = vmax.f32 %v3391_v27, %v3392_v34  ;;  %v1724_v43 = vsel %vm1693_vm8, %v5907_v61, %v5900_v60 }
 0x279   : > { %v1176_v35 = vpop.permute.xlu1 %1175  ;;  %v5949_v42 = vmax.f32 %v3405_v46, %v3406_v41  ;;  %v1822_v2 = vsel %vm1792_vm11, %v1789_v45, %v1430_v10  ;;  %4328 = vmatprep.mubr.msk.f32.mxu0 %vm1869_vm13, %v1838_v57  ;;  %v5957_v1 = vsel %vm3828_vm15, %v3386_v26, -inf  ;;  %v5960_v39 = vsel %vm3828_vm15, %v3400_v7, -inf }
 0x27a   : > { %v4339_v25 = vpop.f32.mrb[2].mxu1  ;;  %v1854_v52 = vsel %vm1825_vm12, %v1821_v6, %v1556_v13  ;;  %v2052_v23 = vadd.f32 %v4315_v40, %v5745_v53  ;;  %v1146_v21 = vpop.permute.xlu0 %1145  ;;  %v5965_v12 = vsel %vm3828_vm15, %v3393_v59, -inf  ;;  %v1709_v60 = vsel %vm1693_vm8, %v5779_v44, %v1018_v30 }
 0x27b   : > { %v2126_v9 = vpop.f32.mrb[3].mxu1  ;;  %v1741_v61 = vsel %vm1726_vm9, %v1708_v33, %v1144_v22  ;;  %4352 = vmatprep.mubr.msk.f32.mxu1 %vm1869_vm13, %v1854_v52  ;;  %v2047_v10 = vadd.f32 %v5745_v53, %v2046_v20  ;;  %v5973_v11 = vsel %vm1693_vm8, %v1692_v16, %v1050_v63  ;;  %v1839_v13 = vsel %vm1825_vm12, %v1806_v50, %v1526_v24 }
 0x27c   : > { %v2198_v51 = vmax.f32 %v2052_v23, 0.0  ;;  %v2132_v54 = vadd.f32 %v4339_v25, %v5745_v53  ;;  %v5978_v45 = vsel %vm1726_vm9, %v1724_v43, %v1176_v35  ;;  %4329 = vmatmul.mubr.msk.f32.gmra.mrb[12].mxu0 %vm1869_vm13, %v1839_v13  ;;  %v2127_v44 = vadd.f32 %v5745_v53, %v2126_v9 }
 0x27d   : > { %v1558_v18 = vpop.permute.xlu1 %1557  ;;  %v2197_v31 = vmax.f32 %v2047_v10, 0.0  ;;  %v5987_v36 = vsel %vm1726_vm9, %v1709_v60, %v1146_v21 }
 0x27e   : > { %v1855_v30 = vsel %vm1825_vm12, %v1822_v2, %v1558_v18  ;;  %v2310_v22 = vcombine.high %v2198_v51, %v2198_v51  ;;  %v2317_v19 = vrot.slane %v2198_v51, %v5772_v5  ;;  %v5984_v28 = vmax.f32 %v2132_v54, 0.0  ;;  %v1272_v14 = vpop.permute.xlu0 %1271 }
 0x27f   : > { %4353 = vmatmul.mubr.msk.f32.gmra.mrb[12].mxu1 %vm1869_vm13, %v1855_v30  ;;  %v2293_v40 = vcombine.high %v2197_v31, %v2197_v31  ;;  %v2300_v37 = vrot.slane %v2197_v31, %v5772_v5  ;;  %v5991_v8 = vmax.f32 %v2127_v44, 0.0  ;;  %v5994_v63 = vsel %vm1759_vm10, %v1741_v61, %v1272_v14 }
 0x280   : > { %v2324_v20 = vrot.slane %v2310_v22, %v5772_v5  ;;  %v2325_v55 = vcombine.high %v2317_v19, %v2317_v19  ;;  %v3016_v27 = vsel %vm2931_vm14, %v2317_v19, -inf  ;;  %v2582_v48 = vcombine.high %v5984_v28, %v5984_v28 }
 0x281   : > { %v3017_v46 = vrot.slane %v3016_v27, 4  ;;  %v2307_v6 = vrot.slane %v2293_v40, %v5772_v5  ;;  %v2308_v58 = vcombine.high %v2300_v37, %v2300_v37  ;;  %v2988_v24 = vsel %vm2931_vm14, %v2300_v37, -inf  ;;  %v6007_v25 = vpop.permute.xlu1 %1177 }
 0x282   : > { %v2326_v26 = vcombine.high %v2324_v20, %v2324_v20  ;;  %v3023_v34 = vsel %vm2931_vm14, %v2325_v55, -inf  ;;  %v3030_v7 = vsel %vm2931_vm14, %v2324_v20, -inf  ;;  %v2989_v41 = vrot.slane %v2988_v24, 4 }
 0x283   : > { %v3018_v33 = vmax.f32 %v3016_v27, %v3017_v46  ;;  %v3024_v16 = vrot.slane %v3023_v34, 4  ;;  %v3031_v50 = vrot.slane %v3030_v7, 4  ;;  %v2309_v57 = vcombine.high %v2307_v6, %v2307_v6 }
 0x284   : > { %v3037_v35 = vsel %vm2931_vm14, %v2326_v26, -inf  ;;  %v2990_v59 = vmax.f32 %v2988_v24, %v2989_v41  ;;  %v2995_v43 = vsel %vm2931_vm14, %v2308_v58, -inf  ;;  %v3002_v2 = vsel %vm2931_vm14, %v2307_v6, -inf }
 0x285   : > { %v3019_v52 = vrot.slane %v3018_v33, 2  ;;  %v3025_v23 = vmax.f32 %v3023_v34, %v3024_v16  ;;  %v3032_v21 = vmax.f32 %v3030_v7, %v3031_v50  ;;  %v3038_v9 = vrot.slane %v3037_v35, 4  ;;  %v6010_v58 = vpop.permute.xlu1 %1303 }
 0x286   : > { %v2991_v60 = vrot.slane %v2990_v59, 2  ;;  %v2996_v61 = vrot.slane %v2995_v43, 4  ;;  %v3003_v10 = vrot.slane %v3002_v2, 4  ;;  %v3009_v51 = vsel %vm2931_vm14, %v2309_v57, -inf }
 0x287   : > { %v3020_v13 = vmax.f32 %v3018_v33, %v3019_v52  ;;  %v3026_v54 = vrot.slane %v3025_v23, 2  ;;  %v3033_v18 = vrot.slane %v3032_v21, 2  ;;  %v3039_v31 = vmax.f32 %v3037_v35, %v3038_v9  ;;  %v6014_v9 = vpop.permute.xlu0 %1273 }
 0x288   : > { %v2992_v44 = vmax.f32 %v2990_v59, %v2991_v60  ;;  %v2997_v30 = vmax.f32 %v2995_v43, %v2996_v61  ;;  %v3004_v22 = vmax.f32 %v3002_v2, %v3003_v10  ;;  %v3010_v19 = vrot.slane %v3009_v51, 4 }
 0x289   : > { %v3021_v14 = vrot.slane %v3020_v13, 1  ;;  %v3027_v40 = vmax.f32 %v3025_v23, %v3026_v54  ;;  %v3034_v37 = vmax.f32 %v3032_v21, %v3033_v18  ;;  %v3040_v20 = vrot.slane %v3039_v31, 2 }
 0x28a   : > { %v2993_v55 = vrot.slane %v2992_v44, 1  ;;  %v2998_v27 = vrot.slane %v2997_v30, 2  ;;  %v3005_v46 = vrot.slane %v3004_v22, 2  ;;  %v3011_v6 = vmax.f32 %v3009_v51, %v3010_v19 }
 0x28b   : > { %v3022_v24 = vmax.f32 %v3020_v13, %v3021_v14  ;;  %v3028_v26 = vrot.slane %v3027_v40, 1  ;;  %v3035_v34 = vrot.slane %v3034_v37, 1  ;;  %v3041_v7 = vmax.f32 %v3039_v31, %v3040_v20  ;;  %v6021_v31 = vpop.permute.xlu1 %1305 }
 0x28c   : > { %v2994_v41 = vmax.f32 %v2992_v44, %v2993_v55  ;;  %v2999_v33 = vmax.f32 %v2997_v30, %v2998_v27  ;;  %v3006_v16 = vmax.f32 %v3004_v22, %v3005_v46  ;;  %v3012_v50 = vrot.slane %v3011_v6, 2 }
 0x28d   : > { %v3029_v57 = vmax.f32 %v3027_v40, %v3028_v26  ;;  %v3036_v35 = vmax.f32 %v3034_v37, %v3035_v34  ;;  %v3042_v59 = vrot.slane %v3041_v7, 1  ;;  %v3842_v43 = vsel %vm3828_vm15, %v3022_v24, -inf  ;;  %v6040_v24 = vpop.permute.xlu0 %1399 }
 0x28e   : > { %v3843_v2 = vmax.f32 %v5854_v29, %v3842_v43  ;;  %v3000_v52 = vrot.slane %v2999_v33, 1  ;;  %v3007_v23 = vrot.slane %v3006_v16, 1  ;;  %v3013_v21 = vmax.f32 %v3011_v6, %v3012_v50 }
 0x28f   : > { %v3043_v60 = vmax.f32 %v3041_v7, %v3042_v59  ;;  %v3845_v61 = vsel %vm3828_vm15, %v3029_v57, -inf  ;;  %v3848_v10 = vsel %vm3828_vm15, %v3036_v35, -inf  ;;  %v3830_v51 = vsel %vm3828_vm15, %v2994_v41, -inf }
 0x290   : > { %v3846_v13 = vmax.f32 %v5861_v4, %v3845_v61  ;;  %v3849_v54 = vmax.f32 %v5866_v49, %v3848_v10  ;;  %v3001_v18 = vmax.f32 %v2999_v33, %v3000_v52  ;;  %v3008_v29 = vmax.f32 %v3006_v16, %v3007_v23  ;;  %v6047_v33 = vpop.permute.xlu1 %1431 }
 0x291   : > { %v3851_v44 = vsel %vm3828_vm15, %v3043_v60, -inf  ;;  %v3014_v30 = vrot.slane %v3013_v21, 1  ;;  %v3831_v22 = vmax.f32 %v5857_v38, %v3830_v51  ;;  %v2589_v19 = vrot.slane %v5984_v28, %v5772_v5 }
 0x292   : > { %v3852_v14 = vmax.f32 %v5872_v32, %v3851_v44  ;;  %v3833_v4 = vsel %vm3828_vm15, %v3001_v18, -inf  ;;  %v3836_v49 = vsel %vm3828_vm15, %v3008_v29, -inf  ;;  %v2596_v40 = vrot.slane %v2582_v48, %v5772_v5  ;;  %v1402_v29 = vpop.permute.xlu0 %1401 }
 0x293   : > { %v3015_v37 = vmax.f32 %v3013_v21, %v3014_v30  ;;  %v3834_v20 = vmax.f32 %v5875_v3, %v3833_v4  ;;  %v3837_v38 = vmax.f32 %v5887_v47, %v3836_v49  ;;  %v2597_v55 = vcombine.high %v2589_v19, %v2589_v19 }
 0x294   : > { %v2598_v27 = vcombine.high %v2596_v40, %v2596_v40  ;;  %v3464_v46 = vsel %vm2931_vm14, %v2589_v19, -inf  ;;  %v3478_v32 = vsel %vm2931_vm14, %v2596_v40, -inf  ;;  %v2565_v6 = vcombine.high %v5991_v8, %v5991_v8 }
 0x295   : > { %v3839_v28 = vsel %vm3828_vm15, %v3015_v37, -inf  ;;  %v4086_v48 = vsel %vm4085_vm0, %v3834_v20, %v3831_v22  ;;  %v3465_v26 = vrot.slane %v3464_v46, 4  ;;  %v3471_v3 = vsel %vm2931_vm14, %v2597_v55, -inf }
 0x296   : > { %v3840_v47 = vmax.f32 %v5890_v0, %v3839_v28  ;;  %v4088_v34 = vsel %vm4087_vm1, %v3837_v38, %v4086_v48  ;;  %v3472_v7 = vrot.slane %v3471_v3, 4  ;;  %v3479_v41 = vrot.slane %v3478_v32, 4 }
 0x297   : > { %v3466_v16 = vmax.f32 %v3464_v46, %v3465_v26  ;;  %v3485_v50 = vsel %vm2931_vm14, %v2598_v27, -inf  ;;  %v2572_v57 = vrot.slane %v5991_v8, %v5772_v5  ;;  %v2579_v35 = vrot.slane %v2565_v6, %v5772_v5 }
 0x298   : > { %v4090_v59 = vsel %vm4089_vm2, %v3840_v47, %v4088_v34  ;;  %v3473_v43 = vmax.f32 %v3471_v3, %v3472_v7  ;;  %v3480_v52 = vmax.f32 %v3478_v32, %v3479_v41  ;;  %v3486_v0 = vrot.slane %v3485_v50, 4 }
 0x299   : > { %v4092_v23 = vsel %vm4091_vm3, %v3843_v2, %v4090_v59  ;;  %v3467_v21 = vrot.slane %v3466_v16, 2  ;;  %v2580_v60 = vcombine.high %v2572_v57, %v2572_v57  ;;  %v2581_v61 = vcombine.high %v2579_v35, %v2579_v35 }
 0x29a   : > { %v4094_v10 = vsel %vm4093_vm4, %v3846_v13, %v4092_v23  ;;  %v3474_v8 = vrot.slane %v3473_v43, 2  ;;  %v3481_v51 = vrot.slane %v3480_v52, 2  ;;  %v3487_v18 = vmax.f32 %v3485_v50, %v3486_v0  ;;  %v6065_v19 = vpop.f32.mrb[4].mxu0  ;;  %v1434_v13 = vpop.permute.xlu1 %1433 }
 0x29b   : > { %v4096_v44 = vsel %vm4095_vm5, %v3849_v54, %v4094_v10  ;;  %v3468_v30 = vmax.f32 %v3466_v16, %v3467_v21  ;;  %v3436_v2 = vsel %vm2931_vm14, %v2572_v57, -inf  ;;  %v3443_v22 = vsel %vm2931_vm14, %v2580_v60, -inf  ;;  %v6068_v20 = vpop.f32.mrb[5].mxu0  ;;  %v1528_v16 = vpop.permute.xlu0 %1527 }
 0x29c   : > { %v4098_v4 = vsel %vm4097_vm6, %v3852_v14, %v4096_v44  ;;  %v3475_v49 = vmax.f32 %v3473_v43, %v3474_v8  ;;  %v3482_v40 = vmax.f32 %v3480_v52, %v3481_v51  ;;  %v3488_v37 = vrot.slane %v3487_v18, 2 }
 0x29d   : > { %4156 = vst.msk [vmem:[%s6059_s14] sm:$0xff] %vm3828_vm15, %v4098_v4  ;;  %v3469_v38 = vrot.slane %v3468_v30, 1  ;;  %v3437_v55 = vrot.slane %v3436_v2, 4  ;;  %v3444_v54 = vrot.slane %v3443_v22, 4  ;;  %v3450_v27 = vsel %vm2931_vm14, %v2579_v35, -inf }
 0x29e   : > { %v3476_v46 = vrot.slane %v3475_v49, 1  ;;  %v3483_v32 = vrot.slane %v3482_v40, 1  ;;  %v3489_v6 = vmax.f32 %v3487_v18, %v3488_v37  ;;  %v3451_v28 = vrot.slane %v3450_v27, 4  ;;  %v1560_v60 = vpop.permute.xlu1 %1559 }
 0x29f   : > { %v3470_v48 = vmax.f32 %v3468_v30, %v3469_v38  ;;  %v3438_v26 = vmax.f32 %v3436_v2, %v3437_v55  ;;  %v3445_v14 = vmax.f32 %v3443_v22, %v3444_v54  ;;  %v3457_v3 = vsel %vm2931_vm14, %v2581_v61, -inf }
 0x2a0   : > { %v3477_v47 = vmax.f32 %v3475_v49, %v3476_v46  ;;  %v3484_v34 = vmax.f32 %v3482_v40, %v3483_v32  ;;  %v3490_v7 = vrot.slane %v3489_v6, 1  ;;  %v3452_v41 = vmax.f32 %v3450_v27, %v3451_v28 }
 0x2a1   : > { %v6075_v50 = vsel %vm3828_vm15, %v3470_v48, -inf  ;;  %v3439_v57 = vrot.slane %v3438_v26, 2  ;;  %v3446_v59 = vrot.slane %v3445_v14, 2  ;;  %v3458_v35 = vrot.slane %v3457_v3, 4 }
 0x2a2   : > { %v4342_v43 = vpop.f32.mrb[4].mxu1  ;;  %v3491_v52 = vmax.f32 %v3489_v6, %v3490_v7  ;;  %v3939_v0 = vmax.f32 %v5920_v62, %v6075_v50  ;;  %v6080_v23 = vsel %vm3828_vm15, %v3477_v47, -inf  ;;  %v6083_v21 = vsel %vm3828_vm15, %v3484_v34, -inf }
 0x2a3   : > { %v6085_v61 = vpop.f32.mrb[5].mxu1  ;;  %v3942_v10 = vmax.f32 %v5923_v15, %v6080_v23  ;;  %v3945_v8 = vmax.f32 %v5929_v17, %v6083_v21  ;;  %v3440_v51 = vmax.f32 %v3438_v26, %v3439_v57  ;;  %v3447_v18 = vmax.f32 %v3445_v14, %v3446_v59 }
 0x2a4   : > { %v6092_v44 = vsel %vm3828_vm15, %v3491_v52, -inf  ;;  %v3453_v30 = vrot.slane %v3452_v41, 2  ;;  %v3459_v2 = vmax.f32 %v3457_v3, %v3458_v35  ;;  %v1758_v22 = vsel %vm1726_vm9, %v5973_v11, %v6007_v25  ;;  %v1530_v11 = vpop.permute.xlu0 %1529 }
 0x2a5   : > { %v3948_v4 = vmax.f32 %v5932_v56, %v6092_v44  ;;  %v3441_v49 = vrot.slane %v3440_v51, 1  ;;  %v3448_v40 = vrot.slane %v3447_v18, 1  ;;  %v1775_v37 = vsel %vm1759_vm10, %v5987_v36, %v6014_v9 }
 0x2a6   : > { %v3454_v38 = vmax.f32 %v3452_v41, %v3453_v30  ;;  %v3460_v55 = vrot.slane %v3459_v2, 2  ;;  %v1790_v54 = vsel %vm1759_vm10, %v5978_v45, %v6010_v58  ;;  %v1807_v27 = vsel %vm1792_vm11, %v5994_v63, %v6040_v24  ;;  %v1562_v45 = vpop.permute.xlu1 %1561 }
 0x2a7   : > { %v3442_v25 = vmax.f32 %v3440_v51, %v3441_v49  ;;  %v3449_v46 = vmax.f32 %v3447_v18, %v3448_v40  ;;  %v1791_v32 = vsel %vm1759_vm10, %v1758_v22, %v6021_v31  ;;  %v1808_v6 = vsel %vm1792_vm11, %v1775_v37, %v1402_v29 }
 0x2a8   : > { %v3455_v28 = vrot.slane %v3454_v38, 1  ;;  %v3461_v36 = vmax.f32 %v3459_v2, %v3460_v55  ;;  %v1823_v9 = vsel %vm1792_vm11, %v1790_v54, %v6047_v33  ;;  %v1840_v48 = vsel %vm1825_vm12, %v1807_v27, %v1528_v16 }
 0x2a9   : > { %v3926_v58 = vsel %vm3828_vm15, %v3442_v25, -inf  ;;  %v3929_v63 = vsel %vm3828_vm15, %v3449_v46, -inf  ;;  %v1824_v24 = vsel %vm1792_vm11, %v1791_v32, %v1434_v13  ;;  %4331 = vmatprep.mubr.msk.f32.mxu0 %vm1869_vm13, %v1840_v48  ;;  %v1841_v31 = vsel %vm1825_vm12, %v1808_v6, %v1530_v11 }
 0x2aa   : > { %v3456_v26 = vmax.f32 %v3454_v38, %v3455_v28  ;;  %v3462_v29 = vrot.slane %v3461_v36, 1  ;;  %v3927_v14 = vmax.f32 %v5957_v1, %v3926_v58  ;;  %v3930_v3 = vmax.f32 %v5965_v12, %v3929_v63  ;;  %4332 = vmatmul.mubr.msk.f32.gmra.mrb[14].mxu0 %vm1869_vm13, %v1841_v31 }
 0x2ab   : > { %v1856_v33 = vsel %vm1825_vm12, %v1823_v9, %v1560_v60  ;;  %v1857_v47 = vsel %vm1825_vm12, %v1824_v24, %v1562_v45  ;;  %v2062_v34 = vadd.f32 %v6065_v19, %v5745_v53  ;;  %v2057_v13 = vadd.f32 %v5745_v53, %v6068_v20 }
 0x2ac   : > { %v3463_v7 = vmax.f32 %v3461_v36, %v3462_v29  ;;  %v3932_v41 = vsel %vm3828_vm15, %v3456_v26, -inf  ;;  %v4120_v16 = vsel %vm4085_vm0, %v3930_v3, %v3927_v14  ;;  %4355 = vmatprep.mubr.msk.f32.mxu1 %vm1869_vm13, %v1856_v33  ;;  %v2142_v1 = vadd.f32 %v4342_v43, %v5745_v53 }
 0x2ad   : > { %v3933_v12 = vmax.f32 %v5960_v39, %v3932_v41  ;;  %4356 = vmatmul.mubr.msk.f32.gmra.mrb[14].mxu1 %vm1869_vm13, %v1857_v47  ;;  %v2200_v57 = vmax.f32 %v2062_v34, 0.0  ;;  %v2199_v59 = vmax.f32 %v2057_v13, 0.0  ;;  %v3934_v19 = vsel %vm3828_vm15, %v5949_v42, -inf }
 0x2ae   : > { %v3935_v20 = vsel %vm3828_vm15, %v3463_v7, -inf  ;;  %v2216_v43 = vmax.f32 %v2142_v1, 0.0 }
 0x2af   : > { %v3936_v35 = vmax.f32 %v3934_v19, %v3935_v20  ;;  %v4121_v52 = vsel %vm4087_vm1, %v3933_v12, %v4120_v16  ;;  %v2344_v60 = vcombine.high %v2200_v57, %v2200_v57  ;;  %v2351_v51 = vrot.slane %v2200_v57, %v5772_v5 }
 0x2b0   : > { %v2327_v18 = vcombine.high %v2199_v59, %v2199_v59  ;;  %v2334_v53 = vrot.slane %v2199_v59, %v5772_v5  ;;  %v2616_v41 = vcombine.high %v2216_v43, %v2216_v43  ;;  %v2623_v19 = vrot.slane %v2216_v43, %v5772_v5 }
 0x2b1   : > { %v4122_v39 = vsel %vm4089_vm2, %v3936_v35, %v4121_v52  ;;  %v2358_v30 = vrot.slane %v2344_v60, %v5772_v5  ;;  %v2359_v2 = vcombine.high %v2351_v51, %v2351_v51  ;;  %v3072_v22 = vsel %vm2931_vm14, %v2351_v51, -inf }
 0x2b2   : > { %v4123_v42 = vsel %vm4091_vm3, %v3939_v0, %v4122_v39  ;;  %v3073_v49 = vrot.slane %v3072_v22, 4  ;;  %v2341_v40 = vrot.slane %v2327_v18, %v5772_v5  ;;  %v2342_v37 = vcombine.high %v2334_v53, %v2334_v53 }
 0x2b3   : > { %v4124_v38 = vsel %vm4093_vm4, %v3942_v10, %v4123_v42  ;;  %v2360_v55 = vcombine.high %v2358_v30, %v2358_v30  ;;  %v3079_v54 = vsel %vm2931_vm14, %v2359_v2, -inf  ;;  %v3086_v27 = vsel %vm2931_vm14, %v2358_v30, -inf  ;;  %v6174_v30 = vld [vmem:[%s6774_s2] ss:$0 sm:$0xff] }
 0x2b4   : > { %v4125_v62 = vsel %vm4095_vm5, %v3945_v8, %v4124_v38  ;;  %v3074_v50 = vmax.f32 %v3072_v22, %v3073_v49  ;;  %v3080_v0 = vrot.slane %v3079_v54, 4  ;;  %v3087_v11 = vrot.slane %v3086_v27, 4 }
 0x2b5   : > { %v4126_v15 = vsel %vm4097_vm6, %v3948_v4, %v4125_v62  ;;  %v3093_v23 = vsel %vm2931_vm14, %v2360_v55, -inf  ;;  %v2343_v10 = vcombine.high %v2341_v40, %v2341_v40  ;;  %v3044_v25 = vsel %vm2931_vm14, %v2334_v53, -inf }
 0x2b6   : > { %4160 = vst.msk [vmem:[%s6059_s14 + $0x20] sm:$0xff] %vm3828_vm15, %v4126_v15  ;;  %v3075_v46 = vrot.slane %v3074_v50, 2  ;;  %v3081_v32 = vmax.f32 %v3079_v54, %v3080_v0  ;;  %v3088_v17 = vmax.f32 %v3086_v27, %v3087_v11  ;;  %v3094_v21 = vrot.slane %v3093_v23, 4 }
 0x2b7   : > { %v3045_v8 = vrot.slane %v3044_v25, 4  ;;  %v3051_v6 = vsel %vm2931_vm14, %v2342_v37, -inf  ;;  %v3058_v28 = vsel %vm2931_vm14, %v2341_v40, -inf  ;;  %v3065_v56 = vsel %vm2931_vm14, %v2343_v10, -inf }
 0x2b8   : > { %v3076_v44 = vmax.f32 %v3074_v50, %v3075_v46  ;;  %v3082_v4 = vrot.slane %v3081_v32, 2  ;;  %v3089_v36 = vrot.slane %v3088_v17, 2  ;;  %v3095_v9 = vmax.f32 %v3093_v23, %v3094_v21 }
 0x2b9   : > { %v3046_v48 = vmax.f32 %v3044_v25, %v3045_v8  ;;  %v3052_v45 = vrot.slane %v3051_v6, 4  ;;  %v3059_v58 = vrot.slane %v3058_v28, 4  ;;  %v3066_v63 = vrot.slane %v3065_v56, 4 }
 0x2ba   : > { %v3077_v24 = vrot.slane %v3076_v44, 1  ;;  %v3083_v31 = vmax.f32 %v3081_v32, %v3082_v4  ;;  %v3090_v26 = vmax.f32 %v3088_v17, %v3089_v36  ;;  %v3096_v29 = vrot.slane %v3095_v9, 2 }
 0x2bb   : > { %v3047_v14 = vrot.slane %v3046_v48, 2  ;;  %v3053_v3 = vmax.f32 %v3051_v6, %v3052_v45  ;;  %v3060_v33 = vmax.f32 %v3058_v28, %v3059_v58  ;;  %v3067_v47 = vmax.f32 %v3065_v56, %v3066_v63 }
 0x2bc   : > { %v3084_v34 = vrot.slane %v3083_v31, 1  ;;  %v3091_v13 = vrot.slane %v3090_v26, 1  ;;  %v3097_v7 = vmax.f32 %v3095_v9, %v3096_v29  ;;  %v3078_v59 = vmax.f32 %v3076_v44, %v3077_v24 }
 0x2bd   : > { %v3048_v16 = vmax.f32 %v3046_v48, %v3047_v14  ;;  %v3054_v1 = vrot.slane %v3053_v3, 2  ;;  %v3061_v12 = vrot.slane %v3060_v33, 2  ;;  %v3068_v57 = vrot.slane %v3067_v47, 2 }
 0x2be   : > { %v3085_v20 = vmax.f32 %v3083_v31, %v3084_v34  ;;  %v3098_v35 = vrot.slane %v3097_v7, 1  ;;  %v2630_v51 = vrot.slane %v2616_v41, %v5772_v5  ;;  %v3092_v18 = vmax.f32 %v3090_v26, %v3091_v13 }
 0x2bf   : > { %v3055_v52 = vmax.f32 %v3053_v3, %v3054_v1  ;;  %v3062_v60 = vmax.f32 %v3060_v33, %v3061_v12  ;;  %v3049_v53 = vrot.slane %v3048_v16, 1  ;;  %v3069_v39 = vmax.f32 %v3067_v47, %v3068_v57 }
 0x2c0   : > { %v2137_v2 = vadd.f32 %v6174_v30, %v6085_v61  ;;  %v6179_v22 = vsel %vm3828_vm15, %v3078_v59, -inf  ;;  %v2631_v43 = vcombine.high %v2623_v19, %v2623_v19  ;;  %v2632_v42 = vcombine.high %v2630_v51, %v2630_v51 }
 0x2c1   : > { %v3520_v49 = vsel %vm2931_vm14, %v2623_v19, -inf  ;;  %v3099_v40 = vmax.f32 %v3097_v7, %v3098_v35  ;;  %v6183_v37 = vsel %vm3828_vm15, %v3085_v20, -inf  ;;  %v3056_v38 = vrot.slane %v3055_v52, 1 }
 0x2c2   : > { %v3063_v55 = vrot.slane %v3062_v60, 1  ;;  %v3521_v54 = vrot.slane %v3520_v49, 4  ;;  %v3527_v27 = vsel %vm2931_vm14, %v2631_v43, -inf  ;;  %v3534_v62 = vsel %vm2931_vm14, %v2630_v51, -inf }
 0x2c3   : > { %v3541_v61 = vsel %vm2931_vm14, %v2632_v42, -inf  ;;  %v6189_v50 = vsel %vm3828_vm15, %v3092_v18, -inf  ;;  %v3050_v0 = vmax.f32 %v3048_v16, %v3049_v53  ;;  %v3070_v11 = vrot.slane %v3069_v39, 1 }
 0x2c4   : > { %v3528_v15 = vrot.slane %v3527_v27, 4  ;;  %v3522_v23 = vmax.f32 %v3520_v49, %v3521_v54  ;;  %v3535_v10 = vrot.slane %v3534_v62, 4  ;;  %v3542_v25 = vrot.slane %v3541_v61, 4 }
 0x2c5   : > { %v2215_v46 = vmax.f32 %v2137_v2, 0.0  ;;  %v6192_v32 = vsel %vm3828_vm15, %v3099_v40, -inf  ;;  %v3057_v17 = vmax.f32 %v3055_v52, %v3056_v38  ;;  %v3064_v21 = vmax.f32 %v3062_v60, %v3063_v55 }
 0x2c6   : > { %v3529_v8 = vmax.f32 %v3527_v27, %v3528_v15  ;;  %v3523_v28 = vrot.slane %v3522_v23, 2  ;;  %v3536_v56 = vmax.f32 %v3534_v62, %v3535_v10  ;;  %v3543_v44 = vmax.f32 %v3541_v61, %v3542_v25 }
 0x2c7   : > { %v4321_v6 = vpop.f32.mrb[6].mxu0  ;;  %v2599_v4 = vcombine.high %v2215_v46, %v2215_v46  ;;  %v3071_v9 = vmax.f32 %v3069_v39, %v3070_v11  ;;  %v2606_v45 = vrot.slane %v2215_v46, %v5772_v5  ;;  %v6198_v29 = vsel %vm3828_vm15, %v3050_v0, -inf }
 0x2c8   : > { %v2066_v36 = vpop.f32.mrb[7].mxu0  ;;  %v3530_v48 = vrot.slane %v3529_v8, 2  ;;  %v2072_v58 = vadd.f32 %v6174_v30, %v4321_v6  ;;  %v3524_v63 = vmax.f32 %v3522_v23, %v3523_v28  ;;  %v3537_v24 = vrot.slane %v3536_v56, 2 }
 0x2c9   : > { %v3544_v31 = vrot.slane %v3543_v44, 2  ;;  %v2613_v26 = vrot.slane %v2599_v4, %v5772_v5  ;;  %v2614_v3 = vcombine.high %v2606_v45, %v2606_v45  ;;  %v3492_v33 = vsel %vm2931_vm14, %v2606_v45, -inf }
 0x2ca   : > { %v3531_v14 = vmax.f32 %v3529_v8, %v3530_v48  ;;  %v3525_v47 = vrot.slane %v3524_v63, 1  ;;  %v3538_v34 = vmax.f32 %v3536_v56, %v3537_v24  ;;  %v3493_v16 = vrot.slane %v3492_v33, 4 }
 0x2cb   : > { %v3545_v13 = vmax.f32 %v3543_v44, %v3544_v31  ;;  %v2615_v7 = vcombine.high %v2613_v26, %v2613_v26  ;;  %v3499_v1 = vsel %vm2931_vm14, %v2614_v3, -inf  ;;  %v3506_v12 = vsel %vm2931_vm14, %v2613_v26, -inf }
 0x2cc   : > { %v3532_v41 = vrot.slane %v3531_v14, 1  ;;  %v6204_v59 = vsel %vm3828_vm15, %v3057_v17, -inf  ;;  %v3539_v19 = vrot.slane %v3538_v34, 1  ;;  %v3500_v20 = vrot.slane %v3499_v1, 4 }
 0x2cd   : > { %v2202_v35 = vmax.f32 %v2072_v58, 0.0  ;;  %v6209_v60 = vsel %vm3828_vm15, %v3064_v21, -inf  ;;  %v3494_v51 = vmax.f32 %v3492_v33, %v3493_v16  ;;  %v3507_v18 = vrot.slane %v3506_v12, 4 }
 0x2ce   : > { %v4345_v57 = vpop.f32.mrb[6].mxu1  ;;  %v3513_v53 = vsel %vm2931_vm14, %v2615_v7, -inf  ;;  %v6213_v39 = vsel %vm3828_vm15, %v3071_v9, -inf  ;;  %v3526_v2 = vmax.f32 %v3524_v63, %v3525_v47  ;;  %v3546_v43 = vrot.slane %v3545_v13, 1 }
 0x2cf   : > { %v6206_v52 = vpop.f32.mrb[7].mxu1  ;;  %v3501_v42 = vmax.f32 %v3499_v1, %v3500_v20  ;;  %v3533_v49 = vmax.f32 %v3531_v14, %v3532_v41  ;;  %v3495_v40 = vrot.slane %v3494_v51, 2  ;;  %v3508_v38 = vmax.f32 %v3506_v12, %v3507_v18 }
 0x2d0   : > { %v3514_v55 = vrot.slane %v3513_v53, 4  ;;  %v3540_v54 = vmax.f32 %v3538_v34, %v3539_v19  ;;  %v2378_v62 = vcombine.high %v2202_v35, %v2202_v35  ;;  %v2067_v61 = vadd.f32 %v6174_v30, %v2066_v36 }
 0x2d1   : > { %v3502_v27 = vrot.slane %v3501_v42, 2  ;;  %v3496_v0 = vmax.f32 %v3494_v51, %v3495_v40  ;;  %v3509_v11 = vrot.slane %v3508_v38, 2  ;;  %v2385_v23 = vrot.slane %v2202_v35, %v5772_v5 }
 0x2d2   : > { %v3515_v15 = vmax.f32 %v3513_v53, %v3514_v55  ;;  %v3547_v10 = vmax.f32 %v3545_v13, %v3546_v43  ;;  %v6218_v25 = vsel %vm3828_vm15, %v3526_v2, -inf  ;;  %v2392_v17 = vrot.slane %v2378_v62, %v5772_v5 }
 0x2d3   : > { %v3503_v46 = vmax.f32 %v3501_v42, %v3502_v27  ;;  %v6222_v21 = vsel %vm3828_vm15, %v3533_v49, -inf  ;;  %v3510_v8 = vmax.f32 %v3508_v38, %v3509_v11  ;;  %v2393_v28 = vcombine.high %v2385_v23, %v2385_v23 }
 0x2d4   : > { %v3516_v6 = vrot.slane %v3515_v15, 2  ;;  %v3497_v56 = vrot.slane %v3496_v0, 1  ;;  %v2394_v44 = vcombine.high %v2392_v17, %v2392_v17  ;;  %v3128_v4 = vsel %vm2931_vm14, %v2385_v23, -inf }
 0x2d5   : > { %v3142_v36 = vsel %vm2931_vm14, %v2392_v17, -inf  ;;  %v3504_v9 = vrot.slane %v3503_v46, 1  ;;  %v3511_v48 = vrot.slane %v3510_v8, 1  ;;  %v3129_v45 = vrot.slane %v3128_v4, 4 }
 0x2d6   : > { %v2201_v58 = vmax.f32 %v2067_v61, 0.0  ;;  %v6227_v63 = vsel %vm3828_vm15, %v3540_v54, -inf  ;;  %v3135_v24 = vsel %vm2931_vm14, %v2393_v28, -inf  ;;  %v3143_v31 = vrot.slane %v3142_v36, 4 }
 0x2d7   : > { %v3149_v26 = vsel %vm2931_vm14, %v2394_v44, -inf  ;;  %v6232_v14 = vsel %vm3828_vm15, %v3547_v10, -inf  ;;  %v6234_v3 = vmax.f32 %v3515_v15, %v3516_v6  ;;  %v3130_v33 = vmax.f32 %v3128_v4, %v3129_v45 }
 0x2d8   : > { %v2152_v47 = vadd.f32 %v6174_v30, %v4345_v57  ;;  %v3498_v34 = vmax.f32 %v3496_v0, %v3497_v56  ;;  %v3136_v13 = vrot.slane %v3135_v24, 4  ;;  %v3144_v7 = vmax.f32 %v3142_v36, %v3143_v31 }
 0x2d9   : > { %v3150_v41 = vrot.slane %v3149_v26, 4  ;;  %v6237_v16 = vmax.f32 %v3503_v46, %v3504_v9  ;;  %v6239_v1 = vmax.f32 %v3510_v8, %v3511_v48  ;;  %v3131_v12 = vrot.slane %v3130_v33, 2 }
 0x2da   : > { %v2361_v19 = vcombine.high %v2201_v58, %v2201_v58  ;;  %v3137_v20 = vmax.f32 %v3135_v24, %v3136_v13  ;;  %v3145_v35 = vrot.slane %v3144_v7, 2  ;;  %v2368_v18 = vrot.slane %v2201_v58, %v5772_v5 }
 0x2db   : > { %v3151_v51 = vmax.f32 %v3149_v26, %v3150_v41  ;;  %v3518_v53 = vrot.slane %v6234_v3, 1  ;;  %v3132_v2 = vmax.f32 %v3130_v33, %v3131_v12  ;;  %v2218_v43 = vmax.f32 %v2152_v47, 0.0 }
 0x2dc   : > { %v2375_v57 = vrot.slane %v2361_v19, %v5772_v5  ;;  %v3138_v42 = vrot.slane %v3137_v20, 2  ;;  %v3146_v49 = vmax.f32 %v3144_v7, %v3145_v35  ;;  %v2376_v38 = vcombine.high %v2368_v18, %v2368_v18 }
 0x2dd   : > { %v3152_v40 = vrot.slane %v3151_v51, 2  ;;  %v3133_v55 = vrot.slane %v3132_v2, 1  ;;  %v3100_v27 = vsel %vm2931_vm14, %v2368_v18, -inf  ;;  %v2650_v12 = vcombine.high %v2218_v43, %v2218_v43 }
 0x2de   : > { %v2377_v54 = vcombine.high %v2375_v57, %v2375_v57  ;;  %v3114_v62 = vsel %vm2931_vm14, %v2375_v57, -inf  ;;  %v3139_v61 = vmax.f32 %v3137_v20, %v3138_v42  ;;  %v3147_v0 = vrot.slane %v3146_v49, 1 }
 0x2df   : > { %v3153_v11 = vmax.f32 %v3151_v51, %v3152_v40  ;;  %v3101_v15 = vrot.slane %v3100_v27, 4  ;;  %v3134_v23 = vmax.f32 %v3132_v2, %v3133_v55  ;;  %v3107_v10 = vsel %vm2931_vm14, %v2376_v38, -inf }
 0x2e0   : > { %v3115_v46 = vrot.slane %v3114_v62, 4  ;;  %v3121_v17 = vsel %vm2931_vm14, %v2377_v54, -inf  ;;  %v3140_v8 = vrot.slane %v3139_v61, 1  ;;  %v3148_v6 = vmax.f32 %v3146_v49, %v3147_v0 }
 0x2e1   : > { %v3154_v28 = vrot.slane %v3153_v11, 1  ;;  %v3102_v56 = vmax.f32 %v3100_v27, %v3101_v15  ;;  %v6249_v44 = vsel %vm3828_vm15, %v3134_v23, -inf  ;;  %v3108_v4 = vrot.slane %v3107_v10, 4 }
 0x2e2   : > { %v3116_v36 = vmax.f32 %v3114_v62, %v3115_v46  ;;  %v3122_v9 = vrot.slane %v3121_v17, 4  ;;  %v3141_v48 = vmax.f32 %v3139_v61, %v3140_v8  ;;  %v3867_v58 = vmax.f32 %v6179_v22, %v6249_v44 }
 0x2e3   : > { %v3155_v45 = vmax.f32 %v3153_v11, %v3154_v28  ;;  %v6254_v24 = vsel %vm3828_vm15, %v3148_v6, -inf  ;;  %v3103_v26 = vrot.slane %v3102_v56, 2  ;;  %v3109_v33 = vmax.f32 %v3107_v10, %v3108_v4 }
 0x2e4   : > { %v3873_v31 = vmax.f32 %v6189_v50, %v6254_v24  ;;  %v3117_v47 = vrot.slane %v3116_v36, 2  ;;  %v6259_v13 = vsel %vm3828_vm15, %v3141_v48, -inf  ;;  %v3123_v41 = vmax.f32 %v3121_v17, %v3122_v9 }
 0x2e5   : > { %v6262_v7 = vsel %vm3828_vm15, %v3155_v45, -inf  ;;  %v3870_v19 = vmax.f32 %v6183_v37, %v6259_v13  ;;  %v3104_v35 = vmax.f32 %v3102_v56, %v3103_v26  ;;  %v3110_v51 = vrot.slane %v3109_v33, 2 }
 0x2e6   : > { %v3876_v20 = vmax.f32 %v6192_v32, %v6262_v7  ;;  %v3118_v18 = vmax.f32 %v3116_v36, %v3117_v47  ;;  %v3124_v2 = vrot.slane %v3123_v41, 2  ;;  %v2657_v57 = vrot.slane %v2218_v43, %v5772_v5 }
 0x2e7   : > { %v2664_v42 = vrot.slane %v2650_v12, %v5772_v5  ;;  %v6271_v49 = vsel %vm3828_vm15, %v3498_v34, -inf  ;;  %v3105_v40 = vrot.slane %v3104_v35, 1  ;;  %v3111_v38 = vmax.f32 %v3109_v33, %v3110_v51 }
 0x2e8   : > { %v2147_v55 = vadd.f32 %v6174_v30, %v6206_v52  ;;  %v3119_v54 = vrot.slane %v3118_v18, 1  ;;  %v3125_v27 = vmax.f32 %v3123_v41, %v3124_v2  ;;  %v2665_v62 = vcombine.high %v2657_v57, %v2657_v57 }
 0x2e9   : > { %v2666_v61 = vcombine.high %v2664_v42, %v2664_v42  ;;  %v3106_v0 = vmax.f32 %v3104_v35, %v3105_v40  ;;  %v3112_v11 = vrot.slane %v3111_v38, 1  ;;  %v3576_v15 = vsel %vm2931_vm14, %v2657_v57, -inf }
 0x2ea   : > { %v3590_v43 = vsel %vm2931_vm14, %v2664_v42, -inf  ;;  %v3120_v23 = vmax.f32 %v3118_v18, %v3119_v54  ;;  %v3126_v10 = vrot.slane %v3125_v27, 1  ;;  %v3577_v46 = vrot.slane %v3576_v15, 4 }
 0x2eb   : > { %v3583_v34 = vsel %vm2931_vm14, %v2665_v62, -inf  ;;  %v3113_v17 = vmax.f32 %v3111_v38, %v3112_v11  ;;  %v3854_v8 = vsel %vm3828_vm15, %v3106_v0, -inf  ;;  %v3591_v52 = vrot.slane %v3590_v43, 4 }
 0x2ec   : > { %v3584_v6 = vrot.slane %v3583_v34, 4  ;;  %v3127_v28 = vmax.f32 %v3125_v27, %v3126_v10  ;;  %v3855_v56 = vmax.f32 %v6198_v29, %v3854_v8  ;;  %v3860_v4 = vsel %vm3828_vm15, %v3120_v23, -inf }
 0x2ed   : > { %v3578_v36 = vmax.f32 %v3576_v15, %v3577_v46  ;;  %v3857_v9 = vsel %vm3828_vm15, %v3113_v17, -inf  ;;  %v3861_v48 = vmax.f32 %v6209_v60, %v3860_v4  ;;  %v3592_v26 = vmax.f32 %v3590_v43, %v3591_v52 }
 0x2ee   : > { %v3585_v45 = vmax.f32 %v3583_v34, %v3584_v6  ;;  %v3858_v33 = vmax.f32 %v6204_v59, %v3857_v9  ;;  %v3863_v47 = vsel %vm3828_vm15, %v3127_v28, -inf  ;;  %v3597_v12 = vsel %vm2931_vm14, %v2666_v61, -inf }
 0x2ef   : > { %v3579_v41 = vrot.slane %v3578_v36, 2  ;;  %v3864_v35 = vmax.f32 %v6213_v39, %v3863_v47  ;;  %v3593_v29 = vrot.slane %v3592_v26, 2  ;;  %v3598_v18 = vrot.slane %v3597_v12, 4 }
 0x2f0   : > { %v3586_v51 = vrot.slane %v3585_v45, 2  ;;  %v3519_v2 = vmax.f32 %v6234_v3, %v3518_v53  ;;  %v4099_v60 = vsel %vm4085_vm0, %v3858_v33, %v3855_v56  ;;  %v2217_v42 = vmax.f32 %v2147_v55, 0.0 }
 0x2f1   : > { %v3580_v57 = vmax.f32 %v3578_v36, %v3579_v41  ;;  %v4100_v59 = vsel %vm4087_vm1, %v3861_v48, %v4099_v60  ;;  %v3594_v38 = vmax.f32 %v3592_v26, %v3593_v29  ;;  %v3599_v54 = vmax.f32 %v3597_v12, %v3598_v18 }
 0x2f2   : > { %v3587_v40 = vmax.f32 %v3585_v45, %v3586_v51  ;;  %v4101_v62 = vsel %vm4089_vm2, %v3864_v35, %v4100_v59  ;;  %v2633_v61 = vcombine.high %v2217_v42, %v2217_v42  ;;  %v2640_v0 = vrot.slane %v2217_v42, %v5772_v5 }
 0x2f3   : > { %v4324_v27 = vpop.f32.mrb[8].mxu0  ;;  %v3581_v39 = vrot.slane %v3580_v57, 1  ;;  %v4102_v3 = vsel %vm4091_vm3, %v3867_v58, %v4101_v62  ;;  %v3595_v55 = vrot.slane %v3594_v38, 1  ;;  %v3600_v15 = vrot.slane %v3599_v54, 2 }
 0x2f4   : > { %v2076_v11 = vpop.f32.mrb[9].mxu0  ;;  %v3588_v53 = vrot.slane %v3587_v40, 1  ;;  %v4103_v43 = vsel %vm4093_vm4, %v3870_v19, %v4102_v3  ;;  %v2647_v10 = vrot.slane %v2633_v61, %v5772_v5  ;;  %v2648_v46 = vcombine.high %v2640_v0, %v2640_v0 }
 0x2f5   : > { %v3582_v23 = vmax.f32 %v3580_v57, %v3581_v39  ;;  %v4104_v22 = vsel %vm4095_vm5, %v3873_v31, %v4103_v43  ;;  %v3596_v58 = vmax.f32 %v3594_v38, %v3595_v55  ;;  %v3601_v34 = vmax.f32 %v3599_v54, %v3600_v15 }
 0x2f6   : > { %v3589_v44 = vmax.f32 %v3587_v40, %v3588_v53  ;;  %v4105_v17 = vsel %vm4097_vm6, %v3876_v20, %v4104_v22  ;;  %v2649_v13 = vcombine.high %v2647_v10, %v2647_v10  ;;  %v3548_v19 = vsel %vm2931_vm14, %v2640_v0, -inf }
 0x2f7   : > { %v6312_v37 = vsel %vm3828_vm15, %v3582_v23, -inf  ;;  %4157 = vst.msk [vmem:[%s6059_s14 + $0x8] sm:$0xff] %vm3828_vm15, %v4105_v17  ;;  %v3602_v8 = vrot.slane %v3601_v34, 1  ;;  %v6323_v31 = vsel %vm3828_vm15, %v3596_v58, -inf  ;;  %v3549_v6 = vrot.slane %v3548_v19, 4 }
 0x2f8   : > { %v3963_v50 = vmax.f32 %v6218_v25, %v6312_v37  ;;  %v6320_v24 = vsel %vm3828_vm15, %v3589_v44, -inf  ;;  %v3969_v20 = vmax.f32 %v6227_v63, %v6323_v31  ;;  %v3555_v52 = vsel %vm2931_vm14, %v2648_v46, -inf }
 0x2f9   : > { %v3966_v7 = vmax.f32 %v6222_v21, %v6320_v24  ;;  %v3603_v56 = vmax.f32 %v3601_v34, %v3602_v8  ;;  %v3556_v4 = vrot.slane %v3555_v52, 4  ;;  %v3562_v36 = vsel %vm2931_vm14, %v2647_v10, -inf }
 0x2fa   : > { %v6325_v32 = vpop.f32.mrb[8].mxu1  ;;  %v3569_v9 = vsel %vm2931_vm14, %v2649_v13, -inf  ;;  %v3550_v48 = vmax.f32 %v3548_v19, %v3549_v6  ;;  %v3563_v45 = vrot.slane %v3562_v36, 4  ;;  %v2082_v33 = vadd.f32 %v6174_v30, %v4324_v27 }
 0x2fb   : > { %v6332_v28 = vpop.f32.mrb[9].mxu1  ;;  %v3570_v26 = vrot.slane %v3569_v9, 4  ;;  %v3952_v47 = vsel %vm3828_vm15, %v6237_v16, -inf  ;;  %v6340_v41 = vsel %vm3828_vm15, %v3603_v56, -inf  ;;  %v3557_v12 = vmax.f32 %v3555_v52, %v3556_v4 }
 0x2fc   : > { %v2077_v35 = vadd.f32 %v6174_v30, %v2076_v11  ;;  %v3972_v51 = vmax.f32 %v6232_v14, %v6340_v41  ;;  %v3551_v29 = vrot.slane %v3550_v48, 2  ;;  %v3564_v18 = vmax.f32 %v3562_v36, %v3563_v45 }
 0x2fd   : > { %v3571_v60 = vmax.f32 %v3569_v9, %v3570_v26  ;;  %v3955_v57 = vsel %vm3828_vm15, %v6239_v1, -inf  ;;  %v3558_v42 = vrot.slane %v3557_v12, 2  ;;  %v2204_v59 = vmax.f32 %v2082_v33, 0.0 }
 0x2fe   : > { %v2203_v40 = vmax.f32 %v2077_v35, 0.0  ;;  %v3958_v16 = vsel %vm3828_vm15, %v3519_v2, -inf  ;;  %v3552_v38 = vmax.f32 %v3550_v48, %v3551_v29  ;;  %v3565_v54 = vrot.slane %v3564_v18, 2 }
 0x2ff   : > { %v3572_v27 = vrot.slane %v3571_v60, 2  ;;  %v3559_v62 = vmax.f32 %v3557_v12, %v3558_v42  ;;  %v2412_v39 = vcombine.high %v2204_v59, %v2204_v59  ;;  %v2419_v61 = vrot.slane %v2204_v59, %v5772_v5 }
 0x300   : > { %v2395_v0 = vcombine.high %v2203_v40, %v2203_v40  ;;  %v3553_v11 = vrot.slane %v3552_v38, 1  ;;  %v3566_v3 = vmax.f32 %v3564_v18, %v3565_v54  ;;  %v2402_v55 = vrot.slane %v2203_v40, %v5772_v5 }
 0x301   : > { %v3573_v53 = vmax.f32 %v3571_v60, %v3572_v27  ;;  %v3560_v15 = vrot.slane %v3559_v62, 1  ;;  %v2426_v1 = vrot.slane %v2412_v39, %v5772_v5  ;;  %v2427_v43 = vcombine.high %v2419_v61, %v2419_v61 }
 0x302   : > { %v3184_v23 = vsel %vm2931_vm14, %v2419_v61, -inf  ;;  %v3554_v2 = vmax.f32 %v3552_v38, %v3553_v11  ;;  %v3567_v10 = vrot.slane %v3566_v3, 1  ;;  %v2410_v27 = vcombine.high %v2402_v55, %v2402_v55 }
 0x303   : > { %v3574_v46 = vrot.slane %v3573_v53, 1  ;;  %v3185_v22 = vrot.slane %v3184_v23, 4  ;;  %v3561_v44 = vmax.f32 %v3559_v62, %v3560_v15  ;;  %v2428_v58 = vcombine.high %v2426_v1, %v2426_v1 }
 0x304   : > { %v3191_v34 = vsel %vm2931_vm14, %v2427_v43, -inf  ;;  %v3198_v17 = vsel %vm2931_vm14, %v2426_v1, -inf  ;;  %v3568_v13 = vmax.f32 %v3566_v3, %v3567_v10  ;;  %v3950_v8 = vsel %vm3828_vm15, %v3554_v2, -inf }
 0x305   : > { %v3575_v19 = vmax.f32 %v3573_v53, %v3574_v46  ;;  %v3186_v6 = vmax.f32 %v3184_v23, %v3185_v22  ;;  %v3951_v52 = vmax.f32 %v6271_v49, %v3950_v8  ;;  %v3953_v56 = vsel %vm3828_vm15, %v3561_v44, -inf }
 0x306   : > { %v3192_v4 = vrot.slane %v3191_v34, 4  ;;  %v3199_v36 = vrot.slane %v3198_v17, 4  ;;  %v3954_v9 = vmax.f32 %v3952_v47, %v3953_v56  ;;  %v3956_v48 = vsel %vm3828_vm15, %v3568_v13, -inf }
 0x307   : > { %v3959_v45 = vsel %vm3828_vm15, %v3575_v19, -inf  ;;  %v3187_v26 = vrot.slane %v3186_v6, 2  ;;  %v3957_v33 = vmax.f32 %v3955_v57, %v3956_v48  ;;  %v3205_v42 = vsel %vm2931_vm14, %v2428_v58, -inf }
 0x308   : > { %v3960_v12 = vmax.f32 %v3958_v16, %v3959_v45  ;;  %v3193_v35 = vmax.f32 %v3191_v34, %v3192_v4  ;;  %v3200_v29 = vmax.f32 %v3198_v17, %v3199_v36  ;;  %v4127_v18 = vsel %vm4085_vm0, %v3954_v9, %v3951_v52 }
 0x309   : > { %v3188_v60 = vmax.f32 %v3186_v6, %v3187_v26  ;;  %v2409_v49 = vrot.slane %v2395_v0, %v5772_v5  ;;  %v4128_v59 = vsel %vm4087_vm1, %v3957_v33, %v4127_v18  ;;  %v3206_v38 = vrot.slane %v3205_v42, 4 }
 0x30a   : > { %v3194_v40 = vrot.slane %v3193_v35, 2  ;;  %v3201_v47 = vrot.slane %v3200_v29, 2  ;;  %v4129_v54 = vsel %vm4089_vm2, %v3960_v12, %v4128_v59  ;;  %v2162_v57 = vadd.f32 %v6174_v30, %v6325_v32 }
 0x30b   : > { %v4130_v16 = vsel %vm4091_vm3, %v3963_v50, %v4129_v54  ;;  %v3207_v39 = vmax.f32 %v3205_v42, %v3206_v38  ;;  %v2411_v0 = vcombine.high %v2409_v49, %v2409_v49  ;;  %v3156_v11 = vsel %vm2931_vm14, %v2402_v55, -inf }
 0x30c   : > { %v3195_v62 = vmax.f32 %v3193_v35, %v3194_v40  ;;  %v4131_v61 = vsel %vm4093_vm4, %v3966_v7, %v4130_v16  ;;  %v3163_v3 = vsel %vm2931_vm14, %v2410_v27, -inf  ;;  %v3189_v37 = vrot.slane %v3188_v60, 1 }
 0x30d   : > { %v4132_v25 = vsel %vm4095_vm5, %v3969_v20, %v4131_v61  ;;  %v3202_v32 = vmax.f32 %v3200_v29, %v3201_v47  ;;  %v3208_v50 = vrot.slane %v3207_v39, 2  ;;  %v3157_v24 = vrot.slane %v3156_v11, 4 }
 0x30e   : > { %v4133_v21 = vsel %vm4097_vm6, %v3972_v51, %v4132_v25  ;;  %v3164_v7 = vrot.slane %v3163_v3, 4  ;;  %v2220_v53 = vmax.f32 %v2162_v57, 0.0  ;;  %v3196_v55 = vrot.slane %v3195_v62, 1 }
 0x30f   : > { %4161 = vst.msk [vmem:[%s6059_s14 + $0x28] sm:$0xff] %vm3828_vm15, %v4133_v21  ;;  %v3209_v15 = vmax.f32 %v3207_v39, %v3208_v50  ;;  %v3170_v1 = vsel %vm2931_vm14, %v2409_v49, -inf  ;;  %v3158_v63 = vmax.f32 %v3156_v11, %v3157_v24  ;;  %v3177_v43 = vsel %vm2931_vm14, %v2411_v0, -inf }
 0x310   : > { %v3165_v31 = vmax.f32 %v3163_v3, %v3164_v7  ;;  %v3171_v20 = vrot.slane %v3170_v1, 4  ;;  %v3190_v23 = vmax.f32 %v3188_v60, %v3189_v37  ;;  %v3203_v2 = vrot.slane %v3202_v32, 1 }
 0x311   : > { %v3210_v10 = vrot.slane %v3209_v15, 1  ;;  %v3178_v14 = vrot.slane %v3177_v43, 4  ;;  %v3159_v41 = vrot.slane %v3158_v63, 2  ;;  %v2684_v22 = vcombine.high %v2220_v53, %v2220_v53 }
 0x312   : > { %v3166_v51 = vrot.slane %v3165_v31, 2  ;;  %v3172_v46 = vmax.f32 %v3170_v1, %v3171_v20  ;;  %v2691_v58 = vrot.slane %v2220_v53, %v5772_v5  ;;  %v2157_v34 = vadd.f32 %v6174_v30, %v6332_v28 }
 0x313   : > { %v3179_v44 = vmax.f32 %v3177_v43, %v3178_v14  ;;  %v3197_v17 = vmax.f32 %v3195_v62, %v3196_v55  ;;  %v3160_v13 = vmax.f32 %v3158_v63, %v3159_v41  ;;  %v2698_v8 = vrot.slane %v2684_v22, %v5772_v5 }
 0x314   : > { %v3173_v19 = vrot.slane %v3172_v46, 2  ;;  %v6393_v6 = vsel %vm3828_vm15, %v3190_v23, -inf  ;;  %v2699_v56 = vcombine.high %v2691_v58, %v2691_v58  ;;  %v3632_v4 = vsel %vm2931_vm14, %v2691_v58, -inf }
 0x315   : > { %v3180_v52 = vrot.slane %v3179_v44, 2  ;;  %v3204_v36 = vmax.f32 %v3202_v32, %v3203_v2  ;;  %v3211_v9 = vmax.f32 %v3209_v15, %v3210_v10  ;;  %v3167_v48 = vmax.f32 %v3165_v31, %v3166_v51 }
 0x316   : > { %v2700_v45 = vcombine.high %v2698_v8, %v2698_v8  ;;  %v3161_v26 = vrot.slane %v3160_v13, 1  ;;  %v3633_v33 = vrot.slane %v3632_v4, 4  ;;  %v3639_v28 = vsel %vm2931_vm14, %v2699_v56, -inf }
 0x317   : > { %v3646_v12 = vsel %vm2931_vm14, %v2698_v8, -inf  ;;  %v6399_v35 = vsel %vm3828_vm15, %v3197_v17, -inf  ;;  %v3174_v29 = vmax.f32 %v3172_v46, %v3173_v19  ;;  %v3640_v18 = vrot.slane %v3639_v28, 4 }
 0x318   : > { %v2219_v60 = vmax.f32 %v2157_v34, 0.0  ;;  %v3181_v42 = vmax.f32 %v3179_v44, %v3180_v52  ;;  %v3634_v49 = vmax.f32 %v3632_v4, %v3633_v33  ;;  %v3647_v59 = vrot.slane %v3646_v12, 4 }
 0x319   : > { %v3653_v40 = vsel %vm2931_vm14, %v2700_v45, -inf  ;;  %v6403_v47 = vsel %vm3828_vm15, %v3204_v36, -inf  ;;  %v6406_v38 = vsel %vm3828_vm15, %v3211_v9, -inf  ;;  %v3168_v54 = vrot.slane %v3167_v48, 1 }
 0x31a   : > { %v3641_v27 = vmax.f32 %v3639_v28, %v3640_v18  ;;  %v3162_v57 = vmax.f32 %v3160_v13, %v3161_v26  ;;  %v3635_v16 = vrot.slane %v3634_v49, 2  ;;  %v3648_v62 = vmax.f32 %v3646_v12, %v3647_v59 }
 0x31b   : > { %v3654_v39 = vrot.slane %v3653_v40, 4  ;;  %v3175_v61 = vrot.slane %v3174_v29, 1  ;;  %v2667_v11 = vcombine.high %v2219_v60, %v2219_v60  ;;  %v2674_v3 = vrot.slane %v2219_v60, %v5772_v5 }
 0x31c   : > { %v3642_v0 = vrot.slane %v3641_v27, 2  ;;  %v3182_v25 = vrot.slane %v3181_v42, 1  ;;  %v3636_v37 = vmax.f32 %v3634_v49, %v3635_v16  ;;  %v3649_v32 = vrot.slane %v3648_v62, 2 }
 0x31d   : > { %v3655_v50 = vmax.f32 %v3653_v40, %v3654_v39  ;;  %v2681_v7 = vrot.slane %v2667_v11, %v5772_v5  ;;  %v2682_v53 = vcombine.high %v2674_v3, %v2674_v3  ;;  %v3604_v55 = vsel %vm2931_vm14, %v2674_v3, -inf }
 0x31e   : > { %v3643_v24 = vmax.f32 %v3641_v27, %v3642_v0  ;;  %v3637_v1 = vrot.slane %v3636_v37, 1  ;;  %v3650_v63 = vmax.f32 %v3648_v62, %v3649_v32  ;;  %v3605_v20 = vrot.slane %v3604_v55, 4 }
 0x31f   : > { %v4327_v21 = vpop.f32.mrb[10].mxu0  ;;  %v3656_v31 = vrot.slane %v3655_v50, 2  ;;  %v3169_v43 = vmax.f32 %v3167_v48, %v3168_v54  ;;  %v2683_v23 = vcombine.high %v2681_v7, %v2681_v7  ;;  %v3611_v2 = vsel %vm2931_vm14, %v2682_v53, -inf }
 0x320   : > { %v2086_v15 = vpop.f32.mrb[11].mxu0  ;;  %v3618_v10 = vsel %vm2931_vm14, %v2681_v7, -inf  ;;  %v3644_v14 = vrot.slane %v3643_v24, 1  ;;  %v3651_v41 = vrot.slane %v3650_v63, 1  ;;  %v3606_v46 = vmax.f32 %v3604_v55, %v3605_v20 }
 0x321   : > { %v3657_v51 = vmax.f32 %v3655_v50, %v3656_v31  ;;  %v3176_v22 = vmax.f32 %v3174_v29, %v3175_v61  ;;  %v3612_v44 = vrot.slane %v3611_v2, 4  ;;  %v3619_v58 = vrot.slane %v3618_v10, 4 }
 0x322   : > { %v3625_v34 = vsel %vm2931_vm14, %v2683_v23, -inf  ;;  %v3183_v17 = vmax.f32 %v3181_v42, %v3182_v25  ;;  %v6415_v13 = vsel %vm3828_vm15, %v3162_v57, -inf  ;;  %v3638_v19 = vmax.f32 %v3636_v37, %v3637_v1 }
 0x323   : > { %v3607_v8 = vrot.slane %v3606_v46, 2  ;;  %v3658_v56 = vrot.slane %v3657_v51, 1  ;;  %v3613_v4 = vmax.f32 %v3611_v2, %v3612_v44  ;;  %v3620_v36 = vmax.f32 %v3618_v10, %v3619_v58 }
 0x324   : > { %v3626_v9 = vrot.slane %v3625_v34, 4  ;;  %v3645_v45 = vmax.f32 %v3643_v24, %v3644_v14  ;;  %v3652_v26 = vmax.f32 %v3650_v63, %v3651_v41  ;;  %v2092_v28 = vadd.f32 %v6174_v30, %v4327_v21 }
 0x325   : > { %v3608_v33 = vmax.f32 %v3606_v46, %v3607_v8  ;;  %v3614_v12 = vrot.slane %v3613_v4, 2  ;;  %v3621_v29 = vrot.slane %v3620_v36, 2  ;;  %v2087_v60 = vadd.f32 %v6174_v30, %v2086_v15 }
 0x326   : > { %v4351_v52 = vpop.f32.mrb[10].mxu1  ;;  %v3627_v18 = vmax.f32 %v3625_v34, %v3626_v9  ;;  %v6422_v42 = vsel %vm3828_vm15, %v3169_v43, -inf  ;;  %v6425_v49 = vsel %vm3828_vm15, %v3176_v22, -inf  ;;  %v6428_v59 = vsel %vm3828_vm15, %v3183_v17, -inf }
 0x327   : > { %v6417_v48 = vpop.f32.mrb[11].mxu1  ;;  %v2206_v40 = vmax.f32 %v2092_v28, 0.0  ;;  %v3659_v54 = vmax.f32 %v3657_v51, %v3658_v56  ;;  %v3609_v27 = vrot.slane %v3608_v33, 1  ;;  %v3615_v57 = vmax.f32 %v3613_v4, %v3614_v12 }
 0x328   : > { %v2205_v16 = vmax.f32 %v2087_v60, 0.0  ;;  %v6431_v62 = vsel %vm3828_vm15, %v3638_v19, -inf  ;;  %v6434_v39 = vsel %vm3828_vm15, %v3645_v45, -inf  ;;  %v6438_v11 = vsel %vm3828_vm15, %v3652_v26, -inf }
 0x329   : > { %v2446_v61 = vcombine.high %v2206_v40, %v2206_v40  ;;  %v2453_v0 = vrot.slane %v2206_v40, %v5772_v5  ;;  %v6440_v3 = vmax.f32 %v3620_v36, %v3621_v29  ;;  %v3628_v25 = vrot.slane %v3627_v18, 2 }
 0x32a   : > { %v2172_v37 = vadd.f32 %v6174_v30, %v4351_v52  ;;  %v2429_v24 = vcombine.high %v2205_v16, %v2205_v16  ;;  %v6446_v7 = vsel %vm3828_vm15, %v3659_v54, -inf  ;;  %v6448_v53 = vmax.f32 %v3608_v33, %v3609_v27 }
 0x32b   : > { %v2460_v32 = vrot.slane %v2446_v61, %v5772_v5  ;;  %v2461_v50 = vcombine.high %v2453_v0, %v2453_v0  ;;  %v3240_v21 = vsel %vm2931_vm14, %v2453_v0, -inf  ;;  %v3616_v55 = vrot.slane %v3615_v57, 1 }
 0x32c   : > { %v3241_v15 = vrot.slane %v3240_v21, 4  ;;  %v2436_v30 = vrot.slane %v2205_v16, %v5772_v5  ;;  %v3623_v20 = vrot.slane %v6440_v3, 1  ;;  %v6454_v43 = vmax.f32 %v3627_v18, %v3628_v25 }
 0x32d   : > { %v2462_v1 = vcombine.high %v2460_v32, %v2460_v32  ;;  %v3247_v63 = vsel %vm2931_vm14, %v2461_v50, -inf  ;;  %v3254_v31 = vsel %vm2931_vm14, %v2460_v32, -inf  ;;  %v6456_v2 = vmax.f32 %v2172_v37, 0.0 }
 0x32e   : > { %v3242_v23 = vmax.f32 %v3240_v21, %v3241_v15  ;;  %v3248_v10 = vrot.slane %v3247_v63, 4  ;;  %v3255_v14 = vrot.slane %v3254_v31, 4  ;;  %v2443_v51 = vrot.slane %v2429_v24, %v5772_v5 }
 0x32f   : > { %v3261_v41 = vsel %vm2931_vm14, %v2462_v1, -inf  ;;  %v6460_v46 = vmax.f32 %v3615_v57, %v3616_v55  ;;  %v2444_v58 = vcombine.high %v2436_v30, %v2436_v30  ;;  %v3212_v8 = vsel %vm2931_vm14, %v2436_v30, -inf }
 0x330   : > { %v3243_v22 = vrot.slane %v3242_v23, 2  ;;  %v3262_v44 = vrot.slane %v3261_v41, 4  ;;  %v3249_v34 = vmax.f32 %v3247_v63, %v3248_v10  ;;  %v3256_v17 = vmax.f32 %v3254_v31, %v3255_v14 }
 0x331   : > { %v2445_v19 = vcombine.high %v2443_v51, %v2443_v51  ;;  %v3213_v4 = vrot.slane %v3212_v8, 4  ;;  %v3219_v36 = vsel %vm2931_vm14, %v2444_v58, -inf  ;;  %v3226_v33 = vsel %vm2931_vm14, %v2443_v51, -inf }
 0x332   : > { %v3244_v52 = vmax.f32 %v3242_v23, %v3243_v22  ;;  %v3263_v56 = vmax.f32 %v3261_v41, %v3262_v44  ;;  %v3250_v9 = vrot.slane %v3249_v34, 2  ;;  %v3257_v45 = vrot.slane %v3256_v17, 2 }
 0x333   : > { %v3220_v26 = vrot.slane %v3219_v36, 4  ;;  %v3214_v29 = vmax.f32 %v3212_v8, %v3213_v4  ;;  %v3227_v18 = vrot.slane %v3226_v33, 4  ;;  %v3233_v27 = vsel %vm2931_vm14, %v2445_v19, -inf }
 0x334   : > { %v3245_v28 = vrot.slane %v3244_v52, 1  ;;  %v3264_v12 = vrot.slane %v3263_v56, 2  ;;  %v3251_v60 = vmax.f32 %v3249_v34, %v3250_v9  ;;  %v3258_v40 = vmax.f32 %v3256_v17, %v3257_v45 }
 0x335   : > { %v3221_v54 = vmax.f32 %v3219_v36, %v3220_v26  ;;  %v3215_v61 = vrot.slane %v3214_v29, 2  ;;  %v3228_v0 = vmax.f32 %v3226_v33, %v3227_v18  ;;  %v3234_v50 = vrot.slane %v3233_v27, 4 }
 0x336   : > { %v3246_v57 = vmax.f32 %v3244_v52, %v3245_v28  ;;  %v3265_v16 = vmax.f32 %v3263_v56, %v3264_v12  ;;  %v3252_v25 = vrot.slane %v3251_v60, 1  ;;  %v3259_v37 = vrot.slane %v3258_v40, 1 }
 0x337   : > { %v3222_v32 = vrot.slane %v3221_v54, 2  ;;  %v3216_v55 = vmax.f32 %v3214_v29, %v3215_v61  ;;  %v3229_v15 = vrot.slane %v3228_v0, 2  ;;  %v3235_v41 = vmax.f32 %v3233_v27, %v3234_v50 }
 0x338   : > { %v3266_v21 = vrot.slane %v3265_v16, 1  ;;  %v6467_v24 = vsel %vm3828_vm15, %v3246_v57, -inf  ;;  %v3253_v1 = vmax.f32 %v3251_v60, %v3252_v25  ;;  %v3260_v63 = vmax.f32 %v3258_v40, %v3259_v37 }
 0x339   : > { %v3891_v31 = vmax.f32 %v6393_v6, %v6467_v24  ;;  %v3223_v30 = vmax.f32 %v3221_v54, %v3222_v32  ;;  %v3217_v10 = vrot.slane %v3216_v55, 1  ;;  %v3230_v14 = vmax.f32 %v3228_v0, %v3229_v15 }
 0x33a   : > { %v3267_v23 = vmax.f32 %v3265_v16, %v3266_v21  ;;  %v6472_v51 = vsel %vm3828_vm15, %v3253_v1, -inf  ;;  %v6475_v22 = vsel %vm3828_vm15, %v3260_v63, -inf  ;;  %v2718_v58 = vcombine.high %v6456_v2, %v6456_v2 }
 0x33b   : > { %v3224_v44 = vrot.slane %v3223_v30, 1  ;;  %v3894_v34 = vmax.f32 %v6399_v35, %v6472_v51  ;;  %v3897_v17 = vmax.f32 %v6403_v47, %v6475_v22  ;;  %v3218_v8 = vmax.f32 %v3216_v55, %v3217_v10  ;;  %v6495_v47 = vld [vmem:[%s6774_s2] ss:$0 sm:$0xff] }
 0x33c   : > { %v6484_v19 = vsel %vm3828_vm15, %v3267_v23, -inf  ;;  %v3231_v4 = vrot.slane %v3230_v14, 1  ;;  %v3236_v36 = vrot.slane %v3235_v41, 2  ;;  %v2725_v45 = vrot.slane %v6456_v2, %v5772_v5 }
 0x33d   : > { %v3900_v52 = vmax.f32 %v6406_v38, %v6484_v19  ;;  %v3225_v56 = vmax.f32 %v3223_v30, %v3224_v44  ;;  %v3878_v9 = vsel %vm3828_vm15, %v3218_v8, -inf  ;;  %v2732_v35 = vrot.slane %v2718_v58, %v5772_v5 }
 0x33e   : > { %v2167_v26 = vadd.f32 %v6495_v47, %v6417_v48  ;;  %v3232_v33 = vmax.f32 %v3230_v14, %v3231_v4  ;;  %v3237_v38 = vmax.f32 %v3235_v41, %v3236_v36  ;;  %v3879_v28 = vmax.f32 %v6415_v13, %v3878_v9 }
 0x33f   : > { %v3881_v12 = vsel %vm3828_vm15, %v3225_v56, -inf  ;;  %v2733_v18 = vcombine.high %v2725_v45, %v2725_v45  ;;  %v2734_v2 = vcombine.high %v2732_v35, %v2732_v35  ;;  %v3688_v60 = vsel %vm2931_vm14, %v2725_v45, -inf }
 0x340   : > { %v3882_v29 = vmax.f32 %v6422_v42, %v3881_v12  ;;  %v3238_v40 = vrot.slane %v3237_v38, 1  ;;  %v3884_v54 = vsel %vm3828_vm15, %v3232_v33, -inf  ;;  %v3689_v27 = vrot.slane %v3688_v60, 4 }
 0x341   : > { %v3702_v57 = vsel %vm2931_vm14, %v2732_v35, -inf  ;;  %v3885_v48 = vmax.f32 %v6425_v49, %v3884_v54  ;;  %v3695_v13 = vsel %vm2931_vm14, %v2733_v18, -inf  ;;  %v3709_v37 = vsel %vm2931_vm14, %v2734_v2, -inf }
 0x342   : > { %v4106_v16 = vsel %vm4085_vm0, %v3882_v29, %v3879_v28  ;;  %v3703_v61 = vrot.slane %v3702_v57, 4  ;;  %v3239_v0 = vmax.f32 %v3237_v38, %v3238_v40  ;;  %v3690_v25 = vmax.f32 %v3688_v60, %v3689_v27 }
 0x343   : > { %v3696_v42 = vrot.slane %v3695_v13, 4  ;;  %v4107_v32 = vsel %vm4087_vm1, %v3885_v48, %v4106_v16  ;;  %v3710_v21 = vrot.slane %v3709_v37, 4  ;;  %v2221_v55 = vmax.f32 %v2167_v26, 0.0 }
 0x344   : > { %v3704_v50 = vmax.f32 %v3702_v57, %v3703_v61  ;;  %v6513_v15 = vmax.f32 %v6440_v3, %v3623_v20  ;;  %v3887_v49 = vsel %vm3828_vm15, %v3239_v0, -inf  ;;  %v3691_v1 = vrot.slane %v3690_v25, 2 }
 0x345   : > { %v3697_v63 = vmax.f32 %v3695_v13, %v3696_v42  ;;  %v3888_v30 = vmax.f32 %v6428_v59, %v3887_v49  ;;  %v3711_v10 = vmax.f32 %v3709_v37, %v3710_v21  ;;  %v2701_v14 = vcombine.high %v2221_v55, %v2221_v55 }
 0x346   : > { %v3705_v23 = vrot.slane %v3704_v50, 2  ;;  %v3630_v41 = vrot.slane %v6454_v43, 1  ;;  %v3692_v51 = vmax.f32 %v3690_v25, %v3691_v1  ;;  %v2708_v44 = vrot.slane %v2221_v55, %v5772_v5 }
 0x347   : > { %v3698_v22 = vrot.slane %v3697_v63, 2  ;;  %v4108_v58 = vsel %vm4089_vm2, %v3888_v30, %v4107_v32  ;;  %v3712_v3 = vrot.slane %v3711_v10, 2  ;;  %v2715_v20 = vrot.slane %v2701_v14, %v5772_v5 }
 0x348   : > { %v3706_v19 = vmax.f32 %v3704_v50, %v3705_v23  ;;  %v4109_v59 = vsel %vm4091_vm3, %v3891_v31, %v4108_v58  ;;  %v3693_v8 = vrot.slane %v3692_v51, 1  ;;  %v2716_v4 = vcombine.high %v2708_v44, %v2708_v44 }
 0x349   : > { %v3699_v56 = vmax.f32 %v3697_v63, %v3698_v22  ;;  %v4110_v36 = vsel %vm4093_vm4, %v3894_v34, %v4109_v59  ;;  %v3713_v45 = vmax.f32 %v3711_v10, %v3712_v3  ;;  %v2717_v35 = vcombine.high %v2715_v20, %v2715_v20 }
 0x34a   : > { %v3707_v9 = vrot.slane %v3706_v19, 1  ;;  %v4111_v26 = vsel %vm4095_vm5, %v3897_v17, %v4110_v36  ;;  %v3694_v33 = vmax.f32 %v3692_v51, %v3693_v8  ;;  %v3660_v28 = vsel %vm2931_vm14, %v2708_v44, -inf }
 0x34b   : > { %v3700_v38 = vrot.slane %v3699_v56, 1  ;;  %v4112_v12 = vsel %vm4097_vm6, %v3900_v52, %v4111_v26  ;;  %v3714_v24 = vrot.slane %v3713_v45, 1  ;;  %v3661_v31 = vrot.slane %v3660_v28, 4 }
 0x34c   : > { %v3708_v6 = vmax.f32 %v3706_v19, %v3707_v9  ;;  %4158 = vst.msk [vmem:[%s6059_s14 + $0x10] sm:$0xff] %vm3828_vm15, %v4112_v12  ;;  %v6532_v18 = vsel %vm3828_vm15, %v3694_v33, -inf  ;;  %v3667_v34 = vsel %vm2931_vm14, %v2716_v4, -inf  ;;  %v3674_v2 = vsel %vm2931_vm14, %v2715_v20, -inf }
 0x34d   : > { %v3701_v29 = vmax.f32 %v3699_v56, %v3700_v38  ;;  %v3715_v17 = vmax.f32 %v3713_v45, %v3714_v24  ;;  %v3987_v60 = vmax.f32 %v6431_v62, %v6532_v18  ;;  %v3662_v52 = vmax.f32 %v3660_v28, %v3661_v31 }
 0x34e   : > { %v6539_v40 = vsel %vm3828_vm15, %v3708_v6, -inf  ;;  %v3668_v48 = vrot.slane %v3667_v34, 4  ;;  %v3675_v16 = vrot.slane %v3674_v2, 4  ;;  %v3681_v37 = vsel %vm2931_vm14, %v2717_v35, -inf }
 0x34f   : > { %v4330_v54 = vpop.f32.mrb[12].mxu0  ;;  %v6542_v27 = vsel %vm3828_vm15, %v3701_v29, -inf  ;;  %v3993_v57 = vmax.f32 %v6438_v11, %v6539_v40  ;;  %v6551_v25 = vsel %vm3828_vm15, %v3715_v17, -inf  ;;  %v3663_v42 = vrot.slane %v3662_v52, 2 }
 0x350   : > { %v2096_v13 = vpop.f32.mrb[13].mxu0  ;;  %v3990_v0 = vmax.f32 %v6434_v39, %v6542_v27  ;;  %v3996_v50 = vmax.f32 %v6446_v7, %v6551_v25  ;;  %v3669_v21 = vmax.f32 %v3667_v34, %v3668_v48  ;;  %v3676_v55 = vmax.f32 %v3674_v2, %v3675_v16 }
 0x351   : > { %v3682_v49 = vrot.slane %v3681_v37, 4  ;;  %v3973_v1 = vsel %vm3828_vm15, %v6448_v53, -inf  ;;  %v3664_v63 = vmax.f32 %v3662_v52, %v3663_v42  ;;  %v2102_v30 = vadd.f32 %v6495_v47, %v4330_v54 }
 0x352   : > { %v6546_v61 = vpop.f32.mrb[12].mxu1  ;;  %v2097_v23 = vadd.f32 %v6495_v47, %v2096_v13  ;;  %v3631_v10 = vmax.f32 %v6454_v43, %v3630_v41  ;;  %v3670_v14 = vrot.slane %v3669_v21, 2  ;;  %v3677_v51 = vrot.slane %v3676_v55, 2 }
 0x353   : > { %v6554_v32 = vpop.f32.mrb[13].mxu1  ;;  %v3683_v22 = vmax.f32 %v3681_v37, %v3682_v49  ;;  %v3976_v44 = vsel %vm3828_vm15, %v6460_v46, -inf  ;;  %v3665_v58 = vrot.slane %v3664_v63, 1  ;;  %v2208_v19 = vmax.f32 %v2102_v30, 0.0 }
 0x354   : > { %v2207_v3 = vmax.f32 %v2097_v23, 0.0  ;;  %v3979_v20 = vsel %vm3828_vm15, %v6513_v15, -inf  ;;  %v3671_v53 = vmax.f32 %v3669_v21, %v3670_v14  ;;  %v3678_v59 = vmax.f32 %v3676_v55, %v3677_v51 }
 0x355   : > { %v3684_v8 = vrot.slane %v3683_v22, 2  ;;  %v3666_v56 = vmax.f32 %v3664_v63, %v3665_v58  ;;  %v2480_v4 = vcombine.high %v2208_v19, %v2208_v19  ;;  %v2487_v36 = vrot.slane %v2208_v19, %v5772_v5 }
 0x356   : > { %v2463_v43 = vcombine.high %v2207_v3, %v2207_v3  ;;  %v3672_v41 = vrot.slane %v3671_v53, 1  ;;  %v3679_v9 = vrot.slane %v3678_v59, 1  ;;  %v2470_v35 = vrot.slane %v2207_v3, %v5772_v5 }
 0x357   : > { %v3685_v45 = vmax.f32 %v3683_v22, %v3684_v8  ;;  %v3974_v46 = vsel %vm3828_vm15, %v3666_v56, -inf  ;;  %v2494_v26 = vrot.slane %v2480_v4, %v5772_v5  ;;  %v2495_v33 = vcombine.high %v2487_v36, %v2487_v36 }
 0x358   : > { %v3296_v15 = vsel %vm2931_vm14, %v2487_v36, -inf  ;;  %v3673_v38 = vmax.f32 %v3671_v53, %v3672_v41  ;;  %v3680_v28 = vmax.f32 %v3678_v59, %v3679_v9  ;;  %v3975_v6 = vmax.f32 %v3973_v1, %v3974_v46 }
 0x359   : > { %v3686_v12 = vrot.slane %v3685_v45, 1  ;;  %v2496_v24 = vcombine.high %v2494_v26, %v2494_v26  ;;  %v3297_v31 = vrot.slane %v3296_v15, 4  ;;  %v3303_v29 = vsel %vm2931_vm14, %v2495_v33, -inf }
 0x35a   : > { %v3310_v34 = vsel %vm2931_vm14, %v2494_v26, -inf  ;;  %v3977_v17 = vsel %vm3828_vm15, %v3673_v38, -inf  ;;  %v3980_v52 = vsel %vm3828_vm15, %v3680_v28, -inf  ;;  %v3304_v54 = vrot.slane %v3303_v29, 4 }
 0x35b   : > { %v3687_v2 = vmax.f32 %v3685_v45, %v3686_v12  ;;  %v3978_v48 = vmax.f32 %v3976_v44, %v3977_v17  ;;  %v3981_v16 = vmax.f32 %v3979_v20, %v3980_v52  ;;  %v3298_v13 = vmax.f32 %v3296_v15, %v3297_v31 }
 0x35c   : > { %v3311_v42 = vrot.slane %v3310_v34, 4  ;;  %v3982_v37 = vsel %vm3828_vm15, %v3631_v10, -inf  ;;  %v3305_v55 = vmax.f32 %v3303_v29, %v3304_v54  ;;  %v3317_v49 = vsel %vm2931_vm14, %v2496_v24, -inf }
 0x35d   : > { %v3983_v21 = vsel %vm3828_vm15, %v3687_v2, -inf  ;;  %v4134_v63 = vsel %vm4085_vm0, %v3978_v48, %v3975_v6  ;;  %v2477_v23 = vrot.slane %v2463_v43, %v5772_v5  ;;  %v3299_v51 = vrot.slane %v3298_v13, 2 }
 0x35e   : > { %v3984_v1 = vmax.f32 %v3982_v37, %v3983_v21  ;;  %v3312_v30 = vmax.f32 %v3310_v34, %v3311_v42  ;;  %v4135_v14 = vsel %vm4087_vm1, %v3981_v16, %v4134_v63  ;;  %v3318_v22 = vrot.slane %v3317_v49, 4 }
 0x35f   : > { %v2478_v44 = vcombine.high %v2470_v35, %v2470_v35  ;;  %v3306_v10 = vrot.slane %v3305_v55, 2  ;;  %v3268_v20 = vsel %vm2931_vm14, %v2470_v35, -inf  ;;  %v2182_v53 = vadd.f32 %v6495_v47, %v6546_v61 }
 0x360   : > { %v4136_v58 = vsel %vm4089_vm2, %v3984_v1, %v4135_v14  ;;  %v3319_v3 = vmax.f32 %v3317_v49, %v3318_v22  ;;  %v3313_v8 = vrot.slane %v3312_v30, 2  ;;  %v3269_v56 = vrot.slane %v3268_v20, 4 }
 0x361   : > { %v4137_v19 = vsel %vm4091_vm3, %v3987_v60, %v4136_v58  ;;  %v3300_v18 = vmax.f32 %v3298_v13, %v3299_v51  ;;  %v2479_v60 = vcombine.high %v2477_v23, %v2477_v23  ;;  %v3275_v4 = vsel %vm2931_vm14, %v2478_v44, -inf }
 0x362   : > { %v4138_v59 = vsel %vm4093_vm4, %v3990_v0, %v4137_v19  ;;  %v3307_v36 = vmax.f32 %v3305_v55, %v3306_v10  ;;  %v3320_v39 = vrot.slane %v3319_v3, 2  ;;  %v3276_v27 = vrot.slane %v3275_v4, 4 }
 0x363   : > { %v4139_v62 = vsel %vm4095_vm5, %v3993_v57, %v4138_v59  ;;  %v3282_v0 = vsel %vm2931_vm14, %v2477_v23, -inf  ;;  %v2224_v43 = vmax.f32 %v2182_v53, 0.0  ;;  %v3314_v11 = vmax.f32 %v3312_v30, %v3313_v8 }
 0x364   : > { %v4140_v61 = vsel %vm4097_vm6, %v3996_v50, %v4139_v62  ;;  %v3270_v40 = vmax.f32 %v3268_v20, %v3269_v56  ;;  %v3283_v57 = vrot.slane %v3282_v0, 4  ;;  %v3301_v41 = vrot.slane %v3300_v18, 1 }
 0x365   : > { %4162 = vst.msk [vmem:[%s6059_s14 + $0x30] sm:$0xff] %vm3828_vm15, %v4140_v61  ;;  %v3289_v9 = vsel %vm2931_vm14, %v2479_v60, -inf  ;;  %v2177_v45 = vadd.f32 %v6495_v47, %v6554_v32  ;;  %v3308_v7 = vrot.slane %v3307_v36, 1  ;;  %v3277_v25 = vmax.f32 %v3275_v4, %v3276_v27 }
 0x366   : > { %v3284_v50 = vmax.f32 %v3282_v0, %v3283_v57  ;;  %v3290_v35 = vrot.slane %v3289_v9, 4  ;;  %v3321_v46 = vmax.f32 %v3319_v3, %v3320_v39  ;;  %v2752_v26 = vcombine.high %v2224_v43, %v2224_v43 }
 0x367   : > { %v2759_v33 = vrot.slane %v2224_v43, %v5772_v5  ;;  %v3315_v15 = vrot.slane %v3314_v11, 1  ;;  %v3271_v38 = vrot.slane %v3270_v40, 2  ;;  %v3302_v12 = vmax.f32 %v3300_v18, %v3301_v41 }
 0x368   : > { %v3291_v28 = vmax.f32 %v3289_v9, %v3290_v35  ;;  %v2766_v6 = vrot.slane %v2752_v26, %v5772_v5  ;;  %v2223_v31 = vmax.f32 %v2177_v45, 0.0  ;;  %v3309_v29 = vmax.f32 %v3307_v36, %v3308_v7 }
 0x369   : > { %v2767_v24 = vcombine.high %v2759_v33, %v2759_v33  ;;  %v3278_v34 = vrot.slane %v3277_v25, 2  ;;  %v3285_v2 = vrot.slane %v3284_v50, 2  ;;  %v3744_v32 = vsel %vm2931_vm14, %v2759_v33, -inf }
 0x36a   : > { %v3322_v17 = vrot.slane %v3321_v46, 1  ;;  %v2768_v52 = vcombine.high %v2766_v6, %v2766_v6  ;;  %v3745_v54 = vrot.slane %v3744_v32, 4  ;;  %v3316_v16 = vmax.f32 %v3314_v11, %v3315_v15 }
 0x36b   : > { %v3751_v48 = vsel %vm2931_vm14, %v2767_v24, -inf  ;;  %v3272_v13 = vmax.f32 %v3270_v40, %v3271_v38  ;;  %v3292_v42 = vrot.slane %v3291_v28, 2  ;;  %v3758_v55 = vsel %vm2931_vm14, %v2766_v6, -inf }
 0x36c   : > { %v3752_v37 = vrot.slane %v3751_v48, 4  ;;  %v3746_v21 = vmax.f32 %v3744_v32, %v3745_v54  ;;  %v3765_v49 = vsel %vm2931_vm14, %v2768_v52, -inf  ;;  %v2735_v1 = vcombine.high %v2223_v31, %v2223_v31 }
 0x36d   : > { %v3279_v63 = vmax.f32 %v3277_v25, %v3278_v34  ;;  %v3286_v30 = vmax.f32 %v3284_v50, %v3285_v2  ;;  %v3759_v14 = vrot.slane %v3758_v55, 4  ;;  %v3323_v51 = vmax.f32 %v3321_v46, %v3322_v17 }
 0x36e   : > { %v3753_v23 = vmax.f32 %v3751_v48, %v3752_v37  ;;  %v3747_v22 = vrot.slane %v3746_v21, 2  ;;  %v3766_v44 = vrot.slane %v3765_v49, 4  ;;  %v2742_v58 = vrot.slane %v2223_v31, %v5772_v5 }
 0x36f   : > { %v3273_v10 = vrot.slane %v3272_v13, 1  ;;  %v3293_v19 = vmax.f32 %v3291_v28, %v3292_v42  ;;  %v3760_v20 = vmax.f32 %v3758_v55, %v3759_v14  ;;  %v2749_v8 = vrot.slane %v2735_v1, %v5772_v5 }
 0x370   : > { %v3754_v3 = vrot.slane %v3753_v23, 2  ;;  %v3748_v53 = vmax.f32 %v3746_v21, %v3747_v22  ;;  %v3767_v59 = vmax.f32 %v3765_v49, %v3766_v44  ;;  %v2750_v56 = vcombine.high %v2742_v58, %v2742_v58 }
 0x371   : > { %v3280_v62 = vrot.slane %v3279_v63, 1  ;;  %v3287_v18 = vrot.slane %v3286_v30, 1  ;;  %v3761_v60 = vrot.slane %v3760_v20, 2  ;;  %v3716_v4 = vsel %vm2931_vm14, %v2742_v58, -inf }
 0x372   : > { %v3755_v61 = vmax.f32 %v3753_v23, %v3754_v3  ;;  %v3768_v36 = vrot.slane %v3767_v59, 2  ;;  %v2751_v39 = vcombine.high %v2749_v8, %v2749_v8  ;;  %v3717_v27 = vrot.slane %v3716_v4, 4 }
 0x373   : > { %v3294_v0 = vrot.slane %v3293_v19, 1  ;;  %v3762_v43 = vmax.f32 %v3760_v20, %v3761_v60  ;;  %v3723_v11 = vsel %vm2931_vm14, %v2750_v56, -inf  ;;  %v3730_v40 = vsel %vm2931_vm14, %v2749_v8, -inf }
 0x374   : > { %v3749_v57 = vrot.slane %v3748_v53, 1  ;;  %v3769_v41 = vmax.f32 %v3767_v59, %v3768_v36  ;;  %v3718_v9 = vmax.f32 %v3716_v4, %v3717_v27  ;;  %v3724_v45 = vrot.slane %v3723_v11, 4 }
 0x375   : > { %v6621_v7 = vsel %vm3828_vm15, %v3302_v12, -inf  ;;  %v6624_v25 = vsel %vm3828_vm15, %v3309_v29, -inf  ;;  %v3274_v50 = vmax.f32 %v3272_v13, %v3273_v10  ;;  %v3731_v35 = vrot.slane %v3730_v40, 4 }
 0x376   : > { %v3281_v46 = vmax.f32 %v3279_v63, %v3280_v62  ;;  %v3756_v26 = vrot.slane %v3755_v61, 1  ;;  %v3763_v33 = vrot.slane %v3762_v43, 1  ;;  %v3737_v15 = vsel %vm2931_vm14, %v2751_v39, -inf }
 0x377   : > { %v6628_v38 = vsel %vm3828_vm15, %v3316_v16, -inf  ;;  %v3288_v28 = vmax.f32 %v3286_v30, %v3287_v18  ;;  %v3770_v6 = vrot.slane %v3769_v41, 1  ;;  %v3719_v24 = vrot.slane %v3718_v9, 2 }
 0x378   : > { %v6631_v31 = vsel %vm3828_vm15, %v3323_v51, -inf  ;;  %v3295_v12 = vmax.f32 %v3293_v19, %v3294_v0  ;;  %v3750_v34 = vmax.f32 %v3748_v53, %v3749_v57  ;;  %v3725_v29 = vmax.f32 %v3723_v11, %v3724_v45 }
 0x379   : > { %v6634_v32 = vsel %vm3828_vm15, %v3274_v50, -inf  ;;  %v3732_v17 = vmax.f32 %v3730_v40, %v3731_v35  ;;  %v3738_v52 = vrot.slane %v3737_v15, 4  ;;  %v6638_v16 = vsel %vm3828_vm15, %v3281_v46, -inf }
 0x37a   : > { %v3757_v13 = vmax.f32 %v3755_v61, %v3756_v26  ;;  %v3764_v42 = vmax.f32 %v3762_v43, %v3763_v33  ;;  %v6642_v21 = vsel %vm3828_vm15, %v3288_v28, -inf  ;;  %v3771_v55 = vmax.f32 %v3769_v41, %v3770_v6 }
 0x37b   : > { %v6644_v49 = vmax.f32 %v3718_v9, %v3719_v24  ;;  %v6647_v30 = vsel %vm3828_vm15, %v3295_v12, -inf  ;;  %v6650_v23 = vsel %vm3828_vm15, %v3750_v34, -inf  ;;  %v3726_v14 = vrot.slane %v3725_v29, 2 }
 0x37c   : > { %v3733_v44 = vrot.slane %v3732_v17, 2  ;;  %v6654_v58 = vmax.f32 %v3737_v15, %v3738_v52  ;;  %v6658_v3 = vsel %vm3828_vm15, %v3757_v13, -inf  ;;  %v6661_v20 = vsel %vm3828_vm15, %v3764_v42, -inf }
 0x37d   : > { %v4333_v2 = vpop.f32.mrb[14].mxu0  ;;  %v6665_v8 = vsel %vm3828_vm15, %v3771_v55, -inf  ;;  %v3721_v56 = vrot.slane %v6644_v49, 1  ;;  %v6669_v60 = vmax.f32 %v3725_v29, %v3726_v14 }
 0x37e   : > { %v2112_v54 = vadd.f32 %v6495_v47, %v4333_v2  ;;  %v2106_v48 = vpop.f32.mrb[15].mxu0  ;;  %v6673_v39 = vmax.f32 %v3732_v17, %v3733_v44  ;;  %v3740_v27 = vrot.slane %v6654_v58, 2 }
 0x37f   : > { %v2107_v37 = vadd.f32 %v6495_v47, %v2106_v48 }
 0x380   : > { %v2210_v1 = vmax.f32 %v2112_v54, 0.0  ;;  %v4357_v63 = vpop.f32.mrb[14].mxu1 }
 0x381   : > { %v2209_v51 = vmax.f32 %v2107_v37, 0.0  ;;  %v6652_v22 = vpop.f32.mrb[15].mxu1  ;;  %v2192_v35 = vadd.f32 %v6495_v47, %v4357_v63 }
 0x382   : > { %v2514_v10 = vcombine.high %v2210_v1, %v2210_v1  ;;  %v2521_v19 = vrot.slane %v2210_v1, %v5772_v5 }
 0x383   : > { %v2497_v53 = vcombine.high %v2209_v51, %v2209_v51  ;;  %v2504_v59 = vrot.slane %v2209_v51, %v5772_v5 }
 0x384   : > { %v2528_v62 = vrot.slane %v2514_v10, %v5772_v5  ;;  %v2529_v18 = vcombine.high %v2521_v19, %v2521_v19  ;;  %v3352_v4 = vsel %vm2931_vm14, %v2521_v19, -inf }
 0x385   : > { %v2511_v61 = vrot.slane %v2497_v53, %v5772_v5  ;;  %v2512_v36 = vcombine.high %v2504_v59, %v2504_v59  ;;  %v3353_v43 = vrot.slane %v3352_v4, 4  ;;  %v3324_v41 = vsel %vm2931_vm14, %v2504_v59, -inf }
 0x386   : > { %v2530_v0 = vcombine.high %v2528_v62, %v2528_v62  ;;  %v3359_v11 = vsel %vm2931_vm14, %v2529_v18, -inf  ;;  %v3366_v40 = vsel %vm2931_vm14, %v2528_v62, -inf  ;;  %v3325_v26 = vrot.slane %v3324_v41, 4 }
 0x387   : > { %v2513_v57 = vcombine.high %v2511_v61, %v2511_v61  ;;  %v3354_v9 = vmax.f32 %v3352_v4, %v3353_v43  ;;  %v3360_v45 = vrot.slane %v3359_v11, 4  ;;  %v3367_v50 = vrot.slane %v3366_v40, 4 }
 0x388   : > { %v3373_v46 = vsel %vm2931_vm14, %v2530_v0, -inf  ;;  %v3331_v33 = vsel %vm2931_vm14, %v2512_v36, -inf  ;;  %v3338_v15 = vsel %vm2931_vm14, %v2511_v61, -inf  ;;  %v3326_v34 = vmax.f32 %v3324_v41, %v3325_v26 }
 0x389   : > { %v3355_v28 = vrot.slane %v3354_v9, 2  ;;  %v3361_v6 = vmax.f32 %v3359_v11, %v3360_v45  ;;  %v3368_v24 = vmax.f32 %v3366_v40, %v3367_v50  ;;  %v3374_v12 = vrot.slane %v3373_v46, 4 }
 0x38a   : > { %v3332_v29 = vrot.slane %v3331_v33, 4  ;;  %v3339_v2 = vrot.slane %v3338_v15, 4  ;;  %v3345_v17 = vsel %vm2931_vm14, %v2513_v57, -inf  ;;  %v3327_v42 = vrot.slane %v3326_v34, 2 }
 0x38b   : > { %v3356_v52 = vmax.f32 %v3354_v9, %v3355_v28  ;;  %v3362_v54 = vrot.slane %v3361_v6, 2  ;;  %v3369_v48 = vrot.slane %v3368_v24, 2  ;;  %v3375_v13 = vmax.f32 %v3373_v46, %v3374_v12 }
 0x38c   : > { %v3333_v37 = vmax.f32 %v3331_v33, %v3332_v29  ;;  %v3340_v55 = vmax.f32 %v3338_v15, %v3339_v2  ;;  %v3346_v1 = vrot.slane %v3345_v17, 4  ;;  %v3328_v10 = vmax.f32 %v3326_v34, %v3327_v42 }
 0x38d   : > { %v3357_v63 = vrot.slane %v3356_v52, 1  ;;  %v3363_v14 = vmax.f32 %v3361_v6, %v3362_v54  ;;  %v3370_v51 = vmax.f32 %v3368_v24, %v3369_v48  ;;  %v3376_v44 = vrot.slane %v3375_v13, 2 }
 0x38e   : > { %v3334_v19 = vrot.slane %v3333_v37, 2  ;;  %v3341_v53 = vrot.slane %v3340_v55, 2  ;;  %v3347_v59 = vmax.f32 %v3345_v17, %v3346_v1  ;;  %v3329_v36 = vrot.slane %v3328_v10, 1 }
 0x38f   : > { %v3358_v62 = vmax.f32 %v3356_v52, %v3357_v63  ;;  %v3364_v18 = vrot.slane %v3363_v14, 1  ;;  %v3371_v4 = vrot.slane %v3370_v51, 1  ;;  %v3377_v61 = vmax.f32 %v3375_v13, %v3376_v44 }
 0x390   : > { %v3335_v0 = vmax.f32 %v3333_v37, %v3334_v19  ;;  %v3342_v43 = vmax.f32 %v3340_v55, %v3341_v53  ;;  %v3348_v11 = vrot.slane %v3347_v59, 2  ;;  %v3330_v50 = vmax.f32 %v3328_v10, %v3329_v36 }
 0x391   : > { %v3365_v40 = vmax.f32 %v3363_v14, %v3364_v18  ;;  %v3372_v57 = vmax.f32 %v3370_v51, %v3371_v4  ;;  %v3378_v41 = vrot.slane %v3377_v61, 1  ;;  %v3914_v9 = vsel %vm3828_vm15, %v3358_v62, -inf }
 0x392   : > { %v3915_v45 = vmax.f32 %v6621_v7, %v3914_v9  ;;  %v3336_v46 = vrot.slane %v3335_v0, 1  ;;  %v3343_v26 = vrot.slane %v3342_v43, 1  ;;  %v3349_v6 = vmax.f32 %v3347_v59, %v3348_v11 }
 0x393   : > { %v3379_v33 = vmax.f32 %v3377_v61, %v3378_v41  ;;  %v3917_v15 = vsel %vm3828_vm15, %v3365_v40, -inf  ;;  %v3920_v28 = vsel %vm3828_vm15, %v3372_v57, -inf  ;;  %v3902_v7 = vsel %vm3828_vm15, %v3330_v50, -inf }
 0x394   : > { %v3918_v24 = vmax.f32 %v6624_v25, %v3917_v15  ;;  %v3921_v12 = vmax.f32 %v6628_v38, %v3920_v28  ;;  %v3337_v34 = vmax.f32 %v3335_v0, %v3336_v46  ;;  %v3344_v29 = vmax.f32 %v3342_v43, %v3343_v26 }
 0x395   : > { %v3923_v2 = vsel %vm3828_vm15, %v3379_v33, -inf  ;;  %v3350_v17 = vrot.slane %v3349_v6, 1  ;;  %v2226_v52 = vmax.f32 %v2192_v35, 0.0  ;;  %v3903_v48 = vmax.f32 %v6634_v32, %v3902_v7 }
 0x396   : > { %v3924_v54 = vmax.f32 %v6631_v31, %v3923_v2  ;;  %v3905_v13 = vsel %vm3828_vm15, %v3337_v34, -inf  ;;  %v3908_v42 = vsel %vm3828_vm15, %v3344_v29, -inf  ;;  %v6701_v1 = vmax.f32 %v6644_v49, %v3721_v56 }
 0x397   : > { %v3351_v37 = vmax.f32 %v3349_v6, %v3350_v17  ;;  %v3906_v25 = vmax.f32 %v6638_v16, %v3905_v13  ;;  %v3909_v38 = vmax.f32 %v6642_v21, %v3908_v42  ;;  %v2786_v55 = vcombine.high %v2226_v52, %v2226_v52 }
 0x398   : > { %v3728_v35 = vrot.slane %v6669_v60, 1  ;;  %v2793_v31 = vrot.slane %v2226_v52, %v5772_v5  ;;  %v2187_v32 = vadd.f32 %v6495_v47, %v6652_v22  ;;  %v3735_v63 = vrot.slane %v6673_v39, 1 }
 0x399   : > { %v3911_v14 = vsel %vm3828_vm15, %v3351_v37, -inf  ;;  %v4113_v16 = vsel %vm4085_vm0, %v3906_v25, %v3903_v48  ;;  %v2800_v21 = vrot.slane %v2786_v55, %v5772_v5  ;;  %v6718_v22 = vmax.f32 %v6654_v58, %v3740_v27 }
 0x39a   : > { %v3912_v51 = vmax.f32 %v6647_v30, %v3911_v14  ;;  %v4114_v49 = vsel %vm4087_vm1, %v3909_v38, %v4113_v16  ;;  %v2801_v56 = vcombine.high %v2793_v31, %v2793_v31  ;;  %v3800_v44 = vsel %vm2931_vm14, %v2793_v31, -inf }
 0x39b   : > { %v2802_v10 = vcombine.high %v2800_v21, %v2800_v21  ;;  %v3801_v19 = vrot.slane %v3800_v44, 4  ;;  %v3814_v53 = vsel %vm2931_vm14, %v2800_v21, -inf  ;;  %v2225_v47 = vmax.f32 %v2187_v32, 0.0 }
 0x39c   : > { %v4115_v59 = vsel %vm4089_vm2, %v3912_v51, %v4114_v49  ;;  %v3807_v62 = vsel %vm2931_vm14, %v2801_v56, -inf  ;;  %v3815_v30 = vrot.slane %v3814_v53, 4 }
 0x39d   : > { %v4116_v18 = vsel %vm4091_vm3, %v3915_v45, %v4115_v59  ;;  %v3802_v4 = vmax.f32 %v3800_v44, %v3801_v19  ;;  %v3808_v61 = vrot.slane %v3807_v62, 4  ;;  %v3821_v36 = vsel %vm2931_vm14, %v2802_v10, -inf }
 0x39e   : > { %v4117_v0 = vsel %vm4093_vm4, %v3918_v24, %v4116_v18  ;;  %v3816_v43 = vmax.f32 %v3814_v53, %v3815_v30  ;;  %v3822_v11 = vrot.slane %v3821_v36, 4  ;;  %v2769_v40 = vcombine.high %v2225_v47, %v2225_v47 }
 0x39f   : > { %v4118_v58 = vsel %vm4095_vm5, %v3921_v12, %v4117_v0  ;;  %v3803_v27 = vrot.slane %v3802_v4, 2  ;;  %v3809_v57 = vmax.f32 %v3807_v62, %v3808_v61  ;;  %v2776_v41 = vrot.slane %v2225_v47, %v5772_v5 }
 0x3a0   : > { %v4119_v9 = vsel %vm4097_vm6, %v3924_v54, %v4118_v58  ;;  %v3817_v50 = vrot.slane %v3816_v43, 2  ;;  %v3823_v45 = vmax.f32 %v3821_v36, %v3822_v11  ;;  %v2783_v46 = vrot.slane %v2769_v40, %v5772_v5 }
 0x3a1   : > { %4159 = vst.msk [vmem:[%s6059_s14 + $0x18] sm:$0xff] %vm3828_vm15, %v4119_v9  ;;  %v3804_v26 = vmax.f32 %v3802_v4, %v3803_v27  ;;  %v3810_v33 = vrot.slane %v3809_v57, 2  ;;  %v2784_v15 = vcombine.high %v2776_v41, %v2776_v41  ;;  %v3772_v28 = vsel %vm2931_vm14, %v2776_v41, -inf }
 0x3a2   : > { %v3818_v6 = vmax.f32 %v3816_v43, %v3817_v50  ;;  %v3824_v24 = vrot.slane %v3823_v45, 2  ;;  %v2785_v12 = vcombine.high %v2783_v46, %v2783_v46  ;;  %v3773_v34 = vrot.slane %v3772_v28, 4 }
 0x3a3   : > { %v3805_v29 = vrot.slane %v3804_v26, 1  ;;  %v3811_v2 = vmax.f32 %v3809_v57, %v3810_v33  ;;  %v3779_v17 = vsel %vm2931_vm14, %v2784_v15, -inf  ;;  %v3786_v7 = vsel %vm2931_vm14, %v2783_v46, -inf }
 0x3a4   : > { %v3819_v52 = vrot.slane %v3818_v6, 1  ;;  %v3825_v54 = vmax.f32 %v3823_v45, %v3824_v24  ;;  %v3774_v5 = vmax.f32 %v3772_v28, %v3773_v34  ;;  %v3780_v48 = vrot.slane %v3779_v17, 4 }
 0x3a5   : > { %v3806_v13 = vmax.f32 %v3804_v26, %v3805_v29  ;;  %v3812_v42 = vrot.slane %v3811_v2, 1  ;;  %v3787_v37 = vrot.slane %v3786_v7, 4  ;;  %v3793_v25 = vsel %vm2931_vm14, %v2785_v12, -inf }
 0x3a6   : > { %v3820_v38 = vmax.f32 %v3818_v6, %v3819_v52  ;;  %v3826_v55 = vrot.slane %v3825_v54, 1  ;;  %v3775_v31 = vrot.slane %v3774_v5, 2  ;;  %v3781_v32 = vmax.f32 %v3779_v17, %v3780_v48 }
 0x3a7   : > { %v3813_v14 = vmax.f32 %v3811_v2, %v3812_v42  ;;  %v4010_v16 = vsel %vm3828_vm15, %v3806_v13, -inf  ;;  %v3788_v21 = vmax.f32 %v3786_v7, %v3787_v37  ;;  %v3794_v51 = vrot.slane %v3793_v25, 4 }
 0x3a8   : > { %v3827_v49 = vmax.f32 %v3825_v54, %v3826_v55  ;;  %v4011_v56 = vmax.f32 %v6650_v23, %v4010_v16  ;;  %v4016_v44 = vsel %vm3828_vm15, %v3820_v38, -inf  ;;  %v3776_v10 = vmax.f32 %v3774_v5, %v3775_v31 }
 0x3a9   : > { %v4013_v19 = vsel %vm3828_vm15, %v3813_v14, -inf  ;;  %v4017_v53 = vmax.f32 %v6661_v20, %v4016_v44  ;;  %v3782_v47 = vrot.slane %v3781_v32, 2  ;;  %v3789_v59 = vrot.slane %v3788_v21, 2 }
 0x3aa   : > { %v4014_v62 = vmax.f32 %v6658_v3, %v4013_v19  ;;  %v4019_v30 = vsel %vm3828_vm15, %v3827_v49, -inf  ;;  %v3777_v18 = vrot.slane %v3776_v10, 1  ;;  %v3795_v4 = vmax.f32 %v3793_v25, %v3794_v51 }
 0x3ab   : > { %v4020_v61 = vmax.f32 %v6665_v8, %v4019_v30  ;;  %v3783_v36 = vmax.f32 %v3781_v32, %v3782_v47  ;;  %v3790_v0 = vmax.f32 %v3788_v21, %v3789_v59  ;;  %v3742_v23 = vrot.slane %v6718_v22, 1 }
 0x3ac   : > { %v3778_v43 = vmax.f32 %v3776_v10, %v3777_v18  ;;  %v3796_v11 = vrot.slane %v3795_v4, 2  ;;  %v3729_v20 = vmax.f32 %v6669_v60, %v3728_v35  ;;  %v3736_v3 = vmax.f32 %v6673_v39, %v3735_v63 }
 0x3ad   : > { %v3784_v40 = vrot.slane %v3783_v36, 1  ;;  %v3791_v58 = vrot.slane %v3790_v0, 1  ;;  %v3997_v27 = vsel %vm3828_vm15, %v6701_v1, -inf  ;;  %v3743_v45 = vmax.f32 %v6718_v22, %v3742_v23 }
 0x3ae   : > { %v3797_v8 = vmax.f32 %v3795_v4, %v3796_v11  ;;  %v3998_v57 = vsel %vm3828_vm15, %v3778_v43, -inf  ;;  %v4000_v60 = vsel %vm3828_vm15, %v3729_v20, -inf  ;;  %v4003_v35 = vsel %vm3828_vm15, %v3736_v3, -inf }
 0x3af   : > { %v3785_v41 = vmax.f32 %v3783_v36, %v3784_v40  ;;  %v3792_v9 = vmax.f32 %v3790_v0, %v3791_v58  ;;  %v3999_v50 = vmax.f32 %v3997_v27, %v3998_v57  ;;  %v4006_v15 = vsel %vm3828_vm15, %v3743_v45, -inf }
 0x3b0   : > { %v3798_v46 = vrot.slane %v3797_v8, 1 }
 0x3b1   : > { %v4001_v39 = vsel %vm3828_vm15, %v3785_v41, -inf  ;;  %v4004_v63 = vsel %vm3828_vm15, %v3792_v9, -inf }
 0x3b2   : > { %v3799_v26 = vmax.f32 %v3797_v8, %v3798_v46  ;;  %v4002_v1 = vmax.f32 %v4000_v60, %v4001_v39  ;;  %v4005_v33 = vmax.f32 %v4003_v35, %v4004_v63 }
 0x3b4   : > { %v4007_v28 = vsel %vm3828_vm15, %v3799_v26, -inf  ;;  %v4141_v6 = vsel %vm4085_vm0, %v4002_v1, %v3999_v50 }
 0x3b5   : > { %v4008_v22 = vmax.f32 %v4006_v15, %v4007_v28  ;;  %v4142_v24 = vsel %vm4087_vm1, %v4005_v33, %v4141_v6 }
 0x3b7   : > { %v4143_v12 = vsel %vm4089_vm2, %v4008_v22, %v4142_v24 }
 0x3b8   : > { %v4144_v34 = vsel %vm4091_vm3, %v4011_v56, %v4143_v12 }
 0x3b9   : > { %v4145_v29 = vsel %vm4093_vm4, %v4014_v62, %v4144_v34 }
 0x3ba   : > { %v4146_v2 = vsel %vm4095_vm5, %v4017_v53, %v4145_v29 }
 0x3bb   : > { %v4147_v17 = vsel %vm4097_vm6, %v4020_v61, %v4146_v2 }
 0x3bc   : > { %4163 = vst.msk [vmem:[%s6059_s14 + $0x38] sm:$0xff] %vm3828_vm15, %v4147_v17 }
 0x3bd PF: > { %s13_s12 = sadd.s32 1, %s4410_s12  }
 0x3be   : > { %p10_p4 = scmp.ge.s32.totalorder %s13_s12, 4  }
 0x3c0   :  { %12 = sbr.rel (!%p10_p4) target bundleno = 1 (0x1), region = 65 }

</bundles_post_ra>
